<compile_context>
chip_gen: v6e
topology: v6e:2x2x1
jax: 0.10.0
libtpu: 0.0.40
codegen_flags: <defaults>
</compile_context>

<pallas_src>
import jax
import jax.numpy as jnp
from jax.experimental import pallas as pl
from jax.experimental.pallas import tpu as pltpu

# ----- synthetic config (shapes implied by the module's __init__) -------------
Z_SIZE = 32                       # config['z_size']
HIDDEN = [64, 128, 512, 1024, 2048]
PHN_USE_BIAS = True               # config['model']['P_HN']['use_bias']
TN_LAYER_OUT = [8, 16, 32]        # config['model']['TN']['layer_out_channels']
TN_USE_BIAS = 1                   # int(config['model']['TN']['use_bias'])
# relu_slope is stored by the module but unused in forward (plain nn.ReLU).

TN_OUT_CH = [3] + TN_LAYER_OUT + [3]
HEAD_OUT_SIZES = [(TN_OUT_CH[i - 1] + TN_USE_BIAS) * TN_OUT_CH[i]
                  for i in range(1, len(TN_OUT_CH))]
TOTAL_OUT = sum(HEAD_OUT_SIZES)   # 819: width of the concatenated heads


# ----- small helpers -----------------------------------------------------------
def _round_up(a, m):
    return ((a + m - 1) // m) * m


def _device_kind():
    try:
        return jax.devices()[0].device_kind.lower()
    except Exception:
        return ""


def _max_batch_tile():
    # v6e/v7x MXU passes are 256 wide/deep -> 256-row tiles; keep 128 on v5e.
    kind = _device_kind()
    if "v5e" in kind or "v5 lite" in kind or "v5lite" in kind:
        return 128
    return 256


def choose_num_col_blocks(batch):
    """Column-split the folded head matmul only on 2-TensorCore chips (v7x)
    and only when the batch grid is too short to feed both cores."""
    kind = _device_kind()
    two_tc = ("v7" in kind) or ("7x" in kind)
    nb = max(1, pl.cdiv(batch, _max_batch_tile()))
    return 2 if (two_tc and nb < 2) else 1


# ----- Pallas kernel: MLP trunk + folded output heads --------------------------
def hypernet_kernel(x_ref,
                    w1, b1, w2, b2, w3, b3, w4, b4,
                    wf, bfold,
                    o_ref):
    h = x_ref[...]
    # small f32 layers (weights are tiny; DMA traffic negligible)
    h = jnp.maximum(jnp.dot(h, w1[...], preferred_element_type=jnp.float32) + b1[...], 0.0)
    h = jnp.maximum(jnp.dot(h, w2[...], preferred_element_type=jnp.float32) + b2[...], 0.0)
    h = jnp.maximum(jnp.dot(h, w3[...], preferred_element_type=jnp.float32) + b3[...], 0.0)
    # big layers: bf16 weights + bf16 activations, f32 accumulation on the MXU
    h = jnp.maximum(
        jnp.dot(h.astype(jnp.bfloat16), w4[...], preferred_element_type=jnp.float32)
        + b4[...], 0.0)
    # folded (last Linear @ concatenated heads); no ReLU between them in the module
    o_ref[...] = (
        jnp.dot(h.astype(jnp.bfloat16), wf[...], preferred_element_type=jnp.float32)
        + bfold[...]
    ).astype(o_ref.dtype)


# ----- parameter preparation ----------------------------------------------------
def prepare_kernel_params(params, num_col_blocks=1):
    """Fold w5@wo once, optionally pad the folded width for column-splitting,
    store the two large weights in bf16 (f32 accumulation in the kernel)."""
    w1, b1, w2, b2, w3, b3, w4, b4, w5, b5, wo, bo = params
    hi = jax.lax.Precision.HIGHEST
    # (h @ w5 + b5) @ wo + bo  ==  h @ (w5 @ wo) + (b5 @ wo + bo)
    w_fold = jnp.dot(w5, wo, precision=hi)            # [1024, TOTAL_OUT]
    b_fold = jnp.dot(b5, wo, precision=hi) + bo       # [1, TOTAL_OUT]
    if num_col_blocks == 1:
        out_w = TOTAL_OUT                              # 819: no wrapper column slice
    else:
        out_w = _round_up(TOTAL_OUT, 128 * num_col_blocks)   # lane-dense column blocks
    pad = out_w - TOTAL_OUT
    if pad:
        w_fold = jnp.pad(w_fold, ((0, 0), (0, pad)))
        b_fold = jnp.pad(b_fold, ((0, 0), (0, pad)))
    return [w1, b1, w2, b2, w3, b3,
            w4.astype(jnp.bfloat16), b4,
            w_fold.astype(jnp.bfloat16), b_fold]


# ----- pallas_call construction -------------------------------------------------
def _pallas_forward(x_pad, kparams, *, TB, nb, nc, out_w, single_buffer_weights):
    Bp = x_pad.shape[0]
    col_w = out_w // nc
    # Constant-index weights are fetched once; Buffered(1) drops the useless
    # second VMEM copy the default double-buffering would allocate.
    w_kw = {"pipeline_mode": pl.Buffered(1)} if single_buffer_weights else {}

    trunk_specs = [pl.BlockSpec(tuple(p.shape), lambda i, j: (0, 0), **w_kw)
                   for p in kparams[:-2]]
    wf, bfold = kparams[-2], kparams[-1]
    if nc == 1:
        wf_spec = pl.BlockSpec(tuple(wf.shape), lambda i, j: (0, 0), **w_kw)
        bf_spec = pl.BlockSpec(tuple(bfold.shape), lambda i, j: (0, 0), **w_kw)
    else:
        # v7x small-batch path: each TensorCore handles one column block of the
        # folded matmul (index varies with j -> keep default double buffering).
        wf_spec = pl.BlockSpec((wf.shape[0], col_w), lambda i, j: (0, j))
        bf_spec = pl.BlockSpec((1, col_w), lambda i, j: (0, j))

    # VMEM budget: single-buffered params + double-buffered x/out + live trunk
    # activations, with headroom; capped at 64 MiB so it is legal on v7x.
    param_bytes = sum(int(p.size) * p.dtype.itemsize for p in kparams)
    if not single_buffer_weights:
        param_bytes *= 2
    io_bytes = 2 * TB * (x_pad.shape[1] + col_w) * 4
    act_bytes = TB * (64 + 128 + 512 + 1024) * 4
    vmem_limit = min(64 * 1024 * 1024,
                     int(1.5 * (param_bytes + io_bytes + act_bytes)) + (8 << 20))

    return pl.pallas_call(
        hypernet_kernel,
        out_shape=jax.ShapeDtypeStruct((Bp, out_w), jnp.float32),
        grid_spec=pltpu.PrefetchScalarGridSpec(
            num_scalar_prefetch=0,
            grid=(nb, nc),
            in_specs=[pl.BlockSpec((TB, x_pad.shape[1]), lambda i, j: (i, 0))]
                     + trunk_specs + [wf_spec, bf_spec],
            out_specs=pl.BlockSpec((TB, col_w), lambda i, j: (i, j)),
        ),
        compiler_params=pltpu.CompilerParams(
            dimension_semantics=("parallel", "parallel"),  # shards across TCs on v7x
            vmem_limit_bytes=vmem_limit,
        ),
    )(x_pad, *kparams)


# ----- public wrapper ------------------------------------------------------------
def points_hypernetwork_forward(x, kparams, *, num_col_blocks=1):
    """x: [B, Z_SIZE] float32.  kparams: prepare_kernel_params(params, num_col_blocks)."""
    B = x.shape[0]
    nc = num_col_blocks
    out_w = kparams[-2].shape[1]
    assert out_w >= TOTAL_OUT
    if nc > 1:
        assert out_w % (128 * nc) == 0, (
            "kparams must be prepared with prepare_kernel_params(params, num_col_blocks=nc)")

    # Batch-tile policy: at most MAX_TB rows per tile, single grid step whenever
    # the batch fits, minimal padding otherwise (tiles are sublane-aligned).
    max_tb = _max_batch_tile()
    nb = max(1, pl.cdiv(B, max_tb))
    TB = _round_up(pl.cdiv(B, nb), 8)
    Bp = nb * TB
    if Bp != B:
        x = jnp.pad(x, ((0, Bp - B), (0, 0)))

    try:
        out = _pallas_forward(x, kparams, TB=TB, nb=nb, nc=nc, out_w=out_w,
                              single_buffer_weights=True)
    except Exception:
        # pl.Buffered(1) unsupported in this jax build -> identical kernel with
        # default double-buffered weights (costs ~param_bytes extra VMEM only).
        out = _pallas_forward(x, kparams, TB=TB, nb=nb, nc=nc, out_w=out_w,
                              single_buffer_weights=False)

    # Slice only what was actually padded (no full-output copy at large batch).
    if Bp != B:
        out = out[:B]
    if out_w != TOTAL_OUT:
        out = out[:, :TOTAL_OUT]
    return out


# ----- deterministic parameter construction (PyTorch-equivalent, f32) ----------
def init_params(key):
    params = []
    dims = [Z_SIZE] + HIDDEN
    n_mlp = len(HIDDEN)
    keys = jax.random.split(key, 2 * n_mlp + 2 * len(HEAD_OUT_SIZES))
    ki = 0
    # MLP layers (bias = PHN_USE_BIAS; here True)
    for li in range(n_mlp):
        fan_in, fan_out = dims[li], dims[li + 1]
        bound = 1.0 / jnp.sqrt(fan_in)
        w = jax.random.uniform(keys[ki], (fan_in, fan_out), jnp.float32, -bound, bound); ki += 1
        if PHN_USE_BIAS:
            b = jax.random.uniform(keys[ki], (1, fan_out), jnp.float32, -bound, bound)
        else:
            b = jnp.zeros((1, fan_out), jnp.float32)
        ki += 1
        params.extend([w, b])
    # Output heads (always bias=True in the module), fused by column concat
    # (identical to torch.cat of the per-head Linear outputs).
    head_ws, head_bs = [], []
    for out_sz in HEAD_OUT_SIZES:
        fan_in = HIDDEN[-1]
        bound = 1.0 / jnp.sqrt(fan_in)
        head_ws.append(jax.random.uniform(keys[ki], (fan_in, out_sz), jnp.float32, -bound, bound)); ki += 1
        head_bs.append(jax.random.uniform(keys[ki], (1, out_sz), jnp.float32, -bound, bound)); ki += 1
    params.append(jnp.concatenate(head_ws, axis=1))   # [2048, TOTAL_OUT]
    params.append(jnp.concatenate(head_bs, axis=1))   # [1, TOTAL_OUT]
    return params


# ----- pure-JAX reference (exact f32, un-folded) --------------------------------
def reference_forward(x, params):
    hi = jax.lax.Precision.HIGHEST
    h = x
    for li in range(len(HIDDEN)):
        w, b = params[2 * li], params[2 * li + 1]
        h = jnp.dot(h, w, precision=hi) + b
        if li < len(HIDDEN) - 1:
            h = jnp.maximum(h, 0.0)
    wo, bo = params[-2], params[-1]
    return jnp.dot(h, wo, precision=hi) + bo


if __name__ == "__main__":
    key = jax.random.PRNGKey(0)
    k_x, k_p = jax.random.split(key)
    batch = 2
    x = jax.random.normal(k_x, (batch, Z_SIZE), jnp.float32)
    params = init_params(k_p)
    ref = reference_forward(x, params)

    # Tolerance accommodates bf16 storage of the two large weight matrices and
    # the w5@wo fold (reassociation); it is still far tighter than any real bug.
    tol = dict(atol=5e-3, rtol=1e-2)

    # 1) default policy (auto: column split only on 2-TC chips with a 1-step grid)
    nc = choose_num_col_blocks(batch)
    kparams = prepare_kernel_params(params, num_col_blocks=nc)
    out = points_hypernetwork_forward(x, kparams, num_col_blocks=nc)
    out = jax.block_until_ready(out)
    assert out.shape == (batch, TOTAL_OUT)
    assert jnp.allclose(out, ref, **tol)

    # 2) explicitly exercise the v7x small-batch column-split path
    #    (numerically identical and valid on any TPU generation).
    kparams2 = prepare_kernel_params(params, num_col_blocks=2)
    out2 = points_hypernetwork_forward(x, kparams2, num_col_blocks=2)
    out2 = jax.block_until_ready(out2)
    assert out2.shape == (batch, TOTAL_OUT)
    assert jnp.allclose(out2, ref, **tol)

    print("KERNEL_OK")
</pallas_src>

<mosaic_0001>
module attributes {stable_mosaic.version = 11 : i64} {
  func.func @hypernet_kernel(%arg0: i32, %arg1: i32, %arg2: memref<8x32xf32, #tpu.memory_space<vmem>>, %arg3: memref<32x64xf32, #tpu.memory_space<vmem>>, %arg4: memref<1x64xf32, #tpu.memory_space<vmem>>, %arg5: memref<64x128xf32, #tpu.memory_space<vmem>>, %arg6: memref<1x128xf32, #tpu.memory_space<vmem>>, %arg7: memref<128x512xf32, #tpu.memory_space<vmem>>, %arg8: memref<1x512xf32, #tpu.memory_space<vmem>>, %arg9: memref<512x1024xbf16, #tpu.memory_space<vmem>>, %arg10: memref<1x1024xf32, #tpu.memory_space<vmem>>, %arg11: memref<1024x819xbf16, #tpu.memory_space<vmem>>, %arg12: memref<1x819xf32, #tpu.memory_space<vmem>>, %arg13: memref<8x819xf32, #tpu.memory_space<vmem>>) attributes {dimension_semantics = [#tpu.dimension_semantics<parallel>, #tpu.dimension_semantics<parallel>], iteration_bounds = array<i64: 1, 1>, scalar_prefetch = 0 : i64, scratch_operands = 0 : i64, tpu.core_type = #tpu.core_type<tc>, window_params = [{transform_indices = @transform_0, window_bounds = array<i64: 8, 32>}, {pipeline_mode = #tpu.pipeline_mode<synchronous>, transform_indices = @transform_1, window_bounds = array<i64: 32, 64>}, {pipeline_mode = #tpu.pipeline_mode<synchronous>, transform_indices = @transform_2, window_bounds = array<i64: 1, 64>}, {pipeline_mode = #tpu.pipeline_mode<synchronous>, transform_indices = @transform_3, window_bounds = array<i64: 64, 128>}, {pipeline_mode = #tpu.pipeline_mode<synchronous>, transform_indices = @transform_4, window_bounds = array<i64: 1, 128>}, {pipeline_mode = #tpu.pipeline_mode<synchronous>, transform_indices = @transform_5, window_bounds = array<i64: 128, 512>}, {pipeline_mode = #tpu.pipeline_mode<synchronous>, transform_indices = @transform_6, window_bounds = array<i64: 1, 512>}, {pipeline_mode = #tpu.pipeline_mode<synchronous>, transform_indices = @transform_7, window_bounds = array<i64: 512, 1024>}, {pipeline_mode = #tpu.pipeline_mode<synchronous>, transform_indices = @transform_8, window_bounds = array<i64: 1, 1024>}, {pipeline_mode = #tpu.pipeline_mode<synchronous>, transform_indices = @transform_9, window_bounds = array<i64: 1024, 819>}, {pipeline_mode = #tpu.pipeline_mode<synchronous>, transform_indices = @transform_10, window_bounds = array<i64: 1, 819>}, {transform_indices = @transform_11, window_bounds = array<i64: 8, 819>}]} {
    %c0 = arith.constant 0 : index
    %c0_0 = arith.constant 0 : index
    %0 = vector.load %arg2[%c0, %c0_0] : memref<8x32xf32, #tpu.memory_space<vmem>>, vector<8x32xf32>
    %c0_1 = arith.constant 0 : index
    %c0_2 = arith.constant 0 : index
    %1 = vector.load %arg3[%c0_1, %c0_2] : memref<32x64xf32, #tpu.memory_space<vmem>>, vector<32x64xf32>
    %cst = arith.constant dense<0.000000e+00> : vector<8x64xf32>
    %2 = tpu.matmul %0, %1, %cst {dimension_numbers = #tpu.dot_dimension_numbers<[1], [0], [0], [1], [0, 0, 1, 1], [], []>} : vector<8x32xf32>, vector<32x64xf32>, vector<8x64xf32> -> vector<8x64xf32>
    %c0_3 = arith.constant 0 : index
    %c0_4 = arith.constant 0 : index
    %3 = vector.load %arg4[%c0_3, %c0_4] : memref<1x64xf32, #tpu.memory_space<vmem>>, vector<1x64xf32>
    %4 = vector.broadcast %3 : vector<1x64xf32> to vector<8x64xf32>
    %5 = arith.addf %2, %4 : vector<8x64xf32>
    %cst_5 = arith.constant 0.000000e+00 : f32
    %6 = vector.broadcast %cst_5 : f32 to vector<8x64xf32>
    %7 = arith.maximumf %5, %6 : vector<8x64xf32>
    %c0_6 = arith.constant 0 : index
    %c0_7 = arith.constant 0 : index
    %8 = vector.load %arg5[%c0_6, %c0_7] : memref<64x128xf32, #tpu.memory_space<vmem>>, vector<64x128xf32>
    %cst_8 = arith.constant dense<0.000000e+00> : vector<8x128xf32>
    %9 = tpu.matmul %7, %8, %cst_8 {dimension_numbers = #tpu.dot_dimension_numbers<[1], [0], [0], [1], [0, 0, 1, 1], [], []>} : vector<8x64xf32>, vector<64x128xf32>, vector<8x128xf32> -> vector<8x128xf32>
    %c0_9 = arith.constant 0 : index
    %c0_10 = arith.constant 0 : index
    %10 = vector.load %arg6[%c0_9, %c0_10] : memref<1x128xf32, #tpu.memory_space<vmem>>, vector<1x128xf32>
    %11 = vector.broadcast %10 : vector<1x128xf32> to vector<8x128xf32>
    %12 = arith.addf %9, %11 : vector<8x128xf32>
    %cst_11 = arith.constant 0.000000e+00 : f32
    %13 = vector.broadcast %cst_11 : f32 to vector<8x128xf32>
    %14 = arith.maximumf %12, %13 : vector<8x128xf32>
    %c0_12 = arith.constant 0 : index
    %c0_13 = arith.constant 0 : index
    %15 = vector.load %arg7[%c0_12, %c0_13] : memref<128x512xf32, #tpu.memory_space<vmem>>, vector<128x512xf32>
    %cst_14 = arith.constant dense<0.000000e+00> : vector<8x512xf32>
    %16 = tpu.matmul %14, %15, %cst_14 {dimension_numbers = #tpu.dot_dimension_numbers<[1], [0], [0], [1], [0, 0, 1, 1], [], []>} : vector<8x128xf32>, vector<128x512xf32>, vector<8x512xf32> -> vector<8x512xf32>
    %c0_15 = arith.constant 0 : index
    %c0_16 = arith.constant 0 : index
    %17 = vector.load %arg8[%c0_15, %c0_16] : memref<1x512xf32, #tpu.memory_space<vmem>>, vector<1x512xf32>
    %18 = vector.broadcast %17 : vector<1x512xf32> to vector<8x512xf32>
    %19 = arith.addf %16, %18 : vector<8x512xf32>
    %cst_17 = arith.constant 0.000000e+00 : f32
    %20 = vector.broadcast %cst_17 : f32 to vector<8x512xf32>
    %21 = arith.maximumf %19, %20 : vector<8x512xf32>
    %22 = arith.truncf %21 : vector<8x512xf32> to vector<8x512xbf16>
    %c0_18 = arith.constant 0 : index
    %c0_19 = arith.constant 0 : index
    %23 = vector.load %arg9[%c0_18, %c0_19] : memref<512x1024xbf16, #tpu.memory_space<vmem>>, vector<512x1024xbf16>
    %cst_20 = arith.constant dense<0.000000e+00> : vector<8x1024xf32>
    %24 = tpu.matmul %22, %23, %cst_20 {dimension_numbers = #tpu.dot_dimension_numbers<[1], [0], [0], [1], [0, 0, 1, 1], [], []>} : vector<8x512xbf16>, vector<512x1024xbf16>, vector<8x1024xf32> -> vector<8x1024xf32>
    %c0_21 = arith.constant 0 : index
    %c0_22 = arith.constant 0 : index
    %25 = vector.load %arg10[%c0_21, %c0_22] : memref<1x1024xf32, #tpu.memory_space<vmem>>, vector<1x1024xf32>
    %26 = vector.broadcast %25 : vector<1x1024xf32> to vector<8x1024xf32>
    %27 = arith.addf %24, %26 : vector<8x1024xf32>
    %cst_23 = arith.constant 0.000000e+00 : f32
    %28 = vector.broadcast %cst_23 : f32 to vector<8x1024xf32>
    %29 = arith.maximumf %27, %28 : vector<8x1024xf32>
    %30 = arith.truncf %29 : vector<8x1024xf32> to vector<8x1024xbf16>
    %c0_24 = arith.constant 0 : index
    %c0_25 = arith.constant 0 : index
    %31 = vector.load %arg11[%c0_24, %c0_25] : memref<1024x819xbf16, #tpu.memory_space<vmem>>, vector<1024x819xbf16>
    %cst_26 = arith.constant dense<0.000000e+00> : vector<8x819xf32>
    %32 = tpu.matmul %30, %31, %cst_26 {dimension_numbers = #tpu.dot_dimension_numbers<[1], [0], [0], [1], [0, 0, 1, 1], [], []>} : vector<8x1024xbf16>, vector<1024x819xbf16>, vector<8x819xf32> -> vector<8x819xf32>
    %c0_27 = arith.constant 0 : index
    %c0_28 = arith.constant 0 : index
    %33 = vector.load %arg12[%c0_27, %c0_28] : memref<1x819xf32, #tpu.memory_space<vmem>>, vector<1x819xf32>
    %34 = vector.broadcast %33 : vector<1x819xf32> to vector<8x819xf32>
    %35 = arith.addf %32, %34 : vector<8x819xf32>
    %c0_29 = arith.constant 0 : index
    %c0_30 = arith.constant 0 : index
    %36 = vector.load %arg13[%c0_29, %c0_30] : memref<8x819xf32, #tpu.memory_space<vmem>>, vector<8x819xf32>
    tpu.vector_store %arg13[%c0_29, %c0_30], %35 {strides = array<i32>} : memref<8x819xf32, #tpu.memory_space<vmem>>, vector<8x819xf32>,
    return
  }
  func.func @transform_0(%arg0: i32, %arg1: i32) -> (i32, i32) {
    %c0_i32 = arith.constant 0 : i32
    %c0_i32_0 = arith.constant 0 : i32
    return %arg0, %c0_i32 : i32, i32
  }
  func.func @transform_1(%arg0: i32, %arg1: i32) -> (i32, i32) {
    %c0_i32 = arith.constant 0 : i32
    %c0_i32_0 = arith.constant 0 : i32
    %c0_i32_1 = arith.constant 0 : i32
    return %c0_i32, %c0_i32_0 : i32, i32
  }
  func.func @transform_2(%arg0: i32, %arg1: i32) -> (i32, i32) {
    %c0_i32 = arith.constant 0 : i32
    %c0_i32_0 = arith.constant 0 : i32
    %c0_i32_1 = arith.constant 0 : i32
    return %c0_i32, %c0_i32_0 : i32, i32
  }
  func.func @transform_3(%arg0: i32, %arg1: i32) -> (i32, i32) {
    %c0_i32 = arith.constant 0 : i32
    %c0_i32_0 = arith.constant 0 : i32
    %c0_i32_1 = arith.constant 0 : i32
    return %c0_i32, %c0_i32_0 : i32, i32
  }
  func.func @transform_4(%arg0: i32, %arg1: i32) -> (i32, i32) {
    %c0_i32 = arith.constant 0 : i32
    %c0_i32_0 = arith.constant 0 : i32
    %c0_i32_1 = arith.constant 0 : i32
    return %c0_i32, %c0_i32_0 : i32, i32
  }
  func.func @transform_5(%arg0: i32, %arg1: i32) -> (i32, i32) {
    %c0_i32 = arith.constant 0 : i32
    %c0_i32_0 = arith.constant 0 : i32
    %c0_i32_1 = arith.constant 0 : i32
    return %c0_i32, %c0_i32_0 : i32, i32
  }
  func.func @transform_6(%arg0: i32, %arg1: i32) -> (i32, i32) {
    %c0_i32 = arith.constant 0 : i32
    %c0_i32_0 = arith.constant 0 : i32
    %c0_i32_1 = arith.constant 0 : i32
    return %c0_i32, %c0_i32_0 : i32, i32
  }
  func.func @transform_7(%arg0: i32, %arg1: i32) -> (i32, i32) {
    %c0_i32 = arith.constant 0 : i32
    %c0_i32_0 = arith.constant 0 : i32
    %c0_i32_1 = arith.constant 0 : i32
    return %c0_i32, %c0_i32_0 : i32, i32
  }
  func.func @transform_8(%arg0: i32, %arg1: i32) -> (i32, i32) {
    %c0_i32 = arith.constant 0 : i32
    %c0_i32_0 = arith.constant 0 : i32
    %c0_i32_1 = arith.constant 0 : i32
    return %c0_i32, %c0_i32_0 : i32, i32
  }
  func.func @transform_9(%arg0: i32, %arg1: i32) -> (i32, i32) {
    %c0_i32 = arith.constant 0 : i32
    %c0_i32_0 = arith.constant 0 : i32
    %c0_i32_1 = arith.constant 0 : i32
    return %c0_i32, %c0_i32_0 : i32, i32
  }
  func.func @transform_10(%arg0: i32, %arg1: i32) -> (i32, i32) {
    %c0_i32 = arith.constant 0 : i32
    %c0_i32_0 = arith.constant 0 : i32
    %c0_i32_1 = arith.constant 0 : i32
    return %c0_i32, %c0_i32_0 : i32, i32
  }
  func.func @transform_11(%arg0: i32, %arg1: i32) -> (i32, i32) {
    %c0_i32 = arith.constant 0 : i32
    return %arg0, %arg1 : i32, i32
  }
}

module attributes {stable_mosaic.version = 11 : i64} {
  func.func @hypernet_kernel(%arg0: i32, %arg1: i32, %arg2: memref<8x32xf32, #tpu.memory_space<vmem>>, %arg3: memref<32x64xf32, #tpu.memory_space<vmem>>, %arg4: memref<1x64xf32, #tpu.memory_space<vmem>>, %arg5: memref<64x128xf32, #tpu.memory_space<vmem>>, %arg6: memref<1x128xf32, #tpu.memory_space<vmem>>, %arg7: memref<128x512xf32, #tpu.memory_space<vmem>>, %arg8: memref<1x512xf32, #tpu.memory_space<vmem>>, %arg9: memref<512x1024xbf16, #tpu.memory_space<vmem>>, %arg10: memref<1x1024xf32, #tpu.memory_space<vmem>>, %arg11: memref<1024x819xbf16, #tpu.memory_space<vmem>>, %arg12: memref<1x819xf32, #tpu.memory_space<vmem>>, %arg13: memref<8x819xf32, #tpu.memory_space<vmem>>) attributes {dimension_semantics = [#tpu.dimension_semantics<parallel>, #tpu.dimension_semantics<parallel>], iteration_bounds = array<i64: 1, 1>, scalar_prefetch = 0 : i64, scratch_operands = 0 : i64, tpu.core_type = #tpu.core_type<tc>, window_params = [{transform_indices = @transform_0, window_bounds = array<i64: 8, 32>}, {pipeline_mode = #tpu.pipeline_mode<synchronous>, transform_indices = @transform_1, window_bounds = array<i64: 32, 64>}, {pipeline_mode = #tpu.pipeline_mode<synchronous>, transform_indices = @transform_2, window_bounds = array<i64: 1, 64>}, {pipeline_mode = #tpu.pipeline_mode<synchronous>, transform_indices = @transform_3, window_bounds = array<i64: 64, 128>}, {pipeline_mode = #tpu.pipeline_mode<synchronous>, transform_indices = @transform_4, window_bounds = array<i64: 1, 128>}, {pipeline_mode = #tpu.pipeline_mode<synchronous>, transform_indices = @transform_5, window_bounds = array<i64: 128, 512>}, {pipeline_mode = #tpu.pipeline_mode<synchronous>, transform_indices = @transform_6, window_bounds = array<i64: 1, 512>}, {pipeline_mode = #tpu.pipeline_mode<synchronous>, transform_indices = @transform_7, window_bounds = array<i64: 512, 1024>}, {pipeline_mode = #tpu.pipeline_mode<synchronous>, transform_indices = @transform_8, window_bounds = array<i64: 1, 1024>}, {pipeline_mode = #tpu.pipeline_mode<synchronous>, transform_indices = @transform_9, window_bounds = array<i64: 1024, 819>}, {pipeline_mode = #tpu.pipeline_mode<synchronous>, transform_indices = @transform_10, window_bounds = array<i64: 1, 819>}, {transform_indices = @transform_11, window_bounds = array<i64: 8, 819>}]} {
    %c0 = arith.constant 0 : index
    %c0_0 = arith.constant 0 : index
    %0 = vector.load %arg2[%c0, %c0_0] : memref<8x32xf32, #tpu.memory_space<vmem>>, vector<8x32xf32>
    %c0_1 = arith.constant 0 : index
    %c0_2 = arith.constant 0 : index
    %1 = vector.load %arg3[%c0_1, %c0_2] : memref<32x64xf32, #tpu.memory_space<vmem>>, vector<32x64xf32>
    %cst = arith.constant dense<0.000000e+00> : vector<8x64xf32>
    %2 = tpu.matmul %0, %1, %cst {dimension_numbers = #tpu.dot_dimension_numbers<[1], [0], [0], [1], [0, 0, 1, 1], [], []>} : vector<8x32xf32>, vector<32x64xf32>, vector<8x64xf32> -> vector<8x64xf32>
    %c0_3 = arith.constant 0 : index
    %c0_4 = arith.constant 0 : index
    %3 = vector.load %arg4[%c0_3, %c0_4] : memref<1x64xf32, #tpu.memory_space<vmem>>, vector<1x64xf32>
    %4 = vector.broadcast %3 : vector<1x64xf32> to vector<8x64xf32>
    %5 = arith.addf %2, %4 : vector<8x64xf32>
    %cst_5 = arith.constant 0.000000e+00 : f32
    %6 = vector.broadcast %cst_5 : f32 to vector<8x64xf32>
    %7 = arith.maximumf %5, %6 : vector<8x64xf32>
    %c0_6 = arith.constant 0 : index
    %c0_7 = arith.constant 0 : index
    %8 = vector.load %arg5[%c0_6, %c0_7] : memref<64x128xf32, #tpu.memory_space<vmem>>, vector<64x128xf32>
    %cst_8 = arith.constant dense<0.000000e+00> : vector<8x128xf32>
    %9 = tpu.matmul %7, %8, %cst_8 {dimension_numbers = #tpu.dot_dimension_numbers<[1], [0], [0], [1], [0, 0, 1, 1], [], []>} : vector<8x64xf32>, vector<64x128xf32>, vector<8x128xf32> -> vector<8x128xf32>
    %c0_9 = arith.constant 0 : index
    %c0_10 = arith.constant 0 : index
    %10 = vector.load %arg6[%c0_9, %c0_10] : memref<1x128xf32, #tpu.memory_space<vmem>>, vector<1x128xf32>
    %11 = vector.broadcast %10 : vector<1x128xf32> to vector<8x128xf32>
    %12 = arith.addf %9, %11 : vector<8x128xf32>
    %cst_11 = arith.constant 0.000000e+00 : f32
    %13 = vector.broadcast %cst_11 : f32 to vector<8x128xf32>
    %14 = arith.maximumf %12, %13 : vector<8x128xf32>
    %c0_12 = arith.constant 0 : index
    %c0_13 = arith.constant 0 : index
    %15 = vector.load %arg7[%c0_12, %c0_13] : memref<128x512xf32, #tpu.memory_space<vmem>>, vector<128x512xf32>
    %cst_14 = arith.constant dense<0.000000e+00> : vector<8x512xf32>
    %16 = tpu.matmul %14, %15, %cst_14 {dimension_numbers = #tpu.dot_dimension_numbers<[1], [0], [0], [1], [0, 0, 1, 1], [], []>} : vector<8x128xf32>, vector<128x512xf32>, vector<8x512xf32> -> vector<8x512xf32>
    %c0_15 = arith.constant 0 : index
    %c0_16 = arith.constant 0 : index
    %17 = vector.load %arg8[%c0_15, %c0_16] : memref<1x512xf32, #tpu.memory_space<vmem>>, vector<1x512xf32>
    %18 = vector.broadcast %17 : vector<1x512xf32> to vector<8x512xf32>
    %19 = arith.addf %16, %18 : vector<8x512xf32>
    %cst_17 = arith.constant 0.000000e+00 : f32
    %20 = vector.broadcast %cst_17 : f32 to vector<8x512xf32>
    %21 = arith.maximumf %19, %20 : vector<8x512xf32>
    %22 = arith.truncf %21 : vector<8x512xf32> to vector<8x512xbf16>
    %c0_18 = arith.constant 0 : index
    %c0_19 = arith.constant 0 : index
    %23 = vector.load %arg9[%c0_18, %c0_19] : memref<512x1024xbf16, #tpu.memory_space<vmem>>, vector<512x1024xbf16>
    %cst_20 = arith.constant dense<0.000000e+00> : vector<8x1024xf32>
    %24 = tpu.matmul %22, %23, %cst_20 {dimension_numbers = #tpu.dot_dimension_numbers<[1], [0], [0], [1], [0, 0, 1, 1], [], []>} : vector<8x512xbf16>, vector<512x1024xbf16>, vector<8x1024xf32> -> vector<8x1024xf32>
    %c0_21 = arith.constant 0 : index
    %c0_22 = arith.constant 0 : index
    %25 = vector.load %arg10[%c0_21, %c0_22] : memref<1x1024xf32, #tpu.memory_space<vmem>>, vector<1x1024xf32>
    %26 = vector.broadcast %25 : vector<1x1024xf32> to vector<8x1024xf32>
    %27 = arith.addf %24, %26 : vector<8x1024xf32>
    %cst_23 = arith.constant 0.000000e+00 : f32
    %28 = vector.broadcast %cst_23 : f32 to vector<8x1024xf32>
    %29 = arith.maximumf %27, %28 : vector<8x1024xf32>
    %30 = arith.truncf %29 : vector<8x1024xf32> to vector<8x1024xbf16>
    %c0_24 = arith.constant 0 : index
    %c0_25 = arith.constant 0 : index
    %31 = vector.load %arg11[%c0_24, %c0_25] : memref<1024x819xbf16, #tpu.memory_space<vmem>>, vector<1024x819xbf16>
    %cst_26 = arith.constant dense<0.000000e+00> : vector<8x819xf32>
    %32 = tpu.matmul %30, %31, %cst_26 {dimension_numbers = #tpu.dot_dimension_numbers<[1], [0], [0], [1], [0, 0, 1, 1], [], []>} : vector<8x1024xbf16>, vector<1024x819xbf16>, vector<8x819xf32> -> vector<8x819xf32>
    %c0_27 = arith.constant 0 : index
    %c0_28 = arith.constant 0 : index
    %33 = vector.load %arg12[%c0_27, %c0_28] : memref<1x819xf32, #tpu.memory_space<vmem>>, vector<1x819xf32>
    %34 = vector.broadcast %33 : vector<1x819xf32> to vector<8x819xf32>
    %35 = arith.addf %32, %34 : vector<8x819xf32>
    %c0_29 = arith.constant 0 : index
    %c0_30 = arith.constant 0 : index
    %36 = vector.load %arg13[%c0_29, %c0_30] : memref<8x819xf32, #tpu.memory_space<vmem>>, vector<8x819xf32>
    tpu.vector_store %arg13[%c0_29, %c0_30], %35 {strides = array<i32>} : memref<8x819xf32, #tpu.memory_space<vmem>>, vector<8x819xf32>,
    return
  }
  func.func @transform_0(%arg0: i32, %arg1: i32) -> (i32, i32) {
    %c0_i32 = arith.constant 0 : i32
    %c0_i32_0 = arith.constant 0 : i32
    return %arg0, %c0_i32 : i32, i32
  }
  func.func @transform_1(%arg0: i32, %arg1: i32) -> (i32, i32) {
    %c0_i32 = arith.constant 0 : i32
    %c0_i32_0 = arith.constant 0 : i32
    %c0_i32_1 = arith.constant 0 : i32
    return %c0_i32, %c0_i32_0 : i32, i32
  }
  func.func @transform_2(%arg0: i32, %arg1: i32) -> (i32, i32) {
    %c0_i32 = arith.constant 0 : i32
    %c0_i32_0 = arith.constant 0 : i32
    %c0_i32_1 = arith.constant 0 : i32
    return %c0_i32, %c0_i32_0 : i32, i32
  }
  func.func @transform_3(%arg0: i32, %arg1: i32) -> (i32, i32) {
    %c0_i32 = arith.constant 0 : i32
    %c0_i32_0 = arith.constant 0 : i32
    %c0_i32_1 = arith.constant 0 : i32
    return %c0_i32, %c0_i32_0 : i32, i32
  }
  func.func @transform_4(%arg0: i32, %arg1: i32) -> (i32, i32) {
    %c0_i32 = arith.constant 0 : i32
    %c0_i32_0 = arith.constant 0 : i32
    %c0_i32_1 = arith.constant 0 : i32
    return %c0_i32, %c0_i32_0 : i32, i32
  }
  func.func @transform_5(%arg0: i32, %arg1: i32) -> (i32, i32) {
    %c0_i32 = arith.constant 0 : i32
    %c0_i32_0 = arith.constant 0 : i32
    %c0_i32_1 = arith.constant 0 : i32
    return %c0_i32, %c0_i32_0 : i32, i32
  }
  func.func @transform_6(%arg0: i32, %arg1: i32) -> (i32, i32) {
    %c0_i32 = arith.constant 0 : i32
    %c0_i32_0 = arith.constant 0 : i32
    %c0_i32_1 = arith.constant 0 : i32
    return %c0_i32, %c0_i32_0 : i32, i32
  }
  func.func @transform_7(%arg0: i32, %arg1: i32) -> (i32, i32) {
    %c0_i32 = arith.constant 0 : i32
    %c0_i32_0 = arith.constant 0 : i32
    %c0_i32_1 = arith.constant 0 : i32
    return %c0_i32, %c0_i32_0 : i32, i32
  }
  func.func @transform_8(%arg0: i32, %arg1: i32) -> (i32, i32) {
    %c0_i32 = arith.constant 0 : i32
    %c0_i32_0 = arith.constant 0 : i32
    %c0_i32_1 = arith.constant 0 : i32
    return %c0_i32, %c0_i32_0 : i32, i32
  }
  func.func @transform_9(%arg0: i32, %arg1: i32) -> (i32, i32) {
    %c0_i32 = arith.constant 0 : i32
    %c0_i32_0 = arith.constant 0 : i32
    %c0_i32_1 = arith.constant 0 : i32
    return %c0_i32, %c0_i32_0 : i32, i32
  }
  func.func @transform_10(%arg0: i32, %arg1: i32) -> (i32, i32) {
    %c0_i32 = arith.constant 0 : i32
    %c0_i32_0 = arith.constant 0 : i32
    %c0_i32_1 = arith.constant 0 : i32
    return %c0_i32, %c0_i32_0 : i32, i32
  }
  func.func @transform_11(%arg0: i32, %arg1: i32) -> (i32, i32) {
    %c0_i32 = arith.constant 0 : i32
    return %arg0, %arg1 : i32, i32
  }
}

</mosaic_0001>

<bundles_post_ra>
// kernel: tpu_custom_call.1
= control target key start
LH: loop header
LB: loop body
LE: loop exit
PB: predicated region body
PF: predicated region fallthrough
CT: control target
= control target key end

     0   :  { %v7408_v1 = vmov 0.0   ;;  %vm7409_vm0 = vmmov 0   ;;  %vm52_vm1 = vcmask 261120   ;;  %s10019_s0 = inlined_call_operand.vmem [shape: f32[8,32], index: 0, kind: input, shape index: {}]   ;;  %s10020_s1 = inlined_call_operand.vmem [shape: f32[32,64], index: 1, kind: input, shape index: {}]   ;;  %s10021_s2 = inlined_call_operand.vmem [shape: f32[1,64], index: 2, kind: input, shape index: {}]   ;;  %s10022_s3 = inlined_call_operand.vmem [shape: f32[64,128], index: 3, kind: input, shape index: {}]   ;;  %s10023_s4 = inlined_call_operand.vmem [shape: f32[1,128], index: 4, kind: input, shape index: {}]   ;;  %s10024_s5 = inlined_call_operand.vmem [shape: f32[128,512], index: 5, kind: input, shape index: {}]   ;;  %s10025_s6 = inlined_call_operand.vmem [shape: f32[1,512], index: 6, kind: input, shape index: {}]   ;;  %s10026_s7 = inlined_call_operand.vmem [shape: bf16[512,1024], index: 7, kind: input, shape index: {}]   ;;  %s10027_s8 = inlined_call_operand.vmem [shape: f32[1,1024], index: 8, kind: input, shape index: {}]   ;;  %s10028_s9 = inlined_call_operand.vmem [shape: bf16[1024,819], index: 9, kind: input, shape index: {}]   ;;  %s10029_s10 = inlined_call_operand.vmem [shape: f32[1,819], index: 10, kind: input, shape index: {}]   ;;  %s10030_s11 = inlined_call_operand.hbm [shape: f32[8,819], index: 11, kind: output, shape index: {}]  }
   0x1   :  { %v44_v0 = vld [vmem:[%s10020_s1 + $0x18] sm:$0xff]  ;;  %6712 = vmatprep.subr.mxu0 %v7408_v1  ;;  %v43_v2 = vld [vmem:[%s10020_s1 + $0x10] sm:$0xff]  ;;  %6720 = vmatprep.mubr.msk.f32.mxu0 %vm7409_vm0, %v7408_v1  ;;  %v42_v4 = vld [vmem:[%s10020_s1 + $0x8] sm:$0xff] }
   0x2   :  { %v134_v3 = vld [vmem:[%s10022_s3 + $0x38] sm:$0xff]  ;;  %6713 = vmatpush3.msra.mxu0 %v44_v0  ;;  %6723 = vmatprep.subr.mxu1 %v7408_v1  ;;  %v133_v5 = vld [vmem:[%s10022_s3 + $0x30] sm:$0xff]  ;;  %v41_v6 = vld [vmem:[%s10020_s1] sm:$0xff] }
   0x3   :  { %6714 = vmatprep.subr.mxu0 %v7408_v1  ;;  %6724 = vmatpush3.msra.mxu1 %v134_v3  ;;  %v132_v7 = vld [vmem:[%s10022_s3 + $0x28] sm:$0xff]  ;;  %v40_v8 = vld [vmem:[%s10019_s0] sm:$0xff]  ;;  %v130_v10 = vld [vmem:[%s10022_s3 + $0x18] sm:$0xff] }
   0x4   :  { %6715 = vmatpush3.msra.mxu0 %v43_v2  ;;  %6725 = vmatprep.subr.mxu1 %v7408_v1  ;;  %v131_v9 = vld [vmem:[%s10022_s3 + $0x20] sm:$0xff]  ;;  %v129_v11 = vld [vmem:[%s10022_s3 + $0x10] sm:$0xff]  ;;  %v128_v12 = vld [vmem:[%s10022_s3 + $0x8] sm:$0xff] }
   0x5   :  { %6716 = vmatprep.subr.mxu0 %v7408_v1  ;;  %6726 = vmatpush3.msra.mxu1 %v133_v5  ;;  %v127_v13 = vld [vmem:[%s10022_s3] sm:$0xff]  ;;  %v278_v14 = vld [vmem:[%s10024_s5 + $0x1e8] sm:$0xff]  ;;  %v280_v15 = vld [vmem:[%s10024_s5 + $0x1f8] sm:$0xff] }
   0x6   :  { %6717 = vmatpush3.msra.mxu0 %v42_v4  ;;  %6727 = vmatprep.subr.mxu1 %v7408_v1  ;;  %v277_v16 = vld [vmem:[%s10024_s5 + $0x1e0] sm:$0xff]  ;;  %v274_v17 = vld [vmem:[%s10024_s5 + $0x1c8] sm:$0xff] }
   0x7   :  { %6718 = vmatprep.subr.mxu0 %v7408_v1  ;;  %6728 = vmatpush3.msra.mxu1 %v132_v7  ;;  %v273_v18 = vld [vmem:[%s10024_s5 + $0x1c0] sm:$0xff]  ;;  %v270_v19 = vld [vmem:[%s10024_s5 + $0x1a8] sm:$0xff] }
   0x8   :  { %6719 = vmatpush3.msra.mxu0 %v41_v6  ;;  %6729 = vmatprep.subr.mxu1 %v7408_v1  ;;  %v269_v20 = vld [vmem:[%s10024_s5 + $0x1a0] sm:$0xff]  ;;  %v266_v21 = vld [vmem:[%s10024_s5 + $0x188] sm:$0xff] }
   0x9   :  { %6721 = vmatmul.mubr.msk.f32.vlgmr.msra.gmra.mxu0 %vm52_vm1, %v40_v8  ;;  %6730 = vmatpush3.msra.mxu1 %v131_v9  ;;  %v265_v22 = vld [vmem:[%s10024_s5 + $0x180] sm:$0xff]  ;;  %v262_v23 = vld [vmem:[%s10024_s5 + $0x168] sm:$0xff] }
   0xa   :  { %6731 = vmatprep.subr.mxu1 %v7408_v1  ;;  %6739 = vmatprep.mubr.msk.f32.mxu1 %vm7409_vm0, %v7408_v1  ;;  %v261_v24 = vld [vmem:[%s10024_s5 + $0x160] sm:$0xff]  ;;  %v258_v25 = vld [vmem:[%s10024_s5 + $0x148] sm:$0xff] }
   0xb   :  { %6732 = vmatpush3.msra.mxu1 %v130_v10  ;;  %367 = vmatprep.mubr.f32.mxu0 %v7408_v1  ;;  %v257_v26 = vld [vmem:[%s10024_s5 + $0x140] sm:$0xff]  ;;  %v254_v27 = vld [vmem:[%s10024_s5 + $0x128] sm:$0xff] }
   0xc   :  { %6733 = vmatprep.subr.mxu1 %v7408_v1  ;;  %303 = vmatprep.subr.mxu0 %v278_v14  ;;  %v253_v28 = vld [vmem:[%s10024_s5 + $0x120] sm:$0xff]  ;;  %v250_v29 = vld [vmem:[%s10024_s5 + $0x108] sm:$0xff] }
   0xd   :  { %6734 = vmatpush3.msra.mxu1 %v129_v11  ;;  %304 = vmatpush1.msra.mxu0 %v277_v16  ;;  %v249_v30 = vld [vmem:[%s10024_s5 + $0x100] sm:$0xff]  ;;  %v246_v31 = vld [vmem:[%s10024_s5 + $0xe8] sm:$0xff] }
   0xe   :  { %6735 = vmatprep.subr.mxu1 %v7408_v1  ;;  %305 = vmatprep.subr.mxu0 %v274_v17  ;;  %v245_v32 = vld [vmem:[%s10024_s5 + $0xe0] sm:$0xff]  ;;  %v242_v33 = vld [vmem:[%s10024_s5 + $0xc8] sm:$0xff] }
   0xf   :  { %6736 = vmatpush3.msra.mxu1 %v128_v12  ;;  %306 = vmatpush1.msra.mxu0 %v273_v18  ;;  %v241_v34 = vld [vmem:[%s10024_s5 + $0xc0] sm:$0xff]  ;;  %v238_v35 = vld [vmem:[%s10024_s5 + $0xa8] sm:$0xff] }
  0x10   :  { %6737 = vmatprep.subr.mxu1 %v7408_v1  ;;  %307 = vmatprep.subr.mxu0 %v270_v19  ;;  %v237_v36 = vld [vmem:[%s10024_s5 + $0xa0] sm:$0xff]  ;;  %v234_v37 = vld [vmem:[%s10024_s5 + $0x88] sm:$0xff] }
  0x11   :  { %6738 = vmatpush3.msra.mxu1 %v127_v13  ;;  %308 = vmatpush1.msra.mxu0 %v269_v20  ;;  %v233_v38 = vld [vmem:[%s10024_s5 + $0x80] sm:$0xff]  ;;  %v230_v39 = vld [vmem:[%s10024_s5 + $0x68] sm:$0xff] }
  0x12   :  { %374 = vmatprep.subr.mxu1 %v280_v15  ;;  %309 = vmatprep.subr.mxu0 %v266_v21  ;;  %v229_v40 = vld [vmem:[%s10024_s5 + $0x60] sm:$0xff]  ;;  %v226_v41 = vld [vmem:[%s10024_s5 + $0x48] sm:$0xff] }
  0x13   :  { %310 = vmatpush1.msra.mxu0 %v265_v22 }
  0x14   :  { %311 = vmatprep.subr.mxu0 %v262_v23 }
  0x15   :  { %312 = vmatpush1.msra.mxu0 %v261_v24 }
  0x16   :  { %313 = vmatprep.subr.mxu0 %v258_v25 }
  0x17   :  { %314 = vmatpush1.msra.mxu0 %v257_v26 }
  0x18   :  { %315 = vmatprep.subr.mxu0 %v254_v27 }
  0x19   :  { %316 = vmatpush1.msra.mxu0 %v253_v28 }
  0x1a   :  { %317 = vmatprep.subr.mxu0 %v250_v29 }
  0x1b   :  { %318 = vmatpush1.msra.mxu0 %v249_v30 }
  0x1c   :  { %319 = vmatprep.subr.mxu0 %v246_v31 }
  0x1d   :  { %320 = vmatpush1.msra.mxu0 %v245_v32 }
  0x1e   :  { %321 = vmatprep.subr.mxu0 %v242_v33 }
  0x1f   :  { %322 = vmatpush1.msra.mxu0 %v241_v34 }
  0x20   :  { %323 = vmatprep.subr.mxu0 %v238_v35 }
  0x21   :  { %324 = vmatpush1.msra.mxu0 %v237_v36 }
  0x22   :  { %325 = vmatprep.subr.mxu0 %v234_v37 }
  0x23   :  { %326 = vmatpush1.msra.mxu0 %v233_v38 }
  0x24   :  { %327 = vmatprep.subr.mxu0 %v230_v39 }
  0x25   :  { %328 = vmatpush1.msra.mxu0 %v229_v40 }
  0x26   :  { %329 = vmatprep.subr.mxu0 %v226_v41 }
  0x27   :  { %16 = vsyncpa [#allocation3], 0  ;;  %v5902_v42 = vld [vmem:[%s10021_s2] ss:$0 sm:$0xff]  ;;  %vm142_vm2 = vcmask 523264   ;;  %v279_v47 = vld [vmem:[%s10024_s5 + $0x1f0] sm:$0xff] }
  0x28   :  { %v276_v48 = vld [vmem:[%s10024_s5 + $0x1d8] sm:$0xff]  ;;  %v275_v49 = vld [vmem:[%s10024_s5 + $0x1d0] sm:$0xff]  ;;  %v225_v9 = vld [vmem:[%s10024_s5 + $0x40] sm:$0xff]  ;;  %vm5886_vm3 = vcmask 416768  }
  0x29   :  { %v272_v50 = vld [vmem:[%s10024_s5 + $0x1b8] sm:$0xff]  ;;  %v271_v51 = vld [vmem:[%s10024_s5 + $0x1b0] sm:$0xff]  ;;  %330 = vmatpush1.msra.mxu0 %v225_v9  ;;  %v222_v11 = vld [vmem:[%s10024_s5 + $0x28] sm:$0xff] }
  0x2a   :  { %v268_v52 = vld [vmem:[%s10024_s5 + $0x198] sm:$0xff]  ;;  %v267_v53 = vld [vmem:[%s10024_s5 + $0x190] sm:$0xff]  ;;  %331 = vmatprep.subr.mxu0 %v222_v11  ;;  %v221_v13 = vld [vmem:[%s10024_s5 + $0x20] sm:$0xff] }
  0x2b   :  { %v264_v54 = vld [vmem:[%s10024_s5 + $0x178] sm:$0xff]  ;;  %v263_v55 = vld [vmem:[%s10024_s5 + $0x170] sm:$0xff]  ;;  %332 = vmatpush1.msra.mxu0 %v221_v13  ;;  %v218_v15 = vld [vmem:[%s10024_s5 + $0x8] sm:$0xff] }
  0x2c   :  { %v260_v56 = vld [vmem:[%s10024_s5 + $0x158] sm:$0xff]  ;;  %v259_v57 = vld [vmem:[%s10024_s5 + $0x150] sm:$0xff]  ;;  %333 = vmatprep.subr.mxu0 %v218_v15  ;;  %v217_v17 = vld [vmem:[%s10024_s5] sm:$0xff] }
  0x2d   :  { %v256_v58 = vld [vmem:[%s10024_s5 + $0x138] sm:$0xff]  ;;  %v255_v59 = vld [vmem:[%s10024_s5 + $0x130] sm:$0xff]  ;;  %334 = vmatpush1.msra.mxu0 %v217_v17  ;;  %v509_v19 = vld [vmem:[%s10026_s7 + $0x1c0] sm:$0xff] }
  0x2e   :  { %v252_v60 = vld [vmem:[%s10024_s5 + $0x118] sm:$0xff]  ;;  %v251_v61 = vld [vmem:[%s10024_s5 + $0x110] sm:$0xff]  ;;  %v513_v20 = vld [vmem:[%s10026_s7 + $0x1e0] sm:$0xff] }
  0x2f   :  { %v248_v62 = vld [vmem:[%s10024_s5 + $0xf8] sm:$0xff]  ;;  %v247_v63 = vld [vmem:[%s10024_s5 + $0xf0] sm:$0xff]  ;;  %v637_v21 = vld [vmem:[%s10026_s7 + $0x5c0] sm:$0xff]  ;;  %v5962_v22 = vcombine.low %v509_v19, %v513_v20  ;;  %v5963_v23 = vcombine.high %v509_v19, %v513_v20 }
  0x30   :  { %v244_v0 = vld [vmem:[%s10024_s5 + $0xd8] sm:$0xff]  ;;  %v239_v3 = vld [vmem:[%s10024_s5 + $0xb0] sm:$0xff]  ;;  %v641_v24 = vld [vmem:[%s10026_s7 + $0x5e0] sm:$0xff] }
  0x31   :  { %v240_v2 = vld [vmem:[%s10024_s5 + $0xb8] sm:$0xff]  ;;  %v235_v5 = vld [vmem:[%s10024_s5 + $0x90] sm:$0xff]  ;;  %v6090_v25 = vcombine.low %v637_v21, %v641_v24  ;;  %v6091_v26 = vcombine.high %v637_v21, %v641_v24  ;;  %2031 = vmatprep.subr.bf16.mxu0 %v5963_v23  ;;  %v5904_v27 = vld [vmem:[%s10023_s4] ss:$0 sm:$0xff] }
  0x32   :  { %v236_v4 = vld [vmem:[%s10024_s5 + $0x98] sm:$0xff]  ;;  %v231_v7 = vld [vmem:[%s10024_s5 + $0x70] sm:$0xff]  ;;  %v501_v28 = vld [vmem:[%s10026_s7 + $0x180] sm:$0xff] }
  0x33   :  { %v232_v6 = vld [vmem:[%s10024_s5 + $0x78] sm:$0xff]  ;;  %v227_v10 = vld [vmem:[%s10024_s5 + $0x50] sm:$0xff]  ;;  %v505_v30 = vld [vmem:[%s10026_s7 + $0x1a0] sm:$0xff] }
  0x34   :  { %v228_v8 = vld [vmem:[%s10024_s5 + $0x58] sm:$0xff]  ;;  %v223_v14 = vld [vmem:[%s10024_s5 + $0x30] sm:$0xff]  ;;  %v629_v31 = vld [vmem:[%s10026_s7 + $0x580] sm:$0xff]  ;;  %v5955_v36 = vcombine.high %v501_v28, %v505_v30 }
  0x35   :  { %v224_v12 = vld [vmem:[%s10024_s5 + $0x38] sm:$0xff]  ;;  %v219_v18 = vld [vmem:[%s10024_s5 + $0x10] sm:$0xff]  ;;  %v633_v32 = vld [vmem:[%s10026_s7 + $0x5a0] sm:$0xff] }
  0x36   :  { %v220_v16 = vld [vmem:[%s10024_s5 + $0x18] sm:$0xff]  ;;  %v6083_v37 = vcombine.high %v629_v31, %v633_v32  ;;  %v493_v38 = vld [vmem:[%s10026_s7 + $0x140] sm:$0xff] }
  0x37   :  { %v497_v39 = vld [vmem:[%s10026_s7 + $0x160] sm:$0xff] }
  0x38   :  { %v621_v40 = vld [vmem:[%s10026_s7 + $0x540] sm:$0xff] }
  0x39   :  { %v625_v41 = vld [vmem:[%s10026_s7 + $0x560] sm:$0xff] }
  0x3a   :  { %v593_v9 = vld [vmem:[%s10026_s7 + $0x460] sm:$0xff] }
  0x3b   :  { %v457_v15 = vld [vmem:[%s10026_s7 + $0x20] sm:$0xff] }
  0x3c   :  { %v585_v17 = vld [vmem:[%s10026_s7 + $0x420] sm:$0xff] }
  0x3d   :  { %v577_v23 = vld [vmem:[%s10026_s7 + $0x3e0] sm:$0xff] }
  0x3e   :  { %v701_v24 = vld [vmem:[%s10026_s7 + $0x7c0] sm:$0xff] }
  0xc9   :  { %v122_v43 = vpop.f32.mrf.mxu0 }
  0xca   :  { %v123_v44 = vadd.f32 %v5902_v42, %v122_v43  ;;  %v5954_v42 = vcombine.low %v501_v28, %v505_v30  ;;  %v6082_v43 = vcombine.low %v629_v31, %v633_v32  ;;  %v565_v30 = vld [vmem:[%s10026_s7 + $0x380] sm:$0xff] }
  0xcb   :  { %v6722_v45 = vpop.f32.mrf.mxu0  ;;  %v569_v31 = vld [vmem:[%s10026_s7 + $0x3a0] sm:$0xff] }
  0xcc   :  { %v126_v46 = vmax.f32 %v123_v44, 0.0  ;;  %v5947_v44 = vcombine.high %v493_v38, %v497_v39  ;;  %v6075_v45 = vcombine.high %v621_v40, %v625_v41  ;;  %v693_v32 = vld [vmem:[%s10026_s7 + $0x780] sm:$0xff] }
  0xce   :  { %6740 = vmatmul.mubr.msk.f32.vlgmr.msra.gmra.mxu1 %vm142_vm2, %v126_v46  ;;  %v485_v46 = vld [vmem:[%s10026_s7 + $0x100] sm:$0xff] }
  0xcf   :  { %375 = vmatpush1.msra.mxu1 %v279_v47  ;;  %438 = vmatprep.mubr.f32.mxu1 %v7408_v1  ;;  %v243_v1 = vld [vmem:[%s10024_s5 + $0xd0] sm:$0xff]  ;;  %v489_v47 = vld [vmem:[%s10026_s7 + $0x120] sm:$0xff] }
  0xd0   :  { %376 = vmatprep.subr.mxu1 %v276_v48  ;;  %v613_v48 = vld [vmem:[%s10026_s7 + $0x500] sm:$0xff] }
  0xd1   :  { %377 = vmatpush1.msra.mxu1 %v275_v49  ;;  %v617_v49 = vld [vmem:[%s10026_s7 + $0x520] sm:$0xff] }
  0xd2   :  { %378 = vmatprep.subr.mxu1 %v272_v50  ;;  %v5946_v50 = vcombine.low %v493_v38, %v497_v39  ;;  %v557_v38 = vld [vmem:[%s10026_s7 + $0x340] sm:$0xff] }
  0xd3   :  { %379 = vmatpush1.msra.mxu1 %v271_v51  ;;  %v6074_v51 = vcombine.low %v621_v40, %v625_v41  ;;  %v561_v39 = vld [vmem:[%s10026_s7 + $0x360] sm:$0xff] }
  0xd4   :  { %380 = vmatprep.subr.mxu1 %v268_v52  ;;  %v5939_v52 = vcombine.high %v485_v46, %v489_v47  ;;  %v685_v40 = vld [vmem:[%s10026_s7 + $0x740] sm:$0xff] }
  0xd5   :  { %381 = vmatpush1.msra.mxu1 %v267_v53  ;;  %v6067_v53 = vcombine.high %v613_v48, %v617_v49  ;;  %v689_v41 = vld [vmem:[%s10026_s7 + $0x760] sm:$0xff] }
  0xd6   :  { %382 = vmatprep.subr.mxu1 %v264_v54  ;;  %v477_v54 = vld [vmem:[%s10026_s7 + $0xc0] sm:$0xff] }
  0xd7   :  { %383 = vmatpush1.msra.mxu1 %v263_v55  ;;  %v481_v55 = vld [vmem:[%s10026_s7 + $0xe0] sm:$0xff] }
  0xd8   :  { %384 = vmatprep.subr.mxu1 %v260_v56  ;;  %v605_v56 = vld [vmem:[%s10026_s7 + $0x4c0] sm:$0xff] }
  0xd9   :  { %385 = vmatpush1.msra.mxu1 %v259_v57  ;;  %v609_v57 = vld [vmem:[%s10026_s7 + $0x4e0] sm:$0xff] }
  0xda   :  { %386 = vmatprep.subr.mxu1 %v256_v58  ;;  %v5938_v58 = vcombine.low %v485_v46, %v489_v47  ;;  %v549_v46 = vld [vmem:[%s10026_s7 + $0x300] sm:$0xff] }
  0xdb   :  { %387 = vmatpush1.msra.mxu1 %v255_v59  ;;  %v6066_v59 = vcombine.low %v613_v48, %v617_v49  ;;  %v553_v47 = vld [vmem:[%s10026_s7 + $0x320] sm:$0xff] }
  0xdc   :  { %388 = vmatprep.subr.mxu1 %v252_v60  ;;  %v5931_v60 = vcombine.high %v477_v54, %v481_v55  ;;  %v677_v48 = vld [vmem:[%s10026_s7 + $0x700] sm:$0xff] }
  0xdd   :  { %389 = vmatpush1.msra.mxu1 %v251_v61  ;;  %v6059_v61 = vcombine.high %v605_v56, %v609_v57  ;;  %v681_v49 = vld [vmem:[%s10026_s7 + $0x720] sm:$0xff] }
  0xde   :  { %390 = vmatprep.subr.mxu1 %v248_v62  ;;  %v469_v62 = vld [vmem:[%s10026_s7 + $0x80] sm:$0xff] }
  0xdf   :  { %391 = vmatpush1.msra.mxu1 %v247_v63  ;;  %v473_v63 = vld [vmem:[%s10026_s7 + $0xa0] sm:$0xff] }
  0xe0   :  { %392 = vmatprep.subr.mxu1 %v244_v0  ;;  %v597_v0 = vld [vmem:[%s10026_s7 + $0x480] sm:$0xff] }
  0xe1   :  { %393 = vmatpush1.msra.mxu1 %v243_v1  ;;  %v601_v1 = vld [vmem:[%s10026_s7 + $0x4a0] sm:$0xff] }
  0xe2   :  { %394 = vmatprep.subr.mxu1 %v240_v2  ;;  %v5930_v2 = vcombine.low %v477_v54, %v481_v55  ;;  %v6050_v11 = vcombine.low %v597_v0, %v601_v1  ;;  %v541_v54 = vld [vmem:[%s10026_s7 + $0x2c0] sm:$0xff] }
  0xe3   :  { %395 = vmatpush1.msra.mxu1 %v239_v3  ;;  %v6058_v3 = vcombine.low %v605_v56, %v609_v57  ;;  %v545_v55 = vld [vmem:[%s10026_s7 + $0x2e0] sm:$0xff] }
  0xe4   :  { %396 = vmatprep.subr.mxu1 %v236_v4  ;;  %v5923_v4 = vcombine.high %v469_v62, %v473_v63  ;;  %v669_v56 = vld [vmem:[%s10026_s7 + $0x6c0] sm:$0xff] }
  0xe5   :  { %397 = vmatpush1.msra.mxu1 %v235_v5  ;;  %v6051_v5 = vcombine.high %v597_v0, %v601_v1  ;;  %v673_v57 = vld [vmem:[%s10026_s7 + $0x6e0] sm:$0xff] }
  0xe6   :  { %398 = vmatprep.subr.mxu1 %v232_v6  ;;  %v461_v6 = vld [vmem:[%s10026_s7 + $0x40] sm:$0xff] }
  0xe7   :  { %399 = vmatpush1.msra.mxu1 %v231_v7  ;;  %v465_v7 = vld [vmem:[%s10026_s7 + $0x60] sm:$0xff] }
  0xe8   :  { %400 = vmatprep.subr.mxu1 %v228_v8  ;;  %v589_v8 = vld [vmem:[%s10026_s7 + $0x440] sm:$0xff] }
  0xe9   :  { %401 = vmatpush1.msra.mxu1 %v227_v10  ;;  %v5922_v10 = vcombine.low %v469_v62, %v473_v63  ;;  %v6043_v13 = vcombine.high %v589_v8, %v593_v9  ;;  %v6042_v19 = vcombine.low %v589_v8, %v593_v9  ;;  %v533_v62 = vld [vmem:[%s10026_s7 + $0x280] sm:$0xff] }
  0xea   :  { %402 = vmatprep.subr.mxu1 %v224_v12  ;;  %v5915_v12 = vcombine.high %v461_v6, %v465_v7  ;;  %v537_v63 = vld [vmem:[%s10026_s7 + $0x2a0] sm:$0xff] }
  0xeb   :  { %403 = vmatpush1.msra.mxu1 %v223_v14  ;;  %v453_v14 = vld [vmem:[%s10026_s7] sm:$0xff] }
  0xec   :  { %404 = vmatprep.subr.mxu1 %v220_v16  ;;  %v581_v16 = vld [vmem:[%s10026_s7 + $0x400] sm:$0xff]  ;;  %v5907_v20 = vcombine.high %v453_v14, %v457_v15 }
  0xed   :  { %405 = vmatpush1.msra.mxu1 %v219_v18  ;;  %v5914_v18 = vcombine.low %v461_v6, %v465_v7  ;;  %v6035_v21 = vcombine.high %v581_v16, %v585_v17  ;;  %v661_v0 = vld [vmem:[%s10026_s7 + $0x680] sm:$0xff]  ;;  %v5986_v6 = vcombine.low %v533_v62, %v537_v63 }
  0xee   :  { %2072 = vmatprep.subr.bf16.mxu1 %v6091_v26  ;;  %v5906_v26 = vcombine.low %v453_v14, %v457_v15  ;;  %v665_v1 = vld [vmem:[%s10026_s7 + $0x6a0] sm:$0xff] }
  0xef   :  { %v6114_v7 = vcombine.low %v661_v0, %v665_v1  ;;  %v525_v8 = vld [vmem:[%s10026_s7 + $0x240] sm:$0xff] }
  0xf0   :  { %v529_v9 = vld [vmem:[%s10026_s7 + $0x260] sm:$0xff] }
 0x18e   :  { %v212_v29 = vpop.f32.mrf.mxu1 }
 0x18f   :  { %v213_v33 = vadd.f32 %v5904_v27, %v212_v29  ;;  %v6034_v27 = vcombine.low %v581_v16, %v585_v17  ;;  %v517_v16 = vld [vmem:[%s10026_s7 + $0x200] sm:$0xff] }
 0x190   :  { %v6741_v34 = vpop.f32.mrf.mxu1  ;;  %v521_v17 = vld [vmem:[%s10026_s7 + $0x220] sm:$0xff] }
 0x191   :  { %v216_v35 = vmax.f32 %v213_v33, 0.0  ;;  %v697_v33 = vld [vmem:[%s10026_s7 + $0x7a0] sm:$0xff] }
 0x193   :  { %368 = vmatmul.mubr.f32.vlgmr.msra.gmra.mxu0 %v216_v35  ;;  %439 = vmatmul.mubr.f32.vlgmr.msra.gmra.mxu1 %v216_v35 }
 0x194   :  { %2032 = vmatpush1.bf16.msra.mxu0 %v5962_v22  ;;  %2073 = vmatpush1.bf16.msra.mxu1 %v6090_v25  ;;  %v573_v22 = vld [vmem:[%s10026_s7 + $0x3c0] sm:$0xff] }
 0x195   :  { %2033 = vmatprep.subr.bf16.mxu0 %v5955_v36  ;;  %2074 = vmatprep.subr.bf16.mxu1 %v6083_v37  ;;  %v705_v25 = vld [vmem:[%s10026_s7 + $0x7e0] sm:$0xff]  ;;  %v6027_v28 = vcombine.high %v573_v22, %v577_v23  ;;  %v6026_v34 = vcombine.low %v573_v22, %v577_v23  ;;  %v6019_v36 = vcombine.high %v565_v30, %v569_v31 }
 0x196   :  { %v6155_v29 = vcombine.high %v701_v24, %v705_v25  ;;  %v6154_v35 = vcombine.low %v701_v24, %v705_v25  ;;  %v6147_v37 = vcombine.high %v693_v32, %v697_v33  ;;  %v510_v24 = vld [vmem:[%s10026_s7 + $0x1c8] sm:$0xff] }
 0x197   :  { %v514_v25 = vld [vmem:[%s10026_s7 + $0x1e8] sm:$0xff] }
 0x198   :  { %2034 = vmatpush1.bf16.msra.mxu0 %v5954_v42  ;;  %2075 = vmatpush1.bf16.msra.mxu1 %v6082_v43  ;;  %v6018_v42 = vcombine.low %v565_v30, %v569_v31  ;;  %v6146_v43 = vcombine.low %v693_v32, %v697_v33  ;;  %v283_v32 = vlaneseq }
 0x199   :  { %2035 = vmatprep.subr.bf16.mxu0 %v5947_v44  ;;  %2076 = vmatprep.subr.bf16.mxu1 %v6075_v45  ;;  %v6011_v44 = vcombine.high %v557_v38, %v561_v39  ;;  %v6139_v45 = vcombine.high %v685_v40, %v689_v41 }
 0x19a   :  { %v7930_v33 = vshrl.u32 %v283_v32, 7 }
 0x19c   :  { %2036 = vmatpush1.bf16.msra.mxu0 %v5946_v50  ;;  %2077 = vmatpush1.bf16.msra.mxu1 %v6074_v51  ;;  %v6010_v50 = vcombine.low %v557_v38, %v561_v39  ;;  %v6138_v51 = vcombine.low %v685_v40, %v689_v41  ;;  %v7945_v38 = vsub.s32 3, %v7930_v33 }
 0x19d   :  { %2037 = vmatprep.subr.bf16.mxu0 %v5939_v52  ;;  %2078 = vmatprep.subr.bf16.mxu1 %v6067_v53  ;;  %v6003_v52 = vcombine.high %v549_v46, %v553_v47  ;;  %v6131_v53 = vcombine.high %v677_v48, %v681_v49 }
 0x1a0   :  { %2038 = vmatpush1.bf16.msra.mxu0 %v5938_v58  ;;  %2079 = vmatpush1.bf16.msra.mxu1 %v6066_v59  ;;  %v6002_v58 = vcombine.low %v549_v46, %v553_v47  ;;  %v6130_v59 = vcombine.low %v677_v48, %v681_v49 }
 0x1a1   :  { %2039 = vmatprep.subr.bf16.mxu0 %v5931_v60  ;;  %2080 = vmatprep.subr.bf16.mxu1 %v6059_v61  ;;  %v5995_v60 = vcombine.high %v541_v54, %v545_v55  ;;  %v6123_v61 = vcombine.high %v669_v56, %v673_v57 }
 0x1a4   :  { %2040 = vmatpush1.bf16.msra.mxu0 %v5930_v2  ;;  %2081 = vmatpush1.bf16.msra.mxu1 %v6058_v3  ;;  %v5994_v2 = vcombine.low %v541_v54, %v545_v55  ;;  %v6122_v3 = vcombine.low %v669_v56, %v673_v57  ;;  %v502_v55 = vld [vmem:[%s10026_s7 + $0x188] sm:$0xff] }
 0x1a5   :  { %2041 = vmatprep.subr.bf16.mxu0 %v5923_v4  ;;  %2082 = vmatprep.subr.bf16.mxu1 %v6051_v5  ;;  %v5987_v4 = vcombine.high %v533_v62, %v537_v63  ;;  %v6115_v5 = vcombine.high %v661_v0, %v665_v1  ;;  %v506_v56 = vld [vmem:[%s10026_s7 + $0x1a8] sm:$0xff] }
 0x1a6   :  { %v630_v57 = vld [vmem:[%s10026_s7 + $0x588] sm:$0xff]  ;;  %v5957_v0 = vcombine.high %v502_v55, %v506_v56 }
 0x1a7   :  { %v494_v63 = vld [vmem:[%s10026_s7 + $0x148] sm:$0xff] }
 0x1a8   :  { %2042 = vmatpush1.bf16.msra.mxu0 %v5922_v10  ;;  %2083 = vmatpush1.bf16.msra.mxu1 %v6050_v11  ;;  %v653_v10 = vld [vmem:[%s10026_s7 + $0x640] sm:$0xff]  ;;  %v5979_v11 = vcombine.high %v525_v8, %v529_v9 }
 0x1a9   :  { %2043 = vmatprep.subr.bf16.mxu0 %v5915_v12  ;;  %2084 = vmatprep.subr.bf16.mxu1 %v6043_v13  ;;  %v657_v12 = vld [vmem:[%s10026_s7 + $0x660] sm:$0xff]  ;;  %v5978_v13 = vcombine.low %v525_v8, %v529_v9  ;;  %v486_v9 = vld [vmem:[%s10026_s7 + $0x108] sm:$0xff] }
 0x1aa   :  { %v6106_v14 = vcombine.low %v653_v10, %v657_v12  ;;  %v6107_v15 = vcombine.high %v653_v10, %v657_v12  ;;  %v490_v10 = vld [vmem:[%s10026_s7 + $0x128] sm:$0xff] }
 0x1ab   :  { %v618_v12 = vld [vmem:[%s10026_s7 + $0x528] sm:$0xff] }
 0x1ac   :  { %2044 = vmatpush1.bf16.msra.mxu0 %v5914_v18  ;;  %2085 = vmatpush1.bf16.msra.mxu1 %v6042_v19  ;;  %v645_v18 = vld [vmem:[%s10026_s7 + $0x600] sm:$0xff]  ;;  %v5971_v19 = vcombine.high %v517_v16, %v521_v17 }
 0x1ad   :  { %2045 = vmatprep.subr.bf16.mxu0 %v5907_v20  ;;  %2086 = vmatprep.subr.bf16.mxu1 %v6035_v21  ;;  %v649_v20 = vld [vmem:[%s10026_s7 + $0x620] sm:$0xff]  ;;  %v5970_v21 = vcombine.low %v517_v16, %v521_v17  ;;  %v478_v17 = vld [vmem:[%s10026_s7 + $0xc8] sm:$0xff] }
 0x1ae   :  { %v6098_v22 = vcombine.low %v645_v18, %v649_v20  ;;  %v6099_v23 = vcombine.high %v645_v18, %v649_v20  ;;  %v482_v18 = vld [vmem:[%s10026_s7 + $0xe8] sm:$0xff] }
 0x1af   :  { %v610_v20 = vld [vmem:[%s10026_s7 + $0x4e8] sm:$0xff] }
 0x1b0   :  { %2046 = vmatpush1.bf16.msra.mxu0 %v5906_v26  ;;  %2087 = vmatpush1.bf16.msra.mxu1 %v6034_v27  ;;  %v638_v26 = vld [vmem:[%s10026_s7 + $0x5c8] sm:$0xff]  ;;  %v5965_v27 = vcombine.high %v510_v24, %v514_v25 }
 0x1b1   :  { %2047 = vmatprep.subr.bf16.mxu0 %v6027_v28  ;;  %2088 = vmatprep.subr.bf16.mxu1 %v6155_v29  ;;  %v642_v28 = vld [vmem:[%s10026_s7 + $0x5e8] sm:$0xff]  ;;  %v5964_v29 = vcombine.low %v510_v24, %v514_v25 }
 0x1b2   :  { %v6092_v30 = vcombine.low %v638_v26, %v642_v28  ;;  %v6093_v31 = vcombine.high %v638_v26, %v642_v28  ;;  %v470_v25 = vld [vmem:[%s10026_s7 + $0x88] sm:$0xff] }
 0x1b3   :  { %v474_v26 = vld [vmem:[%s10026_s7 + $0xa8] sm:$0xff] }
 0x1b4   :  { %2048 = vmatpush2.bf16.msra.mxu0 %v6026_v34  ;;  %2089 = vmatpush2.bf16.msra.mxu1 %v6154_v35  ;;  %v7933_v34 = vsub.s32 0, %v7930_v33  ;;  %v7936_v35 = vsub.s32 2, %v7930_v33  ;;  %v602_v28 = vld [vmem:[%s10026_s7 + $0x4a8] sm:$0xff] }
 0x1b5   :  { %2049 = vmatprep.subr.bf16.mxu0 %v6019_v36  ;;  %2090 = vmatprep.subr.bf16.mxu1 %v6147_v37  ;;  %v281_v36 = vld [vmem:[%s10025_s6] sm:$0xf]  ;;  %v7942_v37 = vsub.s32 1, %v7930_v33 }
 0x1b6   :  { %v286_v39 = vrot.slane %v281_v36, %v7933_v34  ;;  %v294_v40 = vrot.slane %v281_v36, %v7936_v35 }
 0x1b7   :  { %v290_v41 = vrot.slane %v281_v36, %v7942_v37 }
 0x1b8   :  { %2050 = vmatpush2.bf16.msra.mxu0 %v6018_v42  ;;  %2091 = vmatpush2.bf16.msra.mxu1 %v6146_v43  ;;  %v298_v42 = vrot.slane %v281_v36, %v7945_v38  ;;  %v462_v36 = vld [vmem:[%s10026_s7 + $0x48] sm:$0xff] }
 0x1b9   :  { %2051 = vmatprep.subr.bf16.mxu0 %v6011_v44  ;;  %2092 = vmatprep.subr.bf16.mxu1 %v6139_v45 }
 0x1bc   :  { %2052 = vmatpush2.bf16.msra.mxu0 %v6010_v50  ;;  %2093 = vmatpush2.bf16.msra.mxu1 %v6138_v51 }
 0x1bd   :  { %2053 = vmatprep.subr.bf16.mxu0 %v6003_v52  ;;  %2094 = vmatprep.subr.bf16.mxu1 %v6131_v53 }
 0x1c0   :  { %2054 = vmatpush2.bf16.msra.mxu0 %v6002_v58  ;;  %2095 = vmatpush2.bf16.msra.mxu1 %v6130_v59  ;;  %v634_v58 = vld [vmem:[%s10026_s7 + $0x5a8] sm:$0xff] }
 0x1c1   :  { %2055 = vmatprep.subr.bf16.mxu0 %v5995_v60  ;;  %2096 = vmatprep.subr.bf16.mxu1 %v6123_v61  ;;  %v6085_v1 = vcombine.high %v630_v57, %v634_v58 }
 0x1c4   :  { %2056 = vmatpush2.bf16.msra.mxu0 %v5994_v2  ;;  %2097 = vmatpush2.bf16.msra.mxu1 %v6122_v3  ;;  %v498_v2 = vld [vmem:[%s10026_s7 + $0x168] sm:$0xff] }
 0x1c5   :  { %2057 = vmatprep.subr.bf16.mxu0 %v5987_v4  ;;  %2098 = vmatprep.subr.bf16.mxu1 %v6115_v5  ;;  %v622_v3 = vld [vmem:[%s10026_s7 + $0x548] sm:$0xff]  ;;  %v5956_v5 = vcombine.low %v502_v55, %v506_v56 }
 0x1c6   :  { %v626_v4 = vld [vmem:[%s10026_s7 + $0x568] sm:$0xff] }
 0x1c7   :  { %v6077_v8 = vcombine.high %v622_v3, %v626_v4  ;;  %v578_v55 = vld [vmem:[%s10026_s7 + $0x3e8] sm:$0xff] }
 0x1c8   :  { %2058 = vmatpush2.bf16.msra.mxu0 %v5986_v6  ;;  %2099 = vmatpush2.bf16.msra.mxu1 %v6114_v7  ;;  %v6084_v6 = vcombine.low %v630_v57, %v634_v58  ;;  %v5949_v7 = vcombine.high %v494_v63, %v498_v2  ;;  %v702_v56 = vld [vmem:[%s10026_s7 + $0x7c8] sm:$0xff] }
 0x1c9   :  { %2059 = vmatprep.subr.bf16.mxu0 %v5979_v11  ;;  %2100 = vmatprep.subr.bf16.mxu1 %v6107_v15  ;;  %v614_v11 = vld [vmem:[%s10026_s7 + $0x508] sm:$0xff]  ;;  %v5941_v15 = vcombine.high %v486_v9, %v490_v10 }
 0x1ca   :  { %v6069_v16 = vcombine.high %v614_v11, %v618_v12  ;;  %v706_v57 = vld [vmem:[%s10026_s7 + $0x7e8] sm:$0xff] }
 0x1cc   :  { %2060 = vmatpush2.bf16.msra.mxu0 %v5978_v13  ;;  %2101 = vmatpush2.bf16.msra.mxu1 %v6106_v14  ;;  %v5948_v13 = vcombine.low %v494_v63, %v498_v2  ;;  %v6076_v14 = vcombine.low %v622_v3, %v626_v4  ;;  %v566_v2 = vld [vmem:[%s10026_s7 + $0x388] sm:$0xff] }
 0x1cd   :  { %2061 = vmatprep.subr.bf16.mxu0 %v5971_v19  ;;  %2102 = vmatprep.subr.bf16.mxu1 %v6099_v23  ;;  %v606_v19 = vld [vmem:[%s10026_s7 + $0x4c8] sm:$0xff]  ;;  %v5933_v23 = vcombine.high %v478_v17, %v482_v18 }
 0x1ce   :  { %v6061_v24 = vcombine.high %v606_v19, %v610_v20  ;;  %v570_v3 = vld [vmem:[%s10026_s7 + $0x3a8] sm:$0xff] }
 0x1cf   :  { %v694_v4 = vld [vmem:[%s10026_s7 + $0x788] sm:$0xff] }
 0x1d0   :  { %2062 = vmatpush2.bf16.msra.mxu0 %v5970_v21  ;;  %2103 = vmatpush2.bf16.msra.mxu1 %v6098_v22  ;;  %v5940_v21 = vcombine.low %v486_v9, %v490_v10  ;;  %v6068_v22 = vcombine.low %v614_v11, %v618_v12  ;;  %v558_v10 = vld [vmem:[%s10026_s7 + $0x348] sm:$0xff] }
 0x1d1   :  { %2113 = vmatprep.subr.bf16.mxu0 %v5965_v27  ;;  %2154 = vmatprep.subr.bf16.mxu1 %v6093_v31  ;;  %v598_v27 = vld [vmem:[%s10026_s7 + $0x488] sm:$0xff]  ;;  %v5925_v31 = vcombine.high %v470_v25, %v474_v26 }
 0x1d2   :  { %v6053_v32 = vcombine.high %v598_v27, %v602_v28  ;;  %v562_v11 = vld [vmem:[%s10026_s7 + $0x368] sm:$0xff] }
 0x1d3   :  { %v686_v12 = vld [vmem:[%s10026_s7 + $0x748] sm:$0xff] }
 0x253   :  { %v369_v43 = vpop.f32.mrf.mxu0  ;;  %v440_v44 = vpop.f32.mrf.mxu1 }
 0x254   :  { %v370_v45 = vadd.f32 %v369_v43, %v286_v39  ;;  %v441_v46 = vadd.f32 %v440_v44, %v294_v40  ;;  %v466_v39 = vld [vmem:[%s10026_s7 + $0x68] sm:$0xff]  ;;  %v6052_v43 = vcombine.low %v598_v27, %v602_v28 }
 0x255   :  { %v371_v47 = vpop.f32.mrf.mxu0  ;;  %v442_v48 = vpop.f32.mrf.mxu1  ;;  %v590_v40 = vld [vmem:[%s10026_s7 + $0x448] sm:$0xff]  ;;  %v5917_v44 = vcombine.high %v462_v36, %v466_v39 }
 0x256   :  { %v372_v49 = vadd.f32 %v371_v47, %v290_v41  ;;  %v443_v50 = vadd.f32 %v442_v48, %v298_v42  ;;  %v445_v51 = vmax.f32 %v370_v45, 0.0  ;;  %v447_v52 = vmax.f32 %v441_v46, 0.0  ;;  %v594_v41 = vld [vmem:[%s10026_s7 + $0x468] sm:$0xff] }
 0x257   :  { %v5924_v42 = vcombine.low %v470_v25, %v474_v26  ;;  %v6045_v45 = vcombine.high %v590_v40, %v594_v41  ;;  %v454_v46 = vld [vmem:[%s10026_s7 + $0x8] sm:$0xff] }
 0x258   :  { %v446_v53 = vmax.f32 %v372_v49, 0.0  ;;  %v448_v54 = vmax.f32 %v443_v50, 0.0  ;;  %v7967_v61 = vpack.c.bf16 %v445_v51, %v445_v51  ;;  %v7969_v62 = vpack.c.bf16 %v447_v52, %v447_v52  ;;  %v458_v47 = vld [vmem:[%s10026_s7 + $0x28] sm:$0xff] }
 0x259   :  { %v582_v48 = vld [vmem:[%s10026_s7 + $0x408] sm:$0xff]  ;;  %v5916_v50 = vcombine.low %v462_v36, %v466_v39  ;;  %v6044_v51 = vcombine.low %v590_v40, %v594_v41  ;;  %v5909_v52 = vcombine.high %v454_v46, %v458_v47  ;;  %v5908_v58 = vcombine.low %v454_v46, %v458_v47 }
 0x25a   :  { %v7963_v59 = vpack.c.bf16 %v446_v53, %v446_v53  ;;  %v7965_v60 = vpack.c.bf16 %v448_v54, %v448_v54  ;;  %v586_v49 = vld [vmem:[%s10026_s7 + $0x428] sm:$0xff] }
 0x25b   :  { %v6037_v53 = vcombine.high %v582_v48, %v586_v49  ;;  %v574_v54 = vld [vmem:[%s10026_s7 + $0x3c8] sm:$0xff]  ;;  %v6036_v63 = vcombine.low %v582_v48, %v586_v49 }
 0x25c   :  { %2063 = vmatprep.mubr.bf16.mxu0 %v7963_v59  ;;  %2104 = vmatprep.mubr.bf16.mxu1 %v7965_v60  ;;  %v542_v26 = vld [vmem:[%s10026_s7 + $0x2c8] sm:$0xff] }
 0x25d   :  { %2064 = vmatmul.mubr.bf16.vlgmr.msra.gmra.mxu0 %v7967_v61  ;;  %2105 = vmatmul.mubr.bf16.vlgmr.msra.gmra.mxu1 %v7969_v62  ;;  %v546_v27 = vld [vmem:[%s10026_s7 + $0x2e8] sm:$0xff] }
 0x25e   :  { %2114 = vmatpush1.bf16.msra.mxu0 %v5964_v29  ;;  %2155 = vmatpush1.bf16.msra.mxu1 %v6092_v30  ;;  %v5932_v29 = vcombine.low %v478_v17, %v482_v18  ;;  %v6060_v30 = vcombine.low %v606_v19, %v610_v20  ;;  %v550_v18 = vld [vmem:[%s10026_s7 + $0x308] sm:$0xff] }
 0x25f   :  { %2145 = vmatprep.mubr.bf16.mxu0 %v7963_v59  ;;  %2186 = vmatprep.mubr.bf16.mxu1 %v7965_v60  ;;  %v554_v19 = vld [vmem:[%s10026_s7 + $0x328] sm:$0xff] }
 0x260   :  { %2115 = vmatprep.subr.bf16.mxu0 %v5957_v0  ;;  %2156 = vmatprep.subr.bf16.mxu1 %v6085_v1  ;;  %v6029_v0 = vcombine.high %v574_v54, %v578_v55  ;;  %v6157_v1 = vcombine.high %v702_v56, %v706_v57  ;;  %v678_v20 = vld [vmem:[%s10026_s7 + $0x708] sm:$0xff] }
 0x261   :  { %v670_v28 = vld [vmem:[%s10026_s7 + $0x6c8] sm:$0xff] }
 0x262   :  { %2116 = vmatpush1.bf16.msra.mxu0 %v5956_v5  ;;  %2157 = vmatpush1.bf16.msra.mxu1 %v6084_v6  ;;  %v698_v5 = vld [vmem:[%s10026_s7 + $0x7a8] sm:$0xff]  ;;  %v6028_v6 = vcombine.low %v574_v54, %v578_v55 }
 0x263   :  { %2117 = vmatprep.subr.bf16.mxu0 %v5949_v7  ;;  %2158 = vmatprep.subr.bf16.mxu1 %v6077_v8  ;;  %v6156_v7 = vcombine.low %v702_v56, %v706_v57  ;;  %v6021_v8 = vcombine.high %v566_v2, %v570_v3  ;;  %v6149_v9 = vcombine.high %v694_v4, %v698_v5  ;;  %v534_v39 = vld [vmem:[%s10026_s7 + $0x288] sm:$0xff] }
 0x264   :  { %v538_v40 = vld [vmem:[%s10026_s7 + $0x2a8] sm:$0xff] }
 0x265   :  { %v662_v41 = vld [vmem:[%s10026_s7 + $0x688] sm:$0xff] }
 0x266   :  { %2118 = vmatpush1.bf16.msra.mxu0 %v5948_v13  ;;  %2159 = vmatpush1.bf16.msra.mxu1 %v6076_v14  ;;  %v690_v13 = vld [vmem:[%s10026_s7 + $0x768] sm:$0xff]  ;;  %v6020_v14 = vcombine.low %v566_v2, %v570_v3  ;;  %v511_v3 = vld [vmem:[%s10026_s7 + $0x1d0] sm:$0xff] }
 0x267   :  { %2119 = vmatprep.subr.bf16.mxu0 %v5941_v15  ;;  %2160 = vmatprep.subr.bf16.mxu1 %v6069_v16  ;;  %v6148_v15 = vcombine.low %v694_v4, %v698_v5  ;;  %v6013_v16 = vcombine.high %v558_v10, %v562_v11  ;;  %v6141_v17 = vcombine.high %v686_v12, %v690_v13  ;;  %v526_v47 = vld [vmem:[%s10026_s7 + $0x248] sm:$0xff]  ;;  %v515_v4 = vld [vmem:[%s10026_s7 + $0x1f0] sm:$0xff] }
 0x268   :  { %v530_v48 = vld [vmem:[%s10026_s7 + $0x268] sm:$0xff]  ;;  %v639_v5 = vld [vmem:[%s10026_s7 + $0x5d0] sm:$0xff] }
 0x269   :  { %v654_v49 = vld [vmem:[%s10026_s7 + $0x648] sm:$0xff] }
 0x26a   :  { %2120 = vmatpush1.bf16.msra.mxu0 %v5940_v21  ;;  %2161 = vmatpush1.bf16.msra.mxu1 %v6068_v22  ;;  %v682_v21 = vld [vmem:[%s10026_s7 + $0x728] sm:$0xff]  ;;  %v6012_v22 = vcombine.low %v558_v10, %v562_v11  ;;  %v503_v11 = vld [vmem:[%s10026_s7 + $0x190] sm:$0xff] }
 0x26b   :  { %2121 = vmatprep.subr.bf16.mxu0 %v5933_v23  ;;  %2162 = vmatprep.subr.bf16.mxu1 %v6061_v24  ;;  %v6140_v23 = vcombine.low %v686_v12, %v690_v13  ;;  %v6005_v24 = vcombine.high %v550_v18, %v554_v19  ;;  %v6133_v25 = vcombine.high %v678_v20, %v682_v21  ;;  %v518_v55 = vld [vmem:[%s10026_s7 + $0x208] sm:$0xff]  ;;  %v507_v12 = vld [vmem:[%s10026_s7 + $0x1b0] sm:$0xff] }
 0x26c   :  { %v522_v56 = vld [vmem:[%s10026_s7 + $0x228] sm:$0xff]  ;;  %v631_v13 = vld [vmem:[%s10026_s7 + $0x590] sm:$0xff] }
 0x26d   :  { %v646_v57 = vld [vmem:[%s10026_s7 + $0x608] sm:$0xff] }
 0x26e   :  { %2122 = vmatpush1.bf16.msra.mxu0 %v5932_v29  ;;  %2163 = vmatpush1.bf16.msra.mxu1 %v6060_v30  ;;  %v674_v29 = vld [vmem:[%s10026_s7 + $0x6e8] sm:$0xff]  ;;  %v6004_v30 = vcombine.low %v550_v18, %v554_v19  ;;  %v495_v19 = vld [vmem:[%s10026_s7 + $0x150] sm:$0xff] }
 0x26f   :  { %2123 = vmatprep.subr.bf16.mxu0 %v5925_v31  ;;  %2164 = vmatprep.subr.bf16.mxu1 %v6053_v32  ;;  %v6132_v31 = vcombine.low %v678_v20, %v682_v21  ;;  %v5997_v32 = vcombine.high %v542_v26, %v546_v27  ;;  %v6125_v36 = vcombine.high %v670_v28, %v674_v29  ;;  %v499_v20 = vld [vmem:[%s10026_s7 + $0x170] sm:$0xff] }
 0x270   :  { %v623_v21 = vld [vmem:[%s10026_s7 + $0x550] sm:$0xff] }
 0x272   :  { %2124 = vmatpush1.bf16.msra.mxu0 %v5924_v42  ;;  %2165 = vmatpush1.bf16.msra.mxu1 %v6052_v43  ;;  %v666_v42 = vld [vmem:[%s10026_s7 + $0x6a8] sm:$0xff]  ;;  %v5996_v43 = vcombine.low %v542_v26, %v546_v27  ;;  %v487_v27 = vld [vmem:[%s10026_s7 + $0x110] sm:$0xff] }
 0x273   :  { %2125 = vmatprep.subr.bf16.mxu0 %v5917_v44  ;;  %2166 = vmatprep.subr.bf16.mxu1 %v6045_v45  ;;  %v6124_v44 = vcombine.low %v670_v28, %v674_v29  ;;  %v5989_v45 = vcombine.high %v534_v39, %v538_v40  ;;  %v6117_v46 = vcombine.high %v662_v41, %v666_v42  ;;  %v491_v28 = vld [vmem:[%s10026_s7 + $0x130] sm:$0xff] }
 0x274   :  { %v615_v29 = vld [vmem:[%s10026_s7 + $0x510] sm:$0xff] }
 0x276   :  { %2126 = vmatpush1.bf16.msra.mxu0 %v5916_v50  ;;  %2167 = vmatpush1.bf16.msra.mxu1 %v6044_v51  ;;  %v658_v50 = vld [vmem:[%s10026_s7 + $0x668] sm:$0xff]  ;;  %v5988_v51 = vcombine.low %v534_v39, %v538_v40  ;;  %v479_v40 = vld [vmem:[%s10026_s7 + $0xd0] sm:$0xff] }
 0x277   :  { %2127 = vmatprep.subr.bf16.mxu0 %v5909_v52  ;;  %2168 = vmatprep.subr.bf16.mxu1 %v6037_v53  ;;  %v6116_v52 = vcombine.low %v662_v41, %v666_v42  ;;  %v5981_v53 = vcombine.high %v526_v47, %v530_v48  ;;  %v6109_v54 = vcombine.high %v654_v49, %v658_v50  ;;  %v483_v41 = vld [vmem:[%s10026_s7 + $0xf0] sm:$0xff] }
 0x278   :  { %v607_v42 = vld [vmem:[%s10026_s7 + $0x4d0] sm:$0xff] }
 0x27a   :  { %2128 = vmatpush1.bf16.msra.mxu0 %v5908_v58  ;;  %2169 = vmatpush1.bf16.msra.mxu1 %v6036_v63  ;;  %v650_v58 = vld [vmem:[%s10026_s7 + $0x628] sm:$0xff]  ;;  %v5980_v63 = vcombine.low %v526_v47, %v530_v48  ;;  %v471_v48 = vld [vmem:[%s10026_s7 + $0x90] sm:$0xff] }
 0x27b   :  { %2129 = vmatprep.subr.bf16.mxu0 %v6029_v0  ;;  %2170 = vmatprep.subr.bf16.mxu1 %v6157_v1  ;;  %v6108_v0 = vcombine.low %v654_v49, %v658_v50  ;;  %v5973_v1 = vcombine.high %v518_v55, %v522_v56  ;;  %v6101_v2 = vcombine.high %v646_v57, %v650_v58  ;;  %v475_v49 = vld [vmem:[%s10026_s7 + $0xb0] sm:$0xff] }
 0x27c   :  { %v599_v50 = vld [vmem:[%s10026_s7 + $0x490] sm:$0xff] }
 0x27e   :  { %2130 = vmatpush2.bf16.msra.mxu0 %v6028_v6  ;;  %2171 = vmatpush2.bf16.msra.mxu1 %v6156_v7  ;;  %v643_v6 = vld [vmem:[%s10026_s7 + $0x5f0] sm:$0xff]  ;;  %v5972_v7 = vcombine.low %v518_v55, %v522_v56 }
 0x27f   :  { %2131 = vmatprep.subr.bf16.mxu0 %v6021_v8  ;;  %2172 = vmatprep.subr.bf16.mxu1 %v6149_v9  ;;  %v6100_v8 = vcombine.low %v646_v57, %v650_v58  ;;  %v5967_v9 = vcombine.high %v511_v3, %v515_v4  ;;  %v6095_v10 = vcombine.high %v639_v5, %v643_v6  ;;  %v463_v56 = vld [vmem:[%s10026_s7 + $0x50] sm:$0xff] }
 0x280   :  { %v467_v57 = vld [vmem:[%s10026_s7 + $0x70] sm:$0xff] }
 0x281   :  { %v591_v58 = vld [vmem:[%s10026_s7 + $0x450] sm:$0xff] }
 0x282   :  { %2132 = vmatpush2.bf16.msra.mxu0 %v6020_v14  ;;  %2173 = vmatpush2.bf16.msra.mxu1 %v6148_v15  ;;  %v635_v14 = vld [vmem:[%s10026_s7 + $0x5b0] sm:$0xff]  ;;  %v5966_v15 = vcombine.low %v511_v3, %v515_v4 }
 0x283   :  { %2133 = vmatprep.subr.bf16.mxu0 %v6013_v16  ;;  %2174 = vmatprep.subr.bf16.mxu1 %v6141_v17  ;;  %v6094_v16 = vcombine.low %v639_v5, %v643_v6  ;;  %v5959_v17 = vcombine.high %v503_v11, %v507_v12  ;;  %v6087_v18 = vcombine.high %v631_v13, %v635_v14  ;;  %v455_v4 = vld [vmem:[%s10026_s7 + $0x10] sm:$0xff] }
 0x284   :  { %v459_v5 = vld [vmem:[%s10026_s7 + $0x30] sm:$0xff] }
 0x285   :  { %v583_v6 = vld [vmem:[%s10026_s7 + $0x410] sm:$0xff] }
 0x286   :  { %2134 = vmatpush2.bf16.msra.mxu0 %v6012_v22  ;;  %2175 = vmatpush2.bf16.msra.mxu1 %v6140_v23  ;;  %v627_v22 = vld [vmem:[%s10026_s7 + $0x570] sm:$0xff]  ;;  %v5958_v23 = vcombine.low %v503_v11, %v507_v12 }
 0x287   :  { %2135 = vmatprep.subr.bf16.mxu0 %v6005_v24  ;;  %2176 = vmatprep.subr.bf16.mxu1 %v6133_v25  ;;  %v6086_v24 = vcombine.low %v631_v13, %v635_v14  ;;  %v5951_v25 = vcombine.high %v495_v19, %v499_v20  ;;  %v6079_v26 = vcombine.high %v623_v21, %v627_v22  ;;  %v575_v12 = vld [vmem:[%s10026_s7 + $0x3d0] sm:$0xff] }
 0x288   :  { %v579_v13 = vld [vmem:[%s10026_s7 + $0x3f0] sm:$0xff] }
 0x289   :  { %v703_v14 = vld [vmem:[%s10026_s7 + $0x7d0] sm:$0xff] }
 0x28a   :  { %2136 = vmatpush2.bf16.msra.mxu0 %v6004_v30  ;;  %2177 = vmatpush2.bf16.msra.mxu1 %v6132_v31  ;;  %v619_v30 = vld [vmem:[%s10026_s7 + $0x530] sm:$0xff]  ;;  %v5950_v31 = vcombine.low %v495_v19, %v499_v20 }
 0x28b   :  { %2137 = vmatprep.subr.bf16.mxu0 %v5997_v32  ;;  %2178 = vmatprep.subr.bf16.mxu1 %v6125_v36  ;;  %v6078_v32 = vcombine.low %v623_v21, %v627_v22  ;;  %v5943_v36 = vcombine.high %v487_v27, %v491_v28  ;;  %v6071_v39 = vcombine.high %v615_v29, %v619_v30  ;;  %v567_v20 = vld [vmem:[%s10026_s7 + $0x390] sm:$0xff] }
 0x28c   :  { %v571_v21 = vld [vmem:[%s10026_s7 + $0x3b0] sm:$0xff] }
 0x28d   :  { %v695_v22 = vld [vmem:[%s10026_s7 + $0x790] sm:$0xff] }
 0x28e   :  { %2138 = vmatpush2.bf16.msra.mxu0 %v5996_v43  ;;  %2179 = vmatpush2.bf16.msra.mxu1 %v6124_v44  ;;  %v611_v43 = vld [vmem:[%s10026_s7 + $0x4f0] sm:$0xff]  ;;  %v5942_v44 = vcombine.low %v487_v27, %v491_v28 }
 0x28f   :  { %2139 = vmatprep.subr.bf16.mxu0 %v5989_v45  ;;  %2180 = vmatprep.subr.bf16.mxu1 %v6117_v46  ;;  %v6070_v45 = vcombine.low %v615_v29, %v619_v30  ;;  %v5935_v46 = vcombine.high %v479_v40, %v483_v41  ;;  %v6063_v47 = vcombine.high %v607_v42, %v611_v43  ;;  %v559_v28 = vld [vmem:[%s10026_s7 + $0x350] sm:$0xff] }
 0x290   :  { %v563_v29 = vld [vmem:[%s10026_s7 + $0x370] sm:$0xff] }
 0x291   :  { %v687_v30 = vld [vmem:[%s10026_s7 + $0x750] sm:$0xff] }
 0x292   :  { %2140 = vmatpush2.bf16.msra.mxu0 %v5988_v51  ;;  %2181 = vmatpush2.bf16.msra.mxu1 %v6116_v52  ;;  %v603_v51 = vld [vmem:[%s10026_s7 + $0x4b0] sm:$0xff]  ;;  %v5934_v52 = vcombine.low %v479_v40, %v483_v41 }
 0x293   :  { %2141 = vmatprep.subr.bf16.mxu0 %v5981_v53  ;;  %2182 = vmatprep.subr.bf16.mxu1 %v6109_v54  ;;  %v6062_v53 = vcombine.low %v607_v42, %v611_v43  ;;  %v5927_v54 = vcombine.high %v471_v48, %v475_v49  ;;  %v6055_v55 = vcombine.high %v599_v50, %v603_v51  ;;  %v551_v41 = vld [vmem:[%s10026_s7 + $0x310] sm:$0xff] }
 0x294   :  { %v555_v42 = vld [vmem:[%s10026_s7 + $0x330] sm:$0xff] }
 0x295   :  { %v679_v43 = vld [vmem:[%s10026_s7 + $0x710] sm:$0xff] }
 0x296   :  { %2142 = vmatpush2.bf16.msra.mxu0 %v5980_v63  ;;  %2183 = vmatpush2.bf16.msra.mxu1 %v6108_v0  ;;  %v595_v63 = vld [vmem:[%s10026_s7 + $0x470] sm:$0xff]  ;;  %v5926_v0 = vcombine.low %v471_v48, %v475_v49 }
 0x297   :  { %2143 = vmatprep.subr.bf16.mxu0 %v5973_v1  ;;  %2184 = vmatprep.subr.bf16.mxu1 %v6101_v2  ;;  %v6054_v1 = vcombine.low %v599_v50, %v603_v51  ;;  %v5919_v2 = vcombine.high %v463_v56, %v467_v57  ;;  %v6047_v3 = vcombine.high %v591_v58, %v595_v63  ;;  %v543_v49 = vld [vmem:[%s10026_s7 + $0x2d0] sm:$0xff] }
 0x298   :  { %v547_v50 = vld [vmem:[%s10026_s7 + $0x2f0] sm:$0xff] }
 0x299   :  { %v671_v51 = vld [vmem:[%s10026_s7 + $0x6d0] sm:$0xff] }
 0x29a   :  { %2144 = vmatpush2.bf16.msra.mxu0 %v5972_v7  ;;  %2185 = vmatpush2.bf16.msra.mxu1 %v6100_v8  ;;  %v587_v7 = vld [vmem:[%s10026_s7 + $0x430] sm:$0xff]  ;;  %v5918_v8 = vcombine.low %v463_v56, %v467_v57 }
 0x29b   :  { %2195 = vmatprep.subr.bf16.mxu0 %v5967_v9  ;;  %2236 = vmatprep.subr.bf16.mxu1 %v6095_v10  ;;  %v6046_v9 = vcombine.low %v591_v58, %v595_v63  ;;  %v5911_v10 = vcombine.high %v455_v4, %v459_v5  ;;  %v6039_v11 = vcombine.high %v583_v6, %v587_v7  ;;  %v535_v57 = vld [vmem:[%s10026_s7 + $0x290] sm:$0xff] }
 0x29c   :  { %v539_v58 = vld [vmem:[%s10026_s7 + $0x2b0] sm:$0xff] }
 0x29d   :  { %2146 = vmatmul.mubr.bf16.vlgmr.msra.gmra.mxu0 %v7967_v61  ;;  %2187 = vmatmul.mubr.bf16.vlgmr.msra.gmra.mxu1 %v7969_v62  ;;  %v663_v63 = vld [vmem:[%s10026_s7 + $0x690] sm:$0xff] }
 0x29e   :  { %2196 = vmatpush1.bf16.msra.mxu0 %v5966_v15  ;;  %2227 = vmatprep.mubr.bf16.mxu0 %v7963_v59  ;;  %v707_v15 = vld [vmem:[%s10026_s7 + $0x7f0] sm:$0xff] }
 0x29f   :  { %2237 = vmatpush1.bf16.msra.mxu1 %v6094_v16  ;;  %2268 = vmatprep.mubr.bf16.mxu1 %v7965_v60  ;;  %v5910_v16 = vcombine.low %v455_v4, %v459_v5  ;;  %v6159_v19 = vcombine.high %v703_v14, %v707_v15  ;;  %v527_v5 = vld [vmem:[%s10026_s7 + $0x250] sm:$0xff] }
 0x2a0   :  { %2197 = vmatprep.subr.bf16.mxu0 %v5959_v17  ;;  %2238 = vmatprep.subr.bf16.mxu1 %v6087_v18  ;;  %v6038_v17 = vcombine.low %v583_v6, %v587_v7  ;;  %v6031_v18 = vcombine.high %v575_v12, %v579_v13  ;;  %v531_v6 = vld [vmem:[%s10026_s7 + $0x270] sm:$0xff] }
 0x2a1   :  { %v655_v7 = vld [vmem:[%s10026_s7 + $0x650] sm:$0xff] }
 0x2a2   :  { %2198 = vmatpush1.bf16.msra.mxu0 %v5958_v23  ;;  %v699_v23 = vld [vmem:[%s10026_s7 + $0x7b0] sm:$0xff] }
 0x2a3   :  { %2239 = vmatpush1.bf16.msra.mxu1 %v6086_v24  ;;  %2199 = vmatprep.subr.bf16.mxu0 %v5951_v25  ;;  %v6030_v24 = vcombine.low %v575_v12, %v579_v13  ;;  %v6158_v25 = vcombine.low %v703_v14, %v707_v15  ;;  %v6151_v27 = vcombine.high %v695_v22, %v699_v23  ;;  %v519_v13 = vld [vmem:[%s10026_s7 + $0x210] sm:$0xff] }
 0x2a4   :  { %2240 = vmatprep.subr.bf16.mxu1 %v6079_v26  ;;  %v6023_v26 = vcombine.high %v567_v20, %v571_v21  ;;  %v523_v14 = vld [vmem:[%s10026_s7 + $0x230] sm:$0xff] }
 0x2a5   :  { %v647_v15 = vld [vmem:[%s10026_s7 + $0x610] sm:$0xff] }
 0x2a6   :  { %2200 = vmatpush1.bf16.msra.mxu0 %v5950_v31  ;;  %v691_v31 = vld [vmem:[%s10026_s7 + $0x770] sm:$0xff] }
 0x2a7   :  { %2241 = vmatpush1.bf16.msra.mxu1 %v6078_v32  ;;  %2201 = vmatprep.subr.bf16.mxu0 %v5943_v36  ;;  %v6022_v32 = vcombine.low %v567_v20, %v571_v21  ;;  %v6150_v36 = vcombine.low %v695_v22, %v699_v23  ;;  %v6143_v40 = vcombine.high %v687_v30, %v691_v31  ;;  %v512_v21 = vld [vmem:[%s10026_s7 + $0x1d8] sm:$0xff] }
 0x2a8   :  { %2242 = vmatprep.subr.bf16.mxu1 %v6071_v39  ;;  %v6015_v39 = vcombine.high %v559_v28, %v563_v29  ;;  %v516_v22 = vld [vmem:[%s10026_s7 + $0x1f8] sm:$0xff] }
 0x2a9   :  { %v640_v23 = vld [vmem:[%s10026_s7 + $0x5d8] sm:$0xff] }
 0x2aa   :  { %2202 = vmatpush1.bf16.msra.mxu0 %v5942_v44  ;;  %v683_v44 = vld [vmem:[%s10026_s7 + $0x730] sm:$0xff] }
 0x2ab   :  { %2243 = vmatpush1.bf16.msra.mxu1 %v6070_v45  ;;  %2203 = vmatprep.subr.bf16.mxu0 %v5935_v46  ;;  %v6014_v45 = vcombine.low %v559_v28, %v563_v29  ;;  %v6142_v46 = vcombine.low %v687_v30, %v691_v31  ;;  %v6135_v48 = vcombine.high %v679_v43, %v683_v44  ;;  %v504_v29 = vld [vmem:[%s10026_s7 + $0x198] sm:$0xff] }
 0x2ac   :  { %2244 = vmatprep.subr.bf16.mxu1 %v6063_v47  ;;  %v6007_v47 = vcombine.high %v551_v41, %v555_v42  ;;  %v508_v30 = vld [vmem:[%s10026_s7 + $0x1b8] sm:$0xff]  ;;  %v5968_v31 = vcombine.low %v512_v21, %v516_v22 }
 0x2ae   :  { %2204 = vmatpush1.bf16.msra.mxu0 %v5934_v52  ;;  %v675_v52 = vld [vmem:[%s10026_s7 + $0x6f0] sm:$0xff] }
 0x2af   :  { %2245 = vmatpush1.bf16.msra.mxu1 %v6062_v53  ;;  %2205 = vmatprep.subr.bf16.mxu0 %v5927_v54  ;;  %v6006_v53 = vcombine.low %v551_v41, %v555_v42  ;;  %v6134_v54 = vcombine.low %v679_v43, %v683_v44  ;;  %v6127_v56 = vcombine.high %v671_v51, %v675_v52  ;;  %v496_v41 = vld [vmem:[%s10026_s7 + $0x158] sm:$0xff] }
 0x2b0   :  { %2246 = vmatprep.subr.bf16.mxu1 %v6055_v55  ;;  %v5999_v55 = vcombine.high %v543_v49, %v547_v50  ;;  %v500_v42 = vld [vmem:[%s10026_s7 + $0x178] sm:$0xff] }
 0x2b1   :  { %v624_v44 = vld [vmem:[%s10026_s7 + $0x558] sm:$0xff] }
 0x2b2   :  { %2206 = vmatpush1.bf16.msra.mxu0 %v5926_v0  ;;  %v667_v0 = vld [vmem:[%s10026_s7 + $0x6b0] sm:$0xff] }
 0x2b3   :  { %2247 = vmatpush1.bf16.msra.mxu1 %v6054_v1  ;;  %2207 = vmatprep.subr.bf16.mxu0 %v5919_v2  ;;  %v5998_v1 = vcombine.low %v543_v49, %v547_v50  ;;  %v6126_v2 = vcombine.low %v671_v51, %v675_v52  ;;  %v6119_v4 = vcombine.high %v663_v63, %v667_v0  ;;  %v488_v50 = vld [vmem:[%s10026_s7 + $0x118] sm:$0xff] }
 0x2b4   :  { %2248 = vmatprep.subr.bf16.mxu1 %v6047_v3  ;;  %v5991_v3 = vcombine.high %v535_v57, %v539_v58  ;;  %v492_v51 = vld [vmem:[%s10026_s7 + $0x138] sm:$0xff] }
 0x2b5   :  { %v620_v52 = vld [vmem:[%s10026_s7 + $0x538] sm:$0xff] }
 0x2b6   :  { %2208 = vmatpush1.bf16.msra.mxu0 %v5918_v8  ;;  %v659_v8 = vld [vmem:[%s10026_s7 + $0x670] sm:$0xff] }
 0x2b7   :  { %2249 = vmatpush1.bf16.msra.mxu1 %v6046_v9  ;;  %2209 = vmatprep.subr.bf16.mxu0 %v5911_v10  ;;  %v5990_v9 = vcombine.low %v535_v57, %v539_v58  ;;  %v6118_v10 = vcombine.low %v663_v63, %v667_v0  ;;  %v6111_v12 = vcombine.high %v655_v7, %v659_v8  ;;  %v484_v57 = vld [vmem:[%s10026_s7 + $0xf8] sm:$0xff] }
 0x2b8   :  { %2250 = vmatprep.subr.bf16.mxu1 %v6039_v11  ;;  %v5983_v11 = vcombine.high %v527_v5, %v531_v6  ;;  %v608_v58 = vld [vmem:[%s10026_s7 + $0x4d8] sm:$0xff]  ;;  %v5944_v0 = vcombine.low %v488_v50, %v492_v51 }
 0x2b9   :  { %v612_v63 = vld [vmem:[%s10026_s7 + $0x4f8] sm:$0xff] }
 0x2ba   :  { %2210 = vmatpush1.bf16.msra.mxu0 %v5910_v16  ;;  %v651_v16 = vld [vmem:[%s10026_s7 + $0x630] sm:$0xff] }
 0x2bb   :  { %2251 = vmatpush1.bf16.msra.mxu1 %v6038_v17  ;;  %2211 = vmatprep.subr.bf16.mxu0 %v6031_v18  ;;  %v5982_v17 = vcombine.low %v527_v5, %v531_v6  ;;  %v6110_v18 = vcombine.low %v655_v7, %v659_v8  ;;  %v6103_v20 = vcombine.high %v647_v15, %v651_v16  ;;  %v476_v5 = vld [vmem:[%s10026_s7 + $0xb8] sm:$0xff] }
 0x2bc   :  { %2252 = vmatprep.subr.bf16.mxu1 %v6159_v19  ;;  %v5975_v19 = vcombine.high %v519_v13, %v523_v14  ;;  %v600_v6 = vld [vmem:[%s10026_s7 + $0x498] sm:$0xff] }
 0x2bd   :  { %v604_v7 = vld [vmem:[%s10026_s7 + $0x4b8] sm:$0xff] }
 0x2be   :  { %2212 = vmatpush2.bf16.msra.mxu0 %v6030_v24  ;;  %v644_v24 = vld [vmem:[%s10026_s7 + $0x5f8] sm:$0xff] }
 0x2bf   :  { %2253 = vmatpush2.bf16.msra.mxu1 %v6158_v25  ;;  %2213 = vmatprep.subr.bf16.mxu0 %v6023_v26  ;;  %v5974_v25 = vcombine.low %v519_v13, %v523_v14  ;;  %v6102_v26 = vcombine.low %v647_v15, %v651_v16  ;;  %v6097_v28 = vcombine.high %v640_v23, %v644_v24  ;;  %v468_v13 = vld [vmem:[%s10026_s7 + $0x78] sm:$0xff] }
 0x2c0   :  { %2254 = vmatprep.subr.bf16.mxu1 %v6151_v27  ;;  %v5969_v27 = vcombine.high %v512_v21, %v516_v22  ;;  %v592_v14 = vld [vmem:[%s10026_s7 + $0x458] sm:$0xff] }
 0x2c1   :  { %v596_v15 = vld [vmem:[%s10026_s7 + $0x478] sm:$0xff] }
 0x2c2   :  { %2214 = vmatpush2.bf16.msra.mxu0 %v6022_v32  ;;  %v632_v32 = vld [vmem:[%s10026_s7 + $0x598] sm:$0xff] }
 0x2c3   :  { %2255 = vmatpush2.bf16.msra.mxu1 %v6150_v36  ;;  %2215 = vmatprep.subr.bf16.mxu0 %v6015_v39  ;;  %v636_v36 = vld [vmem:[%s10026_s7 + $0x5b8] sm:$0xff]  ;;  %v6096_v39 = vcombine.low %v640_v23, %v644_v24 }
 0x2c4   :  { %2256 = vmatprep.subr.bf16.mxu1 %v6143_v40  ;;  %v5961_v40 = vcombine.high %v504_v29, %v508_v30  ;;  %v6089_v43 = vcombine.high %v632_v32, %v636_v36  ;;  %v460_v21 = vld [vmem:[%s10026_s7 + $0x38] sm:$0xff] }
 0x2c5   :  { %v584_v22 = vld [vmem:[%s10026_s7 + $0x418] sm:$0xff] }
 0x2c6   :  { %2216 = vmatpush2.bf16.msra.mxu0 %v6014_v45  ;;  %v628_v45 = vld [vmem:[%s10026_s7 + $0x578] sm:$0xff] }
 0x2c7   :  { %2257 = vmatpush2.bf16.msra.mxu1 %v6142_v46  ;;  %2217 = vmatprep.subr.bf16.mxu0 %v6007_v47  ;;  %v5960_v46 = vcombine.low %v504_v29, %v508_v30  ;;  %v6088_v47 = vcombine.low %v632_v32, %v636_v36  ;;  %v6081_v49 = vcombine.high %v624_v44, %v628_v45  ;;  %v588_v23 = vld [vmem:[%s10026_s7 + $0x438] sm:$0xff] }
 0x2c8   :  { %2258 = vmatprep.subr.bf16.mxu1 %v6135_v48  ;;  %v5953_v48 = vcombine.high %v496_v41, %v500_v42  ;;  %v580_v29 = vld [vmem:[%s10026_s7 + $0x3f8] sm:$0xff]  ;;  %v6040_v36 = vcombine.low %v584_v22, %v588_v23 }
 0x2c9   :  { %v704_v30 = vld [vmem:[%s10026_s7 + $0x7d8] sm:$0xff] }
 0x2ca   :  { %2218 = vmatpush2.bf16.msra.mxu0 %v6006_v53  ;;  %v6080_v53 = vcombine.low %v624_v44, %v628_v45  ;;  %v700_v44 = vld [vmem:[%s10026_s7 + $0x7b8] sm:$0xff] }
 0x2cb   :  { %2259 = vmatpush2.bf16.msra.mxu1 %v6134_v54  ;;  %2219 = vmatprep.subr.bf16.mxu0 %v5999_v55  ;;  %v5945_v54 = vcombine.high %v488_v50, %v492_v51  ;;  %v564_v50 = vld [vmem:[%s10026_s7 + $0x378] sm:$0xff] }
 0x2cc   :  { %2260 = vmatprep.subr.bf16.mxu1 %v6127_v56  ;;  %v480_v56 = vld [vmem:[%s10026_s7 + $0xd8] sm:$0xff] }
 0x2cd   :  { %v5936_v8 = vcombine.low %v480_v56, %v484_v57  ;;  %v688_v51 = vld [vmem:[%s10026_s7 + $0x758] sm:$0xff] }
 0x2ce   :  { %2220 = vmatpush2.bf16.msra.mxu0 %v5998_v1 }
 0x2cf   :  { %2261 = vmatpush2.bf16.msra.mxu1 %v6126_v2  ;;  %2221 = vmatprep.subr.bf16.mxu0 %v5991_v3  ;;  %v5937_v2 = vcombine.high %v480_v56, %v484_v57  ;;  %v6065_v3 = vcombine.high %v608_v58, %v612_v63  ;;  %v556_v56 = vld [vmem:[%s10026_s7 + $0x338] sm:$0xff] }
 0x2d0   :  { %2262 = vmatprep.subr.bf16.mxu1 %v6119_v4  ;;  %v472_v4 = vld [vmem:[%s10026_s7 + $0x98] sm:$0xff] }
 0x2d1   :  { %v5928_v16 = vcombine.low %v472_v4, %v476_v5  ;;  %v680_v57 = vld [vmem:[%s10026_s7 + $0x718] sm:$0xff] }
 0x2d2   :  { %2222 = vmatpush2.bf16.msra.mxu0 %v5990_v9  ;;  %v6064_v9 = vcombine.low %v608_v58, %v612_v63  ;;  %v684_v58 = vld [vmem:[%s10026_s7 + $0x738] sm:$0xff] }
 0x2d3   :  { %2263 = vmatpush2.bf16.msra.mxu1 %v6118_v10  ;;  %2223 = vmatprep.subr.bf16.mxu0 %v5983_v11  ;;  %v5929_v10 = vcombine.high %v472_v4, %v476_v5  ;;  %v6057_v11 = vcombine.high %v600_v6, %v604_v7  ;;  %v548_v4 = vld [vmem:[%s10026_s7 + $0x2f8] sm:$0xff] }
 0x2d4   :  { %2264 = vmatprep.subr.bf16.mxu1 %v6111_v12  ;;  %v464_v12 = vld [vmem:[%s10026_s7 + $0x58] sm:$0xff] }
 0x2d5   :  { %v5920_v24 = vcombine.low %v464_v12, %v468_v13  ;;  %v672_v5 = vld [vmem:[%s10026_s7 + $0x6d8] sm:$0xff] }
 0x2d6   :  { %2224 = vmatpush2.bf16.msra.mxu0 %v5982_v17  ;;  %v6056_v17 = vcombine.low %v600_v6, %v604_v7  ;;  %v676_v6 = vld [vmem:[%s10026_s7 + $0x6f8] sm:$0xff] }
 0x2d7   :  { %2265 = vmatpush2.bf16.msra.mxu1 %v6110_v18  ;;  %2225 = vmatprep.subr.bf16.mxu0 %v5975_v19  ;;  %v5921_v18 = vcombine.high %v464_v12, %v468_v13  ;;  %v6049_v19 = vcombine.high %v592_v14, %v596_v15  ;;  %v540_v12 = vld [vmem:[%s10026_s7 + $0x2b8] sm:$0xff] }
 0x2d8   :  { %2266 = vmatprep.subr.bf16.mxu1 %v6103_v20  ;;  %v456_v20 = vld [vmem:[%s10026_s7 + $0x18] sm:$0xff] }
 0x2d9   :  { %v5912_v32 = vcombine.low %v456_v20, %v460_v21  ;;  %v664_v13 = vld [vmem:[%s10026_s7 + $0x698] sm:$0xff] }
 0x2da   :  { %2226 = vmatpush2.bf16.msra.mxu0 %v5974_v25  ;;  %v6048_v25 = vcombine.low %v592_v14, %v596_v15  ;;  %v668_v14 = vld [vmem:[%s10026_s7 + $0x6b8] sm:$0xff] }
 0x2db   :  { %2267 = vmatpush2.bf16.msra.mxu1 %v6102_v26  ;;  %2277 = vmatprep.subr.bf16.mxu0 %v5969_v27  ;;  %v5913_v26 = vcombine.high %v456_v20, %v460_v21  ;;  %v6041_v27 = vcombine.high %v584_v22, %v588_v23  ;;  %v532_v20 = vld [vmem:[%s10026_s7 + $0x278] sm:$0xff] }
 0x2dc   :  { %2318 = vmatprep.subr.bf16.mxu1 %v6097_v28  ;;  %v576_v28 = vld [vmem:[%s10026_s7 + $0x3d8] sm:$0xff] }
 0x2dd   :  { %2228 = vmatmul.mubr.bf16.vlgmr.msra.gmra.mxu0 %v7967_v61  ;;  %v6032_v45 = vcombine.low %v576_v28, %v580_v29  ;;  %v656_v21 = vld [vmem:[%s10026_s7 + $0x658] sm:$0xff] }
 0x2de   :  { %2269 = vmatmul.mubr.bf16.vlgmr.msra.gmra.mxu1 %v7969_v62  ;;  %2278 = vmatpush1.bf16.msra.mxu0 %v5968_v31  ;;  %v708_v31 = vld [vmem:[%s10026_s7 + $0x7f8] sm:$0xff] }
 0x2df   :  { %2309 = vmatprep.mubr.bf16.mxu0 %v7963_v59  ;;  %2319 = vmatpush1.bf16.msra.mxu1 %v6096_v39  ;;  %v616_v59 = vld [vmem:[%s10026_s7 + $0x518] sm:$0xff]  ;;  %v6033_v39 = vcombine.high %v576_v28, %v580_v29 }
 0x2e0   :  { %2350 = vmatprep.mubr.bf16.mxu1 %v7965_v60  ;;  %2279 = vmatprep.subr.bf16.mxu0 %v5961_v40  ;;  %v5952_v60 = vcombine.low %v496_v41, %v500_v42  ;;  %v6073_v55 = vcombine.high %v616_v59, %v620_v52  ;;  %v6072_v1 = vcombine.low %v616_v59, %v620_v52  ;;  %v568_v41 = vld [vmem:[%s10026_s7 + $0x398] sm:$0xff] }
 0x2e1   :  { %2320 = vmatprep.subr.bf16.mxu1 %v6089_v43  ;;  %v6161_v40 = vcombine.high %v704_v30, %v708_v31  ;;  %v572_v42 = vld [vmem:[%s10026_s7 + $0x3b8] sm:$0xff] }
 0x2e2   :  { %2280 = vmatpush1.bf16.msra.mxu0 %v5960_v46  ;;  %v696_v43 = vld [vmem:[%s10026_s7 + $0x798] sm:$0xff]  ;;  %v6160_v46 = vcombine.low %v704_v30, %v708_v31  ;;  %v6024_v52 = vcombine.low %v568_v41, %v572_v42 }
 0x2e3   :  { %2321 = vmatpush1.bf16.msra.mxu1 %v6088_v47  ;;  %2281 = vmatprep.subr.bf16.mxu0 %v5953_v48  ;;  %v6025_v47 = vcombine.high %v568_v41, %v572_v42  ;;  %v6153_v48 = vcombine.high %v696_v43, %v700_v44  ;;  %v692_v59 = vld [vmem:[%s10026_s7 + $0x778] sm:$0xff]  ;;  %v6747_v42 = vld [vmem:[%s10028_s9 + $0x18c] ss:$28 sps:$4 sm:$0xff]  }
 0x2e4   :  { %2322 = vmatprep.subr.bf16.mxu1 %v6081_v49  ;;  %v560_v49 = vld [vmem:[%s10026_s7 + $0x358] sm:$0xff] }
 0x2e5   :  { %v6016_v63 = vcombine.low %v560_v49, %v564_v50  ;;  %v660_v22 = vld [vmem:[%s10026_s7 + $0x678] sm:$0xff] }
 0x2e6   :  { %2282 = vmatpush1.bf16.msra.mxu0 %v5952_v60  ;;  %v6152_v60 = vcombine.low %v696_v43, %v700_v44  ;;  %v524_v28 = vld [vmem:[%s10026_s7 + $0x238] sm:$0xff]  ;;  %v6759_v43 = vld [vmem:[%s10028_s9 + $0x50c] ss:$28 sps:$4 sm:$0xff]  }
 0x2e7   :  { %2323 = vmatpush1.bf16.msra.mxu1 %v6080_v53  ;;  %2283 = vmatprep.subr.bf16.mxu0 %v5945_v54  ;;  %v6017_v53 = vcombine.high %v560_v49, %v564_v50  ;;  %v6145_v54 = vcombine.high %v688_v51, %v692_v59  ;;  %v648_v29 = vld [vmem:[%s10026_s7 + $0x618] sm:$0xff]  ;;  %v6745_v44 = vld [vmem:[%s10028_s9 + $0x188] ss:$28 sps:$4 sm:$0xff]   ;;  %v6765_v49 = vld [vmem:[%s10028_s9 + $0x4d4] ss:$28 sps:$4 sm:$0xff]  }
 0x2e8   :  { %2324 = vmatprep.subr.bf16.mxu1 %v6073_v55  ;;  %v552_v55 = vld [vmem:[%s10026_s7 + $0x318] sm:$0xff] }
 0x2e9   :  { %v6008_v7 = vcombine.low %v552_v55, %v556_v56  ;;  %v652_v30 = vld [vmem:[%s10026_s7 + $0x638] sm:$0xff] }
 0x2ea   :  { %2284 = vmatpush1.bf16.msra.mxu0 %v5944_v0  ;;  %v6144_v0 = vcombine.low %v688_v51, %v692_v59  ;;  %v6104_v41 = vcombine.low %v648_v29, %v652_v30  ;;  %v6748_v59 = vld [vmem:[%s10028_s9 + $0x150] ss:$28 sps:$4 sm:$0xff]  }
 0x2eb   :  { %2325 = vmatpush1.bf16.msra.mxu1 %v6072_v1  ;;  %2285 = vmatprep.subr.bf16.mxu0 %v5937_v2  ;;  %v6009_v1 = vcombine.high %v552_v55, %v556_v56  ;;  %v6137_v2 = vcombine.high %v680_v57, %v684_v58 }
 0x2ec   :  { %2326 = vmatprep.subr.bf16.mxu1 %v6065_v3  ;;  %v544_v3 = vld [vmem:[%s10026_s7 + $0x2d8] sm:$0xff] }
 0x2ed   :  { %v6000_v15 = vcombine.low %v544_v3, %v548_v4 }
 0x2ee   :  { %2286 = vmatpush1.bf16.msra.mxu0 %v5936_v8  ;;  %v6136_v8 = vcombine.low %v680_v57, %v684_v58  ;;  %v6751_v58 = vld [vmem:[%s10028_s9 + $0x118] ss:$28 sps:$4 sm:$0xff]  }
 0x2ef   :  { %2327 = vmatpush1.bf16.msra.mxu1 %v6064_v9  ;;  %2287 = vmatprep.subr.bf16.mxu0 %v5929_v10  ;;  %v6001_v9 = vcombine.high %v544_v3, %v548_v4  ;;  %v6129_v10 = vcombine.high %v672_v5, %v676_v6  ;;  %v6777_v4 = vld [vmem:[%s10028_s9 + $0x464] ss:$28 sps:$4 sm:$0xff]  }
 0x2f0   :  { %2328 = vmatprep.subr.bf16.mxu1 %v6057_v11  ;;  %v536_v11 = vld [vmem:[%s10026_s7 + $0x298] sm:$0xff] }
 0x2f1   :  { %v5992_v23 = vcombine.low %v536_v11, %v540_v12 }
 0x2f2   :  { %2288 = vmatpush1.bf16.msra.mxu0 %v5928_v16  ;;  %v6128_v16 = vcombine.low %v672_v5, %v676_v6  ;;  %v6754_v6 = vld [vmem:[%s10028_s9 + $0xe0] ss:$28 sps:$4 sm:$0xff]  }
 0x2f3   :  { %2329 = vmatpush1.bf16.msra.mxu1 %v6056_v17  ;;  %2289 = vmatprep.subr.bf16.mxu0 %v5921_v18  ;;  %v5993_v17 = vcombine.high %v536_v11, %v540_v12  ;;  %v6121_v18 = vcombine.high %v664_v13, %v668_v14  ;;  %v6768_v11 = vld [vmem:[%s10028_s9 + $0x74] ss:$28 sps:$4 sm:$0xff]   ;;  %v6781_v12 = vld [vmem:[%s10028_s9 + $0x428] ss:$28 sps:$4 sm:$0xff]  }
 0x2f4   :  { %2330 = vmatprep.subr.bf16.mxu1 %v6049_v19  ;;  %v528_v19 = vld [vmem:[%s10026_s7 + $0x258] sm:$0xff] }
 0x2f5   :  { %v5984_v31 = vcombine.low %v528_v19, %v532_v20 }
 0x2f6   :  { %2290 = vmatpush1.bf16.msra.mxu0 %v5920_v24  ;;  %v6120_v24 = vcombine.low %v664_v13, %v668_v14  ;;  %v6789_v13 = vld [vmem:[%s10028_s9 + $0x3f4] ss:$28 sps:$4 sm:$0xff]  }
 0x2f7   :  { %2331 = vmatpush1.bf16.msra.mxu1 %v6048_v25  ;;  %2291 = vmatprep.subr.bf16.mxu0 %v5913_v26  ;;  %v5985_v25 = vcombine.high %v528_v19, %v532_v20  ;;  %v6113_v26 = vcombine.high %v656_v21, %v660_v22  ;;  %v6766_v14 = vld [vmem:[%s10028_s9 + $0x70] ss:$28 sps:$4 sm:$0xff]   ;;  %v6780_v19 = vld [vmem:[%s10028_s9 + $0x4] ss:$28 sps:$4 sm:$0xff]   ;;  %v6793_v20 = vld [vmem:[%s10028_s9 + $0x3b8] ss:$28 sps:$4 sm:$0xff]  }
 0x2f8   :  { %2332 = vmatprep.subr.bf16.mxu1 %v6041_v27  ;;  %v520_v27 = vld [vmem:[%s10026_s7 + $0x218] sm:$0xff] }
 0x2fa   :  { %2292 = vmatpush1.bf16.msra.mxu0 %v5912_v32  ;;  %v6112_v32 = vcombine.low %v656_v21, %v660_v22  ;;  %v6801_v21 = vld [vmem:[%s10028_s9 + $0x384] ss:$28 sps:$4 sm:$0xff]  }
 0x2fb   :  { %2333 = vmatpush1.bf16.msra.mxu1 %v6040_v36  ;;  %2293 = vmatprep.subr.bf16.mxu0 %v6033_v39  ;;  %v5977_v36 = vcombine.high %v520_v27, %v524_v28  ;;  %v6105_v39 = vcombine.high %v648_v29, %v652_v30  ;;  %v6778_v22 = vld [vmem:[%s10028_s9] ss:$28 sps:$4 sm:$0xff]   ;;  %v6813_v29 = vld [vmem:[%s10028_s9 + $0x694] ss:$28 sps:$4 sm:$0xff]  }
 0x2fc   :  { %2334 = vmatprep.subr.bf16.mxu1 %v6161_v40  ;;  %v5976_v40 = vcombine.low %v520_v27, %v524_v28  ;;  %v6792_v27 = vld [vmem:[%s10028_s9 + $0x314] ss:$28 sps:$4 sm:$0xff]   ;;  %v6805_v28 = vld [vmem:[%s10028_s9 + $0x6c8] ss:$28 sps:$4 sm:$0xff]  }
 0x2fd   :  { %v6790_v30 = vld [vmem:[%s10028_s9 + $0x310] ss:$28 sps:$4 sm:$0xff]  }
 0x2fe   :  { %2294 = vmatpush2.bf16.msra.mxu0 %v6032_v45  ;;  %v8549_v45 = vld [vmem:[%s10027_s8] sm:$0xff] }
 0x2ff   :  { %2335 = vmatpush2.bf16.msra.mxu1 %v6160_v46  ;;  %2295 = vmatprep.subr.bf16.mxu0 %v6025_v47  ;;  %v6750_v46 = vld [vmem:[%s10028_s9 + $0x154] ss:$28 sps:$4 sm:$0xff]   ;;  %v6757_v47 = vld [vmem:[%s10028_s9 + $0x508] ss:$28 sps:$4 sm:$0xff]  }
 0x300   :  { %2336 = vmatprep.subr.bf16.mxu1 %v6153_v48  ;;  %v718_v48 = vrot.slane %v8549_v45, %v7942_v37 }
 0x302   :  { %2296 = vmatpush2.bf16.msra.mxu0 %v6024_v52 }
 0x303   :  { %2337 = vmatpush2.bf16.msra.mxu1 %v6152_v60  ;;  %2297 = vmatprep.subr.bf16.mxu0 %v6017_v53  ;;  %v6753_v53 = vld [vmem:[%s10028_s9 + $0x11c] ss:$28 sps:$4 sm:$0xff]  }
 0x304   :  { %2338 = vmatprep.subr.bf16.mxu1 %v6145_v54 }
 0x306   :  { %2298 = vmatpush2.bf16.msra.mxu0 %v6016_v63 }
 0x307   :  { %2339 = vmatpush2.bf16.msra.mxu1 %v6144_v0  ;;  %2299 = vmatprep.subr.bf16.mxu0 %v6009_v1  ;;  %v6756_v1 = vld [vmem:[%s10028_s9 + $0xe4] ss:$28 sps:$4 sm:$0xff]  }
 0x308   :  { %2340 = vmatprep.subr.bf16.mxu1 %v6137_v2  ;;  %v6769_v2 = vld [vmem:[%s10028_s9 + $0x498] ss:$28 sps:$4 sm:$0xff]  }
 0x30a   :  { %2300 = vmatpush2.bf16.msra.mxu0 %v6008_v7  ;;  %v6762_v7 = vld [vmem:[%s10028_s9 + $0xac] ss:$28 sps:$4 sm:$0xff]  }
 0x30b   :  { %2341 = vmatpush2.bf16.msra.mxu1 %v6136_v8  ;;  %2301 = vmatprep.subr.bf16.mxu0 %v6001_v9  ;;  %v6775_v8 = vld [vmem:[%s10028_s9 + $0x460] ss:$28 sps:$4 sm:$0xff]   ;;  %v6783_v9 = vld [vmem:[%s10028_s9 + $0x42c] ss:$28 sps:$4 sm:$0xff]  }
 0x30c   :  { %2342 = vmatprep.subr.bf16.mxu1 %v6129_v10  ;;  %v6760_v10 = vld [vmem:[%s10028_s9 + $0xa8] ss:$28 sps:$4 sm:$0xff]  }
 0x30e   :  { %2302 = vmatpush2.bf16.msra.mxu0 %v6000_v15  ;;  %v6774_v15 = vld [vmem:[%s10028_s9 + $0x3c] ss:$28 sps:$4 sm:$0xff]  }
 0x30f   :  { %2343 = vmatpush2.bf16.msra.mxu1 %v6128_v16  ;;  %2303 = vmatprep.subr.bf16.mxu0 %v5993_v17  ;;  %v6787_v16 = vld [vmem:[%s10028_s9 + $0x3f0] ss:$28 sps:$4 sm:$0xff]   ;;  %v6795_v17 = vld [vmem:[%s10028_s9 + $0x3bc] ss:$28 sps:$4 sm:$0xff]  }
 0x310   :  { %2344 = vmatprep.subr.bf16.mxu1 %v6121_v18  ;;  %v6772_v18 = vld [vmem:[%s10028_s9 + $0x38] ss:$28 sps:$4 sm:$0xff]  }
 0x312   :  { %2304 = vmatpush2.bf16.msra.mxu0 %v5992_v23  ;;  %v6786_v23 = vld [vmem:[%s10028_s9 + $0x34c] ss:$28 sps:$4 sm:$0xff]  }
 0x313   :  { %2345 = vmatpush2.bf16.msra.mxu1 %v6120_v24  ;;  %2305 = vmatprep.subr.bf16.mxu0 %v5985_v25  ;;  %v6799_v24 = vld [vmem:[%s10028_s9 + $0x380] ss:$28 sps:$4 sm:$0xff]   ;;  %v6807_v25 = vld [vmem:[%s10028_s9 + $0x6cc] ss:$28 sps:$4 sm:$0xff]  }
 0x314   :  { %2346 = vmatprep.subr.bf16.mxu1 %v6113_v26  ;;  %v6784_v26 = vld [vmem:[%s10028_s9 + $0x348] ss:$28 sps:$4 sm:$0xff]  }
 0x316   :  { %2306 = vmatpush2.bf16.msra.mxu0 %v5984_v31  ;;  %v6798_v31 = vld [vmem:[%s10028_s9 + $0x2dc] ss:$28 sps:$4 sm:$0xff]  }
 0x317   :  { %2347 = vmatpush2.bf16.msra.mxu1 %v6112_v32  ;;  %2307 = vmatprep.subr.bf16.mxu0 %v5977_v36  ;;  %v6811_v32 = vld [vmem:[%s10028_s9 + $0x690] ss:$28 sps:$4 sm:$0xff]   ;;  %v6819_v36 = vld [vmem:[%s10028_s9 + $0x65c] ss:$28 sps:$4 sm:$0xff]  }
 0x318   :  { %2348 = vmatprep.subr.bf16.mxu1 %v6105_v39  ;;  %v6796_v39 = vld [vmem:[%s10028_s9 + $0x2d8] ss:$28 sps:$4 sm:$0xff]  }
 0x31a   :  { %2308 = vmatpush2.bf16.msra.mxu0 %v5976_v40  ;;  %v6804_v40 = vld [vmem:[%s10028_s9 + $0x2a4] ss:$28 sps:$4 sm:$0xff]  }
 0x31b   :  { %2349 = vmatpush2.bf16.msra.mxu1 %v6104_v41  ;;  %5228 = vmatprep.subr.bf16.mxu0 %v6747_v42  ;;  %v6817_v41 = vld [vmem:[%s10028_s9 + $0x658] ss:$28 sps:$4 sm:$0xff]   ;;  %v6825_v42 = vld [vmem:[%s10028_s9 + $0x624] ss:$28 sps:$4 sm:$0xff]  }
 0x31c   :  { %5269 = vmatprep.subr.bf16.mxu1 %v6759_v43  ;;  %v6802_v43 = vld [vmem:[%s10028_s9 + $0x2a0] ss:$28 sps:$4 sm:$0xff]  }
 0x31d   :  { %2310 = vmatmul.mubr.bf16.vlgmr.msra.gmra.mxu0 %v7967_v61  ;;  %v8563_v50 = vpop.f32.mrf.mxu0  ;;  %v8565_v51 = vpop.f32.mrf.mxu1  ;;  %v6763_v61 = vld [vmem:[%s10028_s9 + $0x4d0] ss:$28 sps:$4 sm:$0xff]  }
 0x31e   :  { %2351 = vmatmul.mubr.bf16.vlgmr.msra.gmra.mxu1 %v7969_v62  ;;  %5229 = vmatpush1.bf16.msra.mxu0 %v6745_v44  ;;  %v6771_v62 = vld [vmem:[%s10028_s9 + $0x49c] ss:$28 sps:$4 sm:$0xff]   ;;  %v6810_v44 = vld [vmem:[%s10028_s9 + $0x26c] ss:$28 sps:$4 sm:$0xff]  }
 0x31f   :  { %v2067_v52 = vpop.f32.mrf.mxu0  ;;  %v2108_v60 = vpop.f32.mrf.mxu1  ;;  %5230 = vmatprep.subr.bf16.mxu0 %v6750_v46  ;;  %5270 = vmatpush1.bf16.msra.mxu1 %v6757_v47  ;;  %v6823_v46 = vld [vmem:[%s10028_s9 + $0x620] ss:$28 sps:$4 sm:$0xff]   ;;  %v6831_v47 = vld [vmem:[%s10028_s9 + $0x5ec] ss:$28 sps:$4 sm:$0xff]  }
 0x320   :  { %v2068_v54 = vadd.f32 %v2067_v52, %v718_v48  ;;  %5271 = vmatprep.subr.bf16.mxu1 %v6765_v49  ;;  %v6808_v48 = vld [vmem:[%s10028_s9 + $0x268] ss:$28 sps:$4 sm:$0xff]   ;;  %v714_v49 = vrot.slane %v8549_v45, %v7933_v34 }
 0x321   :  { %v2069_v55 = vpop.f32.mrf.mxu0  ;;  %v2110_v56 = vpop.f32.mrf.mxu1  ;;  %v6829_v52 = vld [vmem:[%s10028_s9 + $0x5e8] ss:$28 sps:$4 sm:$0xff]  }
 0x322   :  { %v2109_v57 = vadd.f32 %v2108_v60, %v2068_v54  ;;  %5231 = vmatpush1.bf16.msra.mxu0 %v6748_v59  ;;  %v6816_v59 = vld [vmem:[%s10028_s9 + $0x234] ss:$28 sps:$4 sm:$0xff]   ;;  %v6822_v54 = vld [vmem:[%s10028_s9 + $0x1fc] ss:$28 sps:$4 sm:$0xff]  }
 0x323   :  { %v2070_v63 = vpop.f32.mrf.mxu0  ;;  %v2111_v0 = vpop.f32.mrf.mxu1  ;;  %5232 = vmatprep.subr.bf16.mxu0 %v6753_v53  ;;  %5272 = vmatpush1.bf16.msra.mxu1 %v6763_v61  ;;  %v6834_v60 = vld [vmem:[%s10028_s9 + $0x5b4] ss:$28 sps:$4 sm:$0xff]   ;;  %v2066_v61 = vadd.f32 %v8563_v50, %v714_v49  ;;  %v6837_v55 = vld [vmem:[%s10028_s9 + $0x57c] ss:$28 sps:$4 sm:$0xff]  }
 0x324   :  { %v2360_v3 = vmax.f32 %v2109_v57, 0.0  ;;  %5273 = vmatprep.subr.bf16.mxu1 %v6771_v62  ;;  %v6814_v53 = vld [vmem:[%s10028_s9 + $0x230] ss:$28 sps:$4 sm:$0xff]   ;;  %v6820_v50 = vld [vmem:[%s10028_s9 + $0x1f8] ss:$28 sps:$4 sm:$0xff]  }
 0x325   :  { %v6832_v62 = vld [vmem:[%s10028_s9 + $0x5b0] ss:$28 sps:$4 sm:$0xff]   ;;  %v2107_v56 = vadd.f32 %v8565_v51, %v2066_v61  ;;  %v6828_v57 = vld [vmem:[%s10028_s9 + $0x1c4] ss:$28 sps:$4 sm:$0xff]  }
 0x326   :  { %v8592_v5 = vpack.c.bf16 %v2360_v3, %v2360_v3  ;;  %5233 = vmatpush1.bf16.msra.mxu0 %v6751_v58  ;;  %v6835_v58 = vld [vmem:[%s10028_s9 + $0x578] ss:$28 sps:$4 sm:$0xff]   ;;  %v6840_v63 = vld [vmem:[%s10028_s9 + $0x544] ss:$28 sps:$4 sm:$0xff]   ;;  %v6891_v3 = vld [vmem:[%s10028_s9 + $0xc0c] ss:$28 sps:$4 sm:$0xff]  }
 0x327   :  { %5234 = vmatprep.subr.bf16.mxu0 %v6756_v1  ;;  %5274 = vmatpush1.bf16.msra.mxu1 %v6769_v2  ;;  %v6826_v51 = vld [vmem:[%s10028_s9 + $0x1c0] ss:$28 sps:$4 sm:$0xff]   ;;  %v2359_v0 = vmax.f32 %v2107_v56, 0.0  ;;  %v6843_v2 = vld [vmem:[%s10028_s9 + $0x88c] ss:$28 sps:$4 sm:$0xff]  }
 0x328   :  { %5260 = vmatprep.mubr.bf16.mxu0 %v8592_v5  ;;  %5275 = vmatprep.subr.bf16.mxu1 %v6777_v4  ;;  %v6838_v1 = vld [vmem:[%s10028_s9 + $0x540] ss:$28 sps:$4 sm:$0xff]   ;;  %v722_v4 = vrot.slane %v8549_v45, %v7936_v35  ;;  %v6867_v61 = vld [vmem:[%s10028_s9 + $0xa4c] ss:$28 sps:$4 sm:$0xff]  }
 0x329   :  { %v6907_v49 = vld [vmem:[%s10028_s9 + $0xb60] ss:$28 sps:$4 sm:$0xff]  }
 0x32a   :  { %5235 = vmatpush1.bf16.msra.mxu0 %v6754_v6  ;;  %v6841_v6 = vld [vmem:[%s10028_s9 + $0x888] ss:$28 sps:$4 sm:$0xff]   ;;  %v6927_v56 = vld [vmem:[%s10028_s9 + $0xabc] ss:$28 sps:$4 sm:$0xff]  }
 0x32b   :  { %5236 = vmatprep.subr.bf16.mxu0 %v6762_v7  ;;  %5276 = vmatpush1.bf16.msra.mxu1 %v6775_v8  ;;  %v8760_v7 = vpack.c.bf16 %v2359_v0, %v2359_v0  ;;  %v6846_v8 = vld [vmem:[%s10028_s9 + $0x854] ss:$28 sps:$4 sm:$0xff]  }
 0x32c   :  { %5277 = vmatprep.subr.bf16.mxu1 %v6783_v9  ;;  %v726_v9 = vrot.slane %v8549_v45, %v7945_v38  ;;  %v6871_v0 = vld [vmem:[%s10028_s9 + $0x9d8] ss:$28 sps:$4 sm:$0xff]  }
 0x32e   :  { %5237 = vmatpush1.bf16.msra.mxu0 %v6760_v10 }
 0x32f   :  { %5238 = vmatprep.subr.bf16.mxu0 %v6768_v11  ;;  %5278 = vmatpush1.bf16.msra.mxu1 %v6781_v12 }
 0x330   :  { %5279 = vmatprep.subr.bf16.mxu1 %v6789_v13  ;;  %v6844_v13 = vld [vmem:[%s10028_s9 + $0x850] ss:$28 sps:$4 sm:$0xff]  }
 0x332   :  { %5239 = vmatpush1.bf16.msra.mxu0 %v6766_v14 }
 0x333   :  { %5240 = vmatprep.subr.bf16.mxu0 %v6774_v15  ;;  %5280 = vmatpush1.bf16.msra.mxu1 %v6787_v16  ;;  %v6849_v16 = vld [vmem:[%s10028_s9 + $0x81c] ss:$28 sps:$4 sm:$0xff]  }
 0x334   :  { %5281 = vmatprep.subr.bf16.mxu1 %v6795_v17 }
 0x336   :  { %5241 = vmatpush1.bf16.msra.mxu0 %v6772_v18 }
 0x337   :  { %5242 = vmatprep.subr.bf16.mxu0 %v6780_v19  ;;  %5282 = vmatpush1.bf16.msra.mxu1 %v6793_v20 }
 0x338   :  { %5283 = vmatprep.subr.bf16.mxu1 %v6801_v21 }
 0x33a   :  { %5243 = vmatpush1.bf16.msra.mxu0 %v6778_v22  ;;  %v6847_v22 = vld [vmem:[%s10028_s9 + $0x818] ss:$28 sps:$4 sm:$0xff]  }
 0x33b   :  { %5244 = vmatprep.subr.bf16.mxu0 %v6786_v23  ;;  %5284 = vmatpush1.bf16.msra.mxu1 %v6799_v24 }
 0x33c   :  { %5285 = vmatprep.subr.bf16.mxu1 %v6807_v25 }
 0x33e   :  { %5245 = vmatpush2.bf16.msra.mxu0 %v6784_v26  ;;  %v6852_v26 = vld [vmem:[%s10028_s9 + $0x7e4] ss:$28 sps:$4 sm:$0xff]  }
 0x33f   :  { %5246 = vmatprep.subr.bf16.mxu0 %v6792_v27  ;;  %5286 = vmatpush2.bf16.msra.mxu1 %v6805_v28 }
 0x340   :  { %5287 = vmatprep.subr.bf16.mxu1 %v6813_v29  ;;  %v6850_v29 = vld [vmem:[%s10028_s9 + $0x7e0] ss:$28 sps:$4 sm:$0xff]  }
 0x342   :  { %5247 = vmatpush2.bf16.msra.mxu0 %v6790_v30  ;;  %v6889_v30 = vld [vmem:[%s10028_s9 + $0xc08] ss:$28 sps:$4 sm:$0xff]  }
 0x343   :  { %5248 = vmatprep.subr.bf16.mxu0 %v6798_v31  ;;  %5288 = vmatpush2.bf16.msra.mxu1 %v6811_v32  ;;  %v6855_v32 = vld [vmem:[%s10028_s9 + $0x7ac] ss:$28 sps:$4 sm:$0xff]  }
 0x344   :  { %5289 = vmatprep.subr.bf16.mxu1 %v6819_v36  ;;  %v6897_v36 = vld [vmem:[%s10028_s9 + $0xbd4] ss:$28 sps:$4 sm:$0xff]  }
 0x346   :  { %5249 = vmatpush2.bf16.msra.mxu0 %v6796_v39  ;;  %v6853_v39 = vld [vmem:[%s10028_s9 + $0x7a8] ss:$28 sps:$4 sm:$0xff]  }
 0x347   :  { %5250 = vmatprep.subr.bf16.mxu0 %v6804_v40  ;;  %5290 = vmatpush2.bf16.msra.mxu1 %v6817_v41  ;;  %v6895_v40 = vld [vmem:[%s10028_s9 + $0xbd0] ss:$28 sps:$4 sm:$0xff]  }
 0x348   :  { %5291 = vmatprep.subr.bf16.mxu1 %v6825_v42  ;;  %v6858_v41 = vld [vmem:[%s10028_s9 + $0x774] ss:$28 sps:$4 sm:$0xff]   ;;  %v6903_v42 = vld [vmem:[%s10028_s9 + $0xb9c] ss:$28 sps:$4 sm:$0xff]  }
 0x34a   :  { %5251 = vmatpush2.bf16.msra.mxu0 %v6802_v43  ;;  %v6856_v43 = vld [vmem:[%s10028_s9 + $0x770] ss:$28 sps:$4 sm:$0xff]  }
 0x34b   :  { %5252 = vmatprep.subr.bf16.mxu0 %v6810_v44  ;;  %5292 = vmatpush2.bf16.msra.mxu1 %v6823_v46  ;;  %v6901_v44 = vld [vmem:[%s10028_s9 + $0xb98] ss:$28 sps:$4 sm:$0xff]  }
 0x34c   :  { %5293 = vmatprep.subr.bf16.mxu1 %v6831_v47  ;;  %v6861_v46 = vld [vmem:[%s10028_s9 + $0x73c] ss:$28 sps:$4 sm:$0xff]   ;;  %v6909_v47 = vld [vmem:[%s10028_s9 + $0xb64] ss:$28 sps:$4 sm:$0xff]  }
 0x34e   :  { %5253 = vmatpush2.bf16.msra.mxu0 %v6808_v48  ;;  %v6859_v48 = vld [vmem:[%s10028_s9 + $0x738] ss:$28 sps:$4 sm:$0xff]  }
 0x34f   :  { %5254 = vmatprep.subr.bf16.mxu0 %v6816_v59  ;;  %5294 = vmatpush2.bf16.msra.mxu1 %v6829_v52  ;;  %v6864_v59 = vld [vmem:[%s10028_s9 + $0x704] ss:$28 sps:$4 sm:$0xff]   ;;  %v6915_v52 = vld [vmem:[%s10028_s9 + $0xb2c] ss:$28 sps:$4 sm:$0xff]  }
 0x350   :  { %5295 = vmatprep.subr.bf16.mxu1 %v6834_v60  ;;  %v6862_v60 = vld [vmem:[%s10028_s9 + $0x700] ss:$28 sps:$4 sm:$0xff]  }
 0x352   :  { %5255 = vmatpush2.bf16.msra.mxu0 %v6814_v53  ;;  %v6913_v53 = vld [vmem:[%s10028_s9 + $0xb28] ss:$28 sps:$4 sm:$0xff]  }
 0x353   :  { %5256 = vmatprep.subr.bf16.mxu0 %v6822_v54  ;;  %5296 = vmatpush2.bf16.msra.mxu1 %v6832_v62  ;;  %v6921_v54 = vld [vmem:[%s10028_s9 + $0xaf4] ss:$28 sps:$4 sm:$0xff]   ;;  %v6865_v62 = vld [vmem:[%s10028_s9 + $0xa48] ss:$28 sps:$4 sm:$0xff]  }
 0x354   :  { %5297 = vmatprep.subr.bf16.mxu1 %v6837_v55  ;;  %v6919_v55 = vld [vmem:[%s10028_s9 + $0xaf0] ss:$28 sps:$4 sm:$0xff]  }
 0x356   :  { %5257 = vmatpush2.bf16.msra.mxu0 %v6820_v50  ;;  %v6870_v50 = vld [vmem:[%s10028_s9 + $0xa14] ss:$28 sps:$4 sm:$0xff]  }
 0x357   :  { %5258 = vmatprep.subr.bf16.mxu0 %v6828_v57  ;;  %5298 = vmatpush2.bf16.msra.mxu1 %v6835_v58  ;;  %v6868_v57 = vld [vmem:[%s10028_s9 + $0xa10] ss:$28 sps:$4 sm:$0xff]   ;;  %v6925_v58 = vld [vmem:[%s10028_s9 + $0xab8] ss:$28 sps:$4 sm:$0xff]  }
 0x358   :  { %5299 = vmatprep.subr.bf16.mxu1 %v6840_v63  ;;  %v6873_v63 = vld [vmem:[%s10028_s9 + $0x9dc] ss:$28 sps:$4 sm:$0xff]  }
 0x35a   :  { %5259 = vmatpush2.bf16.msra.mxu0 %v6826_v51  ;;  %v6933_v51 = vld [vmem:[%s10028_s9 + $0xa84] ss:$28 sps:$4 sm:$0xff]  }
 0x35b   :  { %5300 = vmatpush2.bf16.msra.mxu1 %v6838_v1  ;;  %5310 = vmatprep.subr.bf16.mxu0 %v6843_v2  ;;  %v6931_v1 = vld [vmem:[%s10028_s9 + $0xa80] ss:$28 sps:$4 sm:$0xff]  }
 0x35c   :  { %5351 = vmatprep.subr.bf16.mxu1 %v6891_v3  ;;  %v6876_v2 = vld [vmem:[%s10028_s9 + $0x9a4] ss:$28 sps:$4 sm:$0xff]   ;;  %v6939_v3 = vld [vmem:[%s10028_s9 + $0xdcc] ss:$28 sps:$4 sm:$0xff]  }
 0x35d   :  { %v2147_v10 = vpop.f32.mrf.mxu0  ;;  %v2188_v11 = vpop.f32.mrf.mxu1  ;;  %5261 = vmatmul.mubr.bf16.vlgmr.msra.gmra.mxu0 %v8760_v7 }
 0x35e   :  { %v2148_v12 = vadd.f32 %v2147_v10, %v722_v4  ;;  %5311 = vmatpush1.bf16.msra.mxu0 %v6841_v6  ;;  %v6874_v4 = vld [vmem:[%s10028_s9 + $0x9a0] ss:$28 sps:$4 sm:$0xff]   ;;  %v6937_v6 = vld [vmem:[%s10028_s9 + $0xdc8] ss:$28 sps:$4 sm:$0xff]  }
 0x35f   :  { %v2149_v14 = vpop.f32.mrf.mxu0  ;;  %v2190_v15 = vpop.f32.mrf.mxu1  ;;  %5312 = vmatprep.subr.bf16.mxu0 %v6846_v8  ;;  %v6879_v8 = vld [vmem:[%s10028_s9 + $0x96c] ss:$28 sps:$4 sm:$0xff]  }
 0x360   :  { %v2189_v17 = vadd.f32 %v2188_v11, %v2148_v12  ;;  %v2150_v18 = vadd.f32 %v2149_v14, %v726_v9  ;;  %v6945_v9 = vld [vmem:[%s10028_s9 + $0xd94] ss:$28 sps:$4 sm:$0xff]   ;;  %v6877_v10 = vld [vmem:[%s10028_s9 + $0x968] ss:$28 sps:$4 sm:$0xff]  }
 0x361   :  { %v2151_v19 = vpop.f32.mrf.mxu0  ;;  %v2192_v20 = vpop.f32.mrf.mxu1  ;;  %v6943_v11 = vld [vmem:[%s10028_s9 + $0xd90] ss:$28 sps:$4 sm:$0xff]  }
 0x362   :  { %v2191_v21 = vadd.f32 %v2190_v15, %v2150_v18  ;;  %5313 = vmatpush1.bf16.msra.mxu0 %v6844_v13  ;;  %v2361_v23 = vmax.f32 %v2189_v17, 0.0  ;;  %v6882_v12 = vld [vmem:[%s10028_s9 + $0x934] ss:$28 sps:$4 sm:$0xff]   ;;  %v6951_v13 = vld [vmem:[%s10028_s9 + $0xd5c] ss:$28 sps:$4 sm:$0xff]  }
 0x363   :  { %v2152_v24 = vpop.f32.mrf.mxu0  ;;  %v2193_v25 = vpop.f32.mrf.mxu1  ;;  %5314 = vmatprep.subr.bf16.mxu0 %v6849_v16  ;;  %v6880_v14 = vld [vmem:[%s10028_s9 + $0x930] ss:$28 sps:$4 sm:$0xff]   ;;  %v6949_v15 = vld [vmem:[%s10028_s9 + $0xd58] ss:$28 sps:$4 sm:$0xff]   ;;  %v6957_v17 = vld [vmem:[%s10028_s9 + $0xd24] ss:$28 sps:$4 sm:$0xff]  }
 0x364   :  { %v2362_v27 = vmax.f32 %v2191_v21, 0.0  ;;  %v8788_v31 = vpack.c.bf16 %v2361_v23, %v2361_v23  ;;  %v6885_v16 = vld [vmem:[%s10028_s9 + $0x8fc] ss:$28 sps:$4 sm:$0xff]   ;;  %v6888_v20 = vld [vmem:[%s10028_s9 + $0x8c4] ss:$28 sps:$4 sm:$0xff]  }
 0x365   :  { %v6883_v18 = vld [vmem:[%s10028_s9 + $0x8f8] ss:$28 sps:$4 sm:$0xff]   ;;  %v6955_v19 = vld [vmem:[%s10028_s9 + $0xd20] ss:$28 sps:$4 sm:$0xff]   ;;  %v6963_v21 = vld [vmem:[%s10028_s9 + $0xcec] ss:$28 sps:$4 sm:$0xff]  }
 0x366   :  { %v8780_v28 = vpack.c.bf16 %v2362_v27, %v2362_v27  ;;  %5315 = vmatpush1.bf16.msra.mxu0 %v6847_v22  ;;  %v729_v22 = vsub.s32 4, %v7930_v33  ;;  %v6886_v23 = vld [vmem:[%s10028_s9 + $0x8c0] ss:$28 sps:$4 sm:$0xff]   ;;  %v6961_v24 = vld [vmem:[%s10028_s9 + $0xce8] ss:$28 sps:$4 sm:$0xff]   ;;  %v733_v27 = vsub.s32 5, %v7930_v33 }
 0x367   :  { %5316 = vmatprep.subr.bf16.mxu0 %v6852_v26  ;;  %v6894_v25 = vld [vmem:[%s10028_s9 + $0x194] ss:$28 sps:$4 sm:$0xff]  }
 0x368   :  { %5301 = vmatprep.mubr.bf16.mxu1 %v8780_v28  ;;  %v6969_v26 = vld [vmem:[%s10028_s9 + $0xcb4] ss:$28 sps:$4 sm:$0xff]  }
 0x369   :  { %5302 = vmatmul.mubr.bf16.vlgmr.msra.gmra.mxu1 %v8788_v31 }
 0x36a   :  { %5317 = vmatpush1.bf16.msra.mxu0 %v6850_v29  ;;  %5352 = vmatpush1.bf16.msra.mxu1 %v6889_v30  ;;  %v730_v29 = vrot.slane %v8549_v45, %v729_v22  ;;  %v6967_v30 = vld [vmem:[%s10028_s9 + $0xcb0] ss:$28 sps:$4 sm:$0xff]  }
 0x36b   :  { %5318 = vmatprep.subr.bf16.mxu0 %v6855_v32  ;;  %5353 = vmatprep.subr.bf16.mxu1 %v6897_v36  ;;  %v6975_v32 = vld [vmem:[%s10028_s9 + $0xc7c] ss:$28 sps:$4 sm:$0xff]   ;;  %v734_v36 = vrot.slane %v8549_v45, %v733_v27 }
 0x36e   :  { %5319 = vmatpush1.bf16.msra.mxu0 %v6853_v39  ;;  %5354 = vmatpush1.bf16.msra.mxu1 %v6895_v40 }
 0x36f   :  { %5320 = vmatprep.subr.bf16.mxu0 %v6858_v41  ;;  %5355 = vmatprep.subr.bf16.mxu1 %v6903_v42  ;;  %v6973_v42 = vld [vmem:[%s10028_s9 + $0xc78] ss:$28 sps:$4 sm:$0xff]  }
 0x372   :  { %5321 = vmatpush1.bf16.msra.mxu0 %v6856_v43  ;;  %5356 = vmatpush1.bf16.msra.mxu1 %v6901_v44  ;;  %v6981_v44 = vld [vmem:[%s10028_s9 + $0xc44] ss:$28 sps:$4 sm:$0xff]  }
 0x373   :  { %5322 = vmatprep.subr.bf16.mxu0 %v6861_v46  ;;  %5357 = vmatprep.subr.bf16.mxu1 %v6909_v47 }
 0x376   :  { %5323 = vmatpush1.bf16.msra.mxu0 %v6859_v48  ;;  %5358 = vmatpush1.bf16.msra.mxu1 %v6907_v49 }
 0x377   :  { %5324 = vmatprep.subr.bf16.mxu0 %v6864_v59  ;;  %5359 = vmatprep.subr.bf16.mxu1 %v6915_v52 }
 0x37a   :  { %5325 = vmatpush1.bf16.msra.mxu0 %v6862_v60  ;;  %5360 = vmatpush1.bf16.msra.mxu1 %v6913_v53  ;;  %v6979_v60 = vld [vmem:[%s10028_s9 + $0xc40] ss:$28 sps:$4 sm:$0xff]  }
 0x37b   :  { %5326 = vmatprep.subr.bf16.mxu0 %v6867_v61  ;;  %5361 = vmatprep.subr.bf16.mxu1 %v6921_v54  ;;  %v6987_v54 = vld [vmem:[%s10028_s9 + $0x514] ss:$28 sps:$4 sm:$0xff]  }
 0x37e   :  { %5327 = vmatpush2.bf16.msra.mxu0 %v6865_v62  ;;  %5362 = vmatpush1.bf16.msra.mxu1 %v6919_v55 }
 0x37f   :  { %5328 = vmatprep.subr.bf16.mxu0 %v6870_v50  ;;  %5363 = vmatprep.subr.bf16.mxu1 %v6927_v56  ;;  %v6892_v56 = vld [vmem:[%s10028_s9 + $0x190] ss:$28 sps:$4 sm:$0xff]  }
 0x382   :  { %5329 = vmatpush2.bf16.msra.mxu0 %v6868_v57  ;;  %5364 = vmatpush1.bf16.msra.mxu1 %v6925_v58  ;;  %v6900_v58 = vld [vmem:[%s10028_s9 + $0x15c] ss:$28 sps:$4 sm:$0xff]  }
 0x383   :  { %5330 = vmatprep.subr.bf16.mxu0 %v6873_v63  ;;  %5365 = vmatprep.subr.bf16.mxu1 %v6933_v51  ;;  %v6898_v63 = vld [vmem:[%s10028_s9 + $0x158] ss:$28 sps:$4 sm:$0xff]   ;;  %v6906_v51 = vld [vmem:[%s10028_s9 + $0x124] ss:$28 sps:$4 sm:$0xff]  }
 0x386   :  { %5331 = vmatpush2.bf16.msra.mxu0 %v6871_v0  ;;  %5366 = vmatpush1.bf16.msra.mxu1 %v6931_v1  ;;  %v6904_v0 = vld [vmem:[%s10028_s9 + $0x120] ss:$28 sps:$4 sm:$0xff]   ;;  %v6912_v1 = vld [vmem:[%s10028_s9 + $0xec] ss:$28 sps:$4 sm:$0xff]  }
 0x387   :  { %5332 = vmatprep.subr.bf16.mxu0 %v6876_v2  ;;  %5367 = vmatprep.subr.bf16.mxu1 %v6939_v3  ;;  %v6910_v2 = vld [vmem:[%s10028_s9 + $0xe8] ss:$28 sps:$4 sm:$0xff]   ;;  %v6918_v3 = vld [vmem:[%s10028_s9 + $0xb4] ss:$28 sps:$4 sm:$0xff]  }
 0x38a   :  { %5333 = vmatpush2.bf16.msra.mxu0 %v6874_v4  ;;  %5368 = vmatpush2.bf16.msra.mxu1 %v6937_v6  ;;  %v6916_v4 = vld [vmem:[%s10028_s9 + $0xb0] ss:$28 sps:$4 sm:$0xff]   ;;  %v6924_v6 = vld [vmem:[%s10028_s9 + $0x7c] ss:$28 sps:$4 sm:$0xff]  }
 0x38b   :  { %5334 = vmatprep.subr.bf16.mxu0 %v6879_v8  ;;  %5369 = vmatprep.subr.bf16.mxu1 %v6945_v9  ;;  %v6922_v8 = vld [vmem:[%s10028_s9 + $0x78] ss:$28 sps:$4 sm:$0xff]   ;;  %v6930_v9 = vld [vmem:[%s10028_s9 + $0x44] ss:$28 sps:$4 sm:$0xff]  }
 0x38e   :  { %5335 = vmatpush2.bf16.msra.mxu0 %v6877_v10  ;;  %5370 = vmatpush2.bf16.msra.mxu1 %v6943_v11  ;;  %v6928_v10 = vld [vmem:[%s10028_s9 + $0x40] ss:$28 sps:$4 sm:$0xff]   ;;  %v6936_v11 = vld [vmem:[%s10028_s9 + $0xc] ss:$28 sps:$4 sm:$0xff]  }
 0x38f   :  { %5336 = vmatprep.subr.bf16.mxu0 %v6882_v12  ;;  %5371 = vmatprep.subr.bf16.mxu1 %v6951_v13  ;;  %v6934_v12 = vld [vmem:[%s10028_s9 + $0x8] ss:$28 sps:$4 sm:$0xff]   ;;  %v6942_v13 = vld [vmem:[%s10028_s9 + $0x354] ss:$28 sps:$4 sm:$0xff]  }
 0x392   :  { %5337 = vmatpush2.bf16.msra.mxu0 %v6880_v14  ;;  %5372 = vmatpush2.bf16.msra.mxu1 %v6949_v15  ;;  %v6940_v14 = vld [vmem:[%s10028_s9 + $0x350] ss:$28 sps:$4 sm:$0xff]   ;;  %v6948_v15 = vld [vmem:[%s10028_s9 + $0x31c] ss:$28 sps:$4 sm:$0xff]  }
 0x393   :  { %5338 = vmatprep.subr.bf16.mxu0 %v6885_v16  ;;  %5373 = vmatprep.subr.bf16.mxu1 %v6957_v17  ;;  %v6946_v16 = vld [vmem:[%s10028_s9 + $0x318] ss:$28 sps:$4 sm:$0xff]   ;;  %v6954_v17 = vld [vmem:[%s10028_s9 + $0x2e4] ss:$28 sps:$4 sm:$0xff]  }
 0x396   :  { %5339 = vmatpush2.bf16.msra.mxu0 %v6883_v18  ;;  %5374 = vmatpush2.bf16.msra.mxu1 %v6955_v19  ;;  %v6952_v18 = vld [vmem:[%s10028_s9 + $0x2e0] ss:$28 sps:$4 sm:$0xff]   ;;  %v6960_v19 = vld [vmem:[%s10028_s9 + $0x2ac] ss:$28 sps:$4 sm:$0xff]  }
 0x397   :  { %5340 = vmatprep.subr.bf16.mxu0 %v6888_v20  ;;  %5375 = vmatprep.subr.bf16.mxu1 %v6963_v21  ;;  %v6958_v20 = vld [vmem:[%s10028_s9 + $0x2a8] ss:$28 sps:$4 sm:$0xff]   ;;  %v6966_v21 = vld [vmem:[%s10028_s9 + $0x274] ss:$28 sps:$4 sm:$0xff]  }
 0x39a   :  { %5341 = vmatpush2.bf16.msra.mxu0 %v6886_v23  ;;  %5376 = vmatpush2.bf16.msra.mxu1 %v6961_v24  ;;  %v6964_v23 = vld [vmem:[%s10028_s9 + $0x270] ss:$28 sps:$4 sm:$0xff]   ;;  %v737_v24 = vsub.s32 6, %v7930_v33 }
 0x39b   :  { %5392 = vmatprep.subr.bf16.mxu0 %v6894_v25  ;;  %5377 = vmatprep.subr.bf16.mxu1 %v6969_v26  ;;  %v6972_v25 = vld [vmem:[%s10028_s9 + $0x23c] ss:$28 sps:$4 sm:$0xff]   ;;  %v741_v26 = vsub.s32 7, %v7930_v33 }
 0x39d   :  { %v2229_v39 = vpop.f32.mrf.mxu0 }
 0x39e   :  { %v2230_v40 = vadd.f32 %v2229_v39, %v730_v29  ;;  %v2270_v41 = vpop.f32.mrf.mxu1  ;;  %5378 = vmatpush2.bf16.msra.mxu1 %v6967_v30  ;;  %v6970_v29 = vld [vmem:[%s10028_s9 + $0x238] ss:$28 sps:$4 sm:$0xff]   ;;  %v738_v30 = vrot.slane %v8549_v45, %v737_v24 }
 0x39f   :  { %v2231_v43 = vpop.f32.mrf.mxu0  ;;  %5379 = vmatprep.subr.bf16.mxu1 %v6975_v32  ;;  %v6978_v32 = vld [vmem:[%s10028_s9 + $0x204] ss:$28 sps:$4 sm:$0xff]  }
 0x3a0   :  { %v2271_v46 = vadd.f32 %v2270_v41, %v2230_v40  ;;  %v2232_v47 = vadd.f32 %v2231_v43, %v734_v36  ;;  %v2272_v48 = vpop.f32.mrf.mxu1  ;;  %v742_v36 = vrot.slane %v8549_v45, %v741_v26  ;;  %v7024_v26 = vld [vmem:[%s10028_s9 + $0x740] ss:$28 sps:$4 sm:$0xff]  }
 0x3a1   :  { %v2233_v49 = vpop.f32.mrf.mxu0 }
 0x3a2   :  { %v2273_v59 = vadd.f32 %v2272_v48, %v2232_v47  ;;  %v2274_v52 = vpop.f32.mrf.mxu1  ;;  %5380 = vmatpush2.bf16.msra.mxu1 %v6973_v42  ;;  %v2363_v53 = vmax.f32 %v2271_v46, 0.0  ;;  %v6976_v42 = vld [vmem:[%s10028_s9 + $0x200] ss:$28 sps:$4 sm:$0xff]  }
 0x3a3   :  { %v2234_v61 = vpop.f32.mrf.mxu0  ;;  %5381 = vmatprep.subr.bf16.mxu1 %v6981_v44  ;;  %v6984_v44 = vld [vmem:[%s10028_s9 + $0x1cc] ss:$28 sps:$4 sm:$0xff]  }
 0x3a4   :  { %v2364_v62 = vmax.f32 %v2273_v59, 0.0  ;;  %v2275_v55 = vpop.f32.mrf.mxu1  ;;  %v8973_v57 = vpack.c.bf16 %v2363_v53, %v2363_v53  ;;  %v6982_v52 = vld [vmem:[%s10028_s9 + $0x1c8] ss:$28 sps:$4 sm:$0xff]   ;;  %v6990_v61 = vld [vmem:[%s10028_s9 + $0x894] ss:$28 sps:$4 sm:$0xff]  }
 0x3a6   :  { %v8968_v50 = vpack.c.bf16 %v2364_v62, %v2364_v62  ;;  %5382 = vmatpush2.bf16.msra.mxu1 %v6979_v60 }
 0x3a7   :  { %5433 = vmatprep.subr.bf16.mxu1 %v6987_v54 }
 0x3a8   :  { %5342 = vmatprep.mubr.bf16.mxu0 %v8968_v50 }
 0x3a9   :  { %5343 = vmatmul.mubr.bf16.vlgmr.msra.gmra.mxu0 %v8973_v57 }
 0x3aa   :  { %5393 = vmatpush1.bf16.msra.mxu0 %v6892_v56  ;;  %5424 = vmatprep.mubr.bf16.mxu0 %v8592_v5  ;;  %v6985_v56 = vld [vmem:[%s10028_s9 + $0x510] ss:$28 sps:$4 sm:$0xff]  }
 0x3ab   :  { %5394 = vmatprep.subr.bf16.mxu0 %v6900_v58  ;;  %v6988_v58 = vld [vmem:[%s10028_s9 + $0x890] ss:$28 sps:$4 sm:$0xff]  }
 0x3ae   :  { %5395 = vmatpush1.bf16.msra.mxu0 %v6898_v63 }
 0x3af   :  { %5396 = vmatprep.subr.bf16.mxu0 %v6906_v51  ;;  %v6993_v51 = vld [vmem:[%s10028_s9 + $0x4dc] ss:$28 sps:$4 sm:$0xff]  }
 0x3b2   :  { %5397 = vmatpush1.bf16.msra.mxu0 %v6904_v0  ;;  %v6996_v0 = vld [vmem:[%s10028_s9 + $0x85c] ss:$28 sps:$4 sm:$0xff]  }
 0x3b3   :  { %5398 = vmatprep.subr.bf16.mxu0 %v6912_v1  ;;  %v6991_v1 = vld [vmem:[%s10028_s9 + $0x4d8] ss:$28 sps:$4 sm:$0xff]  }
 0x3b6   :  { %5399 = vmatpush1.bf16.msra.mxu0 %v6910_v2  ;;  %v6994_v2 = vld [vmem:[%s10028_s9 + $0x858] ss:$28 sps:$4 sm:$0xff]  }
 0x3b7   :  { %5400 = vmatprep.subr.bf16.mxu0 %v6918_v3  ;;  %v6999_v3 = vld [vmem:[%s10028_s9 + $0x4a4] ss:$28 sps:$4 sm:$0xff]  }
 0x3ba   :  { %5401 = vmatpush1.bf16.msra.mxu0 %v6916_v4  ;;  %v7002_v4 = vld [vmem:[%s10028_s9 + $0x824] ss:$28 sps:$4 sm:$0xff]  }
 0x3bb   :  { %5402 = vmatprep.subr.bf16.mxu0 %v6924_v6  ;;  %v6997_v6 = vld [vmem:[%s10028_s9 + $0x4a0] ss:$28 sps:$4 sm:$0xff]  }
 0x3be   :  { %5403 = vmatpush1.bf16.msra.mxu0 %v6922_v8  ;;  %v7000_v8 = vld [vmem:[%s10028_s9 + $0x820] ss:$28 sps:$4 sm:$0xff]  }
 0x3bf   :  { %5404 = vmatprep.subr.bf16.mxu0 %v6930_v9  ;;  %v7005_v9 = vld [vmem:[%s10028_s9 + $0x46c] ss:$28 sps:$4 sm:$0xff]  }
 0x3c2   :  { %5405 = vmatpush1.bf16.msra.mxu0 %v6928_v10  ;;  %v7008_v10 = vld [vmem:[%s10028_s9 + $0x7ec] ss:$28 sps:$4 sm:$0xff]  }
 0x3c3   :  { %5406 = vmatprep.subr.bf16.mxu0 %v6936_v11  ;;  %v7003_v11 = vld [vmem:[%s10028_s9 + $0x468] ss:$28 sps:$4 sm:$0xff]  }
 0x3c6   :  { %5407 = vmatpush1.bf16.msra.mxu0 %v6934_v12  ;;  %v7006_v12 = vld [vmem:[%s10028_s9 + $0x7e8] ss:$28 sps:$4 sm:$0xff]  }
 0x3c7   :  { %5408 = vmatprep.subr.bf16.mxu0 %v6942_v13  ;;  %v7011_v13 = vld [vmem:[%s10028_s9 + $0x434] ss:$28 sps:$4 sm:$0xff]  }
 0x3ca   :  { %5409 = vmatpush2.bf16.msra.mxu0 %v6940_v14  ;;  %v7014_v14 = vld [vmem:[%s10028_s9 + $0x7b4] ss:$28 sps:$4 sm:$0xff]  }
 0x3cb   :  { %5410 = vmatprep.subr.bf16.mxu0 %v6948_v15  ;;  %v7009_v15 = vld [vmem:[%s10028_s9 + $0x430] ss:$28 sps:$4 sm:$0xff]  }
 0x3ce   :  { %5411 = vmatpush2.bf16.msra.mxu0 %v6946_v16  ;;  %v7012_v16 = vld [vmem:[%s10028_s9 + $0x7b0] ss:$28 sps:$4 sm:$0xff]  }
 0x3cf   :  { %5412 = vmatprep.subr.bf16.mxu0 %v6954_v17  ;;  %v7017_v17 = vld [vmem:[%s10028_s9 + $0x3fc] ss:$28 sps:$4 sm:$0xff]  }
 0x3d2   :  { %5413 = vmatpush2.bf16.msra.mxu0 %v6952_v18  ;;  %v7020_v18 = vld [vmem:[%s10028_s9 + $0x77c] ss:$28 sps:$4 sm:$0xff]  }
 0x3d3   :  { %5414 = vmatprep.subr.bf16.mxu0 %v6960_v19  ;;  %v7015_v19 = vld [vmem:[%s10028_s9 + $0x3f8] ss:$28 sps:$4 sm:$0xff]  }
 0x3d6   :  { %5415 = vmatpush2.bf16.msra.mxu0 %v6958_v20  ;;  %v7018_v20 = vld [vmem:[%s10028_s9 + $0x778] ss:$28 sps:$4 sm:$0xff]  }
 0x3d7   :  { %5416 = vmatprep.subr.bf16.mxu0 %v6966_v21  ;;  %v7023_v21 = vld [vmem:[%s10028_s9 + $0x3c4] ss:$28 sps:$4 sm:$0xff]  }
 0x3da   :  { %5417 = vmatpush2.bf16.msra.mxu0 %v6964_v23  ;;  %v7026_v23 = vld [vmem:[%s10028_s9 + $0x744] ss:$28 sps:$4 sm:$0xff]  }
 0x3db   :  { %5418 = vmatprep.subr.bf16.mxu0 %v6972_v25  ;;  %v7021_v25 = vld [vmem:[%s10028_s9 + $0x3c0] ss:$28 sps:$4 sm:$0xff]  }
 0x3dd   :  { %v2311_v39 = vpop.f32.mrf.mxu0 }
 0x3de   :  { %v2312_v40 = vadd.f32 %v2311_v39, %v738_v30  ;;  %v2352_v41 = vpop.f32.mrf.mxu1  ;;  %5419 = vmatpush2.bf16.msra.mxu0 %v6970_v29  ;;  %v7029_v29 = vld [vmem:[%s10028_s9 + $0x38c] ss:$28 sps:$4 sm:$0xff]   ;;  %v7035_v39 = vld [vmem:[%s10028_s9 + $0x6d4] ss:$28 sps:$4 sm:$0xff]  }
 0x3df   :  { %v2313_v43 = vpop.f32.mrf.mxu0  ;;  %5420 = vmatprep.subr.bf16.mxu0 %v6978_v32  ;;  %v7032_v30 = vld [vmem:[%s10028_s9 + $0x70c] ss:$28 sps:$4 sm:$0xff]  }
 0x3e0   :  { %v2353_v46 = vadd.f32 %v2352_v41, %v2312_v40  ;;  %v2314_v47 = vadd.f32 %v2313_v43, %v742_v36  ;;  %v2354_v48 = vpop.f32.mrf.mxu1  ;;  %v7027_v32 = vld [vmem:[%s10028_s9 + $0x388] ss:$28 sps:$4 sm:$0xff]   ;;  %v7038_v40 = vld [vmem:[%s10028_s9 + $0xa54] ss:$28 sps:$4 sm:$0xff]   ;;  %v7041_v43 = vld [vmem:[%s10028_s9 + $0x69c] ss:$28 sps:$4 sm:$0xff]  }
 0x3e1   :  { %v2315_v49 = vpop.f32.mrf.mxu0  ;;  %v7030_v36 = vld [vmem:[%s10028_s9 + $0x708] ss:$28 sps:$4 sm:$0xff]   ;;  %v7033_v41 = vld [vmem:[%s10028_s9 + $0x6d0] ss:$28 sps:$4 sm:$0xff]  }
 0x3e2   :  { %v2355_v59 = vadd.f32 %v2354_v48, %v2314_v47  ;;  %v2356_v45 = vpop.f32.mrf.mxu1  ;;  %5421 = vmatpush2.bf16.msra.mxu0 %v6976_v42  ;;  %v2365_v60 = vmax.f32 %v2353_v46, 0.0  ;;  %v7036_v42 = vld [vmem:[%s10028_s9 + $0xa50] ss:$28 sps:$4 sm:$0xff]   ;;  %v7039_v46 = vld [vmem:[%s10028_s9 + $0x698] ss:$28 sps:$4 sm:$0xff]  }
 0x3e3   :  { %v2316_v53 = vpop.f32.mrf.mxu0  ;;  %5422 = vmatprep.subr.bf16.mxu0 %v6984_v44  ;;  %v7044_v44 = vld [vmem:[%s10028_s9 + $0xa1c] ss:$28 sps:$4 sm:$0xff]   ;;  %v7047_v48 = vld [vmem:[%s10028_s9 + $0x664] ss:$28 sps:$4 sm:$0xff]  }
 0x3e4   :  { %v2366_v54 = vmax.f32 %v2355_v59, 0.0  ;;  %v2357_v62 = vpop.f32.mrf.mxu1  ;;  %v9085_v63 = vpack.c.bf16 %v2365_v60, %v2365_v60  ;;  %v7042_v47 = vld [vmem:[%s10028_s9 + $0xa18] ss:$28 sps:$4 sm:$0xff]   ;;  %v7050_v49 = vld [vmem:[%s10028_s9 + $0x9e4] ss:$28 sps:$4 sm:$0xff]  }
 0x3e5   :  { %v7045_v59 = vld [vmem:[%s10028_s9 + $0x660] ss:$28 sps:$4 sm:$0xff]   ;;  %v7056_v60 = vld [vmem:[%s10028_s9 + $0x9ac] ss:$28 sps:$4 sm:$0xff]   ;;  %v7062_v62 = vld [vmem:[%s10028_s9 + $0x974] ss:$28 sps:$4 sm:$0xff]  }
 0x3e6   :  { %v9077_v55 = vpack.c.bf16 %v2366_v54, %v2366_v54  ;;  %5423 = vmatpush2.bf16.msra.mxu0 %v6982_v52  ;;  %v7048_v45 = vld [vmem:[%s10028_s9 + $0x9e0] ss:$28 sps:$4 sm:$0xff]   ;;  %v7053_v52 = vld [vmem:[%s10028_s9 + $0x62c] ss:$28 sps:$4 sm:$0xff]   ;;  %v7059_v54 = vld [vmem:[%s10028_s9 + $0x5f4] ss:$28 sps:$4 sm:$0xff]  }
 0x3e7   :  { %5474 = vmatprep.subr.bf16.mxu0 %v6990_v61  ;;  %v7051_v53 = vld [vmem:[%s10028_s9 + $0x628] ss:$28 sps:$4 sm:$0xff]  }
 0x3e8   :  { %5383 = vmatprep.mubr.bf16.mxu1 %v9077_v55  ;;  %v7054_v61 = vld [vmem:[%s10028_s9 + $0x9a8] ss:$28 sps:$4 sm:$0xff]  }
 0x3e9   :  { %5425 = vmatmul.mubr.bf16.vlgmr.msra.gmra.mxu0 %v8760_v7  ;;  %5384 = vmatmul.mubr.bf16.vlgmr.msra.gmra.mxu1 %v9085_v63 }
 0x3ea   :  { %5434 = vmatpush1.bf16.msra.mxu1 %v6985_v56  ;;  %5475 = vmatpush1.bf16.msra.mxu0 %v6988_v58  ;;  %v7057_v56 = vld [vmem:[%s10028_s9 + $0x5f0] ss:$28 sps:$4 sm:$0xff]  }
 0x3eb   :  { %5506 = vmatprep.mubr.bf16.mxu0 %v8968_v50  ;;  %5465 = vmatprep.mubr.bf16.mxu1 %v8780_v28  ;;  %v7060_v58 = vld [vmem:[%s10028_s9 + $0x970] ss:$28 sps:$4 sm:$0xff]  }
 0x3ec   :  { %5435 = vmatprep.subr.bf16.mxu1 %v6993_v51  ;;  %5476 = vmatprep.subr.bf16.mxu0 %v6996_v0  ;;  %v7065_v51 = vld [vmem:[%s10028_s9 + $0x5bc] ss:$28 sps:$4 sm:$0xff]  }
 0x3ed   :  { %v7068_v0 = vld [vmem:[%s10028_s9 + $0x93c] ss:$28 sps:$4 sm:$0xff]  }
 0x3ee   :  { %5436 = vmatpush1.bf16.msra.mxu1 %v6991_v1  ;;  %5477 = vmatpush1.bf16.msra.mxu0 %v6994_v2  ;;  %v7063_v1 = vld [vmem:[%s10028_s9 + $0x5b8] ss:$28 sps:$4 sm:$0xff]  }
 0x3ef   :  { %5437 = vmatprep.subr.bf16.mxu1 %v6999_v3  ;;  %5478 = vmatprep.subr.bf16.mxu0 %v7002_v4  ;;  %v7066_v2 = vld [vmem:[%s10028_s9 + $0x938] ss:$28 sps:$4 sm:$0xff]   ;;  %v7071_v3 = vld [vmem:[%s10028_s9 + $0x584] ss:$28 sps:$4 sm:$0xff]  }
 0x3f0   :  { %v7074_v4 = vld [vmem:[%s10028_s9 + $0x904] ss:$28 sps:$4 sm:$0xff]  }
 0x3f2   :  { %5438 = vmatpush1.bf16.msra.mxu1 %v6997_v6  ;;  %5479 = vmatpush1.bf16.msra.mxu0 %v7000_v8  ;;  %v7069_v8 = vld [vmem:[%s10028_s9 + $0x580] ss:$28 sps:$4 sm:$0xff]  }
 0x3f3   :  { %5439 = vmatprep.subr.bf16.mxu1 %v7005_v9  ;;  %5480 = vmatprep.subr.bf16.mxu0 %v7008_v10  ;;  %v7072_v9 = vld [vmem:[%s10028_s9 + $0x900] ss:$28 sps:$4 sm:$0xff]  }
 0x3f6   :  { %5440 = vmatpush1.bf16.msra.mxu1 %v7003_v11  ;;  %5481 = vmatpush1.bf16.msra.mxu0 %v7006_v12  ;;  %v7077_v11 = vld [vmem:[%s10028_s9 + $0x54c] ss:$28 sps:$4 sm:$0xff]  }
 0x3f7   :  { %5441 = vmatprep.subr.bf16.mxu1 %v7011_v13  ;;  %5482 = vmatprep.subr.bf16.mxu0 %v7014_v14  ;;  %v7080_v12 = vld [vmem:[%s10028_s9 + $0x8cc] ss:$28 sps:$4 sm:$0xff]   ;;  %v9269_v13 = vld [vmem:[%s10029_s10] sm:$0x7f] }
 0x3fa   :  { %5442 = vmatpush1.bf16.msra.mxu1 %v7009_v15  ;;  %5483 = vmatpush1.bf16.msra.mxu0 %v7012_v16  ;;  %v7075_v15 = vld [vmem:[%s10028_s9 + $0x548] ss:$28 sps:$4 sm:$0xff]  }
 0x3fb   :  { %5443 = vmatprep.subr.bf16.mxu1 %v7017_v17  ;;  %5484 = vmatprep.subr.bf16.mxu0 %v7020_v18  ;;  %v7078_v16 = vld [vmem:[%s10028_s9 + $0x8c8] ss:$28 sps:$4 sm:$0xff]   ;;  %v7083_v18 = vld [vmem:[%s10028_s9 + $0xc14] ss:$28 sps:$4 sm:$0xff]  }
 0x3fe   :  { %5444 = vmatpush1.bf16.msra.mxu1 %v7015_v19  ;;  %5485 = vmatpush1.bf16.msra.mxu0 %v7018_v20  ;;  %v7086_v19 = vld [vmem:[%s10028_s9 + $0x19c] ss:$28 sps:$4 sm:$0xff]   ;;  %v2892_v20 = vrot.slane %v9269_v13, %v7933_v34 }
 0x3ff   :  { %5445 = vmatprep.subr.bf16.mxu1 %v7023_v21  ;;  %5486 = vmatprep.subr.bf16.mxu0 %v7026_v23  ;;  %v2896_v21 = vrot.slane %v9269_v13, %v7942_v37  ;;  %v7081_v23 = vld [vmem:[%s10028_s9 + $0xc10] ss:$28 sps:$4 sm:$0xff]   ;;  %v7089_v34 = vld [vmem:[%s10028_s9 + $0xbdc] ss:$28 sps:$4 sm:$0xff]   ;;  %v7092_v37 = vld [vmem:[%s10028_s9 + $0x164] ss:$28 sps:$4 sm:$0xff]  }
 0x402   :  { %5446 = vmatpush1.bf16.msra.mxu1 %v7021_v25  ;;  %5487 = vmatpush1.bf16.msra.mxu0 %v7024_v26  ;;  %v7084_v25 = vld [vmem:[%s10028_s9 + $0x198] ss:$28 sps:$4 sm:$0xff]  }
 0x403   :  { %5447 = vmatprep.subr.bf16.mxu1 %v7029_v29  ;;  %5488 = vmatprep.subr.bf16.mxu0 %v7032_v30 }
 0x406   :  { %5448 = vmatpush1.bf16.msra.mxu1 %v7027_v32  ;;  %5489 = vmatpush1.bf16.msra.mxu0 %v7030_v36  ;;  %v7087_v36 = vld [vmem:[%s10028_s9 + $0xbd8] ss:$28 sps:$4 sm:$0xff]  }
 0x407   :  { %5449 = vmatprep.subr.bf16.mxu1 %v7035_v39  ;;  %5490 = vmatprep.subr.bf16.mxu0 %v7038_v40  ;;  %v7090_v40 = vld [vmem:[%s10028_s9 + $0x160] ss:$28 sps:$4 sm:$0xff]  }
 0x40a   :  { %5450 = vmatpush2.bf16.msra.mxu1 %v7033_v41  ;;  %5491 = vmatpush2.bf16.msra.mxu0 %v7036_v42  ;;  %v7095_v41 = vld [vmem:[%s10028_s9 + $0xba4] ss:$28 sps:$4 sm:$0xff]  }
 0x40b   :  { %5451 = vmatprep.subr.bf16.mxu1 %v7041_v43  ;;  %5492 = vmatprep.subr.bf16.mxu0 %v7044_v44  ;;  %v7098_v43 = vld [vmem:[%s10028_s9 + $0x12c] ss:$28 sps:$4 sm:$0xff]  }
 0x40e   :  { %5452 = vmatpush2.bf16.msra.mxu1 %v7039_v46  ;;  %5493 = vmatpush2.bf16.msra.mxu0 %v7042_v47  ;;  %v7093_v46 = vld [vmem:[%s10028_s9 + $0xba0] ss:$28 sps:$4 sm:$0xff]  }
 0x40f   :  { %5453 = vmatprep.subr.bf16.mxu1 %v7047_v48  ;;  %5494 = vmatprep.subr.bf16.mxu0 %v7050_v49  ;;  %v7096_v48 = vld [vmem:[%s10028_s9 + $0x128] ss:$28 sps:$4 sm:$0xff]  }
 0x410   :  { %v7101_v49 = vld [vmem:[%s10028_s9 + $0xb6c] ss:$28 sps:$4 sm:$0xff]  }
 0x412   :  { %5454 = vmatpush2.bf16.msra.mxu1 %v7045_v59  ;;  %5495 = vmatpush2.bf16.msra.mxu0 %v7048_v45  ;;  %v7104_v59 = vld [vmem:[%s10028_s9 + $0xf4] ss:$28 sps:$4 sm:$0xff]   ;;  %v7099_v45 = vld [vmem:[%s10028_s9 + $0xb68] ss:$28 sps:$4 sm:$0xff]  }
 0x413   :  { %5455 = vmatprep.subr.bf16.mxu1 %v7053_v52  ;;  %5496 = vmatprep.subr.bf16.mxu0 %v7056_v60  ;;  %v7102_v52 = vld [vmem:[%s10028_s9 + $0xf0] ss:$28 sps:$4 sm:$0xff]  }
 0x414   :  { %v7107_v60 = vld [vmem:[%s10028_s9 + $0xb34] ss:$28 sps:$4 sm:$0xff]  }
 0x416   :  { %5456 = vmatpush2.bf16.msra.mxu1 %v7051_v53  ;;  %5497 = vmatpush2.bf16.msra.mxu0 %v7054_v61  ;;  %v7110_v53 = vld [vmem:[%s10028_s9 + $0xbc] ss:$28 sps:$4 sm:$0xff]   ;;  %v7105_v61 = vld [vmem:[%s10028_s9 + $0xb30] ss:$28 sps:$4 sm:$0xff]  }
 0x417   :  { %5457 = vmatprep.subr.bf16.mxu1 %v7059_v54  ;;  %5498 = vmatprep.subr.bf16.mxu0 %v7062_v62  ;;  %v7108_v54 = vld [vmem:[%s10028_s9 + $0xb8] ss:$28 sps:$4 sm:$0xff]  }
 0x418   :  { %v7113_v62 = vld [vmem:[%s10028_s9 + $0xafc] ss:$28 sps:$4 sm:$0xff]  }
 0x41a   :  { %5458 = vmatpush2.bf16.msra.mxu1 %v7057_v56  ;;  %5499 = vmatpush2.bf16.msra.mxu0 %v7060_v58  ;;  %v7116_v56 = vld [vmem:[%s10028_s9 + $0x84] ss:$28 sps:$4 sm:$0xff]   ;;  %v7111_v58 = vld [vmem:[%s10028_s9 + $0xaf8] ss:$28 sps:$4 sm:$0xff]  }
 0x41b   :  { %5459 = vmatprep.subr.bf16.mxu1 %v7065_v51  ;;  %5500 = vmatprep.subr.bf16.mxu0 %v7068_v0  ;;  %v7114_v51 = vld [vmem:[%s10028_s9 + $0x80] ss:$28 sps:$4 sm:$0xff]  }
 0x41c   :  { %v7119_v0 = vld [vmem:[%s10028_s9 + $0xac4] ss:$28 sps:$4 sm:$0xff]  }
 0x41d   :  { %v5262_v6 = vpop.f32.mrf.mxu0 }
 0x41e   :  { %5460 = vmatpush2.bf16.msra.mxu1 %v7063_v1  ;;  %5501 = vmatpush2.bf16.msra.mxu0 %v7066_v2  ;;  %v5263_v26 = vadd.f32 %v5262_v6, %v2892_v20  ;;  %v7122_v1 = vld [vmem:[%s10028_s9 + $0x4c] ss:$28 sps:$4 sm:$0xff]   ;;  %v7117_v2 = vld [vmem:[%s10028_s9 + $0xac0] ss:$28 sps:$4 sm:$0xff]   ;;  %v7128_v6 = vld [vmem:[%s10028_s9 + $0x14] ss:$28 sps:$4 sm:$0xff]  }
 0x41f   :  { %v5264_v10 = vpop.f32.mrf.mxu0  ;;  %5461 = vmatprep.subr.bf16.mxu1 %v7071_v3  ;;  %5502 = vmatprep.subr.bf16.mxu0 %v7074_v4  ;;  %v7120_v3 = vld [vmem:[%s10028_s9 + $0x48] ss:$28 sps:$4 sm:$0xff]  }
 0x420   :  { %v5265_v30 = vadd.f32 %v5264_v10, %v2896_v21  ;;  %v7125_v4 = vld [vmem:[%s10028_s9 + $0xa8c] ss:$28 sps:$4 sm:$0xff]   ;;  %v7131_v10 = vld [vmem:[%s10028_s9 + $0xdd4] ss:$28 sps:$4 sm:$0xff]   ;;  %v7141_v21 = vld [vmem:[%s10028_s9 + $0xd60] ss:$28 sps:$4 sm:$0xff]  }
 0x421   :  { %v5266_v14 = vpop.f32.mrf.mxu0  ;;  %v7146_v20 = vld [vmem:[%s10028_s9 + $0x2ec] ss:$28 sps:$4 sm:$0xff]  }
 0x422   :  { %5462 = vmatpush2.bf16.msra.mxu1 %v7069_v8  ;;  %5503 = vmatpush2.bf16.msra.mxu0 %v7072_v9  ;;  %v7123_v8 = vld [vmem:[%s10028_s9 + $0xa88] ss:$28 sps:$4 sm:$0xff]   ;;  %v7126_v9 = vld [vmem:[%s10028_s9 + $0x10] ss:$28 sps:$4 sm:$0xff]   ;;  %v7132_v14 = vld [vmem:[%s10028_s9 + $0x358] ss:$28 sps:$4 sm:$0xff]  }
 0x423   :  { %v5267_v17 = vpop.f32.mrf.mxu0  ;;  %5463 = vmatprep.subr.bf16.mxu1 %v7077_v11  ;;  %5504 = vmatprep.subr.bf16.mxu0 %v7080_v12  ;;  %v7134_v11 = vld [vmem:[%s10028_s9 + $0x35c] ss:$28 sps:$4 sm:$0xff]   ;;  %v7129_v12 = vld [vmem:[%s10028_s9 + $0xdd0] ss:$28 sps:$4 sm:$0xff]  }
 0x424   :  { %v7135_v17 = vld [vmem:[%s10028_s9 + $0xd98] ss:$28 sps:$4 sm:$0xff]  }
 0x426   :  { %5464 = vmatpush2.bf16.msra.mxu1 %v7075_v15  ;;  %5505 = vmatpush2.bf16.msra.mxu0 %v7078_v16  ;;  %v7137_v15 = vld [vmem:[%s10028_s9 + $0xd9c] ss:$28 sps:$4 sm:$0xff]   ;;  %v7140_v16 = vld [vmem:[%s10028_s9 + $0x324] ss:$28 sps:$4 sm:$0xff]  }
 0x427   :  { %5515 = vmatprep.subr.bf16.mxu1 %v7083_v18  ;;  %5556 = vmatprep.subr.bf16.mxu0 %v7086_v19  ;;  %v7138_v18 = vld [vmem:[%s10028_s9 + $0x320] ss:$28 sps:$4 sm:$0xff]  }
 0x428   :  { %v7143_v19 = vld [vmem:[%s10028_s9 + $0xd64] ss:$28 sps:$4 sm:$0xff]  }
 0x429   :  { %5466 = vmatmul.mubr.bf16.vlgmr.msra.gmra.mxu1 %v8788_v31  ;;  %5507 = vmatmul.mubr.bf16.vlgmr.msra.gmra.mxu0 %v8973_v57  ;;  %v5303_v29 = vpop.f32.mrf.mxu1 }
 0x42a   :  { %v9301_v32 = vadd.f32 %v5303_v29, %v5263_v26  ;;  %5516 = vmatpush1.bf16.msra.mxu1 %v7081_v23  ;;  %5547 = vmatprep.mubr.bf16.mxu1 %v9077_v55  ;;  %v7144_v23 = vld [vmem:[%s10028_s9 + $0x2e8] ss:$28 sps:$4 sm:$0xff]   ;;  %v7152_v26 = vld [vmem:[%s10028_s9 + $0x2b4] ss:$28 sps:$4 sm:$0xff]  }
 0x42b   :  { %5557 = vmatpush1.bf16.msra.mxu0 %v7084_v25  ;;  %5588 = vmatprep.mubr.bf16.mxu0 %v8592_v5  ;;  %v5305_v39 = vpop.f32.mrf.mxu1  ;;  %v7149_v25 = vld [vmem:[%s10028_s9 + $0xd2c] ss:$28 sps:$4 sm:$0xff]   ;;  %v7155_v29 = vld [vmem:[%s10028_s9 + $0xcf4] ss:$28 sps:$4 sm:$0xff]  }
 0x42c   :  { %v9314_v42 = vadd.f32 %v5305_v39, %v5265_v30  ;;  %5517 = vmatprep.subr.bf16.mxu1 %v7089_v34  ;;  %5558 = vmatprep.subr.bf16.mxu0 %v7092_v37  ;;  %v7147_v34 = vld [vmem:[%s10028_s9 + $0xd28] ss:$28 sps:$4 sm:$0xff]   ;;  %v7150_v37 = vld [vmem:[%s10028_s9 + $0x2b0] ss:$28 sps:$4 sm:$0xff]   ;;  %v7158_v30 = vld [vmem:[%s10028_s9 + $0x27c] ss:$28 sps:$4 sm:$0xff]  }
 0x42d   :  { %v5307_v44 = vpop.f32.mrf.mxu1  ;;  %v7156_v39 = vld [vmem:[%s10028_s9 + $0x278] ss:$28 sps:$4 sm:$0xff]  }
 0x42e   :  { %5518 = vmatpush1.bf16.msra.mxu1 %v7087_v36  ;;  %v7153_v36 = vld [vmem:[%s10028_s9 + $0xcf0] ss:$28 sps:$4 sm:$0xff]   ;;  %v7162_v44 = vld [vmem:[%s10028_s9 + $0x240] ss:$28 sps:$4 sm:$0xff]  }
 0x42f   :  { %5559 = vmatpush1.bf16.msra.mxu0 %v7090_v40  ;;  %v5308_v47 = vpop.f32.mrf.mxu1  ;;  %5519 = vmatprep.subr.bf16.mxu1 %v7095_v41  ;;  %v7161_v40 = vld [vmem:[%s10028_s9 + $0xcbc] ss:$28 sps:$4 sm:$0xff]   ;;  %v7164_v41 = vld [vmem:[%s10028_s9 + $0x244] ss:$28 sps:$4 sm:$0xff]  }
 0x430   :  { %5560 = vmatprep.subr.bf16.mxu0 %v7098_v43  ;;  %v7159_v43 = vld [vmem:[%s10028_s9 + $0xcb8] ss:$28 sps:$4 sm:$0xff]   ;;  %v7170_v47 = vld [vmem:[%s10028_s9 + $0x20c] ss:$28 sps:$4 sm:$0xff]  }
 0x432   :  { %5520 = vmatpush1.bf16.msra.mxu1 %v7093_v46  ;;  %v7167_v46 = vld [vmem:[%s10028_s9 + $0xc84] ss:$28 sps:$4 sm:$0xff]  }
 0x433   :  { %5561 = vmatpush1.bf16.msra.mxu0 %v7096_v48  ;;  %5521 = vmatprep.subr.bf16.mxu1 %v7101_v49  ;;  %v7165_v48 = vld [vmem:[%s10028_s9 + $0xc80] ss:$28 sps:$4 sm:$0xff]   ;;  %v7168_v49 = vld [vmem:[%s10028_s9 + $0x208] ss:$28 sps:$4 sm:$0xff]  }
 0x434   :  { %5562 = vmatprep.subr.bf16.mxu0 %v7104_v59  ;;  %v7173_v59 = vld [vmem:[%s10028_s9 + $0xc4c] ss:$28 sps:$4 sm:$0xff]  }
 0x436   :  { %5522 = vmatpush1.bf16.msra.mxu1 %v7099_v45  ;;  %v7176_v45 = vld [vmem:[%s10028_s9 + $0x1d4] ss:$28 sps:$4 sm:$0xff]  }
 0x437   :  { %5563 = vmatpush1.bf16.msra.mxu0 %v7102_v52  ;;  %5523 = vmatprep.subr.bf16.mxu1 %v7107_v60  ;;  %v7171_v52 = vld [vmem:[%s10028_s9 + $0xc48] ss:$28 sps:$4 sm:$0xff]   ;;  %v7174_v60 = vld [vmem:[%s10028_s9 + $0x1d0] ss:$28 sps:$4 sm:$0xff]  }
 0x438   :  { %5564 = vmatprep.subr.bf16.mxu0 %v7110_v53  ;;  %v7179_v53 = vld [vmem:[%s10028_s9 + $0x51c] ss:$28 sps:$4 sm:$0xff]  }
 0x43a   :  { %5524 = vmatpush1.bf16.msra.mxu1 %v7105_v61  ;;  %v7182_v61 = vld [vmem:[%s10028_s9 + $0x89c] ss:$28 sps:$4 sm:$0xff]  }
 0x43b   :  { %5565 = vmatpush1.bf16.msra.mxu0 %v7108_v54  ;;  %5525 = vmatprep.subr.bf16.mxu1 %v7113_v62  ;;  %v7177_v54 = vld [vmem:[%s10028_s9 + $0x518] ss:$28 sps:$4 sm:$0xff]  }
 0x43c   :  { %5566 = vmatprep.subr.bf16.mxu0 %v7116_v56  ;;  %v7180_v62 = vld [vmem:[%s10028_s9 + $0x898] ss:$28 sps:$4 sm:$0xff]   ;;  %v7185_v56 = vld [vmem:[%s10028_s9 + $0x4e4] ss:$28 sps:$4 sm:$0xff]  }
 0x43e   :  { %5526 = vmatpush1.bf16.msra.mxu1 %v7111_v58 }
 0x43f   :  { %5567 = vmatpush1.bf16.msra.mxu0 %v7114_v51  ;;  %5527 = vmatprep.subr.bf16.mxu1 %v7119_v0  ;;  %v7188_v51 = vld [vmem:[%s10028_s9 + $0x864] ss:$28 sps:$4 sm:$0xff]  }
 0x440   :  { %5568 = vmatprep.subr.bf16.mxu0 %v7122_v1  ;;  %v7183_v0 = vld [vmem:[%s10028_s9 + $0x4e0] ss:$28 sps:$4 sm:$0xff]  }
 0x442   :  { %5528 = vmatpush1.bf16.msra.mxu1 %v7117_v2  ;;  %v7186_v2 = vld [vmem:[%s10028_s9 + $0x860] ss:$28 sps:$4 sm:$0xff]  }
 0x443   :  { %5569 = vmatpush1.bf16.msra.mxu0 %v7120_v3  ;;  %5529 = vmatprep.subr.bf16.mxu1 %v7125_v4  ;;  %v7191_v3 = vld [vmem:[%s10028_s9 + $0x4ac] ss:$28 sps:$4 sm:$0xff]  }
 0x444   :  { %5570 = vmatprep.subr.bf16.mxu0 %v7128_v6  ;;  %v7194_v4 = vld [vmem:[%s10028_s9 + $0x82c] ss:$28 sps:$4 sm:$0xff]  }
 0x446   :  { %5530 = vmatpush1.bf16.msra.mxu1 %v7123_v8  ;;  %v7189_v8 = vld [vmem:[%s10028_s9 + $0x4a8] ss:$28 sps:$4 sm:$0xff]  }
 0x447   :  { %5571 = vmatpush1.bf16.msra.mxu0 %v7126_v9  ;;  %5531 = vmatprep.subr.bf16.mxu1 %v7131_v10  ;;  %v7192_v10 = vld [vmem:[%s10028_s9 + $0x828] ss:$28 sps:$4 sm:$0xff]  }
 0x448   :  { %5572 = vmatprep.subr.bf16.mxu0 %v7134_v11  ;;  %v7197_v11 = vld [vmem:[%s10028_s9 + $0x474] ss:$28 sps:$4 sm:$0xff]  }
 0x44a   :  { %5532 = vmatpush2.bf16.msra.mxu1 %v7129_v12  ;;  %v7200_v12 = vld [vmem:[%s10028_s9 + $0x7f4] ss:$28 sps:$4 sm:$0xff]  }
 0x44b   :  { %5573 = vmatpush2.bf16.msra.mxu0 %v7132_v14  ;;  %5533 = vmatprep.subr.bf16.mxu1 %v7137_v15  ;;  %v7195_v14 = vld [vmem:[%s10028_s9 + $0x470] ss:$28 sps:$4 sm:$0xff]  }
 0x44c   :  { %5574 = vmatprep.subr.bf16.mxu0 %v7140_v16  ;;  %v7198_v15 = vld [vmem:[%s10028_s9 + $0x7f0] ss:$28 sps:$4 sm:$0xff]   ;;  %v7203_v16 = vld [vmem:[%s10028_s9 + $0x43c] ss:$28 sps:$4 sm:$0xff]  }
 0x44e   :  { %5534 = vmatpush2.bf16.msra.mxu1 %v7135_v17  ;;  %v7206_v17 = vld [vmem:[%s10028_s9 + $0x7bc] ss:$28 sps:$4 sm:$0xff]  }
 0x44f   :  { %5575 = vmatpush2.bf16.msra.mxu0 %v7138_v18  ;;  %5535 = vmatprep.subr.bf16.mxu1 %v7143_v19  ;;  %v7201_v18 = vld [vmem:[%s10028_s9 + $0x438] ss:$28 sps:$4 sm:$0xff]  }
 0x450   :  { %5576 = vmatprep.subr.bf16.mxu0 %v7146_v20  ;;  %v7204_v19 = vld [vmem:[%s10028_s9 + $0x7b8] ss:$28 sps:$4 sm:$0xff]   ;;  %v7209_v20 = vld [vmem:[%s10028_s9 + $0x404] ss:$28 sps:$4 sm:$0xff]  }
 0x452   :  { %5536 = vmatpush2.bf16.msra.mxu1 %v7141_v21  ;;  %v7212_v21 = vld [vmem:[%s10028_s9 + $0x784] ss:$28 sps:$4 sm:$0xff]  }
 0x453   :  { %5577 = vmatpush2.bf16.msra.mxu0 %v7144_v23  ;;  %5537 = vmatprep.subr.bf16.mxu1 %v7149_v25  ;;  %v7207_v23 = vld [vmem:[%s10028_s9 + $0x400] ss:$28 sps:$4 sm:$0xff]  }
 0x454   :  { %5578 = vmatprep.subr.bf16.mxu0 %v7152_v26  ;;  %v7210_v25 = vld [vmem:[%s10028_s9 + $0x780] ss:$28 sps:$4 sm:$0xff]   ;;  %v7215_v26 = vld [vmem:[%s10028_s9 + $0x3cc] ss:$28 sps:$4 sm:$0xff]  }
 0x456   :  { %5538 = vmatpush2.bf16.msra.mxu1 %v7147_v34  ;;  %v7218_v34 = vld [vmem:[%s10028_s9 + $0x74c] ss:$28 sps:$4 sm:$0xff]  }
 0x457   :  { %5579 = vmatpush2.bf16.msra.mxu0 %v7150_v37  ;;  %5539 = vmatprep.subr.bf16.mxu1 %v7155_v29  ;;  %v7213_v37 = vld [vmem:[%s10028_s9 + $0x3c8] ss:$28 sps:$4 sm:$0xff]  }
 0x458   :  { %5580 = vmatprep.subr.bf16.mxu0 %v7158_v30  ;;  %v7216_v29 = vld [vmem:[%s10028_s9 + $0x748] ss:$28 sps:$4 sm:$0xff]   ;;  %v7221_v30 = vld [vmem:[%s10028_s9 + $0x394] ss:$28 sps:$4 sm:$0xff]  }
 0x45a   :  { %5540 = vmatpush2.bf16.msra.mxu1 %v7153_v36  ;;  %v7224_v36 = vld [vmem:[%s10028_s9 + $0x714] ss:$28 sps:$4 sm:$0xff]  }
 0x45b   :  { %5581 = vmatpush2.bf16.msra.mxu0 %v7156_v39  ;;  %5541 = vmatprep.subr.bf16.mxu1 %v7161_v40  ;;  %v7219_v39 = vld [vmem:[%s10028_s9 + $0x390] ss:$28 sps:$4 sm:$0xff]  }
 0x45c   :  { %5582 = vmatprep.subr.bf16.mxu0 %v7164_v41  ;;  %v7222_v40 = vld [vmem:[%s10028_s9 + $0x710] ss:$28 sps:$4 sm:$0xff]   ;;  %v7227_v41 = vld [vmem:[%s10028_s9 + $0x6dc] ss:$28 sps:$4 sm:$0xff]  }
 0x45e   :  { %5542 = vmatpush2.bf16.msra.mxu1 %v7159_v43  ;;  %v7230_v43 = vld [vmem:[%s10028_s9 + $0xa5c] ss:$28 sps:$4 sm:$0xff]  }
 0x45f   :  { %5583 = vmatpush2.bf16.msra.mxu0 %v7162_v44  ;;  %5543 = vmatprep.subr.bf16.mxu1 %v7167_v46  ;;  %v7225_v44 = vld [vmem:[%s10028_s9 + $0x6d8] ss:$28 sps:$4 sm:$0xff]  }
 0x460   :  { %5584 = vmatprep.subr.bf16.mxu0 %v7170_v47  ;;  %v7228_v46 = vld [vmem:[%s10028_s9 + $0xa58] ss:$28 sps:$4 sm:$0xff]   ;;  %v7233_v47 = vld [vmem:[%s10028_s9 + $0x6a4] ss:$28 sps:$4 sm:$0xff]  }
 0x462   :  { %5544 = vmatpush2.bf16.msra.mxu1 %v7165_v48  ;;  %v7236_v48 = vld [vmem:[%s10028_s9 + $0xa24] ss:$28 sps:$4 sm:$0xff]  }
 0x463   :  { %5585 = vmatpush2.bf16.msra.mxu0 %v7168_v49  ;;  %5545 = vmatprep.subr.bf16.mxu1 %v7173_v59  ;;  %v7231_v49 = vld [vmem:[%s10028_s9 + $0x6a0] ss:$28 sps:$4 sm:$0xff]  }
 0x464   :  { %5586 = vmatprep.subr.bf16.mxu0 %v7176_v45  ;;  %v7234_v59 = vld [vmem:[%s10028_s9 + $0xa20] ss:$28 sps:$4 sm:$0xff]   ;;  %v7239_v45 = vld [vmem:[%s10028_s9 + $0x66c] ss:$28 sps:$4 sm:$0xff]  }
 0x466   :  { %5546 = vmatpush2.bf16.msra.mxu1 %v7171_v52  ;;  %v7242_v52 = vld [vmem:[%s10028_s9 + $0x9ec] ss:$28 sps:$4 sm:$0xff]  }
 0x467   :  { %5587 = vmatpush2.bf16.msra.mxu0 %v7174_v60  ;;  %5597 = vmatprep.subr.bf16.mxu1 %v7179_v53  ;;  %v7237_v60 = vld [vmem:[%s10028_s9 + $0x668] ss:$28 sps:$4 sm:$0xff]  }
 0x468   :  { %5638 = vmatprep.subr.bf16.mxu0 %v7182_v61  ;;  %v7240_v53 = vld [vmem:[%s10028_s9 + $0x9e8] ss:$28 sps:$4 sm:$0xff]   ;;  %v7245_v61 = vld [vmem:[%s10028_s9 + $0x634] ss:$28 sps:$4 sm:$0xff]  }
 0x469   :  { %5548 = vmatmul.mubr.bf16.vlgmr.msra.gmra.mxu1 %v9085_v63  ;;  %v9497_v58 = vpop.f32.mrf.mxu0 }
 0x46a   :  { %5589 = vmatmul.mubr.bf16.vlgmr.msra.gmra.mxu0 %v8760_v7  ;;  %5598 = vmatpush1.bf16.msra.mxu1 %v7177_v54  ;;  %v7248_v54 = vld [vmem:[%s10028_s9 + $0x9b4] ss:$28 sps:$4 sm:$0xff]  }
 0x46b   :  { %5629 = vmatprep.mubr.bf16.mxu1 %v8780_v28  ;;  %5639 = vmatpush1.bf16.msra.mxu0 %v7180_v62  ;;  %v9507_v1 = vpop.f32.mrf.mxu0  ;;  %v7243_v62 = vld [vmem:[%s10028_s9 + $0x630] ss:$28 sps:$4 sm:$0xff]  }
 0x46c   :  { %5670 = vmatprep.mubr.bf16.mxu0 %v8968_v50  ;;  %5599 = vmatprep.subr.bf16.mxu1 %v7185_v56  ;;  %v7246_v56 = vld [vmem:[%s10028_s9 + $0x9b0] ss:$28 sps:$4 sm:$0xff]  }
 0x46d   :  { %5640 = vmatprep.subr.bf16.mxu0 %v7188_v51  ;;  %v5348_v6 = vpop.f32.mrf.mxu0  ;;  %v7251_v51 = vld [vmem:[%s10028_s9 + $0x5fc] ss:$28 sps:$4 sm:$0xff]  }
 0x46e   :  { %5600 = vmatpush1.bf16.msra.mxu1 %v7183_v0  ;;  %v7254_v0 = vld [vmem:[%s10028_s9 + $0x97c] ss:$28 sps:$4 sm:$0xff]   ;;  %v7260_v6 = vld [vmem:[%s10028_s9 + $0x944] ss:$28 sps:$4 sm:$0xff]  }
 0x46f   :  { %5641 = vmatpush1.bf16.msra.mxu0 %v7186_v2  ;;  %v5349_v9 = vpop.f32.mrf.mxu0  ;;  %5601 = vmatprep.subr.bf16.mxu1 %v7191_v3  ;;  %v7249_v2 = vld [vmem:[%s10028_s9 + $0x5f8] ss:$28 sps:$4 sm:$0xff]  }
 0x470   :  { %5642 = vmatprep.subr.bf16.mxu0 %v7194_v4  ;;  %v7252_v3 = vld [vmem:[%s10028_s9 + $0x978] ss:$28 sps:$4 sm:$0xff]   ;;  %v7257_v4 = vld [vmem:[%s10028_s9 + $0x5c4] ss:$28 sps:$4 sm:$0xff]  }
 0x471   :  { %v7258_v9 = vld [vmem:[%s10028_s9 + $0x940] ss:$28 sps:$4 sm:$0xff]  }
 0x472   :  { %5602 = vmatpush1.bf16.msra.mxu1 %v7189_v8  ;;  %v7255_v8 = vld [vmem:[%s10028_s9 + $0x5c0] ss:$28 sps:$4 sm:$0xff]  }
 0x473   :  { %5643 = vmatpush1.bf16.msra.mxu0 %v7192_v10  ;;  %5603 = vmatprep.subr.bf16.mxu1 %v7197_v11  ;;  %v7263_v10 = vld [vmem:[%s10028_s9 + $0x58c] ss:$28 sps:$4 sm:$0xff]  }
 0x474   :  { %5644 = vmatprep.subr.bf16.mxu0 %v7200_v12  ;;  %v7266_v11 = vld [vmem:[%s10028_s9 + $0x90c] ss:$28 sps:$4 sm:$0xff]  }
 0x475   :  { %v7261_v12 = vld [vmem:[%s10028_s9 + $0x588] ss:$28 sps:$4 sm:$0xff]  }
 0x476   :  { %5604 = vmatpush1.bf16.msra.mxu1 %v7195_v14  ;;  %v7264_v14 = vld [vmem:[%s10028_s9 + $0x908] ss:$28 sps:$4 sm:$0xff]  }
 0x477   :  { %5645 = vmatpush1.bf16.msra.mxu0 %v7198_v15  ;;  %5605 = vmatprep.subr.bf16.mxu1 %v7203_v16  ;;  %v7269_v15 = vld [vmem:[%s10028_s9 + $0x554] ss:$28 sps:$4 sm:$0xff]  }
 0x478   :  { %5646 = vmatprep.subr.bf16.mxu0 %v7206_v17  ;;  %v7272_v16 = vld [vmem:[%s10028_s9 + $0x8d4] ss:$28 sps:$4 sm:$0xff]  }
 0x479   :  { %v7267_v17 = vld [vmem:[%s10028_s9 + $0x550] ss:$28 sps:$4 sm:$0xff]  }
 0x47a   :  { %5606 = vmatpush1.bf16.msra.mxu1 %v7201_v18  ;;  %v7270_v18 = vld [vmem:[%s10028_s9 + $0x8d0] ss:$28 sps:$4 sm:$0xff]  }
 0x47b   :  { %5647 = vmatpush1.bf16.msra.mxu0 %v7204_v19  ;;  %5607 = vmatprep.subr.bf16.mxu1 %v7209_v20  ;;  %v7275_v19 = vld [vmem:[%s10028_s9 + $0xc1c] ss:$28 sps:$4 sm:$0xff]  }
 0x47c   :  { %5648 = vmatprep.subr.bf16.mxu0 %v7212_v21  ;;  %v7276_v20 = vld [vmem:[%s10028_s9 + $0x360] ss:$28 sps:$4 sm:$0xff]   ;;  %v7273_v21 = vld [vmem:[%s10028_s9 + $0xc18] ss:$28 sps:$4 sm:$0xff]  }
 0x47e   :  { %5608 = vmatpush1.bf16.msra.mxu1 %v7207_v23  ;;  %v7277_v23 = vld [vmem:[%s10028_s9 + $0x1a0] ss:$28 sps:$4 sm:$0xff]  }
 0x47f   :  { %5649 = vmatpush1.bf16.msra.mxu0 %v7210_v25  ;;  %5609 = vmatprep.subr.bf16.mxu1 %v7215_v26  ;;  %v5345_v25 = vadd.f32 %v9497_v58, %v9301_v32  ;;  %v7280_v26 = vld [vmem:[%s10028_s9 + $0xbe4] ss:$28 sps:$4 sm:$0xff]  }
 0x480   :  { %5650 = vmatprep.subr.bf16.mxu0 %v7218_v34  ;;  %v7278_v58 = vld [vmem:[%s10028_s9 + $0xbe0] ss:$28 sps:$4 sm:$0xff]  }
 0x482   :  { %5610 = vmatpush1.bf16.msra.mxu1 %v7213_v37 }
 0x483   :  { %5651 = vmatpush1.bf16.msra.mxu0 %v7216_v29  ;;  %5611 = vmatprep.subr.bf16.mxu1 %v7221_v30  ;;  %v7281_v29 = vld [vmem:[%s10028_s9 + $0x328] ss:$28 sps:$4 sm:$0xff]   ;;  %v5347_v30 = vadd.f32 %v9507_v1, %v9314_v42 }
 0x484   :  { %5652 = vmatprep.subr.bf16.mxu0 %v7224_v36  ;;  %v7285_v42 = vld [vmem:[%s10028_s9 + $0xbac] ss:$28 sps:$4 sm:$0xff]  }
 0x486   :  { %5612 = vmatpush1.bf16.msra.mxu1 %v7219_v39 }
 0x487   :  { %5653 = vmatpush1.bf16.msra.mxu0 %v7222_v40  ;;  %5613 = vmatprep.subr.bf16.mxu1 %v7227_v41  ;;  %v7282_v40 = vld [vmem:[%s10028_s9 + $0x168] ss:$28 sps:$4 sm:$0xff]   ;;  %v7286_v41 = vld [vmem:[%s10028_s9 + $0x2f0] ss:$28 sps:$4 sm:$0xff]  }
 0x488   :  { %5654 = vmatprep.subr.bf16.mxu0 %v7230_v43 }
 0x48a   :  { %5614 = vmatpush2.bf16.msra.mxu1 %v7225_v44 }
 0x48b   :  { %5655 = vmatpush2.bf16.msra.mxu0 %v7228_v46  ;;  %5615 = vmatprep.subr.bf16.mxu1 %v7233_v47  ;;  %v7283_v46 = vld [vmem:[%s10028_s9 + $0xba8] ss:$28 sps:$4 sm:$0xff]  }
 0x48c   :  { %5656 = vmatprep.subr.bf16.mxu0 %v7236_v48 }
 0x48e   :  { %5616 = vmatpush2.bf16.msra.mxu1 %v7231_v49  ;;  %v7290_v49 = vld [vmem:[%s10028_s9 + $0xb74] ss:$28 sps:$4 sm:$0xff]  }
 0x48f   :  { %5657 = vmatpush2.bf16.msra.mxu0 %v7234_v59  ;;  %5617 = vmatprep.subr.bf16.mxu1 %v7239_v45  ;;  %v7291_v59 = vld [vmem:[%s10028_s9 + $0x2b8] ss:$28 sps:$4 sm:$0xff]   ;;  %v7288_v45 = vld [vmem:[%s10028_s9 + $0xb70] ss:$28 sps:$4 sm:$0xff]  }
 0x490   :  { %5658 = vmatprep.subr.bf16.mxu0 %v7242_v52  ;;  %v7292_v52 = vld [vmem:[%s10028_s9 + $0xf8] ss:$28 sps:$4 sm:$0xff]  }
 0x492   :  { %5618 = vmatpush2.bf16.msra.mxu1 %v7237_v60  ;;  %v7295_v60 = vld [vmem:[%s10028_s9 + $0xb3c] ss:$28 sps:$4 sm:$0xff]  }
 0x493   :  { %5659 = vmatpush2.bf16.msra.mxu0 %v7240_v53  ;;  %5619 = vmatprep.subr.bf16.mxu1 %v7245_v61  ;;  %v7296_v53 = vld [vmem:[%s10028_s9 + $0x280] ss:$28 sps:$4 sm:$0xff]   ;;  %v7293_v61 = vld [vmem:[%s10028_s9 + $0xb38] ss:$28 sps:$4 sm:$0xff]  }
 0x494   :  { %5660 = vmatprep.subr.bf16.mxu0 %v7248_v54  ;;  %v7297_v54 = vld [vmem:[%s10028_s9 + $0xc0] ss:$28 sps:$4 sm:$0xff]  }
 0x496   :  { %5620 = vmatpush2.bf16.msra.mxu1 %v7243_v62  ;;  %v7300_v62 = vld [vmem:[%s10028_s9 + $0xb04] ss:$28 sps:$4 sm:$0xff]  }
 0x497   :  { %5661 = vmatpush2.bf16.msra.mxu0 %v7246_v56  ;;  %5621 = vmatprep.subr.bf16.mxu1 %v7251_v51  ;;  %v7301_v56 = vld [vmem:[%s10028_s9 + $0x248] ss:$28 sps:$4 sm:$0xff]   ;;  %v7298_v51 = vld [vmem:[%s10028_s9 + $0xb00] ss:$28 sps:$4 sm:$0xff]  }
 0x498   :  { %5662 = vmatprep.subr.bf16.mxu0 %v7254_v0  ;;  %v7302_v0 = vld [vmem:[%s10028_s9 + $0x88] ss:$28 sps:$4 sm:$0xff]  }
 0x49a   :  { %5622 = vmatpush2.bf16.msra.mxu1 %v7249_v2  ;;  %v7305_v2 = vld [vmem:[%s10028_s9 + $0xacc] ss:$28 sps:$4 sm:$0xff]  }
 0x49b   :  { %5663 = vmatpush2.bf16.msra.mxu0 %v7252_v3  ;;  %5623 = vmatprep.subr.bf16.mxu1 %v7257_v4  ;;  %v7306_v3 = vld [vmem:[%s10028_s9 + $0x210] ss:$28 sps:$4 sm:$0xff]   ;;  %v7303_v4 = vld [vmem:[%s10028_s9 + $0xac8] ss:$28 sps:$4 sm:$0xff]  }
 0x49c   :  { %5664 = vmatprep.subr.bf16.mxu0 %v7260_v6  ;;  %v7307_v6 = vld [vmem:[%s10028_s9 + $0x50] ss:$28 sps:$4 sm:$0xff]  }
 0x49e   :  { %5624 = vmatpush2.bf16.msra.mxu1 %v7255_v8  ;;  %v7310_v8 = vld [vmem:[%s10028_s9 + $0xa94] ss:$28 sps:$4 sm:$0xff]  }
 0x49f   :  { %5665 = vmatpush2.bf16.msra.mxu0 %v7258_v9  ;;  %5625 = vmatprep.subr.bf16.mxu1 %v7263_v10  ;;  %v7311_v9 = vld [vmem:[%s10028_s9 + $0x1d8] ss:$28 sps:$4 sm:$0xff]   ;;  %v7308_v10 = vld [vmem:[%s10028_s9 + $0xa90] ss:$28 sps:$4 sm:$0xff]  }
 0x4a0   :  { %5666 = vmatprep.subr.bf16.mxu0 %v7266_v11  ;;  %v7312_v11 = vld [vmem:[%s10028_s9 + $0x18] ss:$28 sps:$4 sm:$0xff]  }
 0x4a2   :  { %5626 = vmatpush2.bf16.msra.mxu1 %v7261_v12  ;;  %v7315_v12 = vld [vmem:[%s10028_s9 + $0xddc] ss:$28 sps:$4 sm:$0xff]  }
 0x4a3   :  { %5667 = vmatpush2.bf16.msra.mxu0 %v7264_v14  ;;  %5627 = vmatprep.subr.bf16.mxu1 %v7269_v15  ;;  %v7316_v14 = vld [vmem:[%s10028_s9 + $0xa60] ss:$28 sps:$4 sm:$0xff]   ;;  %v7313_v15 = vld [vmem:[%s10028_s9 + $0xdd8] ss:$28 sps:$4 sm:$0xff]  }
 0x4a4   :  { %5668 = vmatprep.subr.bf16.mxu0 %v7272_v16  ;;  %v7317_v16 = vld [vmem:[%s10028_s9 + $0x8a0] ss:$28 sps:$4 sm:$0xff]  }
 0x4a6   :  { %5628 = vmatpush2.bf16.msra.mxu1 %v7267_v17  ;;  %v7320_v17 = vld [vmem:[%s10028_s9 + $0xda4] ss:$28 sps:$4 sm:$0xff]  }
 0x4a7   :  { %5669 = vmatpush2.bf16.msra.mxu0 %v7270_v18  ;;  %5679 = vmatprep.subr.bf16.mxu1 %v7275_v19  ;;  %v7321_v18 = vld [vmem:[%s10028_s9 + $0xa28] ss:$28 sps:$4 sm:$0xff]   ;;  %v7318_v19 = vld [vmem:[%s10028_s9 + $0xda0] ss:$28 sps:$4 sm:$0xff]  }
 0x4a8   :  { %6624 = vmatprep.subr.bf16.mxu0 %v7276_v20  ;;  %v7322_v20 = vld [vmem:[%s10028_s9 + $0x868] ss:$28 sps:$4 sm:$0xff]  }
 0x4a9   :  { %v9698_v34 = vpop.f32.mrf.mxu0  ;;  %5630 = vmatmul.mubr.bf16.vlgmr.msra.gmra.mxu1 %v8788_v31  ;;  %v5385_v37 = vpop.f32.mrf.mxu1 }
 0x4aa   :  { %5671 = vmatmul.mubr.bf16.vlgmr.msra.gmra.mxu0 %v8973_v57  ;;  %v5386_v32 = vadd.f32 %v5385_v37, %v5345_v25  ;;  %5680 = vmatpush1.bf16.msra.mxu1 %v7273_v21  ;;  %v7325_v21 = vld [vmem:[%s10028_s9 + $0xd6c] ss:$28 sps:$4 sm:$0xff]   ;;  %v7330_v25 = vld [vmem:[%s10028_s9 + $0xd34] ss:$28 sps:$4 sm:$0xff]  }
 0x4ab   :  { %5711 = vmatprep.mubr.bf16.mxu1 %v9077_v55  ;;  %6625 = vmatpush3.bf16.msra.mxu0 %v7277_v23  ;;  %v9711_v36 = vpop.f32.mrf.mxu0  ;;  %v5387_v39 = vpop.f32.mrf.mxu1  ;;  %v7323_v23 = vld [vmem:[%s10028_s9 + $0xd68] ss:$28 sps:$4 sm:$0xff]   ;;  %v7328_v37 = vld [vmem:[%s10028_s9 + $0xd30] ss:$28 sps:$4 sm:$0xff]  }
 0x4ac   :  { %5880 = vst [vmem:[#allocation2] sm:$0xff] %v5386_v32  ;;  %5752 = vmatprep.mubr.bf16.mxu0 %v8592_v5  ;;  %v5388_v1 = vadd.f32 %v5387_v39, %v5347_v30  ;;  %5681 = vmatprep.subr.bf16.mxu1 %v7280_v26  ;;  %v7287_v5 = vld [vmem:[%s10028_s9 + $0x130] ss:$28 sps:$4 sm:$0xff]   ;;  %v7331_v26 = vld [vmem:[%s10028_s9 + $0x9b8] ss:$28 sps:$4 sm:$0xff]  }
 0x4ad   :  { %v5430_v43 = vpop.f32.mrf.mxu0  ;;  %6626 = vmatprep.subr.bf16.mxu0 %v7281_v29  ;;  %v5389_v44 = vpop.f32.mrf.mxu1  ;;  %v7332_v29 = vld [vmem:[%s10028_s9 + $0x7f8] ss:$28 sps:$4 sm:$0xff]   ;;  %v7336_v32 = vld [vmem:[%s10028_s9 + $0x980] ss:$28 sps:$4 sm:$0xff]  }
 0x4ae   :  { %5881 = vst [vmem:[#allocation2 + $0x8] sm:$0xff] %v5388_v1  ;;  %5682 = vmatpush1.bf16.msra.mxu1 %v7278_v58  ;;  %v7335_v30 = vld [vmem:[%s10028_s9 + $0xcfc] ss:$28 sps:$4 sm:$0xff]   ;;  %v7345_v43 = vld [vmem:[%s10028_s9 + $0xc8c] ss:$28 sps:$4 sm:$0xff]  }
 0x4af   :  { %6627 = vmatpush3.bf16.msra.mxu0 %v7282_v40  ;;  %v5431_v47 = vpop.f32.mrf.mxu0  ;;  %v5390_v48 = vpop.f32.mrf.mxu1  ;;  %5683 = vmatprep.subr.bf16.mxu1 %v7285_v42  ;;  %v7333_v58 = vld [vmem:[%s10028_s9 + $0xcf8] ss:$28 sps:$4 sm:$0xff]   ;;  %v7337_v39 = vld [vmem:[%s10028_s9 + $0x7c0] ss:$28 sps:$4 sm:$0xff]   ;;  %v7341_v42 = vld [vmem:[%s10028_s9 + $0x948] ss:$28 sps:$4 sm:$0xff]  }
 0x4b0   :  { %6628 = vmatprep.subr.bf16.mxu0 %v7286_v41  ;;  %v7340_v40 = vld [vmem:[%s10028_s9 + $0xcc4] ss:$28 sps:$4 sm:$0xff]   ;;  %v7346_v44 = vld [vmem:[%s10028_s9 + $0x910] ss:$28 sps:$4 sm:$0xff]  }
 0x4b1   :  { %v7338_v1 = vld [vmem:[%s10028_s9 + $0xcc0] ss:$28 sps:$4 sm:$0xff]   ;;  %v7342_v41 = vld [vmem:[%s10028_s9 + $0x788] ss:$28 sps:$4 sm:$0xff]   ;;  %v7347_v47 = vld [vmem:[%s10028_s9 + $0x750] ss:$28 sps:$4 sm:$0xff]  }
 0x4b2   :  { %5684 = vmatpush1.bf16.msra.mxu1 %v7283_v46  ;;  %v7343_v46 = vld [vmem:[%s10028_s9 + $0xc88] ss:$28 sps:$4 sm:$0xff]   ;;  %v7350_v48 = vld [vmem:[%s10028_s9 + $0xc54] ss:$28 sps:$4 sm:$0xff]  }
 0x4b3   :  { %6629 = vmatpush3.bf16.msra.mxu0 %v7287_v5  ;;  %5685 = vmatprep.subr.bf16.mxu1 %v7290_v49  ;;  %v7351_v5 = vld [vmem:[%s10028_s9 + $0x8d8] ss:$28 sps:$4 sm:$0xff]   ;;  %v7348_v49 = vld [vmem:[%s10028_s9 + $0xc50] ss:$28 sps:$4 sm:$0xff]  }
 0x4b4   :  { %6630 = vmatprep.subr.bf16.mxu0 %v7291_v59  ;;  %v7352_v59 = vld [vmem:[%s10028_s9 + $0x718] ss:$28 sps:$4 sm:$0xff]  }
 0x4b6   :  { %5686 = vmatpush1.bf16.msra.mxu1 %v7288_v45  ;;  %v7353_v45 = vld [vmem:[%s10028_s9 + $0x6e0] ss:$28 sps:$4 sm:$0xff]  }
 0x4b7   :  { %6631 = vmatpush3.bf16.msra.mxu0 %v7292_v52  ;;  %5687 = vmatprep.subr.bf16.mxu1 %v7295_v60  ;;  %v7354_v52 = vld [vmem:[%s10028_s9 + $0x520] ss:$28 sps:$4 sm:$0xff]   ;;  %v7355_v60 = vld [vmem:[%s10028_s9 + $0x6a8] ss:$28 sps:$4 sm:$0xff]  }
 0x4b8   :  { %6632 = vmatprep.subr.bf16.mxu0 %v7296_v53 }
 0x4ba   :  { %5688 = vmatpush1.bf16.msra.mxu1 %v7293_v61 }
 0x4bb   :  { %6633 = vmatpush3.bf16.msra.mxu0 %v7297_v54  ;;  %5689 = vmatprep.subr.bf16.mxu1 %v7300_v62  ;;  %v7356_v54 = vld [vmem:[%s10028_s9 + $0x4e8] ss:$28 sps:$4 sm:$0xff]  }
 0x4bc   :  { %6634 = vmatprep.subr.bf16.mxu0 %v7301_v56 }
 0x4be   :  { %5690 = vmatpush1.bf16.msra.mxu1 %v7298_v51  ;;  %v7357_v51 = vld [vmem:[%s10028_s9 + $0x670] ss:$28 sps:$4 sm:$0xff]  }
 0x4bf   :  { %6635 = vmatpush3.bf16.msra.mxu0 %v7302_v0  ;;  %5691 = vmatprep.subr.bf16.mxu1 %v7305_v2 }
 0x4c0   :  { %6636 = vmatprep.subr.bf16.mxu0 %v7306_v3 }
 0x4c2   :  { %5692 = vmatpush1.bf16.msra.mxu1 %v7303_v4 }
 0x4c3   :  { %6637 = vmatpush3.bf16.msra.mxu0 %v7307_v6  ;;  %5693 = vmatprep.subr.bf16.mxu1 %v7310_v8  ;;  %v7360_v6 = vld [vmem:[%s10028_s9 + $0x478] ss:$28 sps:$4 sm:$0xff]   ;;  %v7361_v8 = vld [vmem:[%s10028_s9 + $0x600] ss:$28 sps:$4 sm:$0xff]  }
 0x4c4   :  { %6638 = vmatprep.subr.bf16.mxu0 %v7311_v9  ;;  %v7362_v9 = vld [vmem:[%s10028_s9 + $0x440] ss:$28 sps:$4 sm:$0xff]  }
 0x4c6   :  { %5694 = vmatpush1.bf16.msra.mxu1 %v7308_v10  ;;  %v7363_v10 = vld [vmem:[%s10028_s9 + $0x5c8] ss:$28 sps:$4 sm:$0xff]  }
 0x4c7   :  { %6639 = vmatpush3.bf16.msra.mxu0 %v7312_v11  ;;  %5695 = vmatprep.subr.bf16.mxu1 %v7315_v12  ;;  %v7364_v11 = vld [vmem:[%s10028_s9 + $0x408] ss:$28 sps:$4 sm:$0xff]   ;;  %v7365_v12 = vld [vmem:[%s10028_s9 + $0x590] ss:$28 sps:$4 sm:$0xff]  }
 0x4c8   :  { %6668 = vmatprep.subr.bf16.mxu0 %v7316_v14  ;;  %v7366_v14 = vld [vmem:[%s10028_s9 + $0x3d0] ss:$28 sps:$4 sm:$0xff]  }
 0x4ca   :  { %5753 = vmatmul.mubr.bf16.vlgmr.msra.gmra.mxu0 %v8760_v7  ;;  %5696 = vmatpush2.bf16.msra.mxu1 %v7313_v15  ;;  %v7326_v7 = vld [vmem:[%s10028_s9 + $0x9f0] ss:$28 sps:$4 sm:$0xff]   ;;  %v7367_v15 = vld [vmem:[%s10028_s9 + $0x558] ss:$28 sps:$4 sm:$0xff]  }
 0x4cb   :  { %6669 = vmatpush3.bf16.msra.mxu0 %v7317_v16  ;;  %5832 = vmatprep.mubr.bf16.mxu0 %v8968_v50  ;;  %v7327_v50 = vld [vmem:[%s10028_s9 + $0x830] ss:$28 sps:$4 sm:$0xff]   ;;  %v7368_v16 = vld [vmem:[%s10028_s9 + $0x398] ss:$28 sps:$4 sm:$0xff]  }
 0x4cc   :  { %5697 = vmatprep.subr.bf16.mxu1 %v7320_v17  ;;  %6670 = vmatprep.subr.bf16.mxu0 %v7321_v18  ;;  %v7369_v17 = vld [vmem:[%s10028_s9 + $0xde0] ss:$28 sps:$4 sm:$0xff]  }
 0x4cd   :  { %v7370_v18 = vld [vmem:[%s10028_s9 + $0xc20] ss:$28 sps:$4 sm:$0xff]  }
 0x4ce   :  { %5698 = vmatpush2.bf16.msra.mxu1 %v7318_v19  ;;  %v7371_v19 = vld [vmem:[%s10028_s9 + $0xda8] ss:$28 sps:$4 sm:$0xff]  }
 0x4cf   :  { %6671 = vmatpush3.bf16.msra.mxu0 %v7322_v20  ;;  %5699 = vmatprep.subr.bf16.mxu1 %v7325_v21  ;;  %v7372_v20 = vld [vmem:[%s10028_s9 + $0xbe8] ss:$28 sps:$4 sm:$0xff]   ;;  %v7373_v21 = vld [vmem:[%s10028_s9 + $0xd70] ss:$28 sps:$4 sm:$0xff]  }
 0x4d0   :  { %6672 = vmatprep.subr.bf16.mxu0 %v7326_v7  ;;  %v7374_v7 = vld [vmem:[%s10028_s9 + $0xbb0] ss:$28 sps:$4 sm:$0xff]  }
 0x4d2   :  { %5700 = vmatpush2.bf16.msra.mxu1 %v7323_v23  ;;  %v7377_v23 = vld [vmem:[%s10028_s9 + $0xd00] ss:$28 sps:$4 sm:$0xff]  }
 0x4d3   :  { %6673 = vmatpush3.bf16.msra.mxu0 %v7327_v50  ;;  %5701 = vmatprep.subr.bf16.mxu1 %v7330_v25  ;;  %v7378_v50 = vld [vmem:[%s10028_s9 + $0xb40] ss:$28 sps:$4 sm:$0xff]   ;;  %v7379_v25 = vld [vmem:[%s10028_s9 + $0xcc8] ss:$28 sps:$4 sm:$0xff]  }
 0x4d4   :  { %6674 = vmatprep.subr.bf16.mxu0 %v7331_v26  ;;  %v7380_v26 = vld [vmem:[%s10028_s9 + $0xb08] ss:$28 sps:$4 sm:$0xff]  }
 0x4d6   :  { %5702 = vmatpush2.bf16.msra.mxu1 %v7328_v37  ;;  %v7381_v37 = vld [vmem:[%s10028_s9 + $0xc90] ss:$28 sps:$4 sm:$0xff]  }
 0x4d7   :  { %6675 = vmatpush3.bf16.msra.mxu0 %v7332_v29  ;;  %5703 = vmatprep.subr.bf16.mxu1 %v7335_v30  ;;  %v2900_v29 = vrot.slane %v9269_v13, %v7936_v35  ;;  %v7382_v30 = vld [vmem:[%s10028_s9 + $0xad0] ss:$28 sps:$4 sm:$0xff]   ;;  %v7384_v35 = vld [vmem:[%s10028_s9 + $0xa98] ss:$28 sps:$4 sm:$0xff]  }
 0x4d8   :  { %6676 = vmatprep.subr.bf16.mxu0 %v7336_v32  ;;  %v7383_v32 = vld [vmem:[%s10028_s9 + $0xc58] ss:$28 sps:$4 sm:$0xff]  }
 0x4da   :  { %5704 = vmatpush2.bf16.msra.mxu1 %v7333_v58  ;;  %v2904_v58 = vrot.slane %v9269_v13, %v7945_v38 }
 0x4db   :  { %6677 = vmatpush3.bf16.msra.mxu0 %v7337_v39  ;;  %5705 = vmatprep.subr.bf16.mxu1 %v7340_v40  ;;  %v5427_v39 = vadd.f32 %v9698_v34, %v2900_v29 }
 0x4dc   :  { %6678 = vmatprep.subr.bf16.mxu0 %v7341_v42  ;;  %v5429_v40 = vadd.f32 %v9711_v36, %v2904_v58 }
 0x4de   :  { %5706 = vmatpush2.bf16.msra.mxu1 %v7338_v1 }
 0x4df   :  { %6679 = vmatpush3.bf16.msra.mxu0 %v7342_v41  ;;  %5707 = vmatprep.subr.bf16.mxu1 %v7345_v43 }
 0x4e0   :  { %6680 = vmatprep.subr.bf16.mxu0 %v7346_v44 }
 0x4e2   :  { %5708 = vmatpush2.bf16.msra.mxu1 %v7343_v46 }
 0x4e3   :  { %6681 = vmatpush3.bf16.msra.mxu0 %v7347_v47  ;;  %5709 = vmatprep.subr.bf16.mxu1 %v7350_v48 }
 0x4e4   :  { %6682 = vmatprep.subr.bf16.mxu0 %v7351_v5 }
 0x4e6   :  { %5710 = vmatpush2.bf16.msra.mxu1 %v7348_v49 }
 0x4e7   :  { %6683 = vmatpush3.bf16.msra.mxu0 %v7352_v59  ;;  %6646 = vmatprep.subr.bf16.mxu1 %v7353_v45 }
 0x4e9   :  { %v9896_v53 = vpop.f32.mrf.mxu1  ;;  %v9898_v61 = vpop.f32.mrf.mxu0  ;;  %5712 = vmatmul.mubr.bf16.vlgmr.msra.gmra.mxu1 %v9085_v63 }
 0x4ea   :  { %5833 = vmatmul.mubr.bf16.vlgmr.msra.gmra.mxu0 %v8973_v57  ;;  %6647 = vmatpush3.bf16.msra.mxu1 %v7354_v52  ;;  %v7358_v57 = vld [vmem:[%s10028_s9 + $0x4b0] ss:$28 sps:$4 sm:$0xff]   ;;  %v5468_v42 = vadd.f32 %v9896_v53, %v5427_v39 }
 0x4eb   :  { %5792 = vmatprep.mubr.bf16.mxu1 %v8780_v28  ;;  %v9906_v62 = vpop.f32.mrf.mxu1  ;;  %v9908_v56 = vpop.f32.mrf.mxu0  ;;  %6648 = vmatprep.subr.bf16.mxu1 %v7355_v60  ;;  %v7359_v28 = vld [vmem:[%s10028_s9 + $0x638] ss:$28 sps:$4 sm:$0xff]  }
 0x4ec   :  { %v5470_v1 = vadd.f32 %v9906_v62, %v5429_v40  ;;  %v5509_v41 = vadd.f32 %v9898_v61, %v5468_v42 }
 0x4ed   :  { %v5471_v0 = vpop.f32.mrf.mxu1  ;;  %v5512_v2 = vpop.f32.mrf.mxu0 }
 0x4ee   :  { %6649 = vmatpush3.bf16.msra.mxu1 %v7356_v54  ;;  %v5511_v38 = vadd.f32 %v9908_v56, %v5470_v1 }
 0x4ef   :  { %v5472_v3 = vpop.f32.mrf.mxu1  ;;  %v5513_v4 = vpop.f32.mrf.mxu0  ;;  %6650 = vmatprep.subr.bf16.mxu1 %v7357_v51 }
 0x4f2   :  { %6651 = vmatpush3.bf16.msra.mxu1 %v7358_v57  ;;  %v7385_v57 = vld [vmem:[%s10029_s10] sm:$0x7f]  ;;  %s7410_s10 = smov [#allocation2]  }
 0x4f3   :  { %6652 = vmatprep.subr.bf16.mxu1 %v7359_v28  ;;  %v2908_v3 = vrot.slane %v7385_v57, %v729_v22  ;;  %v2912_v4 = vrot.slane %v7385_v57, %v733_v27  ;;  %s5894_s21 = sshll.u32 %s7410_s10, 4  ;;  %s5895_s21 = int_to_ptr.vmem [resolvable:$true] %s5894_s21 }
 0x4f4   :  { %s7386_s22 = scalar_lea.vmem %s5895_s21, 896  ;;  %p7391_p1 = scmp.lt.s32.totalorder %s5895_s21, %s5895_s21 }
 0x4f5   :  { %p7387_p0 = scmp.ne.s32.totalorder %s5895_s21, %s7386_s22  ;;  %p7392_p2 = scmp.lt.s32.totalorder %s7386_s22, %s7386_s22 }
 0x4f6   :  { %6653 = vmatpush3.bf16.msra.mxu1 %v7360_v6 }
 0x4f7   :  { %6654 = vmatprep.subr.bf16.mxu1 %v7361_v8  ;;  %p7393_p3 = por %p7392_p2, %p7391_p1 }
 0x4f9   :  { %p7394_p4 = pnand %p7393_p3, %p7387_p0 }
 0x4fa   :  { %6655 = vmatpush3.bf16.msra.mxu1 %v7362_v9 }
 0x4fb   :  { %6656 = vmatprep.subr.bf16.mxu1 %v7363_v10 }
 0x4fe   :  { %6657 = vmatpush3.bf16.msra.mxu1 %v7364_v11 }
 0x4ff   :  { %6658 = vmatprep.subr.bf16.mxu1 %v7365_v12 }
 0x502   :  { %6659 = vmatpush3.bf16.msra.mxu1 %v7366_v14 }
 0x503   :  { %6660 = vmatprep.subr.bf16.mxu1 %v7367_v15 }
 0x506   :  { %6661 = vmatpush3.bf16.msra.mxu1 %v7368_v16 }
 0x507   :  { %6690 = vmatprep.subr.bf16.mxu1 %v7369_v17 }
 0x509   :  { %5793 = vmatmul.mubr.bf16.vlgmr.msra.gmra.mxu1 %v8788_v31  ;;  %v7375_v31 = vld [vmem:[%s10028_s9 + $0xd38] ss:$28 sps:$4 sm:$0xff]  }
 0x50a   :  { %6691 = vmatpush3.bf16.msra.mxu1 %v7370_v18  ;;  %5872 = vmatprep.mubr.bf16.mxu1 %v9077_v55  ;;  %v7376_v55 = vld [vmem:[%s10028_s9 + $0xb78] ss:$28 sps:$4 sm:$0xff]  }
 0x50b   :  { %6692 = vmatprep.subr.bf16.mxu1 %v7371_v19 }
 0x50e   :  { %6693 = vmatpush3.bf16.msra.mxu1 %v7372_v20 }
 0x50f   :  { %6694 = vmatprep.subr.bf16.mxu1 %v7373_v21 }
 0x512   :  { %6695 = vmatpush3.bf16.msra.mxu1 %v7374_v7 }
 0x513   :  { %6696 = vmatprep.subr.bf16.mxu1 %v7375_v31 }
 0x516   :  { %6697 = vmatpush3.bf16.msra.mxu1 %v7376_v55 }
 0x517   :  { %6698 = vmatprep.subr.bf16.mxu1 %v7377_v23  ;;  %v2916_v23 = vrot.slane %v7385_v57, %v737_v24 }
 0x51a   :  { %6699 = vmatpush3.bf16.msra.mxu1 %v7378_v50 }
 0x51b   :  { %6700 = vmatprep.subr.bf16.mxu1 %v7379_v25 }
 0x51e   :  { %6701 = vmatpush3.bf16.msra.mxu1 %v7380_v26 }
 0x51f   :  { %6702 = vmatprep.subr.bf16.mxu1 %v7381_v37 }
 0x522   :  { %6703 = vmatpush3.bf16.msra.mxu1 %v7382_v30 }
 0x523   :  { %6704 = vmatprep.subr.bf16.mxu1 %v7383_v32 }
 0x526   :  { %6705 = vmatpush3.bf16.msra.mxu1 %v7384_v35 }
 0x529   :  { %v5549_v43 = vpop.f32.mrf.mxu1  ;;  %5873 = vmatmul.mubr.bf16.vlgmr.msra.gmra.mxu1 %v9085_v63 }
 0x52a   :  { %v5550_v13 = vadd.f32 %v5549_v43, %v5509_v41  ;;  %v5590_v34 = vpop.f32.mrf.mxu0 }
 0x52b   :  { %v5551_v44 = vpop.f32.mrf.mxu1  ;;  %v5591_v28 = vadd.f32 %v5590_v34, %v2908_v3 }
 0x52c   :  { %5882 = vst [vmem:[#allocation2 + $0x10] sm:$0xff] %v5550_v13  ;;  %v5552_v46 = vadd.f32 %v5551_v44, %v5511_v38  ;;  %v5592_v47 = vpop.f32.mrf.mxu0 }
 0x52d   :  { %v5553_v48 = vpop.f32.mrf.mxu1  ;;  %v5593_v6 = vadd.f32 %v5592_v47, %v2912_v4 }
 0x52e   :  { %5883 = vst [vmem:[#allocation2 + $0x18] sm:$0xff] %v5552_v46  ;;  %v5594_v36 = vpop.f32.mrf.mxu0 }
 0x52f   :  { %v5554_v5 = vpop.f32.mrf.mxu1 }
 0x530   :  { %v5595_v49 = vpop.f32.mrf.mxu0 }
 0x569   :  { %v5631_v59 = vpop.f32.mrf.mxu1 }
 0x56a   :  { %v5672_v45 = vpop.f32.mrf.mxu0  ;;  %v5632_v8 = vadd.f32 %v5631_v59, %v5591_v28 }
 0x56b   :  { %v5633_v52 = vpop.f32.mrf.mxu1 }
 0x56c   :  { %v5674_v60 = vpop.f32.mrf.mxu0  ;;  %v5634_v9 = vadd.f32 %v5633_v52, %v5593_v6  ;;  %v5673_v10 = vadd.f32 %v5672_v45, %v5632_v8 }
 0x56d   :  { %v5635_v53 = vpop.f32.mrf.mxu1 }
 0x56e   :  { %v5676_v61 = vpop.f32.mrf.mxu0  ;;  %v5675_v12 = vadd.f32 %v5674_v60, %v5634_v9 }
 0x56f   :  { %v5636_v63 = vpop.f32.mrf.mxu1 }
 0x570   :  { %v5677_v54 = vpop.f32.mrf.mxu0 }
 0x58a   :  { %v6640_v62 = vpop.f32.mrf.mxu0 }
 0x58c   :  { %v6641_v56 = vpop.f32.mrf.mxu0 }
 0x58d   :  { %v6642_v51 = vadd.f32 %v6641_v56, %v6640_v62 }
 0x58e   :  { %v6643_v0 = vpop.f32.mrf.mxu0 }
 0x58f   :  { %v5755_v25 = vadd.f32 %v6642_v51, %v2916_v23 }
 0x590   :  { %v6644_v2 = vpop.f32.mrf.mxu0 }
 0x5a9   :  { %v5713_v11 = vpop.f32.mrf.mxu1 }
 0x5aa   :  { %v5714_v14 = vadd.f32 %v5713_v11, %v5673_v10  ;;  %v6684_v15 = vpop.f32.mrf.mxu0 }
 0x5ab   :  { %v5715_v16 = vpop.f32.mrf.mxu1 }
 0x5ac   :  { %5884 = vst [vmem:[#allocation2 + $0x20] sm:$0xff] %v5714_v14  ;;  %v5716_v17 = vadd.f32 %v5715_v16, %v5675_v12  ;;  %v6685_v18 = vpop.f32.mrf.mxu0 }
 0x5ad   :  { %v5717_v19 = vpop.f32.mrf.mxu1  ;;  %v6686_v29 = vadd.f32 %v6685_v18, %v6684_v15 }
 0x5ae   :  { %5885 = vst [vmem:[#allocation2 + $0x28] sm:$0xff] %v5716_v17  ;;  %v6687_v20 = vpop.f32.mrf.mxu0 }
 0x5af   :  { %v5718_v22 = vpop.f32.mrf.mxu1 }
 0x5b0   :  { %v6688_v21 = vpop.f32.mrf.mxu0 }
 0x5c9   :  { %v6662_v7 = vpop.f32.mrf.mxu1 }
 0x5cb   :  { %v6663_v27 = vpop.f32.mrf.mxu1 }
 0x5cc   :  { %v6664_v50 = vadd.f32 %v6663_v27, %v6662_v7 }
 0x5cd   :  { %v6665_v31 = vpop.f32.mrf.mxu1 }
 0x5ce   :  { %v5795_v26 = vadd.f32 %v6664_v50, %v5755_v25 }
 0x5cf   :  { %v6666_v55 = vpop.f32.mrf.mxu1 }
 0x5d0   :  { %v5835_v32 = vadd.f32 %v6686_v29, %v5795_v26 }
 0x5e9   :  { %v6706_v37 = vpop.f32.mrf.mxu1 }
 0x5eb   :  { %v6707_v30 = vpop.f32.mrf.mxu1 }
 0x5ec   :  { %v6708_v58 = vadd.f32 %v6707_v30, %v6706_v37 }
 0x5ed   :  { %v6709_v39 = vpop.f32.mrf.mxu1 }
 0x5ee   :  { %v5875_v35 = vadd.f32 %v6708_v58, %v5835_v32 }
 0x5ef   :  { %v6710_v40 = vpop.f32.mrf.mxu1 }
 0x5f0   :  { %5887 = vst.msk [vmem:[#allocation2 + $0x30] sm:$0xff] %vm5886_vm3, %v5875_v35 }
 0x5f1   :  { %7397 = shalt.err (!%p7394_p4)
}
 0x5f2   :  { %5897 = dma.vmem_to_hbm [thread:$0]  %s5895_s21, 896, %s10030_s11, [#allocation3]  }
 0x5f3   :  { %7406 = dma.done.wait [#allocation3], 896  }
 0x5f4   :  { %7407 = vsyncadd [#allocation3], 4294966400 }
 0x5f5   :  { %5901 = vsyncpa [#allocation3], 1 }

// kernel: tpu_custom_call.1
= control target key start
LH: loop header
LB: loop body
LE: loop exit
PB: predicated region body
PF: predicated region fallthrough
CT: control target
= control target key end

     0   :  { %v7408_v1 = vmov 0.0   ;;  %vm7409_vm0 = vmmov 0   ;;  %vm52_vm1 = vcmask 261120   ;;  %s10019_s0 = inlined_call_operand.vmem [shape: f32[8,32], index: 0, kind: input, shape index: {}]   ;;  %s10020_s1 = inlined_call_operand.vmem [shape: f32[32,64], index: 1, kind: input, shape index: {}]   ;;  %s10021_s2 = inlined_call_operand.vmem [shape: f32[1,64], index: 2, kind: input, shape index: {}]   ;;  %s10022_s3 = inlined_call_operand.vmem [shape: f32[64,128], index: 3, kind: input, shape index: {}]   ;;  %s10023_s4 = inlined_call_operand.vmem [shape: f32[1,128], index: 4, kind: input, shape index: {}]   ;;  %s10024_s5 = inlined_call_operand.vmem [shape: f32[128,512], index: 5, kind: input, shape index: {}]   ;;  %s10025_s6 = inlined_call_operand.vmem [shape: f32[1,512], index: 6, kind: input, shape index: {}]   ;;  %s10026_s7 = inlined_call_operand.vmem [shape: bf16[512,1024], index: 7, kind: input, shape index: {}]   ;;  %s10027_s8 = inlined_call_operand.vmem [shape: f32[1,1024], index: 8, kind: input, shape index: {}]   ;;  %s10028_s9 = inlined_call_operand.vmem [shape: bf16[1024,819], index: 9, kind: input, shape index: {}]   ;;  %s10029_s10 = inlined_call_operand.vmem [shape: f32[1,819], index: 10, kind: input, shape index: {}]   ;;  %s10030_s11 = inlined_call_operand.hbm [shape: f32[8,819], index: 11, kind: output, shape index: {}]  }
   0x1   :  { %v44_v0 = vld [vmem:[%s10020_s1 + $0x18] sm:$0xff]  ;;  %6712 = vmatprep.subr.mxu0 %v7408_v1  ;;  %v43_v2 = vld [vmem:[%s10020_s1 + $0x10] sm:$0xff]  ;;  %6720 = vmatprep.mubr.msk.f32.mxu0 %vm7409_vm0, %v7408_v1  ;;  %v42_v4 = vld [vmem:[%s10020_s1 + $0x8] sm:$0xff] }
   0x2   :  { %v134_v3 = vld [vmem:[%s10022_s3 + $0x38] sm:$0xff]  ;;  %6713 = vmatpush3.msra.mxu0 %v44_v0  ;;  %6723 = vmatprep.subr.mxu1 %v7408_v1  ;;  %v133_v5 = vld [vmem:[%s10022_s3 + $0x30] sm:$0xff]  ;;  %v41_v6 = vld [vmem:[%s10020_s1] sm:$0xff] }
   0x3   :  { %6714 = vmatprep.subr.mxu0 %v7408_v1  ;;  %6724 = vmatpush3.msra.mxu1 %v134_v3  ;;  %v132_v7 = vld [vmem:[%s10022_s3 + $0x28] sm:$0xff]  ;;  %v40_v8 = vld [vmem:[%s10019_s0] sm:$0xff]  ;;  %v130_v10 = vld [vmem:[%s10022_s3 + $0x18] sm:$0xff] }
   0x4   :  { %6715 = vmatpush3.msra.mxu0 %v43_v2  ;;  %6725 = vmatprep.subr.mxu1 %v7408_v1  ;;  %v131_v9 = vld [vmem:[%s10022_s3 + $0x20] sm:$0xff]  ;;  %v129_v11 = vld [vmem:[%s10022_s3 + $0x10] sm:$0xff]  ;;  %v128_v12 = vld [vmem:[%s10022_s3 + $0x8] sm:$0xff] }
   0x5   :  { %6716 = vmatprep.subr.mxu0 %v7408_v1  ;;  %6726 = vmatpush3.msra.mxu1 %v133_v5  ;;  %v127_v13 = vld [vmem:[%s10022_s3] sm:$0xff]  ;;  %v278_v14 = vld [vmem:[%s10024_s5 + $0x1e8] sm:$0xff]  ;;  %v280_v15 = vld [vmem:[%s10024_s5 + $0x1f8] sm:$0xff] }
   0x6   :  { %6717 = vmatpush3.msra.mxu0 %v42_v4  ;;  %6727 = vmatprep.subr.mxu1 %v7408_v1  ;;  %v277_v16 = vld [vmem:[%s10024_s5 + $0x1e0] sm:$0xff]  ;;  %v274_v17 = vld [vmem:[%s10024_s5 + $0x1c8] sm:$0xff] }
   0x7   :  { %6718 = vmatprep.subr.mxu0 %v7408_v1  ;;  %6728 = vmatpush3.msra.mxu1 %v132_v7  ;;  %v273_v18 = vld [vmem:[%s10024_s5 + $0x1c0] sm:$0xff]  ;;  %v270_v19 = vld [vmem:[%s10024_s5 + $0x1a8] sm:$0xff] }
   0x8   :  { %6719 = vmatpush3.msra.mxu0 %v41_v6  ;;  %6729 = vmatprep.subr.mxu1 %v7408_v1  ;;  %v269_v20 = vld [vmem:[%s10024_s5 + $0x1a0] sm:$0xff]  ;;  %v266_v21 = vld [vmem:[%s10024_s5 + $0x188] sm:$0xff] }
   0x9   :  { %6721 = vmatmul.mubr.msk.f32.vlgmr.msra.gmra.mxu0 %vm52_vm1, %v40_v8  ;;  %6730 = vmatpush3.msra.mxu1 %v131_v9  ;;  %v265_v22 = vld [vmem:[%s10024_s5 + $0x180] sm:$0xff]  ;;  %v262_v23 = vld [vmem:[%s10024_s5 + $0x168] sm:$0xff] }
   0xa   :  { %6731 = vmatprep.subr.mxu1 %v7408_v1  ;;  %6739 = vmatprep.mubr.msk.f32.mxu1 %vm7409_vm0, %v7408_v1  ;;  %v261_v24 = vld [vmem:[%s10024_s5 + $0x160] sm:$0xff]  ;;  %v258_v25 = vld [vmem:[%s10024_s5 + $0x148] sm:$0xff] }
   0xb   :  { %6732 = vmatpush3.msra.mxu1 %v130_v10  ;;  %367 = vmatprep.mubr.f32.mxu0 %v7408_v1  ;;  %v257_v26 = vld [vmem:[%s10024_s5 + $0x140] sm:$0xff]  ;;  %v254_v27 = vld [vmem:[%s10024_s5 + $0x128] sm:$0xff] }
   0xc   :  { %6733 = vmatprep.subr.mxu1 %v7408_v1  ;;  %303 = vmatprep.subr.mxu0 %v278_v14  ;;  %v253_v28 = vld [vmem:[%s10024_s5 + $0x120] sm:$0xff]  ;;  %v250_v29 = vld [vmem:[%s10024_s5 + $0x108] sm:$0xff] }
   0xd   :  { %6734 = vmatpush3.msra.mxu1 %v129_v11  ;;  %304 = vmatpush1.msra.mxu0 %v277_v16  ;;  %v249_v30 = vld [vmem:[%s10024_s5 + $0x100] sm:$0xff]  ;;  %v246_v31 = vld [vmem:[%s10024_s5 + $0xe8] sm:$0xff] }
   0xe   :  { %6735 = vmatprep.subr.mxu1 %v7408_v1  ;;  %305 = vmatprep.subr.mxu0 %v274_v17  ;;  %v245_v32 = vld [vmem:[%s10024_s5 + $0xe0] sm:$0xff]  ;;  %v242_v33 = vld [vmem:[%s10024_s5 + $0xc8] sm:$0xff] }
   0xf   :  { %6736 = vmatpush3.msra.mxu1 %v128_v12  ;;  %306 = vmatpush1.msra.mxu0 %v273_v18  ;;  %v241_v34 = vld [vmem:[%s10024_s5 + $0xc0] sm:$0xff]  ;;  %v238_v35 = vld [vmem:[%s10024_s5 + $0xa8] sm:$0xff] }
  0x10   :  { %6737 = vmatprep.subr.mxu1 %v7408_v1  ;;  %307 = vmatprep.subr.mxu0 %v270_v19  ;;  %v237_v36 = vld [vmem:[%s10024_s5 + $0xa0] sm:$0xff]  ;;  %v234_v37 = vld [vmem:[%s10024_s5 + $0x88] sm:$0xff] }
  0x11   :  { %6738 = vmatpush3.msra.mxu1 %v127_v13  ;;  %308 = vmatpush1.msra.mxu0 %v269_v20  ;;  %v233_v38 = vld [vmem:[%s10024_s5 + $0x80] sm:$0xff]  ;;  %v230_v39 = vld [vmem:[%s10024_s5 + $0x68] sm:$0xff] }
  0x12   :  { %374 = vmatprep.subr.mxu1 %v280_v15  ;;  %309 = vmatprep.subr.mxu0 %v266_v21  ;;  %v229_v40 = vld [vmem:[%s10024_s5 + $0x60] sm:$0xff]  ;;  %v226_v41 = vld [vmem:[%s10024_s5 + $0x48] sm:$0xff] }
  0x13   :  { %310 = vmatpush1.msra.mxu0 %v265_v22 }
  0x14   :  { %311 = vmatprep.subr.mxu0 %v262_v23 }
  0x15   :  { %312 = vmatpush1.msra.mxu0 %v261_v24 }
  0x16   :  { %313 = vmatprep.subr.mxu0 %v258_v25 }
  0x17   :  { %314 = vmatpush1.msra.mxu0 %v257_v26 }
  0x18   :  { %315 = vmatprep.subr.mxu0 %v254_v27 }
  0x19   :  { %316 = vmatpush1.msra.mxu0 %v253_v28 }
  0x1a   :  { %317 = vmatprep.subr.mxu0 %v250_v29 }
  0x1b   :  { %318 = vmatpush1.msra.mxu0 %v249_v30 }
  0x1c   :  { %319 = vmatprep.subr.mxu0 %v246_v31 }
  0x1d   :  { %320 = vmatpush1.msra.mxu0 %v245_v32 }
  0x1e   :  { %321 = vmatprep.subr.mxu0 %v242_v33 }
  0x1f   :  { %322 = vmatpush1.msra.mxu0 %v241_v34 }
  0x20   :  { %323 = vmatprep.subr.mxu0 %v238_v35 }
  0x21   :  { %324 = vmatpush1.msra.mxu0 %v237_v36 }
  0x22   :  { %325 = vmatprep.subr.mxu0 %v234_v37 }
  0x23   :  { %326 = vmatpush1.msra.mxu0 %v233_v38 }
  0x24   :  { %327 = vmatprep.subr.mxu0 %v230_v39 }
  0x25   :  { %328 = vmatpush1.msra.mxu0 %v229_v40 }
  0x26   :  { %329 = vmatprep.subr.mxu0 %v226_v41 }
  0x27   :  { %16 = vsyncpa [#allocation3], 0  ;;  %v5902_v42 = vld [vmem:[%s10021_s2] ss:$0 sm:$0xff]  ;;  %vm142_vm2 = vcmask 523264   ;;  %v279_v47 = vld [vmem:[%s10024_s5 + $0x1f0] sm:$0xff] }
  0x28   :  { %v276_v48 = vld [vmem:[%s10024_s5 + $0x1d8] sm:$0xff]  ;;  %v275_v49 = vld [vmem:[%s10024_s5 + $0x1d0] sm:$0xff]  ;;  %v225_v9 = vld [vmem:[%s10024_s5 + $0x40] sm:$0xff]  ;;  %vm5886_vm3 = vcmask 416768  }
  0x29   :  { %v272_v50 = vld [vmem:[%s10024_s5 + $0x1b8] sm:$0xff]  ;;  %v271_v51 = vld [vmem:[%s10024_s5 + $0x1b0] sm:$0xff]  ;;  %330 = vmatpush1.msra.mxu0 %v225_v9  ;;  %v222_v11 = vld [vmem:[%s10024_s5 + $0x28] sm:$0xff] }
  0x2a   :  { %v268_v52 = vld [vmem:[%s10024_s5 + $0x198] sm:$0xff]  ;;  %v267_v53 = vld [vmem:[%s10024_s5 + $0x190] sm:$0xff]  ;;  %331 = vmatprep.subr.mxu0 %v222_v11  ;;  %v221_v13 = vld [vmem:[%s10024_s5 + $0x20] sm:$0xff] }
  0x2b   :  { %v264_v54 = vld [vmem:[%s10024_s5 + $0x178] sm:$0xff]  ;;  %v263_v55 = vld [vmem:[%s10024_s5 + $0x170] sm:$0xff]  ;;  %332 = vmatpush1.msra.mxu0 %v221_v13  ;;  %v218_v15 = vld [vmem:[%s10024_s5 + $0x8] sm:$0xff] }
  0x2c   :  { %v260_v56 = vld [vmem:[%s10024_s5 + $0x158] sm:$0xff]  ;;  %v259_v57 = vld [vmem:[%s10024_s5 + $0x150] sm:$0xff]  ;;  %333 = vmatprep.subr.mxu0 %v218_v15  ;;  %v217_v17 = vld [vmem:[%s10024_s5] sm:$0xff] }
  0x2d   :  { %v256_v58 = vld [vmem:[%s10024_s5 + $0x138] sm:$0xff]  ;;  %v255_v59 = vld [vmem:[%s10024_s5 + $0x130] sm:$0xff]  ;;  %334 = vmatpush1.msra.mxu0 %v217_v17  ;;  %v509_v19 = vld [vmem:[%s10026_s7 + $0x1c0] sm:$0xff] }
  0x2e   :  { %v252_v60 = vld [vmem:[%s10024_s5 + $0x118] sm:$0xff]  ;;  %v251_v61 = vld [vmem:[%s10024_s5 + $0x110] sm:$0xff]  ;;  %v513_v20 = vld [vmem:[%s10026_s7 + $0x1e0] sm:$0xff] }
  0x2f   :  { %v248_v62 = vld [vmem:[%s10024_s5 + $0xf8] sm:$0xff]  ;;  %v247_v63 = vld [vmem:[%s10024_s5 + $0xf0] sm:$0xff]  ;;  %v637_v21 = vld [vmem:[%s10026_s7 + $0x5c0] sm:$0xff]  ;;  %v5962_v22 = vcombine.low %v509_v19, %v513_v20  ;;  %v5963_v23 = vcombine.high %v509_v19, %v513_v20 }
  0x30   :  { %v244_v0 = vld [vmem:[%s10024_s5 + $0xd8] sm:$0xff]  ;;  %v239_v3 = vld [vmem:[%s10024_s5 + $0xb0] sm:$0xff]  ;;  %v641_v24 = vld [vmem:[%s10026_s7 + $0x5e0] sm:$0xff] }
  0x31   :  { %v240_v2 = vld [vmem:[%s10024_s5 + $0xb8] sm:$0xff]  ;;  %v235_v5 = vld [vmem:[%s10024_s5 + $0x90] sm:$0xff]  ;;  %v6090_v25 = vcombine.low %v637_v21, %v641_v24  ;;  %v6091_v26 = vcombine.high %v637_v21, %v641_v24  ;;  %2031 = vmatprep.subr.bf16.mxu0 %v5963_v23  ;;  %v5904_v27 = vld [vmem:[%s10023_s4] ss:$0 sm:$0xff] }
  0x32   :  { %v236_v4 = vld [vmem:[%s10024_s5 + $0x98] sm:$0xff]  ;;  %v231_v7 = vld [vmem:[%s10024_s5 + $0x70] sm:$0xff]  ;;  %v501_v28 = vld [vmem:[%s10026_s7 + $0x180] sm:$0xff] }
  0x33   :  { %v232_v6 = vld [vmem:[%s10024_s5 + $0x78] sm:$0xff]  ;;  %v227_v10 = vld [vmem:[%s10024_s5 + $0x50] sm:$0xff]  ;;  %v505_v30 = vld [vmem:[%s10026_s7 + $0x1a0] sm:$0xff] }
  0x34   :  { %v228_v8 = vld [vmem:[%s10024_s5 + $0x58] sm:$0xff]  ;;  %v223_v14 = vld [vmem:[%s10024_s5 + $0x30] sm:$0xff]  ;;  %v629_v31 = vld [vmem:[%s10026_s7 + $0x580] sm:$0xff]  ;;  %v5955_v36 = vcombine.high %v501_v28, %v505_v30 }
  0x35   :  { %v224_v12 = vld [vmem:[%s10024_s5 + $0x38] sm:$0xff]  ;;  %v219_v18 = vld [vmem:[%s10024_s5 + $0x10] sm:$0xff]  ;;  %v633_v32 = vld [vmem:[%s10026_s7 + $0x5a0] sm:$0xff] }
  0x36   :  { %v220_v16 = vld [vmem:[%s10024_s5 + $0x18] sm:$0xff]  ;;  %v6083_v37 = vcombine.high %v629_v31, %v633_v32  ;;  %v493_v38 = vld [vmem:[%s10026_s7 + $0x140] sm:$0xff] }
  0x37   :  { %v497_v39 = vld [vmem:[%s10026_s7 + $0x160] sm:$0xff] }
  0x38   :  { %v621_v40 = vld [vmem:[%s10026_s7 + $0x540] sm:$0xff] }
  0x39   :  { %v625_v41 = vld [vmem:[%s10026_s7 + $0x560] sm:$0xff] }
  0x3a   :  { %v593_v9 = vld [vmem:[%s10026_s7 + $0x460] sm:$0xff] }
  0x3b   :  { %v457_v15 = vld [vmem:[%s10026_s7 + $0x20] sm:$0xff] }
  0x3c   :  { %v585_v17 = vld [vmem:[%s10026_s7 + $0x420] sm:$0xff] }
  0x3d   :  { %v577_v23 = vld [vmem:[%s10026_s7 + $0x3e0] sm:$0xff] }
  0x3e   :  { %v701_v24 = vld [vmem:[%s10026_s7 + $0x7c0] sm:$0xff] }
  0xc9   :  { %v122_v43 = vpop.f32.mrf.mxu0 }
  0xca   :  { %v123_v44 = vadd.f32 %v5902_v42, %v122_v43  ;;  %v5954_v42 = vcombine.low %v501_v28, %v505_v30  ;;  %v6082_v43 = vcombine.low %v629_v31, %v633_v32  ;;  %v565_v30 = vld [vmem:[%s10026_s7 + $0x380] sm:$0xff] }
  0xcb   :  { %v6722_v45 = vpop.f32.mrf.mxu0  ;;  %v569_v31 = vld [vmem:[%s10026_s7 + $0x3a0] sm:$0xff] }
  0xcc   :  { %v126_v46 = vmax.f32 %v123_v44, 0.0  ;;  %v5947_v44 = vcombine.high %v493_v38, %v497_v39  ;;  %v6075_v45 = vcombine.high %v621_v40, %v625_v41  ;;  %v693_v32 = vld [vmem:[%s10026_s7 + $0x780] sm:$0xff] }
  0xce   :  { %6740 = vmatmul.mubr.msk.f32.vlgmr.msra.gmra.mxu1 %vm142_vm2, %v126_v46  ;;  %v485_v46 = vld [vmem:[%s10026_s7 + $0x100] sm:$0xff] }
  0xcf   :  { %375 = vmatpush1.msra.mxu1 %v279_v47  ;;  %438 = vmatprep.mubr.f32.mxu1 %v7408_v1  ;;  %v243_v1 = vld [vmem:[%s10024_s5 + $0xd0] sm:$0xff]  ;;  %v489_v47 = vld [vmem:[%s10026_s7 + $0x120] sm:$0xff] }
  0xd0   :  { %376 = vmatprep.subr.mxu1 %v276_v48  ;;  %v613_v48 = vld [vmem:[%s10026_s7 + $0x500] sm:$0xff] }
  0xd1   :  { %377 = vmatpush1.msra.mxu1 %v275_v49  ;;  %v617_v49 = vld [vmem:[%s10026_s7 + $0x520] sm:$0xff] }
  0xd2   :  { %378 = vmatprep.subr.mxu1 %v272_v50  ;;  %v5946_v50 = vcombine.low %v493_v38, %v497_v39  ;;  %v557_v38 = vld [vmem:[%s10026_s7 + $0x340] sm:$0xff] }
  0xd3   :  { %379 = vmatpush1.msra.mxu1 %v271_v51  ;;  %v6074_v51 = vcombine.low %v621_v40, %v625_v41  ;;  %v561_v39 = vld [vmem:[%s10026_s7 + $0x360] sm:$0xff] }
  0xd4   :  { %380 = vmatprep.subr.mxu1 %v268_v52  ;;  %v5939_v52 = vcombine.high %v485_v46, %v489_v47  ;;  %v685_v40 = vld [vmem:[%s10026_s7 + $0x740] sm:$0xff] }
  0xd5   :  { %381 = vmatpush1.msra.mxu1 %v267_v53  ;;  %v6067_v53 = vcombine.high %v613_v48, %v617_v49  ;;  %v689_v41 = vld [vmem:[%s10026_s7 + $0x760] sm:$0xff] }
  0xd6   :  { %382 = vmatprep.subr.mxu1 %v264_v54  ;;  %v477_v54 = vld [vmem:[%s10026_s7 + $0xc0] sm:$0xff] }
  0xd7   :  { %383 = vmatpush1.msra.mxu1 %v263_v55  ;;  %v481_v55 = vld [vmem:[%s10026_s7 + $0xe0] sm:$0xff] }
  0xd8   :  { %384 = vmatprep.subr.mxu1 %v260_v56  ;;  %v605_v56 = vld [vmem:[%s10026_s7 + $0x4c0] sm:$0xff] }
  0xd9   :  { %385 = vmatpush1.msra.mxu1 %v259_v57  ;;  %v609_v57 = vld [vmem:[%s10026_s7 + $0x4e0] sm:$0xff] }
  0xda   :  { %386 = vmatprep.subr.mxu1 %v256_v58  ;;  %v5938_v58 = vcombine.low %v485_v46, %v489_v47  ;;  %v549_v46 = vld [vmem:[%s10026_s7 + $0x300] sm:$0xff] }
  0xdb   :  { %387 = vmatpush1.msra.mxu1 %v255_v59  ;;  %v6066_v59 = vcombine.low %v613_v48, %v617_v49  ;;  %v553_v47 = vld [vmem:[%s10026_s7 + $0x320] sm:$0xff] }
  0xdc   :  { %388 = vmatprep.subr.mxu1 %v252_v60  ;;  %v5931_v60 = vcombine.high %v477_v54, %v481_v55  ;;  %v677_v48 = vld [vmem:[%s10026_s7 + $0x700] sm:$0xff] }
  0xdd   :  { %389 = vmatpush1.msra.mxu1 %v251_v61  ;;  %v6059_v61 = vcombine.high %v605_v56, %v609_v57  ;;  %v681_v49 = vld [vmem:[%s10026_s7 + $0x720] sm:$0xff] }
  0xde   :  { %390 = vmatprep.subr.mxu1 %v248_v62  ;;  %v469_v62 = vld [vmem:[%s10026_s7 + $0x80] sm:$0xff] }
  0xdf   :  { %391 = vmatpush1.msra.mxu1 %v247_v63  ;;  %v473_v63 = vld [vmem:[%s10026_s7 + $0xa0] sm:$0xff] }
  0xe0   :  { %392 = vmatprep.subr.mxu1 %v244_v0  ;;  %v597_v0 = vld [vmem:[%s10026_s7 + $0x480] sm:$0xff] }
  0xe1   :  { %393 = vmatpush1.msra.mxu1 %v243_v1  ;;  %v601_v1 = vld [vmem:[%s10026_s7 + $0x4a0] sm:$0xff] }
  0xe2   :  { %394 = vmatprep.subr.mxu1 %v240_v2  ;;  %v5930_v2 = vcombine.low %v477_v54, %v481_v55  ;;  %v6050_v11 = vcombine.low %v597_v0, %v601_v1  ;;  %v541_v54 = vld [vmem:[%s10026_s7 + $0x2c0] sm:$0xff] }
  0xe3   :  { %395 = vmatpush1.msra.mxu1 %v239_v3  ;;  %v6058_v3 = vcombine.low %v605_v56, %v609_v57  ;;  %v545_v55 = vld [vmem:[%s10026_s7 + $0x2e0] sm:$0xff] }
  0xe4   :  { %396 = vmatprep.subr.mxu1 %v236_v4  ;;  %v5923_v4 = vcombine.high %v469_v62, %v473_v63  ;;  %v669_v56 = vld [vmem:[%s10026_s7 + $0x6c0] sm:$0xff] }
  0xe5   :  { %397 = vmatpush1.msra.mxu1 %v235_v5  ;;  %v6051_v5 = vcombine.high %v597_v0, %v601_v1  ;;  %v673_v57 = vld [vmem:[%s10026_s7 + $0x6e0] sm:$0xff] }
  0xe6   :  { %398 = vmatprep.subr.mxu1 %v232_v6  ;;  %v461_v6 = vld [vmem:[%s10026_s7 + $0x40] sm:$0xff] }
  0xe7   :  { %399 = vmatpush1.msra.mxu1 %v231_v7  ;;  %v465_v7 = vld [vmem:[%s10026_s7 + $0x60] sm:$0xff] }
  0xe8   :  { %400 = vmatprep.subr.mxu1 %v228_v8  ;;  %v589_v8 = vld [vmem:[%s10026_s7 + $0x440] sm:$0xff] }
  0xe9   :  { %401 = vmatpush1.msra.mxu1 %v227_v10  ;;  %v5922_v10 = vcombine.low %v469_v62, %v473_v63  ;;  %v6043_v13 = vcombine.high %v589_v8, %v593_v9  ;;  %v6042_v19 = vcombine.low %v589_v8, %v593_v9  ;;  %v533_v62 = vld [vmem:[%s10026_s7 + $0x280] sm:$0xff] }
  0xea   :  { %402 = vmatprep.subr.mxu1 %v224_v12  ;;  %v5915_v12 = vcombine.high %v461_v6, %v465_v7  ;;  %v537_v63 = vld [vmem:[%s10026_s7 + $0x2a0] sm:$0xff] }
  0xeb   :  { %403 = vmatpush1.msra.mxu1 %v223_v14  ;;  %v453_v14 = vld [vmem:[%s10026_s7] sm:$0xff] }
  0xec   :  { %404 = vmatprep.subr.mxu1 %v220_v16  ;;  %v581_v16 = vld [vmem:[%s10026_s7 + $0x400] sm:$0xff]  ;;  %v5907_v20 = vcombine.high %v453_v14, %v457_v15 }
  0xed   :  { %405 = vmatpush1.msra.mxu1 %v219_v18  ;;  %v5914_v18 = vcombine.low %v461_v6, %v465_v7  ;;  %v6035_v21 = vcombine.high %v581_v16, %v585_v17  ;;  %v661_v0 = vld [vmem:[%s10026_s7 + $0x680] sm:$0xff]  ;;  %v5986_v6 = vcombine.low %v533_v62, %v537_v63 }
  0xee   :  { %2072 = vmatprep.subr.bf16.mxu1 %v6091_v26  ;;  %v5906_v26 = vcombine.low %v453_v14, %v457_v15  ;;  %v665_v1 = vld [vmem:[%s10026_s7 + $0x6a0] sm:$0xff] }
  0xef   :  { %v6114_v7 = vcombine.low %v661_v0, %v665_v1  ;;  %v525_v8 = vld [vmem:[%s10026_s7 + $0x240] sm:$0xff] }
  0xf0   :  { %v529_v9 = vld [vmem:[%s10026_s7 + $0x260] sm:$0xff] }
 0x18e   :  { %v212_v29 = vpop.f32.mrf.mxu1 }
 0x18f   :  { %v213_v33 = vadd.f32 %v5904_v27, %v212_v29  ;;  %v6034_v27 = vcombine.low %v581_v16, %v585_v17  ;;  %v517_v16 = vld [vmem:[%s10026_s7 + $0x200] sm:$0xff] }
 0x190   :  { %v6741_v34 = vpop.f32.mrf.mxu1  ;;  %v521_v17 = vld [vmem:[%s10026_s7 + $0x220] sm:$0xff] }
 0x191   :  { %v216_v35 = vmax.f32 %v213_v33, 0.0  ;;  %v697_v33 = vld [vmem:[%s10026_s7 + $0x7a0] sm:$0xff] }
 0x193   :  { %368 = vmatmul.mubr.f32.vlgmr.msra.gmra.mxu0 %v216_v35  ;;  %439 = vmatmul.mubr.f32.vlgmr.msra.gmra.mxu1 %v216_v35 }
 0x194   :  { %2032 = vmatpush1.bf16.msra.mxu0 %v5962_v22  ;;  %2073 = vmatpush1.bf16.msra.mxu1 %v6090_v25  ;;  %v573_v22 = vld [vmem:[%s10026_s7 + $0x3c0] sm:$0xff] }
 0x195   :  { %2033 = vmatprep.subr.bf16.mxu0 %v5955_v36  ;;  %2074 = vmatprep.subr.bf16.mxu1 %v6083_v37  ;;  %v705_v25 = vld [vmem:[%s10026_s7 + $0x7e0] sm:$0xff]  ;;  %v6027_v28 = vcombine.high %v573_v22, %v577_v23  ;;  %v6026_v34 = vcombine.low %v573_v22, %v577_v23  ;;  %v6019_v36 = vcombine.high %v565_v30, %v569_v31 }
 0x196   :  { %v6155_v29 = vcombine.high %v701_v24, %v705_v25  ;;  %v6154_v35 = vcombine.low %v701_v24, %v705_v25  ;;  %v6147_v37 = vcombine.high %v693_v32, %v697_v33  ;;  %v510_v24 = vld [vmem:[%s10026_s7 + $0x1c8] sm:$0xff] }
 0x197   :  { %v514_v25 = vld [vmem:[%s10026_s7 + $0x1e8] sm:$0xff] }
 0x198   :  { %2034 = vmatpush1.bf16.msra.mxu0 %v5954_v42  ;;  %2075 = vmatpush1.bf16.msra.mxu1 %v6082_v43  ;;  %v6018_v42 = vcombine.low %v565_v30, %v569_v31  ;;  %v6146_v43 = vcombine.low %v693_v32, %v697_v33  ;;  %v283_v32 = vlaneseq }
 0x199   :  { %2035 = vmatprep.subr.bf16.mxu0 %v5947_v44  ;;  %2076 = vmatprep.subr.bf16.mxu1 %v6075_v45  ;;  %v6011_v44 = vcombine.high %v557_v38, %v561_v39  ;;  %v6139_v45 = vcombine.high %v685_v40, %v689_v41 }
 0x19a   :  { %v7930_v33 = vshrl.u32 %v283_v32, 7 }
 0x19c   :  { %2036 = vmatpush1.bf16.msra.mxu0 %v5946_v50  ;;  %2077 = vmatpush1.bf16.msra.mxu1 %v6074_v51  ;;  %v6010_v50 = vcombine.low %v557_v38, %v561_v39  ;;  %v6138_v51 = vcombine.low %v685_v40, %v689_v41  ;;  %v7945_v38 = vsub.s32 3, %v7930_v33 }
 0x19d   :  { %2037 = vmatprep.subr.bf16.mxu0 %v5939_v52  ;;  %2078 = vmatprep.subr.bf16.mxu1 %v6067_v53  ;;  %v6003_v52 = vcombine.high %v549_v46, %v553_v47  ;;  %v6131_v53 = vcombine.high %v677_v48, %v681_v49 }
 0x1a0   :  { %2038 = vmatpush1.bf16.msra.mxu0 %v5938_v58  ;;  %2079 = vmatpush1.bf16.msra.mxu1 %v6066_v59  ;;  %v6002_v58 = vcombine.low %v549_v46, %v553_v47  ;;  %v6130_v59 = vcombine.low %v677_v48, %v681_v49 }
 0x1a1   :  { %2039 = vmatprep.subr.bf16.mxu0 %v5931_v60  ;;  %2080 = vmatprep.subr.bf16.mxu1 %v6059_v61  ;;  %v5995_v60 = vcombine.high %v541_v54, %v545_v55  ;;  %v6123_v61 = vcombine.high %v669_v56, %v673_v57 }
 0x1a4   :  { %2040 = vmatpush1.bf16.msra.mxu0 %v5930_v2  ;;  %2081 = vmatpush1.bf16.msra.mxu1 %v6058_v3  ;;  %v5994_v2 = vcombine.low %v541_v54, %v545_v55  ;;  %v6122_v3 = vcombine.low %v669_v56, %v673_v57  ;;  %v502_v55 = vld [vmem:[%s10026_s7 + $0x188] sm:$0xff] }
 0x1a5   :  { %2041 = vmatprep.subr.bf16.mxu0 %v5923_v4  ;;  %2082 = vmatprep.subr.bf16.mxu1 %v6051_v5  ;;  %v5987_v4 = vcombine.high %v533_v62, %v537_v63  ;;  %v6115_v5 = vcombine.high %v661_v0, %v665_v1  ;;  %v506_v56 = vld [vmem:[%s10026_s7 + $0x1a8] sm:$0xff] }
 0x1a6   :  { %v630_v57 = vld [vmem:[%s10026_s7 + $0x588] sm:$0xff]  ;;  %v5957_v0 = vcombine.high %v502_v55, %v506_v56 }
 0x1a7   :  { %v494_v63 = vld [vmem:[%s10026_s7 + $0x148] sm:$0xff] }
 0x1a8   :  { %2042 = vmatpush1.bf16.msra.mxu0 %v5922_v10  ;;  %2083 = vmatpush1.bf16.msra.mxu1 %v6050_v11  ;;  %v653_v10 = vld [vmem:[%s10026_s7 + $0x640] sm:$0xff]  ;;  %v5979_v11 = vcombine.high %v525_v8, %v529_v9 }
 0x1a9   :  { %2043 = vmatprep.subr.bf16.mxu0 %v5915_v12  ;;  %2084 = vmatprep.subr.bf16.mxu1 %v6043_v13  ;;  %v657_v12 = vld [vmem:[%s10026_s7 + $0x660] sm:$0xff]  ;;  %v5978_v13 = vcombine.low %v525_v8, %v529_v9  ;;  %v486_v9 = vld [vmem:[%s10026_s7 + $0x108] sm:$0xff] }
 0x1aa   :  { %v6106_v14 = vcombine.low %v653_v10, %v657_v12  ;;  %v6107_v15 = vcombine.high %v653_v10, %v657_v12  ;;  %v490_v10 = vld [vmem:[%s10026_s7 + $0x128] sm:$0xff] }
 0x1ab   :  { %v618_v12 = vld [vmem:[%s10026_s7 + $0x528] sm:$0xff] }
 0x1ac   :  { %2044 = vmatpush1.bf16.msra.mxu0 %v5914_v18  ;;  %2085 = vmatpush1.bf16.msra.mxu1 %v6042_v19  ;;  %v645_v18 = vld [vmem:[%s10026_s7 + $0x600] sm:$0xff]  ;;  %v5971_v19 = vcombine.high %v517_v16, %v521_v17 }
 0x1ad   :  { %2045 = vmatprep.subr.bf16.mxu0 %v5907_v20  ;;  %2086 = vmatprep.subr.bf16.mxu1 %v6035_v21  ;;  %v649_v20 = vld [vmem:[%s10026_s7 + $0x620] sm:$0xff]  ;;  %v5970_v21 = vcombine.low %v517_v16, %v521_v17  ;;  %v478_v17 = vld [vmem:[%s10026_s7 + $0xc8] sm:$0xff] }
 0x1ae   :  { %v6098_v22 = vcombine.low %v645_v18, %v649_v20  ;;  %v6099_v23 = vcombine.high %v645_v18, %v649_v20  ;;  %v482_v18 = vld [vmem:[%s10026_s7 + $0xe8] sm:$0xff] }
 0x1af   :  { %v610_v20 = vld [vmem:[%s10026_s7 + $0x4e8] sm:$0xff] }
 0x1b0   :  { %2046 = vmatpush1.bf16.msra.mxu0 %v5906_v26  ;;  %2087 = vmatpush1.bf16.msra.mxu1 %v6034_v27  ;;  %v638_v26 = vld [vmem:[%s10026_s7 + $0x5c8] sm:$0xff]  ;;  %v5965_v27 = vcombine.high %v510_v24, %v514_v25 }
 0x1b1   :  { %2047 = vmatprep.subr.bf16.mxu0 %v6027_v28  ;;  %2088 = vmatprep.subr.bf16.mxu1 %v6155_v29  ;;  %v642_v28 = vld [vmem:[%s10026_s7 + $0x5e8] sm:$0xff]  ;;  %v5964_v29 = vcombine.low %v510_v24, %v514_v25 }
 0x1b2   :  { %v6092_v30 = vcombine.low %v638_v26, %v642_v28  ;;  %v6093_v31 = vcombine.high %v638_v26, %v642_v28  ;;  %v470_v25 = vld [vmem:[%s10026_s7 + $0x88] sm:$0xff] }
 0x1b3   :  { %v474_v26 = vld [vmem:[%s10026_s7 + $0xa8] sm:$0xff] }
 0x1b4   :  { %2048 = vmatpush2.bf16.msra.mxu0 %v6026_v34  ;;  %2089 = vmatpush2.bf16.msra.mxu1 %v6154_v35  ;;  %v7933_v34 = vsub.s32 0, %v7930_v33  ;;  %v7936_v35 = vsub.s32 2, %v7930_v33  ;;  %v602_v28 = vld [vmem:[%s10026_s7 + $0x4a8] sm:$0xff] }
 0x1b5   :  { %2049 = vmatprep.subr.bf16.mxu0 %v6019_v36  ;;  %2090 = vmatprep.subr.bf16.mxu1 %v6147_v37  ;;  %v281_v36 = vld [vmem:[%s10025_s6] sm:$0xf]  ;;  %v7942_v37 = vsub.s32 1, %v7930_v33 }
 0x1b6   :  { %v286_v39 = vrot.slane %v281_v36, %v7933_v34  ;;  %v294_v40 = vrot.slane %v281_v36, %v7936_v35 }
 0x1b7   :  { %v290_v41 = vrot.slane %v281_v36, %v7942_v37 }
 0x1b8   :  { %2050 = vmatpush2.bf16.msra.mxu0 %v6018_v42  ;;  %2091 = vmatpush2.bf16.msra.mxu1 %v6146_v43  ;;  %v298_v42 = vrot.slane %v281_v36, %v7945_v38  ;;  %v462_v36 = vld [vmem:[%s10026_s7 + $0x48] sm:$0xff] }
 0x1b9   :  { %2051 = vmatprep.subr.bf16.mxu0 %v6011_v44  ;;  %2092 = vmatprep.subr.bf16.mxu1 %v6139_v45 }
 0x1bc   :  { %2052 = vmatpush2.bf16.msra.mxu0 %v6010_v50  ;;  %2093 = vmatpush2.bf16.msra.mxu1 %v6138_v51 }
 0x1bd   :  { %2053 = vmatprep.subr.bf16.mxu0 %v6003_v52  ;;  %2094 = vmatprep.subr.bf16.mxu1 %v6131_v53 }
 0x1c0   :  { %2054 = vmatpush2.bf16.msra.mxu0 %v6002_v58  ;;  %2095 = vmatpush2.bf16.msra.mxu1 %v6130_v59  ;;  %v634_v58 = vld [vmem:[%s10026_s7 + $0x5a8] sm:$0xff] }
 0x1c1   :  { %2055 = vmatprep.subr.bf16.mxu0 %v5995_v60  ;;  %2096 = vmatprep.subr.bf16.mxu1 %v6123_v61  ;;  %v6085_v1 = vcombine.high %v630_v57, %v634_v58 }
 0x1c4   :  { %2056 = vmatpush2.bf16.msra.mxu0 %v5994_v2  ;;  %2097 = vmatpush2.bf16.msra.mxu1 %v6122_v3  ;;  %v498_v2 = vld [vmem:[%s10026_s7 + $0x168] sm:$0xff] }
 0x1c5   :  { %2057 = vmatprep.subr.bf16.mxu0 %v5987_v4  ;;  %2098 = vmatprep.subr.bf16.mxu1 %v6115_v5  ;;  %v622_v3 = vld [vmem:[%s10026_s7 + $0x548] sm:$0xff]  ;;  %v5956_v5 = vcombine.low %v502_v55, %v506_v56 }
 0x1c6   :  { %v626_v4 = vld [vmem:[%s10026_s7 + $0x568] sm:$0xff] }
 0x1c7   :  { %v6077_v8 = vcombine.high %v622_v3, %v626_v4  ;;  %v578_v55 = vld [vmem:[%s10026_s7 + $0x3e8] sm:$0xff] }
 0x1c8   :  { %2058 = vmatpush2.bf16.msra.mxu0 %v5986_v6  ;;  %2099 = vmatpush2.bf16.msra.mxu1 %v6114_v7  ;;  %v6084_v6 = vcombine.low %v630_v57, %v634_v58  ;;  %v5949_v7 = vcombine.high %v494_v63, %v498_v2  ;;  %v702_v56 = vld [vmem:[%s10026_s7 + $0x7c8] sm:$0xff] }
 0x1c9   :  { %2059 = vmatprep.subr.bf16.mxu0 %v5979_v11  ;;  %2100 = vmatprep.subr.bf16.mxu1 %v6107_v15  ;;  %v614_v11 = vld [vmem:[%s10026_s7 + $0x508] sm:$0xff]  ;;  %v5941_v15 = vcombine.high %v486_v9, %v490_v10 }
 0x1ca   :  { %v6069_v16 = vcombine.high %v614_v11, %v618_v12  ;;  %v706_v57 = vld [vmem:[%s10026_s7 + $0x7e8] sm:$0xff] }
 0x1cc   :  { %2060 = vmatpush2.bf16.msra.mxu0 %v5978_v13  ;;  %2101 = vmatpush2.bf16.msra.mxu1 %v6106_v14  ;;  %v5948_v13 = vcombine.low %v494_v63, %v498_v2  ;;  %v6076_v14 = vcombine.low %v622_v3, %v626_v4  ;;  %v566_v2 = vld [vmem:[%s10026_s7 + $0x388] sm:$0xff] }
 0x1cd   :  { %2061 = vmatprep.subr.bf16.mxu0 %v5971_v19  ;;  %2102 = vmatprep.subr.bf16.mxu1 %v6099_v23  ;;  %v606_v19 = vld [vmem:[%s10026_s7 + $0x4c8] sm:$0xff]  ;;  %v5933_v23 = vcombine.high %v478_v17, %v482_v18 }
 0x1ce   :  { %v6061_v24 = vcombine.high %v606_v19, %v610_v20  ;;  %v570_v3 = vld [vmem:[%s10026_s7 + $0x3a8] sm:$0xff] }
 0x1cf   :  { %v694_v4 = vld [vmem:[%s10026_s7 + $0x788] sm:$0xff] }
 0x1d0   :  { %2062 = vmatpush2.bf16.msra.mxu0 %v5970_v21  ;;  %2103 = vmatpush2.bf16.msra.mxu1 %v6098_v22  ;;  %v5940_v21 = vcombine.low %v486_v9, %v490_v10  ;;  %v6068_v22 = vcombine.low %v614_v11, %v618_v12  ;;  %v558_v10 = vld [vmem:[%s10026_s7 + $0x348] sm:$0xff] }
 0x1d1   :  { %2113 = vmatprep.subr.bf16.mxu0 %v5965_v27  ;;  %2154 = vmatprep.subr.bf16.mxu1 %v6093_v31  ;;  %v598_v27 = vld [vmem:[%s10026_s7 + $0x488] sm:$0xff]  ;;  %v5925_v31 = vcombine.high %v470_v25, %v474_v26 }
 0x1d2   :  { %v6053_v32 = vcombine.high %v598_v27, %v602_v28  ;;  %v562_v11 = vld [vmem:[%s10026_s7 + $0x368] sm:$0xff] }
 0x1d3   :  { %v686_v12 = vld [vmem:[%s10026_s7 + $0x748] sm:$0xff] }
 0x253   :  { %v369_v43 = vpop.f32.mrf.mxu0  ;;  %v440_v44 = vpop.f32.mrf.mxu1 }
 0x254   :  { %v370_v45 = vadd.f32 %v369_v43, %v286_v39  ;;  %v441_v46 = vadd.f32 %v440_v44, %v294_v40  ;;  %v466_v39 = vld [vmem:[%s10026_s7 + $0x68] sm:$0xff]  ;;  %v6052_v43 = vcombine.low %v598_v27, %v602_v28 }
 0x255   :  { %v371_v47 = vpop.f32.mrf.mxu0  ;;  %v442_v48 = vpop.f32.mrf.mxu1  ;;  %v590_v40 = vld [vmem:[%s10026_s7 + $0x448] sm:$0xff]  ;;  %v5917_v44 = vcombine.high %v462_v36, %v466_v39 }
 0x256   :  { %v372_v49 = vadd.f32 %v371_v47, %v290_v41  ;;  %v443_v50 = vadd.f32 %v442_v48, %v298_v42  ;;  %v445_v51 = vmax.f32 %v370_v45, 0.0  ;;  %v447_v52 = vmax.f32 %v441_v46, 0.0  ;;  %v594_v41 = vld [vmem:[%s10026_s7 + $0x468] sm:$0xff] }
 0x257   :  { %v5924_v42 = vcombine.low %v470_v25, %v474_v26  ;;  %v6045_v45 = vcombine.high %v590_v40, %v594_v41  ;;  %v454_v46 = vld [vmem:[%s10026_s7 + $0x8] sm:$0xff] }
 0x258   :  { %v446_v53 = vmax.f32 %v372_v49, 0.0  ;;  %v448_v54 = vmax.f32 %v443_v50, 0.0  ;;  %v7967_v61 = vpack.c.bf16 %v445_v51, %v445_v51  ;;  %v7969_v62 = vpack.c.bf16 %v447_v52, %v447_v52  ;;  %v458_v47 = vld [vmem:[%s10026_s7 + $0x28] sm:$0xff] }
 0x259   :  { %v582_v48 = vld [vmem:[%s10026_s7 + $0x408] sm:$0xff]  ;;  %v5916_v50 = vcombine.low %v462_v36, %v466_v39  ;;  %v6044_v51 = vcombine.low %v590_v40, %v594_v41  ;;  %v5909_v52 = vcombine.high %v454_v46, %v458_v47  ;;  %v5908_v58 = vcombine.low %v454_v46, %v458_v47 }
 0x25a   :  { %v7963_v59 = vpack.c.bf16 %v446_v53, %v446_v53  ;;  %v7965_v60 = vpack.c.bf16 %v448_v54, %v448_v54  ;;  %v586_v49 = vld [vmem:[%s10026_s7 + $0x428] sm:$0xff] }
 0x25b   :  { %v6037_v53 = vcombine.high %v582_v48, %v586_v49  ;;  %v574_v54 = vld [vmem:[%s10026_s7 + $0x3c8] sm:$0xff]  ;;  %v6036_v63 = vcombine.low %v582_v48, %v586_v49 }
 0x25c   :  { %2063 = vmatprep.mubr.bf16.mxu0 %v7963_v59  ;;  %2104 = vmatprep.mubr.bf16.mxu1 %v7965_v60  ;;  %v542_v26 = vld [vmem:[%s10026_s7 + $0x2c8] sm:$0xff] }
 0x25d   :  { %2064 = vmatmul.mubr.bf16.vlgmr.msra.gmra.mxu0 %v7967_v61  ;;  %2105 = vmatmul.mubr.bf16.vlgmr.msra.gmra.mxu1 %v7969_v62  ;;  %v546_v27 = vld [vmem:[%s10026_s7 + $0x2e8] sm:$0xff] }
 0x25e   :  { %2114 = vmatpush1.bf16.msra.mxu0 %v5964_v29  ;;  %2155 = vmatpush1.bf16.msra.mxu1 %v6092_v30  ;;  %v5932_v29 = vcombine.low %v478_v17, %v482_v18  ;;  %v6060_v30 = vcombine.low %v606_v19, %v610_v20  ;;  %v550_v18 = vld [vmem:[%s10026_s7 + $0x308] sm:$0xff] }
 0x25f   :  { %2145 = vmatprep.mubr.bf16.mxu0 %v7963_v59  ;;  %2186 = vmatprep.mubr.bf16.mxu1 %v7965_v60  ;;  %v554_v19 = vld [vmem:[%s10026_s7 + $0x328] sm:$0xff] }
 0x260   :  { %2115 = vmatprep.subr.bf16.mxu0 %v5957_v0  ;;  %2156 = vmatprep.subr.bf16.mxu1 %v6085_v1  ;;  %v6029_v0 = vcombine.high %v574_v54, %v578_v55  ;;  %v6157_v1 = vcombine.high %v702_v56, %v706_v57  ;;  %v678_v20 = vld [vmem:[%s10026_s7 + $0x708] sm:$0xff] }
 0x261   :  { %v670_v28 = vld [vmem:[%s10026_s7 + $0x6c8] sm:$0xff] }
 0x262   :  { %2116 = vmatpush1.bf16.msra.mxu0 %v5956_v5  ;;  %2157 = vmatpush1.bf16.msra.mxu1 %v6084_v6  ;;  %v698_v5 = vld [vmem:[%s10026_s7 + $0x7a8] sm:$0xff]  ;;  %v6028_v6 = vcombine.low %v574_v54, %v578_v55 }
 0x263   :  { %2117 = vmatprep.subr.bf16.mxu0 %v5949_v7  ;;  %2158 = vmatprep.subr.bf16.mxu1 %v6077_v8  ;;  %v6156_v7 = vcombine.low %v702_v56, %v706_v57  ;;  %v6021_v8 = vcombine.high %v566_v2, %v570_v3  ;;  %v6149_v9 = vcombine.high %v694_v4, %v698_v5  ;;  %v534_v39 = vld [vmem:[%s10026_s7 + $0x288] sm:$0xff] }
 0x264   :  { %v538_v40 = vld [vmem:[%s10026_s7 + $0x2a8] sm:$0xff] }
 0x265   :  { %v662_v41 = vld [vmem:[%s10026_s7 + $0x688] sm:$0xff] }
 0x266   :  { %2118 = vmatpush1.bf16.msra.mxu0 %v5948_v13  ;;  %2159 = vmatpush1.bf16.msra.mxu1 %v6076_v14  ;;  %v690_v13 = vld [vmem:[%s10026_s7 + $0x768] sm:$0xff]  ;;  %v6020_v14 = vcombine.low %v566_v2, %v570_v3  ;;  %v511_v3 = vld [vmem:[%s10026_s7 + $0x1d0] sm:$0xff] }
 0x267   :  { %2119 = vmatprep.subr.bf16.mxu0 %v5941_v15  ;;  %2160 = vmatprep.subr.bf16.mxu1 %v6069_v16  ;;  %v6148_v15 = vcombine.low %v694_v4, %v698_v5  ;;  %v6013_v16 = vcombine.high %v558_v10, %v562_v11  ;;  %v6141_v17 = vcombine.high %v686_v12, %v690_v13  ;;  %v526_v47 = vld [vmem:[%s10026_s7 + $0x248] sm:$0xff]  ;;  %v515_v4 = vld [vmem:[%s10026_s7 + $0x1f0] sm:$0xff] }
 0x268   :  { %v530_v48 = vld [vmem:[%s10026_s7 + $0x268] sm:$0xff]  ;;  %v639_v5 = vld [vmem:[%s10026_s7 + $0x5d0] sm:$0xff] }
 0x269   :  { %v654_v49 = vld [vmem:[%s10026_s7 + $0x648] sm:$0xff] }
 0x26a   :  { %2120 = vmatpush1.bf16.msra.mxu0 %v5940_v21  ;;  %2161 = vmatpush1.bf16.msra.mxu1 %v6068_v22  ;;  %v682_v21 = vld [vmem:[%s10026_s7 + $0x728] sm:$0xff]  ;;  %v6012_v22 = vcombine.low %v558_v10, %v562_v11  ;;  %v503_v11 = vld [vmem:[%s10026_s7 + $0x190] sm:$0xff] }
 0x26b   :  { %2121 = vmatprep.subr.bf16.mxu0 %v5933_v23  ;;  %2162 = vmatprep.subr.bf16.mxu1 %v6061_v24  ;;  %v6140_v23 = vcombine.low %v686_v12, %v690_v13  ;;  %v6005_v24 = vcombine.high %v550_v18, %v554_v19  ;;  %v6133_v25 = vcombine.high %v678_v20, %v682_v21  ;;  %v518_v55 = vld [vmem:[%s10026_s7 + $0x208] sm:$0xff]  ;;  %v507_v12 = vld [vmem:[%s10026_s7 + $0x1b0] sm:$0xff] }
 0x26c   :  { %v522_v56 = vld [vmem:[%s10026_s7 + $0x228] sm:$0xff]  ;;  %v631_v13 = vld [vmem:[%s10026_s7 + $0x590] sm:$0xff] }
 0x26d   :  { %v646_v57 = vld [vmem:[%s10026_s7 + $0x608] sm:$0xff] }
 0x26e   :  { %2122 = vmatpush1.bf16.msra.mxu0 %v5932_v29  ;;  %2163 = vmatpush1.bf16.msra.mxu1 %v6060_v30  ;;  %v674_v29 = vld [vmem:[%s10026_s7 + $0x6e8] sm:$0xff]  ;;  %v6004_v30 = vcombine.low %v550_v18, %v554_v19  ;;  %v495_v19 = vld [vmem:[%s10026_s7 + $0x150] sm:$0xff] }
 0x26f   :  { %2123 = vmatprep.subr.bf16.mxu0 %v5925_v31  ;;  %2164 = vmatprep.subr.bf16.mxu1 %v6053_v32  ;;  %v6132_v31 = vcombine.low %v678_v20, %v682_v21  ;;  %v5997_v32 = vcombine.high %v542_v26, %v546_v27  ;;  %v6125_v36 = vcombine.high %v670_v28, %v674_v29  ;;  %v499_v20 = vld [vmem:[%s10026_s7 + $0x170] sm:$0xff] }
 0x270   :  { %v623_v21 = vld [vmem:[%s10026_s7 + $0x550] sm:$0xff] }
 0x272   :  { %2124 = vmatpush1.bf16.msra.mxu0 %v5924_v42  ;;  %2165 = vmatpush1.bf16.msra.mxu1 %v6052_v43  ;;  %v666_v42 = vld [vmem:[%s10026_s7 + $0x6a8] sm:$0xff]  ;;  %v5996_v43 = vcombine.low %v542_v26, %v546_v27  ;;  %v487_v27 = vld [vmem:[%s10026_s7 + $0x110] sm:$0xff] }
 0x273   :  { %2125 = vmatprep.subr.bf16.mxu0 %v5917_v44  ;;  %2166 = vmatprep.subr.bf16.mxu1 %v6045_v45  ;;  %v6124_v44 = vcombine.low %v670_v28, %v674_v29  ;;  %v5989_v45 = vcombine.high %v534_v39, %v538_v40  ;;  %v6117_v46 = vcombine.high %v662_v41, %v666_v42  ;;  %v491_v28 = vld [vmem:[%s10026_s7 + $0x130] sm:$0xff] }
 0x274   :  { %v615_v29 = vld [vmem:[%s10026_s7 + $0x510] sm:$0xff] }
 0x276   :  { %2126 = vmatpush1.bf16.msra.mxu0 %v5916_v50  ;;  %2167 = vmatpush1.bf16.msra.mxu1 %v6044_v51  ;;  %v658_v50 = vld [vmem:[%s10026_s7 + $0x668] sm:$0xff]  ;;  %v5988_v51 = vcombine.low %v534_v39, %v538_v40  ;;  %v479_v40 = vld [vmem:[%s10026_s7 + $0xd0] sm:$0xff] }
 0x277   :  { %2127 = vmatprep.subr.bf16.mxu0 %v5909_v52  ;;  %2168 = vmatprep.subr.bf16.mxu1 %v6037_v53  ;;  %v6116_v52 = vcombine.low %v662_v41, %v666_v42  ;;  %v5981_v53 = vcombine.high %v526_v47, %v530_v48  ;;  %v6109_v54 = vcombine.high %v654_v49, %v658_v50  ;;  %v483_v41 = vld [vmem:[%s10026_s7 + $0xf0] sm:$0xff] }
 0x278   :  { %v607_v42 = vld [vmem:[%s10026_s7 + $0x4d0] sm:$0xff] }
 0x27a   :  { %2128 = vmatpush1.bf16.msra.mxu0 %v5908_v58  ;;  %2169 = vmatpush1.bf16.msra.mxu1 %v6036_v63  ;;  %v650_v58 = vld [vmem:[%s10026_s7 + $0x628] sm:$0xff]  ;;  %v5980_v63 = vcombine.low %v526_v47, %v530_v48  ;;  %v471_v48 = vld [vmem:[%s10026_s7 + $0x90] sm:$0xff] }
 0x27b   :  { %2129 = vmatprep.subr.bf16.mxu0 %v6029_v0  ;;  %2170 = vmatprep.subr.bf16.mxu1 %v6157_v1  ;;  %v6108_v0 = vcombine.low %v654_v49, %v658_v50  ;;  %v5973_v1 = vcombine.high %v518_v55, %v522_v56  ;;  %v6101_v2 = vcombine.high %v646_v57, %v650_v58  ;;  %v475_v49 = vld [vmem:[%s10026_s7 + $0xb0] sm:$0xff] }
 0x27c   :  { %v599_v50 = vld [vmem:[%s10026_s7 + $0x490] sm:$0xff] }
 0x27e   :  { %2130 = vmatpush2.bf16.msra.mxu0 %v6028_v6  ;;  %2171 = vmatpush2.bf16.msra.mxu1 %v6156_v7  ;;  %v643_v6 = vld [vmem:[%s10026_s7 + $0x5f0] sm:$0xff]  ;;  %v5972_v7 = vcombine.low %v518_v55, %v522_v56 }
 0x27f   :  { %2131 = vmatprep.subr.bf16.mxu0 %v6021_v8  ;;  %2172 = vmatprep.subr.bf16.mxu1 %v6149_v9  ;;  %v6100_v8 = vcombine.low %v646_v57, %v650_v58  ;;  %v5967_v9 = vcombine.high %v511_v3, %v515_v4  ;;  %v6095_v10 = vcombine.high %v639_v5, %v643_v6  ;;  %v463_v56 = vld [vmem:[%s10026_s7 + $0x50] sm:$0xff] }
 0x280   :  { %v467_v57 = vld [vmem:[%s10026_s7 + $0x70] sm:$0xff] }
 0x281   :  { %v591_v58 = vld [vmem:[%s10026_s7 + $0x450] sm:$0xff] }
 0x282   :  { %2132 = vmatpush2.bf16.msra.mxu0 %v6020_v14  ;;  %2173 = vmatpush2.bf16.msra.mxu1 %v6148_v15  ;;  %v635_v14 = vld [vmem:[%s10026_s7 + $0x5b0] sm:$0xff]  ;;  %v5966_v15 = vcombine.low %v511_v3, %v515_v4 }
 0x283   :  { %2133 = vmatprep.subr.bf16.mxu0 %v6013_v16  ;;  %2174 = vmatprep.subr.bf16.mxu1 %v6141_v17  ;;  %v6094_v16 = vcombine.low %v639_v5, %v643_v6  ;;  %v5959_v17 = vcombine.high %v503_v11, %v507_v12  ;;  %v6087_v18 = vcombine.high %v631_v13, %v635_v14  ;;  %v455_v4 = vld [vmem:[%s10026_s7 + $0x10] sm:$0xff] }
 0x284   :  { %v459_v5 = vld [vmem:[%s10026_s7 + $0x30] sm:$0xff] }
 0x285   :  { %v583_v6 = vld [vmem:[%s10026_s7 + $0x410] sm:$0xff] }
 0x286   :  { %2134 = vmatpush2.bf16.msra.mxu0 %v6012_v22  ;;  %2175 = vmatpush2.bf16.msra.mxu1 %v6140_v23  ;;  %v627_v22 = vld [vmem:[%s10026_s7 + $0x570] sm:$0xff]  ;;  %v5958_v23 = vcombine.low %v503_v11, %v507_v12 }
 0x287   :  { %2135 = vmatprep.subr.bf16.mxu0 %v6005_v24  ;;  %2176 = vmatprep.subr.bf16.mxu1 %v6133_v25  ;;  %v6086_v24 = vcombine.low %v631_v13, %v635_v14  ;;  %v5951_v25 = vcombine.high %v495_v19, %v499_v20  ;;  %v6079_v26 = vcombine.high %v623_v21, %v627_v22  ;;  %v575_v12 = vld [vmem:[%s10026_s7 + $0x3d0] sm:$0xff] }
 0x288   :  { %v579_v13 = vld [vmem:[%s10026_s7 + $0x3f0] sm:$0xff] }
 0x289   :  { %v703_v14 = vld [vmem:[%s10026_s7 + $0x7d0] sm:$0xff] }
 0x28a   :  { %2136 = vmatpush2.bf16.msra.mxu0 %v6004_v30  ;;  %2177 = vmatpush2.bf16.msra.mxu1 %v6132_v31  ;;  %v619_v30 = vld [vmem:[%s10026_s7 + $0x530] sm:$0xff]  ;;  %v5950_v31 = vcombine.low %v495_v19, %v499_v20 }
 0x28b   :  { %2137 = vmatprep.subr.bf16.mxu0 %v5997_v32  ;;  %2178 = vmatprep.subr.bf16.mxu1 %v6125_v36  ;;  %v6078_v32 = vcombine.low %v623_v21, %v627_v22  ;;  %v5943_v36 = vcombine.high %v487_v27, %v491_v28  ;;  %v6071_v39 = vcombine.high %v615_v29, %v619_v30  ;;  %v567_v20 = vld [vmem:[%s10026_s7 + $0x390] sm:$0xff] }
 0x28c   :  { %v571_v21 = vld [vmem:[%s10026_s7 + $0x3b0] sm:$0xff] }
 0x28d   :  { %v695_v22 = vld [vmem:[%s10026_s7 + $0x790] sm:$0xff] }
 0x28e   :  { %2138 = vmatpush2.bf16.msra.mxu0 %v5996_v43  ;;  %2179 = vmatpush2.bf16.msra.mxu1 %v6124_v44  ;;  %v611_v43 = vld [vmem:[%s10026_s7 + $0x4f0] sm:$0xff]  ;;  %v5942_v44 = vcombine.low %v487_v27, %v491_v28 }
 0x28f   :  { %2139 = vmatprep.subr.bf16.mxu0 %v5989_v45  ;;  %2180 = vmatprep.subr.bf16.mxu1 %v6117_v46  ;;  %v6070_v45 = vcombine.low %v615_v29, %v619_v30  ;;  %v5935_v46 = vcombine.high %v479_v40, %v483_v41  ;;  %v6063_v47 = vcombine.high %v607_v42, %v611_v43  ;;  %v559_v28 = vld [vmem:[%s10026_s7 + $0x350] sm:$0xff] }
 0x290   :  { %v563_v29 = vld [vmem:[%s10026_s7 + $0x370] sm:$0xff] }
 0x291   :  { %v687_v30 = vld [vmem:[%s10026_s7 + $0x750] sm:$0xff] }
 0x292   :  { %2140 = vmatpush2.bf16.msra.mxu0 %v5988_v51  ;;  %2181 = vmatpush2.bf16.msra.mxu1 %v6116_v52  ;;  %v603_v51 = vld [vmem:[%s10026_s7 + $0x4b0] sm:$0xff]  ;;  %v5934_v52 = vcombine.low %v479_v40, %v483_v41 }
 0x293   :  { %2141 = vmatprep.subr.bf16.mxu0 %v5981_v53  ;;  %2182 = vmatprep.subr.bf16.mxu1 %v6109_v54  ;;  %v6062_v53 = vcombine.low %v607_v42, %v611_v43  ;;  %v5927_v54 = vcombine.high %v471_v48, %v475_v49  ;;  %v6055_v55 = vcombine.high %v599_v50, %v603_v51  ;;  %v551_v41 = vld [vmem:[%s10026_s7 + $0x310] sm:$0xff] }
 0x294   :  { %v555_v42 = vld [vmem:[%s10026_s7 + $0x330] sm:$0xff] }
 0x295   :  { %v679_v43 = vld [vmem:[%s10026_s7 + $0x710] sm:$0xff] }
 0x296   :  { %2142 = vmatpush2.bf16.msra.mxu0 %v5980_v63  ;;  %2183 = vmatpush2.bf16.msra.mxu1 %v6108_v0  ;;  %v595_v63 = vld [vmem:[%s10026_s7 + $0x470] sm:$0xff]  ;;  %v5926_v0 = vcombine.low %v471_v48, %v475_v49 }
 0x297   :  { %2143 = vmatprep.subr.bf16.mxu0 %v5973_v1  ;;  %2184 = vmatprep.subr.bf16.mxu1 %v6101_v2  ;;  %v6054_v1 = vcombine.low %v599_v50, %v603_v51  ;;  %v5919_v2 = vcombine.high %v463_v56, %v467_v57  ;;  %v6047_v3 = vcombine.high %v591_v58, %v595_v63  ;;  %v543_v49 = vld [vmem:[%s10026_s7 + $0x2d0] sm:$0xff] }
 0x298   :  { %v547_v50 = vld [vmem:[%s10026_s7 + $0x2f0] sm:$0xff] }
 0x299   :  { %v671_v51 = vld [vmem:[%s10026_s7 + $0x6d0] sm:$0xff] }
 0x29a   :  { %2144 = vmatpush2.bf16.msra.mxu0 %v5972_v7  ;;  %2185 = vmatpush2.bf16.msra.mxu1 %v6100_v8  ;;  %v587_v7 = vld [vmem:[%s10026_s7 + $0x430] sm:$0xff]  ;;  %v5918_v8 = vcombine.low %v463_v56, %v467_v57 }
 0x29b   :  { %2195 = vmatprep.subr.bf16.mxu0 %v5967_v9  ;;  %2236 = vmatprep.subr.bf16.mxu1 %v6095_v10  ;;  %v6046_v9 = vcombine.low %v591_v58, %v595_v63  ;;  %v5911_v10 = vcombine.high %v455_v4, %v459_v5  ;;  %v6039_v11 = vcombine.high %v583_v6, %v587_v7  ;;  %v535_v57 = vld [vmem:[%s10026_s7 + $0x290] sm:$0xff] }
 0x29c   :  { %v539_v58 = vld [vmem:[%s10026_s7 + $0x2b0] sm:$0xff] }
 0x29d   :  { %2146 = vmatmul.mubr.bf16.vlgmr.msra.gmra.mxu0 %v7967_v61  ;;  %2187 = vmatmul.mubr.bf16.vlgmr.msra.gmra.mxu1 %v7969_v62  ;;  %v663_v63 = vld [vmem:[%s10026_s7 + $0x690] sm:$0xff] }
 0x29e   :  { %2196 = vmatpush1.bf16.msra.mxu0 %v5966_v15  ;;  %2227 = vmatprep.mubr.bf16.mxu0 %v7963_v59  ;;  %v707_v15 = vld [vmem:[%s10026_s7 + $0x7f0] sm:$0xff] }
 0x29f   :  { %2237 = vmatpush1.bf16.msra.mxu1 %v6094_v16  ;;  %2268 = vmatprep.mubr.bf16.mxu1 %v7965_v60  ;;  %v5910_v16 = vcombine.low %v455_v4, %v459_v5  ;;  %v6159_v19 = vcombine.high %v703_v14, %v707_v15  ;;  %v527_v5 = vld [vmem:[%s10026_s7 + $0x250] sm:$0xff] }
 0x2a0   :  { %2197 = vmatprep.subr.bf16.mxu0 %v5959_v17  ;;  %2238 = vmatprep.subr.bf16.mxu1 %v6087_v18  ;;  %v6038_v17 = vcombine.low %v583_v6, %v587_v7  ;;  %v6031_v18 = vcombine.high %v575_v12, %v579_v13  ;;  %v531_v6 = vld [vmem:[%s10026_s7 + $0x270] sm:$0xff] }
 0x2a1   :  { %v655_v7 = vld [vmem:[%s10026_s7 + $0x650] sm:$0xff] }
 0x2a2   :  { %2198 = vmatpush1.bf16.msra.mxu0 %v5958_v23  ;;  %v699_v23 = vld [vmem:[%s10026_s7 + $0x7b0] sm:$0xff] }
 0x2a3   :  { %2239 = vmatpush1.bf16.msra.mxu1 %v6086_v24  ;;  %2199 = vmatprep.subr.bf16.mxu0 %v5951_v25  ;;  %v6030_v24 = vcombine.low %v575_v12, %v579_v13  ;;  %v6158_v25 = vcombine.low %v703_v14, %v707_v15  ;;  %v6151_v27 = vcombine.high %v695_v22, %v699_v23  ;;  %v519_v13 = vld [vmem:[%s10026_s7 + $0x210] sm:$0xff] }
 0x2a4   :  { %2240 = vmatprep.subr.bf16.mxu1 %v6079_v26  ;;  %v6023_v26 = vcombine.high %v567_v20, %v571_v21  ;;  %v523_v14 = vld [vmem:[%s10026_s7 + $0x230] sm:$0xff] }
 0x2a5   :  { %v647_v15 = vld [vmem:[%s10026_s7 + $0x610] sm:$0xff] }
 0x2a6   :  { %2200 = vmatpush1.bf16.msra.mxu0 %v5950_v31  ;;  %v691_v31 = vld [vmem:[%s10026_s7 + $0x770] sm:$0xff] }
 0x2a7   :  { %2241 = vmatpush1.bf16.msra.mxu1 %v6078_v32  ;;  %2201 = vmatprep.subr.bf16.mxu0 %v5943_v36  ;;  %v6022_v32 = vcombine.low %v567_v20, %v571_v21  ;;  %v6150_v36 = vcombine.low %v695_v22, %v699_v23  ;;  %v6143_v40 = vcombine.high %v687_v30, %v691_v31  ;;  %v512_v21 = vld [vmem:[%s10026_s7 + $0x1d8] sm:$0xff] }
 0x2a8   :  { %2242 = vmatprep.subr.bf16.mxu1 %v6071_v39  ;;  %v6015_v39 = vcombine.high %v559_v28, %v563_v29  ;;  %v516_v22 = vld [vmem:[%s10026_s7 + $0x1f8] sm:$0xff] }
 0x2a9   :  { %v640_v23 = vld [vmem:[%s10026_s7 + $0x5d8] sm:$0xff] }
 0x2aa   :  { %2202 = vmatpush1.bf16.msra.mxu0 %v5942_v44  ;;  %v683_v44 = vld [vmem:[%s10026_s7 + $0x730] sm:$0xff] }
 0x2ab   :  { %2243 = vmatpush1.bf16.msra.mxu1 %v6070_v45  ;;  %2203 = vmatprep.subr.bf16.mxu0 %v5935_v46  ;;  %v6014_v45 = vcombine.low %v559_v28, %v563_v29  ;;  %v6142_v46 = vcombine.low %v687_v30, %v691_v31  ;;  %v6135_v48 = vcombine.high %v679_v43, %v683_v44  ;;  %v504_v29 = vld [vmem:[%s10026_s7 + $0x198] sm:$0xff] }
 0x2ac   :  { %2244 = vmatprep.subr.bf16.mxu1 %v6063_v47  ;;  %v6007_v47 = vcombine.high %v551_v41, %v555_v42  ;;  %v508_v30 = vld [vmem:[%s10026_s7 + $0x1b8] sm:$0xff]  ;;  %v5968_v31 = vcombine.low %v512_v21, %v516_v22 }
 0x2ae   :  { %2204 = vmatpush1.bf16.msra.mxu0 %v5934_v52  ;;  %v675_v52 = vld [vmem:[%s10026_s7 + $0x6f0] sm:$0xff] }
 0x2af   :  { %2245 = vmatpush1.bf16.msra.mxu1 %v6062_v53  ;;  %2205 = vmatprep.subr.bf16.mxu0 %v5927_v54  ;;  %v6006_v53 = vcombine.low %v551_v41, %v555_v42  ;;  %v6134_v54 = vcombine.low %v679_v43, %v683_v44  ;;  %v6127_v56 = vcombine.high %v671_v51, %v675_v52  ;;  %v496_v41 = vld [vmem:[%s10026_s7 + $0x158] sm:$0xff] }
 0x2b0   :  { %2246 = vmatprep.subr.bf16.mxu1 %v6055_v55  ;;  %v5999_v55 = vcombine.high %v543_v49, %v547_v50  ;;  %v500_v42 = vld [vmem:[%s10026_s7 + $0x178] sm:$0xff] }
 0x2b1   :  { %v624_v44 = vld [vmem:[%s10026_s7 + $0x558] sm:$0xff] }
 0x2b2   :  { %2206 = vmatpush1.bf16.msra.mxu0 %v5926_v0  ;;  %v667_v0 = vld [vmem:[%s10026_s7 + $0x6b0] sm:$0xff] }
 0x2b3   :  { %2247 = vmatpush1.bf16.msra.mxu1 %v6054_v1  ;;  %2207 = vmatprep.subr.bf16.mxu0 %v5919_v2  ;;  %v5998_v1 = vcombine.low %v543_v49, %v547_v50  ;;  %v6126_v2 = vcombine.low %v671_v51, %v675_v52  ;;  %v6119_v4 = vcombine.high %v663_v63, %v667_v0  ;;  %v488_v50 = vld [vmem:[%s10026_s7 + $0x118] sm:$0xff] }
 0x2b4   :  { %2248 = vmatprep.subr.bf16.mxu1 %v6047_v3  ;;  %v5991_v3 = vcombine.high %v535_v57, %v539_v58  ;;  %v492_v51 = vld [vmem:[%s10026_s7 + $0x138] sm:$0xff] }
 0x2b5   :  { %v620_v52 = vld [vmem:[%s10026_s7 + $0x538] sm:$0xff] }
 0x2b6   :  { %2208 = vmatpush1.bf16.msra.mxu0 %v5918_v8  ;;  %v659_v8 = vld [vmem:[%s10026_s7 + $0x670] sm:$0xff] }
 0x2b7   :  { %2249 = vmatpush1.bf16.msra.mxu1 %v6046_v9  ;;  %2209 = vmatprep.subr.bf16.mxu0 %v5911_v10  ;;  %v5990_v9 = vcombine.low %v535_v57, %v539_v58  ;;  %v6118_v10 = vcombine.low %v663_v63, %v667_v0  ;;  %v6111_v12 = vcombine.high %v655_v7, %v659_v8  ;;  %v484_v57 = vld [vmem:[%s10026_s7 + $0xf8] sm:$0xff] }
 0x2b8   :  { %2250 = vmatprep.subr.bf16.mxu1 %v6039_v11  ;;  %v5983_v11 = vcombine.high %v527_v5, %v531_v6  ;;  %v608_v58 = vld [vmem:[%s10026_s7 + $0x4d8] sm:$0xff]  ;;  %v5944_v0 = vcombine.low %v488_v50, %v492_v51 }
 0x2b9   :  { %v612_v63 = vld [vmem:[%s10026_s7 + $0x4f8] sm:$0xff] }
 0x2ba   :  { %2210 = vmatpush1.bf16.msra.mxu0 %v5910_v16  ;;  %v651_v16 = vld [vmem:[%s10026_s7 + $0x630] sm:$0xff] }
 0x2bb   :  { %2251 = vmatpush1.bf16.msra.mxu1 %v6038_v17  ;;  %2211 = vmatprep.subr.bf16.mxu0 %v6031_v18  ;;  %v5982_v17 = vcombine.low %v527_v5, %v531_v6  ;;  %v6110_v18 = vcombine.low %v655_v7, %v659_v8  ;;  %v6103_v20 = vcombine.high %v647_v15, %v651_v16  ;;  %v476_v5 = vld [vmem:[%s10026_s7 + $0xb8] sm:$0xff] }
 0x2bc   :  { %2252 = vmatprep.subr.bf16.mxu1 %v6159_v19  ;;  %v5975_v19 = vcombine.high %v519_v13, %v523_v14  ;;  %v600_v6 = vld [vmem:[%s10026_s7 + $0x498] sm:$0xff] }
 0x2bd   :  { %v604_v7 = vld [vmem:[%s10026_s7 + $0x4b8] sm:$0xff] }
 0x2be   :  { %2212 = vmatpush2.bf16.msra.mxu0 %v6030_v24  ;;  %v644_v24 = vld [vmem:[%s10026_s7 + $0x5f8] sm:$0xff] }
 0x2bf   :  { %2253 = vmatpush2.bf16.msra.mxu1 %v6158_v25  ;;  %2213 = vmatprep.subr.bf16.mxu0 %v6023_v26  ;;  %v5974_v25 = vcombine.low %v519_v13, %v523_v14  ;;  %v6102_v26 = vcombine.low %v647_v15, %v651_v16  ;;  %v6097_v28 = vcombine.high %v640_v23, %v644_v24  ;;  %v468_v13 = vld [vmem:[%s10026_s7 + $0x78] sm:$0xff] }
 0x2c0   :  { %2254 = vmatprep.subr.bf16.mxu1 %v6151_v27  ;;  %v5969_v27 = vcombine.high %v512_v21, %v516_v22  ;;  %v592_v14 = vld [vmem:[%s10026_s7 + $0x458] sm:$0xff] }
 0x2c1   :  { %v596_v15 = vld [vmem:[%s10026_s7 + $0x478] sm:$0xff] }
 0x2c2   :  { %2214 = vmatpush2.bf16.msra.mxu0 %v6022_v32  ;;  %v632_v32 = vld [vmem:[%s10026_s7 + $0x598] sm:$0xff] }
 0x2c3   :  { %2255 = vmatpush2.bf16.msra.mxu1 %v6150_v36  ;;  %2215 = vmatprep.subr.bf16.mxu0 %v6015_v39  ;;  %v636_v36 = vld [vmem:[%s10026_s7 + $0x5b8] sm:$0xff]  ;;  %v6096_v39 = vcombine.low %v640_v23, %v644_v24 }
 0x2c4   :  { %2256 = vmatprep.subr.bf16.mxu1 %v6143_v40  ;;  %v5961_v40 = vcombine.high %v504_v29, %v508_v30  ;;  %v6089_v43 = vcombine.high %v632_v32, %v636_v36  ;;  %v460_v21 = vld [vmem:[%s10026_s7 + $0x38] sm:$0xff] }
 0x2c5   :  { %v584_v22 = vld [vmem:[%s10026_s7 + $0x418] sm:$0xff] }
 0x2c6   :  { %2216 = vmatpush2.bf16.msra.mxu0 %v6014_v45  ;;  %v628_v45 = vld [vmem:[%s10026_s7 + $0x578] sm:$0xff] }
 0x2c7   :  { %2257 = vmatpush2.bf16.msra.mxu1 %v6142_v46  ;;  %2217 = vmatprep.subr.bf16.mxu0 %v6007_v47  ;;  %v5960_v46 = vcombine.low %v504_v29, %v508_v30  ;;  %v6088_v47 = vcombine.low %v632_v32, %v636_v36  ;;  %v6081_v49 = vcombine.high %v624_v44, %v628_v45  ;;  %v588_v23 = vld [vmem:[%s10026_s7 + $0x438] sm:$0xff] }
 0x2c8   :  { %2258 = vmatprep.subr.bf16.mxu1 %v6135_v48  ;;  %v5953_v48 = vcombine.high %v496_v41, %v500_v42  ;;  %v580_v29 = vld [vmem:[%s10026_s7 + $0x3f8] sm:$0xff]  ;;  %v6040_v36 = vcombine.low %v584_v22, %v588_v23 }
 0x2c9   :  { %v704_v30 = vld [vmem:[%s10026_s7 + $0x7d8] sm:$0xff] }
 0x2ca   :  { %2218 = vmatpush2.bf16.msra.mxu0 %v6006_v53  ;;  %v6080_v53 = vcombine.low %v624_v44, %v628_v45  ;;  %v700_v44 = vld [vmem:[%s10026_s7 + $0x7b8] sm:$0xff] }
 0x2cb   :  { %2259 = vmatpush2.bf16.msra.mxu1 %v6134_v54  ;;  %2219 = vmatprep.subr.bf16.mxu0 %v5999_v55  ;;  %v5945_v54 = vcombine.high %v488_v50, %v492_v51  ;;  %v564_v50 = vld [vmem:[%s10026_s7 + $0x378] sm:$0xff] }
 0x2cc   :  { %2260 = vmatprep.subr.bf16.mxu1 %v6127_v56  ;;  %v480_v56 = vld [vmem:[%s10026_s7 + $0xd8] sm:$0xff] }
 0x2cd   :  { %v5936_v8 = vcombine.low %v480_v56, %v484_v57  ;;  %v688_v51 = vld [vmem:[%s10026_s7 + $0x758] sm:$0xff] }
 0x2ce   :  { %2220 = vmatpush2.bf16.msra.mxu0 %v5998_v1 }
 0x2cf   :  { %2261 = vmatpush2.bf16.msra.mxu1 %v6126_v2  ;;  %2221 = vmatprep.subr.bf16.mxu0 %v5991_v3  ;;  %v5937_v2 = vcombine.high %v480_v56, %v484_v57  ;;  %v6065_v3 = vcombine.high %v608_v58, %v612_v63  ;;  %v556_v56 = vld [vmem:[%s10026_s7 + $0x338] sm:$0xff] }
 0x2d0   :  { %2262 = vmatprep.subr.bf16.mxu1 %v6119_v4  ;;  %v472_v4 = vld [vmem:[%s10026_s7 + $0x98] sm:$0xff] }
 0x2d1   :  { %v5928_v16 = vcombine.low %v472_v4, %v476_v5  ;;  %v680_v57 = vld [vmem:[%s10026_s7 + $0x718] sm:$0xff] }
 0x2d2   :  { %2222 = vmatpush2.bf16.msra.mxu0 %v5990_v9  ;;  %v6064_v9 = vcombine.low %v608_v58, %v612_v63  ;;  %v684_v58 = vld [vmem:[%s10026_s7 + $0x738] sm:$0xff] }
 0x2d3   :  { %2263 = vmatpush2.bf16.msra.mxu1 %v6118_v10  ;;  %2223 = vmatprep.subr.bf16.mxu0 %v5983_v11  ;;  %v5929_v10 = vcombine.high %v472_v4, %v476_v5  ;;  %v6057_v11 = vcombine.high %v600_v6, %v604_v7  ;;  %v548_v4 = vld [vmem:[%s10026_s7 + $0x2f8] sm:$0xff] }
 0x2d4   :  { %2264 = vmatprep.subr.bf16.mxu1 %v6111_v12  ;;  %v464_v12 = vld [vmem:[%s10026_s7 + $0x58] sm:$0xff] }
 0x2d5   :  { %v5920_v24 = vcombine.low %v464_v12, %v468_v13  ;;  %v672_v5 = vld [vmem:[%s10026_s7 + $0x6d8] sm:$0xff] }
 0x2d6   :  { %2224 = vmatpush2.bf16.msra.mxu0 %v5982_v17  ;;  %v6056_v17 = vcombine.low %v600_v6, %v604_v7  ;;  %v676_v6 = vld [vmem:[%s10026_s7 + $0x6f8] sm:$0xff] }
 0x2d7   :  { %2265 = vmatpush2.bf16.msra.mxu1 %v6110_v18  ;;  %2225 = vmatprep.subr.bf16.mxu0 %v5975_v19  ;;  %v5921_v18 = vcombine.high %v464_v12, %v468_v13  ;;  %v6049_v19 = vcombine.high %v592_v14, %v596_v15  ;;  %v540_v12 = vld [vmem:[%s10026_s7 + $0x2b8] sm:$0xff] }
 0x2d8   :  { %2266 = vmatprep.subr.bf16.mxu1 %v6103_v20  ;;  %v456_v20 = vld [vmem:[%s10026_s7 + $0x18] sm:$0xff] }
 0x2d9   :  { %v5912_v32 = vcombine.low %v456_v20, %v460_v21  ;;  %v664_v13 = vld [vmem:[%s10026_s7 + $0x698] sm:$0xff] }
 0x2da   :  { %2226 = vmatpush2.bf16.msra.mxu0 %v5974_v25  ;;  %v6048_v25 = vcombine.low %v592_v14, %v596_v15  ;;  %v668_v14 = vld [vmem:[%s10026_s7 + $0x6b8] sm:$0xff] }
 0x2db   :  { %2267 = vmatpush2.bf16.msra.mxu1 %v6102_v26  ;;  %2277 = vmatprep.subr.bf16.mxu0 %v5969_v27  ;;  %v5913_v26 = vcombine.high %v456_v20, %v460_v21  ;;  %v6041_v27 = vcombine.high %v584_v22, %v588_v23  ;;  %v532_v20 = vld [vmem:[%s10026_s7 + $0x278] sm:$0xff] }
 0x2dc   :  { %2318 = vmatprep.subr.bf16.mxu1 %v6097_v28  ;;  %v576_v28 = vld [vmem:[%s10026_s7 + $0x3d8] sm:$0xff] }
 0x2dd   :  { %2228 = vmatmul.mubr.bf16.vlgmr.msra.gmra.mxu0 %v7967_v61  ;;  %v6032_v45 = vcombine.low %v576_v28, %v580_v29  ;;  %v656_v21 = vld [vmem:[%s10026_s7 + $0x658] sm:$0xff] }
 0x2de   :  { %2269 = vmatmul.mubr.bf16.vlgmr.msra.gmra.mxu1 %v7969_v62  ;;  %2278 = vmatpush1.bf16.msra.mxu0 %v5968_v31  ;;  %v708_v31 = vld [vmem:[%s10026_s7 + $0x7f8] sm:$0xff] }
 0x2df   :  { %2309 = vmatprep.mubr.bf16.mxu0 %v7963_v59  ;;  %2319 = vmatpush1.bf16.msra.mxu1 %v6096_v39  ;;  %v616_v59 = vld [vmem:[%s10026_s7 + $0x518] sm:$0xff]  ;;  %v6033_v39 = vcombine.high %v576_v28, %v580_v29 }
 0x2e0   :  { %2350 = vmatprep.mubr.bf16.mxu1 %v7965_v60  ;;  %2279 = vmatprep.subr.bf16.mxu0 %v5961_v40  ;;  %v5952_v60 = vcombine.low %v496_v41, %v500_v42  ;;  %v6073_v55 = vcombine.high %v616_v59, %v620_v52  ;;  %v6072_v1 = vcombine.low %v616_v59, %v620_v52  ;;  %v568_v41 = vld [vmem:[%s10026_s7 + $0x398] sm:$0xff] }
 0x2e1   :  { %2320 = vmatprep.subr.bf16.mxu1 %v6089_v43  ;;  %v6161_v40 = vcombine.high %v704_v30, %v708_v31  ;;  %v572_v42 = vld [vmem:[%s10026_s7 + $0x3b8] sm:$0xff] }
 0x2e2   :  { %2280 = vmatpush1.bf16.msra.mxu0 %v5960_v46  ;;  %v696_v43 = vld [vmem:[%s10026_s7 + $0x798] sm:$0xff]  ;;  %v6160_v46 = vcombine.low %v704_v30, %v708_v31  ;;  %v6024_v52 = vcombine.low %v568_v41, %v572_v42 }
 0x2e3   :  { %2321 = vmatpush1.bf16.msra.mxu1 %v6088_v47  ;;  %2281 = vmatprep.subr.bf16.mxu0 %v5953_v48  ;;  %v6025_v47 = vcombine.high %v568_v41, %v572_v42  ;;  %v6153_v48 = vcombine.high %v696_v43, %v700_v44  ;;  %v692_v59 = vld [vmem:[%s10026_s7 + $0x778] sm:$0xff]  ;;  %v6747_v42 = vld [vmem:[%s10028_s9 + $0x18c] ss:$28 sps:$4 sm:$0xff]  }
 0x2e4   :  { %2322 = vmatprep.subr.bf16.mxu1 %v6081_v49  ;;  %v560_v49 = vld [vmem:[%s10026_s7 + $0x358] sm:$0xff] }
 0x2e5   :  { %v6016_v63 = vcombine.low %v560_v49, %v564_v50  ;;  %v660_v22 = vld [vmem:[%s10026_s7 + $0x678] sm:$0xff] }
 0x2e6   :  { %2282 = vmatpush1.bf16.msra.mxu0 %v5952_v60  ;;  %v6152_v60 = vcombine.low %v696_v43, %v700_v44  ;;  %v524_v28 = vld [vmem:[%s10026_s7 + $0x238] sm:$0xff]  ;;  %v6759_v43 = vld [vmem:[%s10028_s9 + $0x50c] ss:$28 sps:$4 sm:$0xff]  }
 0x2e7   :  { %2323 = vmatpush1.bf16.msra.mxu1 %v6080_v53  ;;  %2283 = vmatprep.subr.bf16.mxu0 %v5945_v54  ;;  %v6017_v53 = vcombine.high %v560_v49, %v564_v50  ;;  %v6145_v54 = vcombine.high %v688_v51, %v692_v59  ;;  %v648_v29 = vld [vmem:[%s10026_s7 + $0x618] sm:$0xff]  ;;  %v6745_v44 = vld [vmem:[%s10028_s9 + $0x188] ss:$28 sps:$4 sm:$0xff]   ;;  %v6765_v49 = vld [vmem:[%s10028_s9 + $0x4d4] ss:$28 sps:$4 sm:$0xff]  }
 0x2e8   :  { %2324 = vmatprep.subr.bf16.mxu1 %v6073_v55  ;;  %v552_v55 = vld [vmem:[%s10026_s7 + $0x318] sm:$0xff] }
 0x2e9   :  { %v6008_v7 = vcombine.low %v552_v55, %v556_v56  ;;  %v652_v30 = vld [vmem:[%s10026_s7 + $0x638] sm:$0xff] }
 0x2ea   :  { %2284 = vmatpush1.bf16.msra.mxu0 %v5944_v0  ;;  %v6144_v0 = vcombine.low %v688_v51, %v692_v59  ;;  %v6104_v41 = vcombine.low %v648_v29, %v652_v30  ;;  %v6748_v59 = vld [vmem:[%s10028_s9 + $0x150] ss:$28 sps:$4 sm:$0xff]  }
 0x2eb   :  { %2325 = vmatpush1.bf16.msra.mxu1 %v6072_v1  ;;  %2285 = vmatprep.subr.bf16.mxu0 %v5937_v2  ;;  %v6009_v1 = vcombine.high %v552_v55, %v556_v56  ;;  %v6137_v2 = vcombine.high %v680_v57, %v684_v58 }
 0x2ec   :  { %2326 = vmatprep.subr.bf16.mxu1 %v6065_v3  ;;  %v544_v3 = vld [vmem:[%s10026_s7 + $0x2d8] sm:$0xff] }
 0x2ed   :  { %v6000_v15 = vcombine.low %v544_v3, %v548_v4 }
 0x2ee   :  { %2286 = vmatpush1.bf16.msra.mxu0 %v5936_v8  ;;  %v6136_v8 = vcombine.low %v680_v57, %v684_v58  ;;  %v6751_v58 = vld [vmem:[%s10028_s9 + $0x118] ss:$28 sps:$4 sm:$0xff]  }
 0x2ef   :  { %2327 = vmatpush1.bf16.msra.mxu1 %v6064_v9  ;;  %2287 = vmatprep.subr.bf16.mxu0 %v5929_v10  ;;  %v6001_v9 = vcombine.high %v544_v3, %v548_v4  ;;  %v6129_v10 = vcombine.high %v672_v5, %v676_v6  ;;  %v6777_v4 = vld [vmem:[%s10028_s9 + $0x464] ss:$28 sps:$4 sm:$0xff]  }
 0x2f0   :  { %2328 = vmatprep.subr.bf16.mxu1 %v6057_v11  ;;  %v536_v11 = vld [vmem:[%s10026_s7 + $0x298] sm:$0xff] }
 0x2f1   :  { %v5992_v23 = vcombine.low %v536_v11, %v540_v12 }
 0x2f2   :  { %2288 = vmatpush1.bf16.msra.mxu0 %v5928_v16  ;;  %v6128_v16 = vcombine.low %v672_v5, %v676_v6  ;;  %v6754_v6 = vld [vmem:[%s10028_s9 + $0xe0] ss:$28 sps:$4 sm:$0xff]  }
 0x2f3   :  { %2329 = vmatpush1.bf16.msra.mxu1 %v6056_v17  ;;  %2289 = vmatprep.subr.bf16.mxu0 %v5921_v18  ;;  %v5993_v17 = vcombine.high %v536_v11, %v540_v12  ;;  %v6121_v18 = vcombine.high %v664_v13, %v668_v14  ;;  %v6768_v11 = vld [vmem:[%s10028_s9 + $0x74] ss:$28 sps:$4 sm:$0xff]   ;;  %v6781_v12 = vld [vmem:[%s10028_s9 + $0x428] ss:$28 sps:$4 sm:$0xff]  }
 0x2f4   :  { %2330 = vmatprep.subr.bf16.mxu1 %v6049_v19  ;;  %v528_v19 = vld [vmem:[%s10026_s7 + $0x258] sm:$0xff] }
 0x2f5   :  { %v5984_v31 = vcombine.low %v528_v19, %v532_v20 }
 0x2f6   :  { %2290 = vmatpush1.bf16.msra.mxu0 %v5920_v24  ;;  %v6120_v24 = vcombine.low %v664_v13, %v668_v14  ;;  %v6789_v13 = vld [vmem:[%s10028_s9 + $0x3f4] ss:$28 sps:$4 sm:$0xff]  }
 0x2f7   :  { %2331 = vmatpush1.bf16.msra.mxu1 %v6048_v25  ;;  %2291 = vmatprep.subr.bf16.mxu0 %v5913_v26  ;;  %v5985_v25 = vcombine.high %v528_v19, %v532_v20  ;;  %v6113_v26 = vcombine.high %v656_v21, %v660_v22  ;;  %v6766_v14 = vld [vmem:[%s10028_s9 + $0x70] ss:$28 sps:$4 sm:$0xff]   ;;  %v6780_v19 = vld [vmem:[%s10028_s9 + $0x4] ss:$28 sps:$4 sm:$0xff]   ;;  %v6793_v20 = vld [vmem:[%s10028_s9 + $0x3b8] ss:$28 sps:$4 sm:$0xff]  }
 0x2f8   :  { %2332 = vmatprep.subr.bf16.mxu1 %v6041_v27  ;;  %v520_v27 = vld [vmem:[%s10026_s7 + $0x218] sm:$0xff] }
 0x2fa   :  { %2292 = vmatpush1.bf16.msra.mxu0 %v5912_v32  ;;  %v6112_v32 = vcombine.low %v656_v21, %v660_v22  ;;  %v6801_v21 = vld [vmem:[%s10028_s9 + $0x384] ss:$28 sps:$4 sm:$0xff]  }
 0x2fb   :  { %2333 = vmatpush1.bf16.msra.mxu1 %v6040_v36  ;;  %2293 = vmatprep.subr.bf16.mxu0 %v6033_v39  ;;  %v5977_v36 = vcombine.high %v520_v27, %v524_v28  ;;  %v6105_v39 = vcombine.high %v648_v29, %v652_v30  ;;  %v6778_v22 = vld [vmem:[%s10028_s9] ss:$28 sps:$4 sm:$0xff]   ;;  %v6813_v29 = vld [vmem:[%s10028_s9 + $0x694] ss:$28 sps:$4 sm:$0xff]  }
 0x2fc   :  { %2334 = vmatprep.subr.bf16.mxu1 %v6161_v40  ;;  %v5976_v40 = vcombine.low %v520_v27, %v524_v28  ;;  %v6792_v27 = vld [vmem:[%s10028_s9 + $0x314] ss:$28 sps:$4 sm:$0xff]   ;;  %v6805_v28 = vld [vmem:[%s10028_s9 + $0x6c8] ss:$28 sps:$4 sm:$0xff]  }
 0x2fd   :  { %v6790_v30 = vld [vmem:[%s10028_s9 + $0x310] ss:$28 sps:$4 sm:$0xff]  }
 0x2fe   :  { %2294 = vmatpush2.bf16.msra.mxu0 %v6032_v45  ;;  %v8549_v45 = vld [vmem:[%s10027_s8] sm:$0xff] }
 0x2ff   :  { %2335 = vmatpush2.bf16.msra.mxu1 %v6160_v46  ;;  %2295 = vmatprep.subr.bf16.mxu0 %v6025_v47  ;;  %v6750_v46 = vld [vmem:[%s10028_s9 + $0x154] ss:$28 sps:$4 sm:$0xff]   ;;  %v6757_v47 = vld [vmem:[%s10028_s9 + $0x508] ss:$28 sps:$4 sm:$0xff]  }
 0x300   :  { %2336 = vmatprep.subr.bf16.mxu1 %v6153_v48  ;;  %v718_v48 = vrot.slane %v8549_v45, %v7942_v37 }
 0x302   :  { %2296 = vmatpush2.bf16.msra.mxu0 %v6024_v52 }
 0x303   :  { %2337 = vmatpush2.bf16.msra.mxu1 %v6152_v60  ;;  %2297 = vmatprep.subr.bf16.mxu0 %v6017_v53  ;;  %v6753_v53 = vld [vmem:[%s10028_s9 + $0x11c] ss:$28 sps:$4 sm:$0xff]  }
 0x304   :  { %2338 = vmatprep.subr.bf16.mxu1 %v6145_v54 }
 0x306   :  { %2298 = vmatpush2.bf16.msra.mxu0 %v6016_v63 }
 0x307   :  { %2339 = vmatpush2.bf16.msra.mxu1 %v6144_v0  ;;  %2299 = vmatprep.subr.bf16.mxu0 %v6009_v1  ;;  %v6756_v1 = vld [vmem:[%s10028_s9 + $0xe4] ss:$28 sps:$4 sm:$0xff]  }
 0x308   :  { %2340 = vmatprep.subr.bf16.mxu1 %v6137_v2  ;;  %v6769_v2 = vld [vmem:[%s10028_s9 + $0x498] ss:$28 sps:$4 sm:$0xff]  }
 0x30a   :  { %2300 = vmatpush2.bf16.msra.mxu0 %v6008_v7  ;;  %v6762_v7 = vld [vmem:[%s10028_s9 + $0xac] ss:$28 sps:$4 sm:$0xff]  }
 0x30b   :  { %2341 = vmatpush2.bf16.msra.mxu1 %v6136_v8  ;;  %2301 = vmatprep.subr.bf16.mxu0 %v6001_v9  ;;  %v6775_v8 = vld [vmem:[%s10028_s9 + $0x460] ss:$28 sps:$4 sm:$0xff]   ;;  %v6783_v9 = vld [vmem:[%s10028_s9 + $0x42c] ss:$28 sps:$4 sm:$0xff]  }
 0x30c   :  { %2342 = vmatprep.subr.bf16.mxu1 %v6129_v10  ;;  %v6760_v10 = vld [vmem:[%s10028_s9 + $0xa8] ss:$28 sps:$4 sm:$0xff]  }
 0x30e   :  { %2302 = vmatpush2.bf16.msra.mxu0 %v6000_v15  ;;  %v6774_v15 = vld [vmem:[%s10028_s9 + $0x3c] ss:$28 sps:$4 sm:$0xff]  }
 0x30f   :  { %2343 = vmatpush2.bf16.msra.mxu1 %v6128_v16  ;;  %2303 = vmatprep.subr.bf16.mxu0 %v5993_v17  ;;  %v6787_v16 = vld [vmem:[%s10028_s9 + $0x3f0] ss:$28 sps:$4 sm:$0xff]   ;;  %v6795_v17 = vld [vmem:[%s10028_s9 + $0x3bc] ss:$28 sps:$4 sm:$0xff]  }
 0x310   :  { %2344 = vmatprep.subr.bf16.mxu1 %v6121_v18  ;;  %v6772_v18 = vld [vmem:[%s10028_s9 + $0x38] ss:$28 sps:$4 sm:$0xff]  }
 0x312   :  { %2304 = vmatpush2.bf16.msra.mxu0 %v5992_v23  ;;  %v6786_v23 = vld [vmem:[%s10028_s9 + $0x34c] ss:$28 sps:$4 sm:$0xff]  }
 0x313   :  { %2345 = vmatpush2.bf16.msra.mxu1 %v6120_v24  ;;  %2305 = vmatprep.subr.bf16.mxu0 %v5985_v25  ;;  %v6799_v24 = vld [vmem:[%s10028_s9 + $0x380] ss:$28 sps:$4 sm:$0xff]   ;;  %v6807_v25 = vld [vmem:[%s10028_s9 + $0x6cc] ss:$28 sps:$4 sm:$0xff]  }
 0x314   :  { %2346 = vmatprep.subr.bf16.mxu1 %v6113_v26  ;;  %v6784_v26 = vld [vmem:[%s10028_s9 + $0x348] ss:$28 sps:$4 sm:$0xff]  }
 0x316   :  { %2306 = vmatpush2.bf16.msra.mxu0 %v5984_v31  ;;  %v6798_v31 = vld [vmem:[%s10028_s9 + $0x2dc] ss:$28 sps:$4 sm:$0xff]  }
 0x317   :  { %2347 = vmatpush2.bf16.msra.mxu1 %v6112_v32  ;;  %2307 = vmatprep.subr.bf16.mxu0 %v5977_v36  ;;  %v6811_v32 = vld [vmem:[%s10028_s9 + $0x690] ss:$28 sps:$4 sm:$0xff]   ;;  %v6819_v36 = vld [vmem:[%s10028_s9 + $0x65c] ss:$28 sps:$4 sm:$0xff]  }
 0x318   :  { %2348 = vmatprep.subr.bf16.mxu1 %v6105_v39  ;;  %v6796_v39 = vld [vmem:[%s10028_s9 + $0x2d8] ss:$28 sps:$4 sm:$0xff]  }
 0x31a   :  { %2308 = vmatpush2.bf16.msra.mxu0 %v5976_v40  ;;  %v6804_v40 = vld [vmem:[%s10028_s9 + $0x2a4] ss:$28 sps:$4 sm:$0xff]  }
 0x31b   :  { %2349 = vmatpush2.bf16.msra.mxu1 %v6104_v41  ;;  %5228 = vmatprep.subr.bf16.mxu0 %v6747_v42  ;;  %v6817_v41 = vld [vmem:[%s10028_s9 + $0x658] ss:$28 sps:$4 sm:$0xff]   ;;  %v6825_v42 = vld [vmem:[%s10028_s9 + $0x624] ss:$28 sps:$4 sm:$0xff]  }
 0x31c   :  { %5269 = vmatprep.subr.bf16.mxu1 %v6759_v43  ;;  %v6802_v43 = vld [vmem:[%s10028_s9 + $0x2a0] ss:$28 sps:$4 sm:$0xff]  }
 0x31d   :  { %2310 = vmatmul.mubr.bf16.vlgmr.msra.gmra.mxu0 %v7967_v61  ;;  %v8563_v50 = vpop.f32.mrf.mxu0  ;;  %v8565_v51 = vpop.f32.mrf.mxu1  ;;  %v6763_v61 = vld [vmem:[%s10028_s9 + $0x4d0] ss:$28 sps:$4 sm:$0xff]  }
 0x31e   :  { %2351 = vmatmul.mubr.bf16.vlgmr.msra.gmra.mxu1 %v7969_v62  ;;  %5229 = vmatpush1.bf16.msra.mxu0 %v6745_v44  ;;  %v6771_v62 = vld [vmem:[%s10028_s9 + $0x49c] ss:$28 sps:$4 sm:$0xff]   ;;  %v6810_v44 = vld [vmem:[%s10028_s9 + $0x26c] ss:$28 sps:$4 sm:$0xff]  }
 0x31f   :  { %v2067_v52 = vpop.f32.mrf.mxu0  ;;  %v2108_v60 = vpop.f32.mrf.mxu1  ;;  %5230 = vmatprep.subr.bf16.mxu0 %v6750_v46  ;;  %5270 = vmatpush1.bf16.msra.mxu1 %v6757_v47  ;;  %v6823_v46 = vld [vmem:[%s10028_s9 + $0x620] ss:$28 sps:$4 sm:$0xff]   ;;  %v6831_v47 = vld [vmem:[%s10028_s9 + $0x5ec] ss:$28 sps:$4 sm:$0xff]  }
 0x320   :  { %v2068_v54 = vadd.f32 %v2067_v52, %v718_v48  ;;  %5271 = vmatprep.subr.bf16.mxu1 %v6765_v49  ;;  %v6808_v48 = vld [vmem:[%s10028_s9 + $0x268] ss:$28 sps:$4 sm:$0xff]   ;;  %v714_v49 = vrot.slane %v8549_v45, %v7933_v34 }
 0x321   :  { %v2069_v55 = vpop.f32.mrf.mxu0  ;;  %v2110_v56 = vpop.f32.mrf.mxu1  ;;  %v6829_v52 = vld [vmem:[%s10028_s9 + $0x5e8] ss:$28 sps:$4 sm:$0xff]  }
 0x322   :  { %v2109_v57 = vadd.f32 %v2108_v60, %v2068_v54  ;;  %5231 = vmatpush1.bf16.msra.mxu0 %v6748_v59  ;;  %v6816_v59 = vld [vmem:[%s10028_s9 + $0x234] ss:$28 sps:$4 sm:$0xff]   ;;  %v6822_v54 = vld [vmem:[%s10028_s9 + $0x1fc] ss:$28 sps:$4 sm:$0xff]  }
 0x323   :  { %v2070_v63 = vpop.f32.mrf.mxu0  ;;  %v2111_v0 = vpop.f32.mrf.mxu1  ;;  %5232 = vmatprep.subr.bf16.mxu0 %v6753_v53  ;;  %5272 = vmatpush1.bf16.msra.mxu1 %v6763_v61  ;;  %v6834_v60 = vld [vmem:[%s10028_s9 + $0x5b4] ss:$28 sps:$4 sm:$0xff]   ;;  %v2066_v61 = vadd.f32 %v8563_v50, %v714_v49  ;;  %v6837_v55 = vld [vmem:[%s10028_s9 + $0x57c] ss:$28 sps:$4 sm:$0xff]  }
 0x324   :  { %v2360_v3 = vmax.f32 %v2109_v57, 0.0  ;;  %5273 = vmatprep.subr.bf16.mxu1 %v6771_v62  ;;  %v6814_v53 = vld [vmem:[%s10028_s9 + $0x230] ss:$28 sps:$4 sm:$0xff]   ;;  %v6820_v50 = vld [vmem:[%s10028_s9 + $0x1f8] ss:$28 sps:$4 sm:$0xff]  }
 0x325   :  { %v6832_v62 = vld [vmem:[%s10028_s9 + $0x5b0] ss:$28 sps:$4 sm:$0xff]   ;;  %v2107_v56 = vadd.f32 %v8565_v51, %v2066_v61  ;;  %v6828_v57 = vld [vmem:[%s10028_s9 + $0x1c4] ss:$28 sps:$4 sm:$0xff]  }
 0x326   :  { %v8592_v5 = vpack.c.bf16 %v2360_v3, %v2360_v3  ;;  %5233 = vmatpush1.bf16.msra.mxu0 %v6751_v58  ;;  %v6835_v58 = vld [vmem:[%s10028_s9 + $0x578] ss:$28 sps:$4 sm:$0xff]   ;;  %v6840_v63 = vld [vmem:[%s10028_s9 + $0x544] ss:$28 sps:$4 sm:$0xff]   ;;  %v6891_v3 = vld [vmem:[%s10028_s9 + $0xc0c] ss:$28 sps:$4 sm:$0xff]  }
 0x327   :  { %5234 = vmatprep.subr.bf16.mxu0 %v6756_v1  ;;  %5274 = vmatpush1.bf16.msra.mxu1 %v6769_v2  ;;  %v6826_v51 = vld [vmem:[%s10028_s9 + $0x1c0] ss:$28 sps:$4 sm:$0xff]   ;;  %v2359_v0 = vmax.f32 %v2107_v56, 0.0  ;;  %v6843_v2 = vld [vmem:[%s10028_s9 + $0x88c] ss:$28 sps:$4 sm:$0xff]  }
 0x328   :  { %5260 = vmatprep.mubr.bf16.mxu0 %v8592_v5  ;;  %5275 = vmatprep.subr.bf16.mxu1 %v6777_v4  ;;  %v6838_v1 = vld [vmem:[%s10028_s9 + $0x540] ss:$28 sps:$4 sm:$0xff]   ;;  %v722_v4 = vrot.slane %v8549_v45, %v7936_v35  ;;  %v6867_v61 = vld [vmem:[%s10028_s9 + $0xa4c] ss:$28 sps:$4 sm:$0xff]  }
 0x329   :  { %v6907_v49 = vld [vmem:[%s10028_s9 + $0xb60] ss:$28 sps:$4 sm:$0xff]  }
 0x32a   :  { %5235 = vmatpush1.bf16.msra.mxu0 %v6754_v6  ;;  %v6841_v6 = vld [vmem:[%s10028_s9 + $0x888] ss:$28 sps:$4 sm:$0xff]   ;;  %v6927_v56 = vld [vmem:[%s10028_s9 + $0xabc] ss:$28 sps:$4 sm:$0xff]  }
 0x32b   :  { %5236 = vmatprep.subr.bf16.mxu0 %v6762_v7  ;;  %5276 = vmatpush1.bf16.msra.mxu1 %v6775_v8  ;;  %v8760_v7 = vpack.c.bf16 %v2359_v0, %v2359_v0  ;;  %v6846_v8 = vld [vmem:[%s10028_s9 + $0x854] ss:$28 sps:$4 sm:$0xff]  }
 0x32c   :  { %5277 = vmatprep.subr.bf16.mxu1 %v6783_v9  ;;  %v726_v9 = vrot.slane %v8549_v45, %v7945_v38  ;;  %v6871_v0 = vld [vmem:[%s10028_s9 + $0x9d8] ss:$28 sps:$4 sm:$0xff]  }
 0x32e   :  { %5237 = vmatpush1.bf16.msra.mxu0 %v6760_v10 }
 0x32f   :  { %5238 = vmatprep.subr.bf16.mxu0 %v6768_v11  ;;  %5278 = vmatpush1.bf16.msra.mxu1 %v6781_v12 }
 0x330   :  { %5279 = vmatprep.subr.bf16.mxu1 %v6789_v13  ;;  %v6844_v13 = vld [vmem:[%s10028_s9 + $0x850] ss:$28 sps:$4 sm:$0xff]  }
 0x332   :  { %5239 = vmatpush1.bf16.msra.mxu0 %v6766_v14 }
 0x333   :  { %5240 = vmatprep.subr.bf16.mxu0 %v6774_v15  ;;  %5280 = vmatpush1.bf16.msra.mxu1 %v6787_v16  ;;  %v6849_v16 = vld [vmem:[%s10028_s9 + $0x81c] ss:$28 sps:$4 sm:$0xff]  }
 0x334   :  { %5281 = vmatprep.subr.bf16.mxu1 %v6795_v17 }
 0x336   :  { %5241 = vmatpush1.bf16.msra.mxu0 %v6772_v18 }
 0x337   :  { %5242 = vmatprep.subr.bf16.mxu0 %v6780_v19  ;;  %5282 = vmatpush1.bf16.msra.mxu1 %v6793_v20 }
 0x338   :  { %5283 = vmatprep.subr.bf16.mxu1 %v6801_v21 }
 0x33a   :  { %5243 = vmatpush1.bf16.msra.mxu0 %v6778_v22  ;;  %v6847_v22 = vld [vmem:[%s10028_s9 + $0x818] ss:$28 sps:$4 sm:$0xff]  }
 0x33b   :  { %5244 = vmatprep.subr.bf16.mxu0 %v6786_v23  ;;  %5284 = vmatpush1.bf16.msra.mxu1 %v6799_v24 }
 0x33c   :  { %5285 = vmatprep.subr.bf16.mxu1 %v6807_v25 }
 0x33e   :  { %5245 = vmatpush2.bf16.msra.mxu0 %v6784_v26  ;;  %v6852_v26 = vld [vmem:[%s10028_s9 + $0x7e4] ss:$28 sps:$4 sm:$0xff]  }
 0x33f   :  { %5246 = vmatprep.subr.bf16.mxu0 %v6792_v27  ;;  %5286 = vmatpush2.bf16.msra.mxu1 %v6805_v28 }
 0x340   :  { %5287 = vmatprep.subr.bf16.mxu1 %v6813_v29  ;;  %v6850_v29 = vld [vmem:[%s10028_s9 + $0x7e0] ss:$28 sps:$4 sm:$0xff]  }
 0x342   :  { %5247 = vmatpush2.bf16.msra.mxu0 %v6790_v30  ;;  %v6889_v30 = vld [vmem:[%s10028_s9 + $0xc08] ss:$28 sps:$4 sm:$0xff]  }
 0x343   :  { %5248 = vmatprep.subr.bf16.mxu0 %v6798_v31  ;;  %5288 = vmatpush2.bf16.msra.mxu1 %v6811_v32  ;;  %v6855_v32 = vld [vmem:[%s10028_s9 + $0x7ac] ss:$28 sps:$4 sm:$0xff]  }
 0x344   :  { %5289 = vmatprep.subr.bf16.mxu1 %v6819_v36  ;;  %v6897_v36 = vld [vmem:[%s10028_s9 + $0xbd4] ss:$28 sps:$4 sm:$0xff]  }
 0x346   :  { %5249 = vmatpush2.bf16.msra.mxu0 %v6796_v39  ;;  %v6853_v39 = vld [vmem:[%s10028_s9 + $0x7a8] ss:$28 sps:$4 sm:$0xff]  }
 0x347   :  { %5250 = vmatprep.subr.bf16.mxu0 %v6804_v40  ;;  %5290 = vmatpush2.bf16.msra.mxu1 %v6817_v41  ;;  %v6895_v40 = vld [vmem:[%s10028_s9 + $0xbd0] ss:$28 sps:$4 sm:$0xff]  }
 0x348   :  { %5291 = vmatprep.subr.bf16.mxu1 %v6825_v42  ;;  %v6858_v41 = vld [vmem:[%s10028_s9 + $0x774] ss:$28 sps:$4 sm:$0xff]   ;;  %v6903_v42 = vld [vmem:[%s10028_s9 + $0xb9c] ss:$28 sps:$4 sm:$0xff]  }
 0x34a   :  { %5251 = vmatpush2.bf16.msra.mxu0 %v6802_v43  ;;  %v6856_v43 = vld [vmem:[%s10028_s9 + $0x770] ss:$28 sps:$4 sm:$0xff]  }
 0x34b   :  { %5252 = vmatprep.subr.bf16.mxu0 %v6810_v44  ;;  %5292 = vmatpush2.bf16.msra.mxu1 %v6823_v46  ;;  %v6901_v44 = vld [vmem:[%s10028_s9 + $0xb98] ss:$28 sps:$4 sm:$0xff]  }
 0x34c   :  { %5293 = vmatprep.subr.bf16.mxu1 %v6831_v47  ;;  %v6861_v46 = vld [vmem:[%s10028_s9 + $0x73c] ss:$28 sps:$4 sm:$0xff]   ;;  %v6909_v47 = vld [vmem:[%s10028_s9 + $0xb64] ss:$28 sps:$4 sm:$0xff]  }
 0x34e   :  { %5253 = vmatpush2.bf16.msra.mxu0 %v6808_v48  ;;  %v6859_v48 = vld [vmem:[%s10028_s9 + $0x738] ss:$28 sps:$4 sm:$0xff]  }
 0x34f   :  { %5254 = vmatprep.subr.bf16.mxu0 %v6816_v59  ;;  %5294 = vmatpush2.bf16.msra.mxu1 %v6829_v52  ;;  %v6864_v59 = vld [vmem:[%s10028_s9 + $0x704] ss:$28 sps:$4 sm:$0xff]   ;;  %v6915_v52 = vld [vmem:[%s10028_s9 + $0xb2c] ss:$28 sps:$4 sm:$0xff]  }
 0x350   :  { %5295 = vmatprep.subr.bf16.mxu1 %v6834_v60  ;;  %v6862_v60 = vld [vmem:[%s10028_s9 + $0x700] ss:$28 sps:$4 sm:$0xff]  }
 0x352   :  { %5255 = vmatpush2.bf16.msra.mxu0 %v6814_v53  ;;  %v6913_v53 = vld [vmem:[%s10028_s9 + $0xb28] ss:$28 sps:$4 sm:$0xff]  }
 0x353   :  { %5256 = vmatprep.subr.bf16.mxu0 %v6822_v54  ;;  %5296 = vmatpush2.bf16.msra.mxu1 %v6832_v62  ;;  %v6921_v54 = vld [vmem:[%s10028_s9 + $0xaf4] ss:$28 sps:$4 sm:$0xff]   ;;  %v6865_v62 = vld [vmem:[%s10028_s9 + $0xa48] ss:$28 sps:$4 sm:$0xff]  }
 0x354   :  { %5297 = vmatprep.subr.bf16.mxu1 %v6837_v55  ;;  %v6919_v55 = vld [vmem:[%s10028_s9 + $0xaf0] ss:$28 sps:$4 sm:$0xff]  }
 0x356   :  { %5257 = vmatpush2.bf16.msra.mxu0 %v6820_v50  ;;  %v6870_v50 = vld [vmem:[%s10028_s9 + $0xa14] ss:$28 sps:$4 sm:$0xff]  }
 0x357   :  { %5258 = vmatprep.subr.bf16.mxu0 %v6828_v57  ;;  %5298 = vmatpush2.bf16.msra.mxu1 %v6835_v58  ;;  %v6868_v57 = vld [vmem:[%s10028_s9 + $0xa10] ss:$28 sps:$4 sm:$0xff]   ;;  %v6925_v58 = vld [vmem:[%s10028_s9 + $0xab8] ss:$28 sps:$4 sm:$0xff]  }
 0x358   :  { %5299 = vmatprep.subr.bf16.mxu1 %v6840_v63  ;;  %v6873_v63 = vld [vmem:[%s10028_s9 + $0x9dc] ss:$28 sps:$4 sm:$0xff]  }
 0x35a   :  { %5259 = vmatpush2.bf16.msra.mxu0 %v6826_v51  ;;  %v6933_v51 = vld [vmem:[%s10028_s9 + $0xa84] ss:$28 sps:$4 sm:$0xff]  }
 0x35b   :  { %5300 = vmatpush2.bf16.msra.mxu1 %v6838_v1  ;;  %5310 = vmatprep.subr.bf16.mxu0 %v6843_v2  ;;  %v6931_v1 = vld [vmem:[%s10028_s9 + $0xa80] ss:$28 sps:$4 sm:$0xff]  }
 0x35c   :  { %5351 = vmatprep.subr.bf16.mxu1 %v6891_v3  ;;  %v6876_v2 = vld [vmem:[%s10028_s9 + $0x9a4] ss:$28 sps:$4 sm:$0xff]   ;;  %v6939_v3 = vld [vmem:[%s10028_s9 + $0xdcc] ss:$28 sps:$4 sm:$0xff]  }
 0x35d   :  { %v2147_v10 = vpop.f32.mrf.mxu0  ;;  %v2188_v11 = vpop.f32.mrf.mxu1  ;;  %5261 = vmatmul.mubr.bf16.vlgmr.msra.gmra.mxu0 %v8760_v7 }
 0x35e   :  { %v2148_v12 = vadd.f32 %v2147_v10, %v722_v4  ;;  %5311 = vmatpush1.bf16.msra.mxu0 %v6841_v6  ;;  %v6874_v4 = vld [vmem:[%s10028_s9 + $0x9a0] ss:$28 sps:$4 sm:$0xff]   ;;  %v6937_v6 = vld [vmem:[%s10028_s9 + $0xdc8] ss:$28 sps:$4 sm:$0xff]  }
 0x35f   :  { %v2149_v14 = vpop.f32.mrf.mxu0  ;;  %v2190_v15 = vpop.f32.mrf.mxu1  ;;  %5312 = vmatprep.subr.bf16.mxu0 %v6846_v8  ;;  %v6879_v8 = vld [vmem:[%s10028_s9 + $0x96c] ss:$28 sps:$4 sm:$0xff]  }
 0x360   :  { %v2189_v17 = vadd.f32 %v2188_v11, %v2148_v12  ;;  %v2150_v18 = vadd.f32 %v2149_v14, %v726_v9  ;;  %v6945_v9 = vld [vmem:[%s10028_s9 + $0xd94] ss:$28 sps:$4 sm:$0xff]   ;;  %v6877_v10 = vld [vmem:[%s10028_s9 + $0x968] ss:$28 sps:$4 sm:$0xff]  }
 0x361   :  { %v2151_v19 = vpop.f32.mrf.mxu0  ;;  %v2192_v20 = vpop.f32.mrf.mxu1  ;;  %v6943_v11 = vld [vmem:[%s10028_s9 + $0xd90] ss:$28 sps:$4 sm:$0xff]  }
 0x362   :  { %v2191_v21 = vadd.f32 %v2190_v15, %v2150_v18  ;;  %5313 = vmatpush1.bf16.msra.mxu0 %v6844_v13  ;;  %v2361_v23 = vmax.f32 %v2189_v17, 0.0  ;;  %v6882_v12 = vld [vmem:[%s10028_s9 + $0x934] ss:$28 sps:$4 sm:$0xff]   ;;  %v6951_v13 = vld [vmem:[%s10028_s9 + $0xd5c] ss:$28 sps:$4 sm:$0xff]  }
 0x363   :  { %v2152_v24 = vpop.f32.mrf.mxu0  ;;  %v2193_v25 = vpop.f32.mrf.mxu1  ;;  %5314 = vmatprep.subr.bf16.mxu0 %v6849_v16  ;;  %v6880_v14 = vld [vmem:[%s10028_s9 + $0x930] ss:$28 sps:$4 sm:$0xff]   ;;  %v6949_v15 = vld [vmem:[%s10028_s9 + $0xd58] ss:$28 sps:$4 sm:$0xff]   ;;  %v6957_v17 = vld [vmem:[%s10028_s9 + $0xd24] ss:$28 sps:$4 sm:$0xff]  }
 0x364   :  { %v2362_v27 = vmax.f32 %v2191_v21, 0.0  ;;  %v8788_v31 = vpack.c.bf16 %v2361_v23, %v2361_v23  ;;  %v6885_v16 = vld [vmem:[%s10028_s9 + $0x8fc] ss:$28 sps:$4 sm:$0xff]   ;;  %v6888_v20 = vld [vmem:[%s10028_s9 + $0x8c4] ss:$28 sps:$4 sm:$0xff]  }
 0x365   :  { %v6883_v18 = vld [vmem:[%s10028_s9 + $0x8f8] ss:$28 sps:$4 sm:$0xff]   ;;  %v6955_v19 = vld [vmem:[%s10028_s9 + $0xd20] ss:$28 sps:$4 sm:$0xff]   ;;  %v6963_v21 = vld [vmem:[%s10028_s9 + $0xcec] ss:$28 sps:$4 sm:$0xff]  }
 0x366   :  { %v8780_v28 = vpack.c.bf16 %v2362_v27, %v2362_v27  ;;  %5315 = vmatpush1.bf16.msra.mxu0 %v6847_v22  ;;  %v729_v22 = vsub.s32 4, %v7930_v33  ;;  %v6886_v23 = vld [vmem:[%s10028_s9 + $0x8c0] ss:$28 sps:$4 sm:$0xff]   ;;  %v6961_v24 = vld [vmem:[%s10028_s9 + $0xce8] ss:$28 sps:$4 sm:$0xff]   ;;  %v733_v27 = vsub.s32 5, %v7930_v33 }
 0x367   :  { %5316 = vmatprep.subr.bf16.mxu0 %v6852_v26  ;;  %v6894_v25 = vld [vmem:[%s10028_s9 + $0x194] ss:$28 sps:$4 sm:$0xff]  }
 0x368   :  { %5301 = vmatprep.mubr.bf16.mxu1 %v8780_v28  ;;  %v6969_v26 = vld [vmem:[%s10028_s9 + $0xcb4] ss:$28 sps:$4 sm:$0xff]  }
 0x369   :  { %5302 = vmatmul.mubr.bf16.vlgmr.msra.gmra.mxu1 %v8788_v31 }
 0x36a   :  { %5317 = vmatpush1.bf16.msra.mxu0 %v6850_v29  ;;  %5352 = vmatpush1.bf16.msra.mxu1 %v6889_v30  ;;  %v730_v29 = vrot.slane %v8549_v45, %v729_v22  ;;  %v6967_v30 = vld [vmem:[%s10028_s9 + $0xcb0] ss:$28 sps:$4 sm:$0xff]  }
 0x36b   :  { %5318 = vmatprep.subr.bf16.mxu0 %v6855_v32  ;;  %5353 = vmatprep.subr.bf16.mxu1 %v6897_v36  ;;  %v6975_v32 = vld [vmem:[%s10028_s9 + $0xc7c] ss:$28 sps:$4 sm:$0xff]   ;;  %v734_v36 = vrot.slane %v8549_v45, %v733_v27 }
 0x36e   :  { %5319 = vmatpush1.bf16.msra.mxu0 %v6853_v39  ;;  %5354 = vmatpush1.bf16.msra.mxu1 %v6895_v40 }
 0x36f   :  { %5320 = vmatprep.subr.bf16.mxu0 %v6858_v41  ;;  %5355 = vmatprep.subr.bf16.mxu1 %v6903_v42  ;;  %v6973_v42 = vld [vmem:[%s10028_s9 + $0xc78] ss:$28 sps:$4 sm:$0xff]  }
 0x372   :  { %5321 = vmatpush1.bf16.msra.mxu0 %v6856_v43  ;;  %5356 = vmatpush1.bf16.msra.mxu1 %v6901_v44  ;;  %v6981_v44 = vld [vmem:[%s10028_s9 + $0xc44] ss:$28 sps:$4 sm:$0xff]  }
 0x373   :  { %5322 = vmatprep.subr.bf16.mxu0 %v6861_v46  ;;  %5357 = vmatprep.subr.bf16.mxu1 %v6909_v47 }
 0x376   :  { %5323 = vmatpush1.bf16.msra.mxu0 %v6859_v48  ;;  %5358 = vmatpush1.bf16.msra.mxu1 %v6907_v49 }
 0x377   :  { %5324 = vmatprep.subr.bf16.mxu0 %v6864_v59  ;;  %5359 = vmatprep.subr.bf16.mxu1 %v6915_v52 }
 0x37a   :  { %5325 = vmatpush1.bf16.msra.mxu0 %v6862_v60  ;;  %5360 = vmatpush1.bf16.msra.mxu1 %v6913_v53  ;;  %v6979_v60 = vld [vmem:[%s10028_s9 + $0xc40] ss:$28 sps:$4 sm:$0xff]  }
 0x37b   :  { %5326 = vmatprep.subr.bf16.mxu0 %v6867_v61  ;;  %5361 = vmatprep.subr.bf16.mxu1 %v6921_v54  ;;  %v6987_v54 = vld [vmem:[%s10028_s9 + $0x514] ss:$28 sps:$4 sm:$0xff]  }
 0x37e   :  { %5327 = vmatpush2.bf16.msra.mxu0 %v6865_v62  ;;  %5362 = vmatpush1.bf16.msra.mxu1 %v6919_v55 }
 0x37f   :  { %5328 = vmatprep.subr.bf16.mxu0 %v6870_v50  ;;  %5363 = vmatprep.subr.bf16.mxu1 %v6927_v56  ;;  %v6892_v56 = vld [vmem:[%s10028_s9 + $0x190] ss:$28 sps:$4 sm:$0xff]  }
 0x382   :  { %5329 = vmatpush2.bf16.msra.mxu0 %v6868_v57  ;;  %5364 = vmatpush1.bf16.msra.mxu1 %v6925_v58  ;;  %v6900_v58 = vld [vmem:[%s10028_s9 + $0x15c] ss:$28 sps:$4 sm:$0xff]  }
 0x383   :  { %5330 = vmatprep.subr.bf16.mxu0 %v6873_v63  ;;  %5365 = vmatprep.subr.bf16.mxu1 %v6933_v51  ;;  %v6898_v63 = vld [vmem:[%s10028_s9 + $0x158] ss:$28 sps:$4 sm:$0xff]   ;;  %v6906_v51 = vld [vmem:[%s10028_s9 + $0x124] ss:$28 sps:$4 sm:$0xff]  }
 0x386   :  { %5331 = vmatpush2.bf16.msra.mxu0 %v6871_v0  ;;  %5366 = vmatpush1.bf16.msra.mxu1 %v6931_v1  ;;  %v6904_v0 = vld [vmem:[%s10028_s9 + $0x120] ss:$28 sps:$4 sm:$0xff]   ;;  %v6912_v1 = vld [vmem:[%s10028_s9 + $0xec] ss:$28 sps:$4 sm:$0xff]  }
 0x387   :  { %5332 = vmatprep.subr.bf16.mxu0 %v6876_v2  ;;  %5367 = vmatprep.subr.bf16.mxu1 %v6939_v3  ;;  %v6910_v2 = vld [vmem:[%s10028_s9 + $0xe8] ss:$28 sps:$4 sm:$0xff]   ;;  %v6918_v3 = vld [vmem:[%s10028_s9 + $0xb4] ss:$28 sps:$4 sm:$0xff]  }
 0x38a   :  { %5333 = vmatpush2.bf16.msra.mxu0 %v6874_v4  ;;  %5368 = vmatpush2.bf16.msra.mxu1 %v6937_v6  ;;  %v6916_v4 = vld [vmem:[%s10028_s9 + $0xb0] ss:$28 sps:$4 sm:$0xff]   ;;  %v6924_v6 = vld [vmem:[%s10028_s9 + $0x7c] ss:$28 sps:$4 sm:$0xff]  }
 0x38b   :  { %5334 = vmatprep.subr.bf16.mxu0 %v6879_v8  ;;  %5369 = vmatprep.subr.bf16.mxu1 %v6945_v9  ;;  %v6922_v8 = vld [vmem:[%s10028_s9 + $0x78] ss:$28 sps:$4 sm:$0xff]   ;;  %v6930_v9 = vld [vmem:[%s10028_s9 + $0x44] ss:$28 sps:$4 sm:$0xff]  }
 0x38e   :  { %5335 = vmatpush2.bf16.msra.mxu0 %v6877_v10  ;;  %5370 = vmatpush2.bf16.msra.mxu1 %v6943_v11  ;;  %v6928_v10 = vld [vmem:[%s10028_s9 + $0x40] ss:$28 sps:$4 sm:$0xff]   ;;  %v6936_v11 = vld [vmem:[%s10028_s9 + $0xc] ss:$28 sps:$4 sm:$0xff]  }
 0x38f   :  { %5336 = vmatprep.subr.bf16.mxu0 %v6882_v12  ;;  %5371 = vmatprep.subr.bf16.mxu1 %v6951_v13  ;;  %v6934_v12 = vld [vmem:[%s10028_s9 + $0x8] ss:$28 sps:$4 sm:$0xff]   ;;  %v6942_v13 = vld [vmem:[%s10028_s9 + $0x354] ss:$28 sps:$4 sm:$0xff]  }
 0x392   :  { %5337 = vmatpush2.bf16.msra.mxu0 %v6880_v14  ;;  %5372 = vmatpush2.bf16.msra.mxu1 %v6949_v15  ;;  %v6940_v14 = vld [vmem:[%s10028_s9 + $0x350] ss:$28 sps:$4 sm:$0xff]   ;;  %v6948_v15 = vld [vmem:[%s10028_s9 + $0x31c] ss:$28 sps:$4 sm:$0xff]  }
 0x393   :  { %5338 = vmatprep.subr.bf16.mxu0 %v6885_v16  ;;  %5373 = vmatprep.subr.bf16.mxu1 %v6957_v17  ;;  %v6946_v16 = vld [vmem:[%s10028_s9 + $0x318] ss:$28 sps:$4 sm:$0xff]   ;;  %v6954_v17 = vld [vmem:[%s10028_s9 + $0x2e4] ss:$28 sps:$4 sm:$0xff]  }
 0x396   :  { %5339 = vmatpush2.bf16.msra.mxu0 %v6883_v18  ;;  %5374 = vmatpush2.bf16.msra.mxu1 %v6955_v19  ;;  %v6952_v18 = vld [vmem:[%s10028_s9 + $0x2e0] ss:$28 sps:$4 sm:$0xff]   ;;  %v6960_v19 = vld [vmem:[%s10028_s9 + $0x2ac] ss:$28 sps:$4 sm:$0xff]  }
 0x397   :  { %5340 = vmatprep.subr.bf16.mxu0 %v6888_v20  ;;  %5375 = vmatprep.subr.bf16.mxu1 %v6963_v21  ;;  %v6958_v20 = vld [vmem:[%s10028_s9 + $0x2a8] ss:$28 sps:$4 sm:$0xff]   ;;  %v6966_v21 = vld [vmem:[%s10028_s9 + $0x274] ss:$28 sps:$4 sm:$0xff]  }
 0x39a   :  { %5341 = vmatpush2.bf16.msra.mxu0 %v6886_v23  ;;  %5376 = vmatpush2.bf16.msra.mxu1 %v6961_v24  ;;  %v6964_v23 = vld [vmem:[%s10028_s9 + $0x270] ss:$28 sps:$4 sm:$0xff]   ;;  %v737_v24 = vsub.s32 6, %v7930_v33 }
 0x39b   :  { %5392 = vmatprep.subr.bf16.mxu0 %v6894_v25  ;;  %5377 = vmatprep.subr.bf16.mxu1 %v6969_v26  ;;  %v6972_v25 = vld [vmem:[%s10028_s9 + $0x23c] ss:$28 sps:$4 sm:$0xff]   ;;  %v741_v26 = vsub.s32 7, %v7930_v33 }
 0x39d   :  { %v2229_v39 = vpop.f32.mrf.mxu0 }
 0x39e   :  { %v2230_v40 = vadd.f32 %v2229_v39, %v730_v29  ;;  %v2270_v41 = vpop.f32.mrf.mxu1  ;;  %5378 = vmatpush2.bf16.msra.mxu1 %v6967_v30  ;;  %v6970_v29 = vld [vmem:[%s10028_s9 + $0x238] ss:$28 sps:$4 sm:$0xff]   ;;  %v738_v30 = vrot.slane %v8549_v45, %v737_v24 }
 0x39f   :  { %v2231_v43 = vpop.f32.mrf.mxu0  ;;  %5379 = vmatprep.subr.bf16.mxu1 %v6975_v32  ;;  %v6978_v32 = vld [vmem:[%s10028_s9 + $0x204] ss:$28 sps:$4 sm:$0xff]  }
 0x3a0   :  { %v2271_v46 = vadd.f32 %v2270_v41, %v2230_v40  ;;  %v2232_v47 = vadd.f32 %v2231_v43, %v734_v36  ;;  %v2272_v48 = vpop.f32.mrf.mxu1  ;;  %v742_v36 = vrot.slane %v8549_v45, %v741_v26  ;;  %v7024_v26 = vld [vmem:[%s10028_s9 + $0x740] ss:$28 sps:$4 sm:$0xff]  }
 0x3a1   :  { %v2233_v49 = vpop.f32.mrf.mxu0 }
 0x3a2   :  { %v2273_v59 = vadd.f32 %v2272_v48, %v2232_v47  ;;  %v2274_v52 = vpop.f32.mrf.mxu1  ;;  %5380 = vmatpush2.bf16.msra.mxu1 %v6973_v42  ;;  %v2363_v53 = vmax.f32 %v2271_v46, 0.0  ;;  %v6976_v42 = vld [vmem:[%s10028_s9 + $0x200] ss:$28 sps:$4 sm:$0xff]  }
 0x3a3   :  { %v2234_v61 = vpop.f32.mrf.mxu0  ;;  %5381 = vmatprep.subr.bf16.mxu1 %v6981_v44  ;;  %v6984_v44 = vld [vmem:[%s10028_s9 + $0x1cc] ss:$28 sps:$4 sm:$0xff]  }
 0x3a4   :  { %v2364_v62 = vmax.f32 %v2273_v59, 0.0  ;;  %v2275_v55 = vpop.f32.mrf.mxu1  ;;  %v8973_v57 = vpack.c.bf16 %v2363_v53, %v2363_v53  ;;  %v6982_v52 = vld [vmem:[%s10028_s9 + $0x1c8] ss:$28 sps:$4 sm:$0xff]   ;;  %v6990_v61 = vld [vmem:[%s10028_s9 + $0x894] ss:$28 sps:$4 sm:$0xff]  }
 0x3a6   :  { %v8968_v50 = vpack.c.bf16 %v2364_v62, %v2364_v62  ;;  %5382 = vmatpush2.bf16.msra.mxu1 %v6979_v60 }
 0x3a7   :  { %5433 = vmatprep.subr.bf16.mxu1 %v6987_v54 }
 0x3a8   :  { %5342 = vmatprep.mubr.bf16.mxu0 %v8968_v50 }
 0x3a9   :  { %5343 = vmatmul.mubr.bf16.vlgmr.msra.gmra.mxu0 %v8973_v57 }
 0x3aa   :  { %5393 = vmatpush1.bf16.msra.mxu0 %v6892_v56  ;;  %5424 = vmatprep.mubr.bf16.mxu0 %v8592_v5  ;;  %v6985_v56 = vld [vmem:[%s10028_s9 + $0x510] ss:$28 sps:$4 sm:$0xff]  }
 0x3ab   :  { %5394 = vmatprep.subr.bf16.mxu0 %v6900_v58  ;;  %v6988_v58 = vld [vmem:[%s10028_s9 + $0x890] ss:$28 sps:$4 sm:$0xff]  }
 0x3ae   :  { %5395 = vmatpush1.bf16.msra.mxu0 %v6898_v63 }
 0x3af   :  { %5396 = vmatprep.subr.bf16.mxu0 %v6906_v51  ;;  %v6993_v51 = vld [vmem:[%s10028_s9 + $0x4dc] ss:$28 sps:$4 sm:$0xff]  }
 0x3b2   :  { %5397 = vmatpush1.bf16.msra.mxu0 %v6904_v0  ;;  %v6996_v0 = vld [vmem:[%s10028_s9 + $0x85c] ss:$28 sps:$4 sm:$0xff]  }
 0x3b3   :  { %5398 = vmatprep.subr.bf16.mxu0 %v6912_v1  ;;  %v6991_v1 = vld [vmem:[%s10028_s9 + $0x4d8] ss:$28 sps:$4 sm:$0xff]  }
 0x3b6   :  { %5399 = vmatpush1.bf16.msra.mxu0 %v6910_v2  ;;  %v6994_v2 = vld [vmem:[%s10028_s9 + $0x858] ss:$28 sps:$4 sm:$0xff]  }
 0x3b7   :  { %5400 = vmatprep.subr.bf16.mxu0 %v6918_v3  ;;  %v6999_v3 = vld [vmem:[%s10028_s9 + $0x4a4] ss:$28 sps:$4 sm:$0xff]  }
 0x3ba   :  { %5401 = vmatpush1.bf16.msra.mxu0 %v6916_v4  ;;  %v7002_v4 = vld [vmem:[%s10028_s9 + $0x824] ss:$28 sps:$4 sm:$0xff]  }
 0x3bb   :  { %5402 = vmatprep.subr.bf16.mxu0 %v6924_v6  ;;  %v6997_v6 = vld [vmem:[%s10028_s9 + $0x4a0] ss:$28 sps:$4 sm:$0xff]  }
 0x3be   :  { %5403 = vmatpush1.bf16.msra.mxu0 %v6922_v8  ;;  %v7000_v8 = vld [vmem:[%s10028_s9 + $0x820] ss:$28 sps:$4 sm:$0xff]  }
 0x3bf   :  { %5404 = vmatprep.subr.bf16.mxu0 %v6930_v9  ;;  %v7005_v9 = vld [vmem:[%s10028_s9 + $0x46c] ss:$28 sps:$4 sm:$0xff]  }
 0x3c2   :  { %5405 = vmatpush1.bf16.msra.mxu0 %v6928_v10  ;;  %v7008_v10 = vld [vmem:[%s10028_s9 + $0x7ec] ss:$28 sps:$4 sm:$0xff]  }
 0x3c3   :  { %5406 = vmatprep.subr.bf16.mxu0 %v6936_v11  ;;  %v7003_v11 = vld [vmem:[%s10028_s9 + $0x468] ss:$28 sps:$4 sm:$0xff]  }
 0x3c6   :  { %5407 = vmatpush1.bf16.msra.mxu0 %v6934_v12  ;;  %v7006_v12 = vld [vmem:[%s10028_s9 + $0x7e8] ss:$28 sps:$4 sm:$0xff]  }
 0x3c7   :  { %5408 = vmatprep.subr.bf16.mxu0 %v6942_v13  ;;  %v7011_v13 = vld [vmem:[%s10028_s9 + $0x434] ss:$28 sps:$4 sm:$0xff]  }
 0x3ca   :  { %5409 = vmatpush2.bf16.msra.mxu0 %v6940_v14  ;;  %v7014_v14 = vld [vmem:[%s10028_s9 + $0x7b4] ss:$28 sps:$4 sm:$0xff]  }
 0x3cb   :  { %5410 = vmatprep.subr.bf16.mxu0 %v6948_v15  ;;  %v7009_v15 = vld [vmem:[%s10028_s9 + $0x430] ss:$28 sps:$4 sm:$0xff]  }
 0x3ce   :  { %5411 = vmatpush2.bf16.msra.mxu0 %v6946_v16  ;;  %v7012_v16 = vld [vmem:[%s10028_s9 + $0x7b0] ss:$28 sps:$4 sm:$0xff]  }
 0x3cf   :  { %5412 = vmatprep.subr.bf16.mxu0 %v6954_v17  ;;  %v7017_v17 = vld [vmem:[%s10028_s9 + $0x3fc] ss:$28 sps:$4 sm:$0xff]  }
 0x3d2   :  { %5413 = vmatpush2.bf16.msra.mxu0 %v6952_v18  ;;  %v7020_v18 = vld [vmem:[%s10028_s9 + $0x77c] ss:$28 sps:$4 sm:$0xff]  }
 0x3d3   :  { %5414 = vmatprep.subr.bf16.mxu0 %v6960_v19  ;;  %v7015_v19 = vld [vmem:[%s10028_s9 + $0x3f8] ss:$28 sps:$4 sm:$0xff]  }
 0x3d6   :  { %5415 = vmatpush2.bf16.msra.mxu0 %v6958_v20  ;;  %v7018_v20 = vld [vmem:[%s10028_s9 + $0x778] ss:$28 sps:$4 sm:$0xff]  }
 0x3d7   :  { %5416 = vmatprep.subr.bf16.mxu0 %v6966_v21  ;;  %v7023_v21 = vld [vmem:[%s10028_s9 + $0x3c4] ss:$28 sps:$4 sm:$0xff]  }
 0x3da   :  { %5417 = vmatpush2.bf16.msra.mxu0 %v6964_v23  ;;  %v7026_v23 = vld [vmem:[%s10028_s9 + $0x744] ss:$28 sps:$4 sm:$0xff]  }
 0x3db   :  { %5418 = vmatprep.subr.bf16.mxu0 %v6972_v25  ;;  %v7021_v25 = vld [vmem:[%s10028_s9 + $0x3c0] ss:$28 sps:$4 sm:$0xff]  }
 0x3dd   :  { %v2311_v39 = vpop.f32.mrf.mxu0 }
 0x3de   :  { %v2312_v40 = vadd.f32 %v2311_v39, %v738_v30  ;;  %v2352_v41 = vpop.f32.mrf.mxu1  ;;  %5419 = vmatpush2.bf16.msra.mxu0 %v6970_v29  ;;  %v7029_v29 = vld [vmem:[%s10028_s9 + $0x38c] ss:$28 sps:$4 sm:$0xff]   ;;  %v7035_v39 = vld [vmem:[%s10028_s9 + $0x6d4] ss:$28 sps:$4 sm:$0xff]  }
 0x3df   :  { %v2313_v43 = vpop.f32.mrf.mxu0  ;;  %5420 = vmatprep.subr.bf16.mxu0 %v6978_v32  ;;  %v7032_v30 = vld [vmem:[%s10028_s9 + $0x70c] ss:$28 sps:$4 sm:$0xff]  }
 0x3e0   :  { %v2353_v46 = vadd.f32 %v2352_v41, %v2312_v40  ;;  %v2314_v47 = vadd.f32 %v2313_v43, %v742_v36  ;;  %v2354_v48 = vpop.f32.mrf.mxu1  ;;  %v7027_v32 = vld [vmem:[%s10028_s9 + $0x388] ss:$28 sps:$4 sm:$0xff]   ;;  %v7038_v40 = vld [vmem:[%s10028_s9 + $0xa54] ss:$28 sps:$4 sm:$0xff]   ;;  %v7041_v43 = vld [vmem:[%s10028_s9 + $0x69c] ss:$28 sps:$4 sm:$0xff]  }
 0x3e1   :  { %v2315_v49 = vpop.f32.mrf.mxu0  ;;  %v7030_v36 = vld [vmem:[%s10028_s9 + $0x708] ss:$28 sps:$4 sm:$0xff]   ;;  %v7033_v41 = vld [vmem:[%s10028_s9 + $0x6d0] ss:$28 sps:$4 sm:$0xff]  }
 0x3e2   :  { %v2355_v59 = vadd.f32 %v2354_v48, %v2314_v47  ;;  %v2356_v45 = vpop.f32.mrf.mxu1  ;;  %5421 = vmatpush2.bf16.msra.mxu0 %v6976_v42  ;;  %v2365_v60 = vmax.f32 %v2353_v46, 0.0  ;;  %v7036_v42 = vld [vmem:[%s10028_s9 + $0xa50] ss:$28 sps:$4 sm:$0xff]   ;;  %v7039_v46 = vld [vmem:[%s10028_s9 + $0x698] ss:$28 sps:$4 sm:$0xff]  }
 0x3e3   :  { %v2316_v53 = vpop.f32.mrf.mxu0  ;;  %5422 = vmatprep.subr.bf16.mxu0 %v6984_v44  ;;  %v7044_v44 = vld [vmem:[%s10028_s9 + $0xa1c] ss:$28 sps:$4 sm:$0xff]   ;;  %v7047_v48 = vld [vmem:[%s10028_s9 + $0x664] ss:$28 sps:$4 sm:$0xff]  }
 0x3e4   :  { %v2366_v54 = vmax.f32 %v2355_v59, 0.0  ;;  %v2357_v62 = vpop.f32.mrf.mxu1  ;;  %v9085_v63 = vpack.c.bf16 %v2365_v60, %v2365_v60  ;;  %v7042_v47 = vld [vmem:[%s10028_s9 + $0xa18] ss:$28 sps:$4 sm:$0xff]   ;;  %v7050_v49 = vld [vmem:[%s10028_s9 + $0x9e4] ss:$28 sps:$4 sm:$0xff]  }
 0x3e5   :  { %v7045_v59 = vld [vmem:[%s10028_s9 + $0x660] ss:$28 sps:$4 sm:$0xff]   ;;  %v7056_v60 = vld [vmem:[%s10028_s9 + $0x9ac] ss:$28 sps:$4 sm:$0xff]   ;;  %v7062_v62 = vld [vmem:[%s10028_s9 + $0x974] ss:$28 sps:$4 sm:$0xff]  }
 0x3e6   :  { %v9077_v55 = vpack.c.bf16 %v2366_v54, %v2366_v54  ;;  %5423 = vmatpush2.bf16.msra.mxu0 %v6982_v52  ;;  %v7048_v45 = vld [vmem:[%s10028_s9 + $0x9e0] ss:$28 sps:$4 sm:$0xff]   ;;  %v7053_v52 = vld [vmem:[%s10028_s9 + $0x62c] ss:$28 sps:$4 sm:$0xff]   ;;  %v7059_v54 = vld [vmem:[%s10028_s9 + $0x5f4] ss:$28 sps:$4 sm:$0xff]  }
 0x3e7   :  { %5474 = vmatprep.subr.bf16.mxu0 %v6990_v61  ;;  %v7051_v53 = vld [vmem:[%s10028_s9 + $0x628] ss:$28 sps:$4 sm:$0xff]  }
 0x3e8   :  { %5383 = vmatprep.mubr.bf16.mxu1 %v9077_v55  ;;  %v7054_v61 = vld [vmem:[%s10028_s9 + $0x9a8] ss:$28 sps:$4 sm:$0xff]  }
 0x3e9   :  { %5425 = vmatmul.mubr.bf16.vlgmr.msra.gmra.mxu0 %v8760_v7  ;;  %5384 = vmatmul.mubr.bf16.vlgmr.msra.gmra.mxu1 %v9085_v63 }
 0x3ea   :  { %5434 = vmatpush1.bf16.msra.mxu1 %v6985_v56  ;;  %5475 = vmatpush1.bf16.msra.mxu0 %v6988_v58  ;;  %v7057_v56 = vld [vmem:[%s10028_s9 + $0x5f0] ss:$28 sps:$4 sm:$0xff]  }
 0x3eb   :  { %5506 = vmatprep.mubr.bf16.mxu0 %v8968_v50  ;;  %5465 = vmatprep.mubr.bf16.mxu1 %v8780_v28  ;;  %v7060_v58 = vld [vmem:[%s10028_s9 + $0x970] ss:$28 sps:$4 sm:$0xff]  }
 0x3ec   :  { %5435 = vmatprep.subr.bf16.mxu1 %v6993_v51  ;;  %5476 = vmatprep.subr.bf16.mxu0 %v6996_v0  ;;  %v7065_v51 = vld [vmem:[%s10028_s9 + $0x5bc] ss:$28 sps:$4 sm:$0xff]  }
 0x3ed   :  { %v7068_v0 = vld [vmem:[%s10028_s9 + $0x93c] ss:$28 sps:$4 sm:$0xff]  }
 0x3ee   :  { %5436 = vmatpush1.bf16.msra.mxu1 %v6991_v1  ;;  %5477 = vmatpush1.bf16.msra.mxu0 %v6994_v2  ;;  %v7063_v1 = vld [vmem:[%s10028_s9 + $0x5b8] ss:$28 sps:$4 sm:$0xff]  }
 0x3ef   :  { %5437 = vmatprep.subr.bf16.mxu1 %v6999_v3  ;;  %5478 = vmatprep.subr.bf16.mxu0 %v7002_v4  ;;  %v7066_v2 = vld [vmem:[%s10028_s9 + $0x938] ss:$28 sps:$4 sm:$0xff]   ;;  %v7071_v3 = vld [vmem:[%s10028_s9 + $0x584] ss:$28 sps:$4 sm:$0xff]  }
 0x3f0   :  { %v7074_v4 = vld [vmem:[%s10028_s9 + $0x904] ss:$28 sps:$4 sm:$0xff]  }
 0x3f2   :  { %5438 = vmatpush1.bf16.msra.mxu1 %v6997_v6  ;;  %5479 = vmatpush1.bf16.msra.mxu0 %v7000_v8  ;;  %v7069_v8 = vld [vmem:[%s10028_s9 + $0x580] ss:$28 sps:$4 sm:$0xff]  }
 0x3f3   :  { %5439 = vmatprep.subr.bf16.mxu1 %v7005_v9  ;;  %5480 = vmatprep.subr.bf16.mxu0 %v7008_v10  ;;  %v7072_v9 = vld [vmem:[%s10028_s9 + $0x900] ss:$28 sps:$4 sm:$0xff]  }
 0x3f6   :  { %5440 = vmatpush1.bf16.msra.mxu1 %v7003_v11  ;;  %5481 = vmatpush1.bf16.msra.mxu0 %v7006_v12  ;;  %v7077_v11 = vld [vmem:[%s10028_s9 + $0x54c] ss:$28 sps:$4 sm:$0xff]  }
 0x3f7   :  { %5441 = vmatprep.subr.bf16.mxu1 %v7011_v13  ;;  %5482 = vmatprep.subr.bf16.mxu0 %v7014_v14  ;;  %v7080_v12 = vld [vmem:[%s10028_s9 + $0x8cc] ss:$28 sps:$4 sm:$0xff]   ;;  %v9269_v13 = vld [vmem:[%s10029_s10] sm:$0x7f] }
 0x3fa   :  { %5442 = vmatpush1.bf16.msra.mxu1 %v7009_v15  ;;  %5483 = vmatpush1.bf16.msra.mxu0 %v7012_v16  ;;  %v7075_v15 = vld [vmem:[%s10028_s9 + $0x548] ss:$28 sps:$4 sm:$0xff]  }
 0x3fb   :  { %5443 = vmatprep.subr.bf16.mxu1 %v7017_v17  ;;  %5484 = vmatprep.subr.bf16.mxu0 %v7020_v18  ;;  %v7078_v16 = vld [vmem:[%s10028_s9 + $0x8c8] ss:$28 sps:$4 sm:$0xff]   ;;  %v7083_v18 = vld [vmem:[%s10028_s9 + $0xc14] ss:$28 sps:$4 sm:$0xff]  }
 0x3fe   :  { %5444 = vmatpush1.bf16.msra.mxu1 %v7015_v19  ;;  %5485 = vmatpush1.bf16.msra.mxu0 %v7018_v20  ;;  %v7086_v19 = vld [vmem:[%s10028_s9 + $0x19c] ss:$28 sps:$4 sm:$0xff]   ;;  %v2892_v20 = vrot.slane %v9269_v13, %v7933_v34 }
 0x3ff   :  { %5445 = vmatprep.subr.bf16.mxu1 %v7023_v21  ;;  %5486 = vmatprep.subr.bf16.mxu0 %v7026_v23  ;;  %v2896_v21 = vrot.slane %v9269_v13, %v7942_v37  ;;  %v7081_v23 = vld [vmem:[%s10028_s9 + $0xc10] ss:$28 sps:$4 sm:$0xff]   ;;  %v7089_v34 = vld [vmem:[%s10028_s9 + $0xbdc] ss:$28 sps:$4 sm:$0xff]   ;;  %v7092_v37 = vld [vmem:[%s10028_s9 + $0x164] ss:$28 sps:$4 sm:$0xff]  }
 0x402   :  { %5446 = vmatpush1.bf16.msra.mxu1 %v7021_v25  ;;  %5487 = vmatpush1.bf16.msra.mxu0 %v7024_v26  ;;  %v7084_v25 = vld [vmem:[%s10028_s9 + $0x198] ss:$28 sps:$4 sm:$0xff]  }
 0x403   :  { %5447 = vmatprep.subr.bf16.mxu1 %v7029_v29  ;;  %5488 = vmatprep.subr.bf16.mxu0 %v7032_v30 }
 0x406   :  { %5448 = vmatpush1.bf16.msra.mxu1 %v7027_v32  ;;  %5489 = vmatpush1.bf16.msra.mxu0 %v7030_v36  ;;  %v7087_v36 = vld [vmem:[%s10028_s9 + $0xbd8] ss:$28 sps:$4 sm:$0xff]  }
 0x407   :  { %5449 = vmatprep.subr.bf16.mxu1 %v7035_v39  ;;  %5490 = vmatprep.subr.bf16.mxu0 %v7038_v40  ;;  %v7090_v40 = vld [vmem:[%s10028_s9 + $0x160] ss:$28 sps:$4 sm:$0xff]  }
 0x40a   :  { %5450 = vmatpush2.bf16.msra.mxu1 %v7033_v41  ;;  %5491 = vmatpush2.bf16.msra.mxu0 %v7036_v42  ;;  %v7095_v41 = vld [vmem:[%s10028_s9 + $0xba4] ss:$28 sps:$4 sm:$0xff]  }
 0x40b   :  { %5451 = vmatprep.subr.bf16.mxu1 %v7041_v43  ;;  %5492 = vmatprep.subr.bf16.mxu0 %v7044_v44  ;;  %v7098_v43 = vld [vmem:[%s10028_s9 + $0x12c] ss:$28 sps:$4 sm:$0xff]  }
 0x40e   :  { %5452 = vmatpush2.bf16.msra.mxu1 %v7039_v46  ;;  %5493 = vmatpush2.bf16.msra.mxu0 %v7042_v47  ;;  %v7093_v46 = vld [vmem:[%s10028_s9 + $0xba0] ss:$28 sps:$4 sm:$0xff]  }
 0x40f   :  { %5453 = vmatprep.subr.bf16.mxu1 %v7047_v48  ;;  %5494 = vmatprep.subr.bf16.mxu0 %v7050_v49  ;;  %v7096_v48 = vld [vmem:[%s10028_s9 + $0x128] ss:$28 sps:$4 sm:$0xff]  }
 0x410   :  { %v7101_v49 = vld [vmem:[%s10028_s9 + $0xb6c] ss:$28 sps:$4 sm:$0xff]  }
 0x412   :  { %5454 = vmatpush2.bf16.msra.mxu1 %v7045_v59  ;;  %5495 = vmatpush2.bf16.msra.mxu0 %v7048_v45  ;;  %v7104_v59 = vld [vmem:[%s10028_s9 + $0xf4] ss:$28 sps:$4 sm:$0xff]   ;;  %v7099_v45 = vld [vmem:[%s10028_s9 + $0xb68] ss:$28 sps:$4 sm:$0xff]  }
 0x413   :  { %5455 = vmatprep.subr.bf16.mxu1 %v7053_v52  ;;  %5496 = vmatprep.subr.bf16.mxu0 %v7056_v60  ;;  %v7102_v52 = vld [vmem:[%s10028_s9 + $0xf0] ss:$28 sps:$4 sm:$0xff]  }
 0x414   :  { %v7107_v60 = vld [vmem:[%s10028_s9 + $0xb34] ss:$28 sps:$4 sm:$0xff]  }
 0x416   :  { %5456 = vmatpush2.bf16.msra.mxu1 %v7051_v53  ;;  %5497 = vmatpush2.bf16.msra.mxu0 %v7054_v61  ;;  %v7110_v53 = vld [vmem:[%s10028_s9 + $0xbc] ss:$28 sps:$4 sm:$0xff]   ;;  %v7105_v61 = vld [vmem:[%s10028_s9 + $0xb30] ss:$28 sps:$4 sm:$0xff]  }
 0x417   :  { %5457 = vmatprep.subr.bf16.mxu1 %v7059_v54  ;;  %5498 = vmatprep.subr.bf16.mxu0 %v7062_v62  ;;  %v7108_v54 = vld [vmem:[%s10028_s9 + $0xb8] ss:$28 sps:$4 sm:$0xff]  }
 0x418   :  { %v7113_v62 = vld [vmem:[%s10028_s9 + $0xafc] ss:$28 sps:$4 sm:$0xff]  }
 0x41a   :  { %5458 = vmatpush2.bf16.msra.mxu1 %v7057_v56  ;;  %5499 = vmatpush2.bf16.msra.mxu0 %v7060_v58  ;;  %v7116_v56 = vld [vmem:[%s10028_s9 + $0x84] ss:$28 sps:$4 sm:$0xff]   ;;  %v7111_v58 = vld [vmem:[%s10028_s9 + $0xaf8] ss:$28 sps:$4 sm:$0xff]  }
 0x41b   :  { %5459 = vmatprep.subr.bf16.mxu1 %v7065_v51  ;;  %5500 = vmatprep.subr.bf16.mxu0 %v7068_v0  ;;  %v7114_v51 = vld [vmem:[%s10028_s9 + $0x80] ss:$28 sps:$4 sm:$0xff]  }
 0x41c   :  { %v7119_v0 = vld [vmem:[%s10028_s9 + $0xac4] ss:$28 sps:$4 sm:$0xff]  }
 0x41d   :  { %v5262_v6 = vpop.f32.mrf.mxu0 }
 0x41e   :  { %5460 = vmatpush2.bf16.msra.mxu1 %v7063_v1  ;;  %5501 = vmatpush2.bf16.msra.mxu0 %v7066_v2  ;;  %v5263_v26 = vadd.f32 %v5262_v6, %v2892_v20  ;;  %v7122_v1 = vld [vmem:[%s10028_s9 + $0x4c] ss:$28 sps:$4 sm:$0xff]   ;;  %v7117_v2 = vld [vmem:[%s10028_s9 + $0xac0] ss:$28 sps:$4 sm:$0xff]   ;;  %v7128_v6 = vld [vmem:[%s10028_s9 + $0x14] ss:$28 sps:$4 sm:$0xff]  }
 0x41f   :  { %v5264_v10 = vpop.f32.mrf.mxu0  ;;  %5461 = vmatprep.subr.bf16.mxu1 %v7071_v3  ;;  %5502 = vmatprep.subr.bf16.mxu0 %v7074_v4  ;;  %v7120_v3 = vld [vmem:[%s10028_s9 + $0x48] ss:$28 sps:$4 sm:$0xff]  }
 0x420   :  { %v5265_v30 = vadd.f32 %v5264_v10, %v2896_v21  ;;  %v7125_v4 = vld [vmem:[%s10028_s9 + $0xa8c] ss:$28 sps:$4 sm:$0xff]   ;;  %v7131_v10 = vld [vmem:[%s10028_s9 + $0xdd4] ss:$28 sps:$4 sm:$0xff]   ;;  %v7141_v21 = vld [vmem:[%s10028_s9 + $0xd60] ss:$28 sps:$4 sm:$0xff]  }
 0x421   :  { %v5266_v14 = vpop.f32.mrf.mxu0  ;;  %v7146_v20 = vld [vmem:[%s10028_s9 + $0x2ec] ss:$28 sps:$4 sm:$0xff]  }
 0x422   :  { %5462 = vmatpush2.bf16.msra.mxu1 %v7069_v8  ;;  %5503 = vmatpush2.bf16.msra.mxu0 %v7072_v9  ;;  %v7123_v8 = vld [vmem:[%s10028_s9 + $0xa88] ss:$28 sps:$4 sm:$0xff]   ;;  %v7126_v9 = vld [vmem:[%s10028_s9 + $0x10] ss:$28 sps:$4 sm:$0xff]   ;;  %v7132_v14 = vld [vmem:[%s10028_s9 + $0x358] ss:$28 sps:$4 sm:$0xff]  }
 0x423   :  { %v5267_v17 = vpop.f32.mrf.mxu0  ;;  %5463 = vmatprep.subr.bf16.mxu1 %v7077_v11  ;;  %5504 = vmatprep.subr.bf16.mxu0 %v7080_v12  ;;  %v7134_v11 = vld [vmem:[%s10028_s9 + $0x35c] ss:$28 sps:$4 sm:$0xff]   ;;  %v7129_v12 = vld [vmem:[%s10028_s9 + $0xdd0] ss:$28 sps:$4 sm:$0xff]  }
 0x424   :  { %v7135_v17 = vld [vmem:[%s10028_s9 + $0xd98] ss:$28 sps:$4 sm:$0xff]  }
 0x426   :  { %5464 = vmatpush2.bf16.msra.mxu1 %v7075_v15  ;;  %5505 = vmatpush2.bf16.msra.mxu0 %v7078_v16  ;;  %v7137_v15 = vld [vmem:[%s10028_s9 + $0xd9c] ss:$28 sps:$4 sm:$0xff]   ;;  %v7140_v16 = vld [vmem:[%s10028_s9 + $0x324] ss:$28 sps:$4 sm:$0xff]  }
 0x427   :  { %5515 = vmatprep.subr.bf16.mxu1 %v7083_v18  ;;  %5556 = vmatprep.subr.bf16.mxu0 %v7086_v19  ;;  %v7138_v18 = vld [vmem:[%s10028_s9 + $0x320] ss:$28 sps:$4 sm:$0xff]  }
 0x428   :  { %v7143_v19 = vld [vmem:[%s10028_s9 + $0xd64] ss:$28 sps:$4 sm:$0xff]  }
 0x429   :  { %5466 = vmatmul.mubr.bf16.vlgmr.msra.gmra.mxu1 %v8788_v31  ;;  %5507 = vmatmul.mubr.bf16.vlgmr.msra.gmra.mxu0 %v8973_v57  ;;  %v5303_v29 = vpop.f32.mrf.mxu1 }
 0x42a   :  { %v9301_v32 = vadd.f32 %v5303_v29, %v5263_v26  ;;  %5516 = vmatpush1.bf16.msra.mxu1 %v7081_v23  ;;  %5547 = vmatprep.mubr.bf16.mxu1 %v9077_v55  ;;  %v7144_v23 = vld [vmem:[%s10028_s9 + $0x2e8] ss:$28 sps:$4 sm:$0xff]   ;;  %v7152_v26 = vld [vmem:[%s10028_s9 + $0x2b4] ss:$28 sps:$4 sm:$0xff]  }
 0x42b   :  { %5557 = vmatpush1.bf16.msra.mxu0 %v7084_v25  ;;  %5588 = vmatprep.mubr.bf16.mxu0 %v8592_v5  ;;  %v5305_v39 = vpop.f32.mrf.mxu1  ;;  %v7149_v25 = vld [vmem:[%s10028_s9 + $0xd2c] ss:$28 sps:$4 sm:$0xff]   ;;  %v7155_v29 = vld [vmem:[%s10028_s9 + $0xcf4] ss:$28 sps:$4 sm:$0xff]  }
 0x42c   :  { %v9314_v42 = vadd.f32 %v5305_v39, %v5265_v30  ;;  %5517 = vmatprep.subr.bf16.mxu1 %v7089_v34  ;;  %5558 = vmatprep.subr.bf16.mxu0 %v7092_v37  ;;  %v7147_v34 = vld [vmem:[%s10028_s9 + $0xd28] ss:$28 sps:$4 sm:$0xff]   ;;  %v7150_v37 = vld [vmem:[%s10028_s9 + $0x2b0] ss:$28 sps:$4 sm:$0xff]   ;;  %v7158_v30 = vld [vmem:[%s10028_s9 + $0x27c] ss:$28 sps:$4 sm:$0xff]  }
 0x42d   :  { %v5307_v44 = vpop.f32.mrf.mxu1  ;;  %v7156_v39 = vld [vmem:[%s10028_s9 + $0x278] ss:$28 sps:$4 sm:$0xff]  }
 0x42e   :  { %5518 = vmatpush1.bf16.msra.mxu1 %v7087_v36  ;;  %v7153_v36 = vld [vmem:[%s10028_s9 + $0xcf0] ss:$28 sps:$4 sm:$0xff]   ;;  %v7162_v44 = vld [vmem:[%s10028_s9 + $0x240] ss:$28 sps:$4 sm:$0xff]  }
 0x42f   :  { %5559 = vmatpush1.bf16.msra.mxu0 %v7090_v40  ;;  %v5308_v47 = vpop.f32.mrf.mxu1  ;;  %5519 = vmatprep.subr.bf16.mxu1 %v7095_v41  ;;  %v7161_v40 = vld [vmem:[%s10028_s9 + $0xcbc] ss:$28 sps:$4 sm:$0xff]   ;;  %v7164_v41 = vld [vmem:[%s10028_s9 + $0x244] ss:$28 sps:$4 sm:$0xff]  }
 0x430   :  { %5560 = vmatprep.subr.bf16.mxu0 %v7098_v43  ;;  %v7159_v43 = vld [vmem:[%s10028_s9 + $0xcb8] ss:$28 sps:$4 sm:$0xff]   ;;  %v7170_v47 = vld [vmem:[%s10028_s9 + $0x20c] ss:$28 sps:$4 sm:$0xff]  }
 0x432   :  { %5520 = vmatpush1.bf16.msra.mxu1 %v7093_v46  ;;  %v7167_v46 = vld [vmem:[%s10028_s9 + $0xc84] ss:$28 sps:$4 sm:$0xff]  }
 0x433   :  { %5561 = vmatpush1.bf16.msra.mxu0 %v7096_v48  ;;  %5521 = vmatprep.subr.bf16.mxu1 %v7101_v49  ;;  %v7165_v48 = vld [vmem:[%s10028_s9 + $0xc80] ss:$28 sps:$4 sm:$0xff]   ;;  %v7168_v49 = vld [vmem:[%s10028_s9 + $0x208] ss:$28 sps:$4 sm:$0xff]  }
 0x434   :  { %5562 = vmatprep.subr.bf16.mxu0 %v7104_v59  ;;  %v7173_v59 = vld [vmem:[%s10028_s9 + $0xc4c] ss:$28 sps:$4 sm:$0xff]  }
 0x436   :  { %5522 = vmatpush1.bf16.msra.mxu1 %v7099_v45  ;;  %v7176_v45 = vld [vmem:[%s10028_s9 + $0x1d4] ss:$28 sps:$4 sm:$0xff]  }
 0x437   :  { %5563 = vmatpush1.bf16.msra.mxu0 %v7102_v52  ;;  %5523 = vmatprep.subr.bf16.mxu1 %v7107_v60  ;;  %v7171_v52 = vld [vmem:[%s10028_s9 + $0xc48] ss:$28 sps:$4 sm:$0xff]   ;;  %v7174_v60 = vld [vmem:[%s10028_s9 + $0x1d0] ss:$28 sps:$4 sm:$0xff]  }
 0x438   :  { %5564 = vmatprep.subr.bf16.mxu0 %v7110_v53  ;;  %v7179_v53 = vld [vmem:[%s10028_s9 + $0x51c] ss:$28 sps:$4 sm:$0xff]  }
 0x43a   :  { %5524 = vmatpush1.bf16.msra.mxu1 %v7105_v61  ;;  %v7182_v61 = vld [vmem:[%s10028_s9 + $0x89c] ss:$28 sps:$4 sm:$0xff]  }
 0x43b   :  { %5565 = vmatpush1.bf16.msra.mxu0 %v7108_v54  ;;  %5525 = vmatprep.subr.bf16.mxu1 %v7113_v62  ;;  %v7177_v54 = vld [vmem:[%s10028_s9 + $0x518] ss:$28 sps:$4 sm:$0xff]  }
 0x43c   :  { %5566 = vmatprep.subr.bf16.mxu0 %v7116_v56  ;;  %v7180_v62 = vld [vmem:[%s10028_s9 + $0x898] ss:$28 sps:$4 sm:$0xff]   ;;  %v7185_v56 = vld [vmem:[%s10028_s9 + $0x4e4] ss:$28 sps:$4 sm:$0xff]  }
 0x43e   :  { %5526 = vmatpush1.bf16.msra.mxu1 %v7111_v58 }
 0x43f   :  { %5567 = vmatpush1.bf16.msra.mxu0 %v7114_v51  ;;  %5527 = vmatprep.subr.bf16.mxu1 %v7119_v0  ;;  %v7188_v51 = vld [vmem:[%s10028_s9 + $0x864] ss:$28 sps:$4 sm:$0xff]  }
 0x440   :  { %5568 = vmatprep.subr.bf16.mxu0 %v7122_v1  ;;  %v7183_v0 = vld [vmem:[%s10028_s9 + $0x4e0] ss:$28 sps:$4 sm:$0xff]  }
 0x442   :  { %5528 = vmatpush1.bf16.msra.mxu1 %v7117_v2  ;;  %v7186_v2 = vld [vmem:[%s10028_s9 + $0x860] ss:$28 sps:$4 sm:$0xff]  }
 0x443   :  { %5569 = vmatpush1.bf16.msra.mxu0 %v7120_v3  ;;  %5529 = vmatprep.subr.bf16.mxu1 %v7125_v4  ;;  %v7191_v3 = vld [vmem:[%s10028_s9 + $0x4ac] ss:$28 sps:$4 sm:$0xff]  }
 0x444   :  { %5570 = vmatprep.subr.bf16.mxu0 %v7128_v6  ;;  %v7194_v4 = vld [vmem:[%s10028_s9 + $0x82c] ss:$28 sps:$4 sm:$0xff]  }
 0x446   :  { %5530 = vmatpush1.bf16.msra.mxu1 %v7123_v8  ;;  %v7189_v8 = vld [vmem:[%s10028_s9 + $0x4a8] ss:$28 sps:$4 sm:$0xff]  }
 0x447   :  { %5571 = vmatpush1.bf16.msra.mxu0 %v7126_v9  ;;  %5531 = vmatprep.subr.bf16.mxu1 %v7131_v10  ;;  %v7192_v10 = vld [vmem:[%s10028_s9 + $0x828] ss:$28 sps:$4 sm:$0xff]  }
 0x448   :  { %5572 = vmatprep.subr.bf16.mxu0 %v7134_v11  ;;  %v7197_v11 = vld [vmem:[%s10028_s9 + $0x474] ss:$28 sps:$4 sm:$0xff]  }
 0x44a   :  { %5532 = vmatpush2.bf16.msra.mxu1 %v7129_v12  ;;  %v7200_v12 = vld [vmem:[%s10028_s9 + $0x7f4] ss:$28 sps:$4 sm:$0xff]  }
 0x44b   :  { %5573 = vmatpush2.bf16.msra.mxu0 %v7132_v14  ;;  %5533 = vmatprep.subr.bf16.mxu1 %v7137_v15  ;;  %v7195_v14 = vld [vmem:[%s10028_s9 + $0x470] ss:$28 sps:$4 sm:$0xff]  }
 0x44c   :  { %5574 = vmatprep.subr.bf16.mxu0 %v7140_v16  ;;  %v7198_v15 = vld [vmem:[%s10028_s9 + $0x7f0] ss:$28 sps:$4 sm:$0xff]   ;;  %v7203_v16 = vld [vmem:[%s10028_s9 + $0x43c] ss:$28 sps:$4 sm:$0xff]  }
 0x44e   :  { %5534 = vmatpush2.bf16.msra.mxu1 %v7135_v17  ;;  %v7206_v17 = vld [vmem:[%s10028_s9 + $0x7bc] ss:$28 sps:$4 sm:$0xff]  }
 0x44f   :  { %5575 = vmatpush2.bf16.msra.mxu0 %v7138_v18  ;;  %5535 = vmatprep.subr.bf16.mxu1 %v7143_v19  ;;  %v7201_v18 = vld [vmem:[%s10028_s9 + $0x438] ss:$28 sps:$4 sm:$0xff]  }
 0x450   :  { %5576 = vmatprep.subr.bf16.mxu0 %v7146_v20  ;;  %v7204_v19 = vld [vmem:[%s10028_s9 + $0x7b8] ss:$28 sps:$4 sm:$0xff]   ;;  %v7209_v20 = vld [vmem:[%s10028_s9 + $0x404] ss:$28 sps:$4 sm:$0xff]  }
 0x452   :  { %5536 = vmatpush2.bf16.msra.mxu1 %v7141_v21  ;;  %v7212_v21 = vld [vmem:[%s10028_s9 + $0x784] ss:$28 sps:$4 sm:$0xff]  }
 0x453   :  { %5577 = vmatpush2.bf16.msra.mxu0 %v7144_v23  ;;  %5537 = vmatprep.subr.bf16.mxu1 %v7149_v25  ;;  %v7207_v23 = vld [vmem:[%s10028_s9 + $0x400] ss:$28 sps:$4 sm:$0xff]  }
 0x454   :  { %5578 = vmatprep.subr.bf16.mxu0 %v7152_v26  ;;  %v7210_v25 = vld [vmem:[%s10028_s9 + $0x780] ss:$28 sps:$4 sm:$0xff]   ;;  %v7215_v26 = vld [vmem:[%s10028_s9 + $0x3cc] ss:$28 sps:$4 sm:$0xff]  }
 0x456   :  { %5538 = vmatpush2.bf16.msra.mxu1 %v7147_v34  ;;  %v7218_v34 = vld [vmem:[%s10028_s9 + $0x74c] ss:$28 sps:$4 sm:$0xff]  }
 0x457   :  { %5579 = vmatpush2.bf16.msra.mxu0 %v7150_v37  ;;  %5539 = vmatprep.subr.bf16.mxu1 %v7155_v29  ;;  %v7213_v37 = vld [vmem:[%s10028_s9 + $0x3c8] ss:$28 sps:$4 sm:$0xff]  }
 0x458   :  { %5580 = vmatprep.subr.bf16.mxu0 %v7158_v30  ;;  %v7216_v29 = vld [vmem:[%s10028_s9 + $0x748] ss:$28 sps:$4 sm:$0xff]   ;;  %v7221_v30 = vld [vmem:[%s10028_s9 + $0x394] ss:$28 sps:$4 sm:$0xff]  }
 0x45a   :  { %5540 = vmatpush2.bf16.msra.mxu1 %v7153_v36  ;;  %v7224_v36 = vld [vmem:[%s10028_s9 + $0x714] ss:$28 sps:$4 sm:$0xff]  }
 0x45b   :  { %5581 = vmatpush2.bf16.msra.mxu0 %v7156_v39  ;;  %5541 = vmatprep.subr.bf16.mxu1 %v7161_v40  ;;  %v7219_v39 = vld [vmem:[%s10028_s9 + $0x390] ss:$28 sps:$4 sm:$0xff]  }
 0x45c   :  { %5582 = vmatprep.subr.bf16.mxu0 %v7164_v41  ;;  %v7222_v40 = vld [vmem:[%s10028_s9 + $0x710] ss:$28 sps:$4 sm:$0xff]   ;;  %v7227_v41 = vld [vmem:[%s10028_s9 + $0x6dc] ss:$28 sps:$4 sm:$0xff]  }
 0x45e   :  { %5542 = vmatpush2.bf16.msra.mxu1 %v7159_v43  ;;  %v7230_v43 = vld [vmem:[%s10028_s9 + $0xa5c] ss:$28 sps:$4 sm:$0xff]  }
 0x45f   :  { %5583 = vmatpush2.bf16.msra.mxu0 %v7162_v44  ;;  %5543 = vmatprep.subr.bf16.mxu1 %v7167_v46  ;;  %v7225_v44 = vld [vmem:[%s10028_s9 + $0x6d8] ss:$28 sps:$4 sm:$0xff]  }
 0x460   :  { %5584 = vmatprep.subr.bf16.mxu0 %v7170_v47  ;;  %v7228_v46 = vld [vmem:[%s10028_s9 + $0xa58] ss:$28 sps:$4 sm:$0xff]   ;;  %v7233_v47 = vld [vmem:[%s10028_s9 + $0x6a4] ss:$28 sps:$4 sm:$0xff]  }
 0x462   :  { %5544 = vmatpush2.bf16.msra.mxu1 %v7165_v48  ;;  %v7236_v48 = vld [vmem:[%s10028_s9 + $0xa24] ss:$28 sps:$4 sm:$0xff]  }
 0x463   :  { %5585 = vmatpush2.bf16.msra.mxu0 %v7168_v49  ;;  %5545 = vmatprep.subr.bf16.mxu1 %v7173_v59  ;;  %v7231_v49 = vld [vmem:[%s10028_s9 + $0x6a0] ss:$28 sps:$4 sm:$0xff]  }
 0x464   :  { %5586 = vmatprep.subr.bf16.mxu0 %v7176_v45  ;;  %v7234_v59 = vld [vmem:[%s10028_s9 + $0xa20] ss:$28 sps:$4 sm:$0xff]   ;;  %v7239_v45 = vld [vmem:[%s10028_s9 + $0x66c] ss:$28 sps:$4 sm:$0xff]  }
 0x466   :  { %5546 = vmatpush2.bf16.msra.mxu1 %v7171_v52  ;;  %v7242_v52 = vld [vmem:[%s10028_s9 + $0x9ec] ss:$28 sps:$4 sm:$0xff]  }
 0x467   :  { %5587 = vmatpush2.bf16.msra.mxu0 %v7174_v60  ;;  %5597 = vmatprep.subr.bf16.mxu1 %v7179_v53  ;;  %v7237_v60 = vld [vmem:[%s10028_s9 + $0x668] ss:$28 sps:$4 sm:$0xff]  }
 0x468   :  { %5638 = vmatprep.subr.bf16.mxu0 %v7182_v61  ;;  %v7240_v53 = vld [vmem:[%s10028_s9 + $0x9e8] ss:$28 sps:$4 sm:$0xff]   ;;  %v7245_v61 = vld [vmem:[%s10028_s9 + $0x634] ss:$28 sps:$4 sm:$0xff]  }
 0x469   :  { %5548 = vmatmul.mubr.bf16.vlgmr.msra.gmra.mxu1 %v9085_v63  ;;  %v9497_v58 = vpop.f32.mrf.mxu0 }
 0x46a   :  { %5589 = vmatmul.mubr.bf16.vlgmr.msra.gmra.mxu0 %v8760_v7  ;;  %5598 = vmatpush1.bf16.msra.mxu1 %v7177_v54  ;;  %v7248_v54 = vld [vmem:[%s10028_s9 + $0x9b4] ss:$28 sps:$4 sm:$0xff]  }
 0x46b   :  { %5629 = vmatprep.mubr.bf16.mxu1 %v8780_v28  ;;  %5639 = vmatpush1.bf16.msra.mxu0 %v7180_v62  ;;  %v9507_v1 = vpop.f32.mrf.mxu0  ;;  %v7243_v62 = vld [vmem:[%s10028_s9 + $0x630] ss:$28 sps:$4 sm:$0xff]  }
 0x46c   :  { %5670 = vmatprep.mubr.bf16.mxu0 %v8968_v50  ;;  %5599 = vmatprep.subr.bf16.mxu1 %v7185_v56  ;;  %v7246_v56 = vld [vmem:[%s10028_s9 + $0x9b0] ss:$28 sps:$4 sm:$0xff]  }
 0x46d   :  { %5640 = vmatprep.subr.bf16.mxu0 %v7188_v51  ;;  %v5348_v6 = vpop.f32.mrf.mxu0  ;;  %v7251_v51 = vld [vmem:[%s10028_s9 + $0x5fc] ss:$28 sps:$4 sm:$0xff]  }
 0x46e   :  { %5600 = vmatpush1.bf16.msra.mxu1 %v7183_v0  ;;  %v7254_v0 = vld [vmem:[%s10028_s9 + $0x97c] ss:$28 sps:$4 sm:$0xff]   ;;  %v7260_v6 = vld [vmem:[%s10028_s9 + $0x944] ss:$28 sps:$4 sm:$0xff]  }
 0x46f   :  { %5641 = vmatpush1.bf16.msra.mxu0 %v7186_v2  ;;  %v5349_v9 = vpop.f32.mrf.mxu0  ;;  %5601 = vmatprep.subr.bf16.mxu1 %v7191_v3  ;;  %v7249_v2 = vld [vmem:[%s10028_s9 + $0x5f8] ss:$28 sps:$4 sm:$0xff]  }
 0x470   :  { %5642 = vmatprep.subr.bf16.mxu0 %v7194_v4  ;;  %v7252_v3 = vld [vmem:[%s10028_s9 + $0x978] ss:$28 sps:$4 sm:$0xff]   ;;  %v7257_v4 = vld [vmem:[%s10028_s9 + $0x5c4] ss:$28 sps:$4 sm:$0xff]  }
 0x471   :  { %v7258_v9 = vld [vmem:[%s10028_s9 + $0x940] ss:$28 sps:$4 sm:$0xff]  }
 0x472   :  { %5602 = vmatpush1.bf16.msra.mxu1 %v7189_v8  ;;  %v7255_v8 = vld [vmem:[%s10028_s9 + $0x5c0] ss:$28 sps:$4 sm:$0xff]  }
 0x473   :  { %5643 = vmatpush1.bf16.msra.mxu0 %v7192_v10  ;;  %5603 = vmatprep.subr.bf16.mxu1 %v7197_v11  ;;  %v7263_v10 = vld [vmem:[%s10028_s9 + $0x58c] ss:$28 sps:$4 sm:$0xff]  }
 0x474   :  { %5644 = vmatprep.subr.bf16.mxu0 %v7200_v12  ;;  %v7266_v11 = vld [vmem:[%s10028_s9 + $0x90c] ss:$28 sps:$4 sm:$0xff]  }
 0x475   :  { %v7261_v12 = vld [vmem:[%s10028_s9 + $0x588] ss:$28 sps:$4 sm:$0xff]  }
 0x476   :  { %5604 = vmatpush1.bf16.msra.mxu1 %v7195_v14  ;;  %v7264_v14 = vld [vmem:[%s10028_s9 + $0x908] ss:$28 sps:$4 sm:$0xff]  }
 0x477   :  { %5645 = vmatpush1.bf16.msra.mxu0 %v7198_v15  ;;  %5605 = vmatprep.subr.bf16.mxu1 %v7203_v16  ;;  %v7269_v15 = vld [vmem:[%s10028_s9 + $0x554] ss:$28 sps:$4 sm:$0xff]  }
 0x478   :  { %5646 = vmatprep.subr.bf16.mxu0 %v7206_v17  ;;  %v7272_v16 = vld [vmem:[%s10028_s9 + $0x8d4] ss:$28 sps:$4 sm:$0xff]  }
 0x479   :  { %v7267_v17 = vld [vmem:[%s10028_s9 + $0x550] ss:$28 sps:$4 sm:$0xff]  }
 0x47a   :  { %5606 = vmatpush1.bf16.msra.mxu1 %v7201_v18  ;;  %v7270_v18 = vld [vmem:[%s10028_s9 + $0x8d0] ss:$28 sps:$4 sm:$0xff]  }
 0x47b   :  { %5647 = vmatpush1.bf16.msra.mxu0 %v7204_v19  ;;  %5607 = vmatprep.subr.bf16.mxu1 %v7209_v20  ;;  %v7275_v19 = vld [vmem:[%s10028_s9 + $0xc1c] ss:$28 sps:$4 sm:$0xff]  }
 0x47c   :  { %5648 = vmatprep.subr.bf16.mxu0 %v7212_v21  ;;  %v7276_v20 = vld [vmem:[%s10028_s9 + $0x360] ss:$28 sps:$4 sm:$0xff]   ;;  %v7273_v21 = vld [vmem:[%s10028_s9 + $0xc18] ss:$28 sps:$4 sm:$0xff]  }
 0x47e   :  { %5608 = vmatpush1.bf16.msra.mxu1 %v7207_v23  ;;  %v7277_v23 = vld [vmem:[%s10028_s9 + $0x1a0] ss:$28 sps:$4 sm:$0xff]  }
 0x47f   :  { %5649 = vmatpush1.bf16.msra.mxu0 %v7210_v25  ;;  %5609 = vmatprep.subr.bf16.mxu1 %v7215_v26  ;;  %v5345_v25 = vadd.f32 %v9497_v58, %v9301_v32  ;;  %v7280_v26 = vld [vmem:[%s10028_s9 + $0xbe4] ss:$28 sps:$4 sm:$0xff]  }
 0x480   :  { %5650 = vmatprep.subr.bf16.mxu0 %v7218_v34  ;;  %v7278_v58 = vld [vmem:[%s10028_s9 + $0xbe0] ss:$28 sps:$4 sm:$0xff]  }
 0x482   :  { %5610 = vmatpush1.bf16.msra.mxu1 %v7213_v37 }
 0x483   :  { %5651 = vmatpush1.bf16.msra.mxu0 %v7216_v29  ;;  %5611 = vmatprep.subr.bf16.mxu1 %v7221_v30  ;;  %v7281_v29 = vld [vmem:[%s10028_s9 + $0x328] ss:$28 sps:$4 sm:$0xff]   ;;  %v5347_v30 = vadd.f32 %v9507_v1, %v9314_v42 }
 0x484   :  { %5652 = vmatprep.subr.bf16.mxu0 %v7224_v36  ;;  %v7285_v42 = vld [vmem:[%s10028_s9 + $0xbac] ss:$28 sps:$4 sm:$0xff]  }
 0x486   :  { %5612 = vmatpush1.bf16.msra.mxu1 %v7219_v39 }
 0x487   :  { %5653 = vmatpush1.bf16.msra.mxu0 %v7222_v40  ;;  %5613 = vmatprep.subr.bf16.mxu1 %v7227_v41  ;;  %v7282_v40 = vld [vmem:[%s10028_s9 + $0x168] ss:$28 sps:$4 sm:$0xff]   ;;  %v7286_v41 = vld [vmem:[%s10028_s9 + $0x2f0] ss:$28 sps:$4 sm:$0xff]  }
 0x488   :  { %5654 = vmatprep.subr.bf16.mxu0 %v7230_v43 }
 0x48a   :  { %5614 = vmatpush2.bf16.msra.mxu1 %v7225_v44 }
 0x48b   :  { %5655 = vmatpush2.bf16.msra.mxu0 %v7228_v46  ;;  %5615 = vmatprep.subr.bf16.mxu1 %v7233_v47  ;;  %v7283_v46 = vld [vmem:[%s10028_s9 + $0xba8] ss:$28 sps:$4 sm:$0xff]  }
 0x48c   :  { %5656 = vmatprep.subr.bf16.mxu0 %v7236_v48 }
 0x48e   :  { %5616 = vmatpush2.bf16.msra.mxu1 %v7231_v49  ;;  %v7290_v49 = vld [vmem:[%s10028_s9 + $0xb74] ss:$28 sps:$4 sm:$0xff]  }
 0x48f   :  { %5657 = vmatpush2.bf16.msra.mxu0 %v7234_v59  ;;  %5617 = vmatprep.subr.bf16.mxu1 %v7239_v45  ;;  %v7291_v59 = vld [vmem:[%s10028_s9 + $0x2b8] ss:$28 sps:$4 sm:$0xff]   ;;  %v7288_v45 = vld [vmem:[%s10028_s9 + $0xb70] ss:$28 sps:$4 sm:$0xff]  }
 0x490   :  { %5658 = vmatprep.subr.bf16.mxu0 %v7242_v52  ;;  %v7292_v52 = vld [vmem:[%s10028_s9 + $0xf8] ss:$28 sps:$4 sm:$0xff]  }
 0x492   :  { %5618 = vmatpush2.bf16.msra.mxu1 %v7237_v60  ;;  %v7295_v60 = vld [vmem:[%s10028_s9 + $0xb3c] ss:$28 sps:$4 sm:$0xff]  }
 0x493   :  { %5659 = vmatpush2.bf16.msra.mxu0 %v7240_v53  ;;  %5619 = vmatprep.subr.bf16.mxu1 %v7245_v61  ;;  %v7296_v53 = vld [vmem:[%s10028_s9 + $0x280] ss:$28 sps:$4 sm:$0xff]   ;;  %v7293_v61 = vld [vmem:[%s10028_s9 + $0xb38] ss:$28 sps:$4 sm:$0xff]  }
 0x494   :  { %5660 = vmatprep.subr.bf16.mxu0 %v7248_v54  ;;  %v7297_v54 = vld [vmem:[%s10028_s9 + $0xc0] ss:$28 sps:$4 sm:$0xff]  }
 0x496   :  { %5620 = vmatpush2.bf16.msra.mxu1 %v7243_v62  ;;  %v7300_v62 = vld [vmem:[%s10028_s9 + $0xb04] ss:$28 sps:$4 sm:$0xff]  }
 0x497   :  { %5661 = vmatpush2.bf16.msra.mxu0 %v7246_v56  ;;  %5621 = vmatprep.subr.bf16.mxu1 %v7251_v51  ;;  %v7301_v56 = vld [vmem:[%s10028_s9 + $0x248] ss:$28 sps:$4 sm:$0xff]   ;;  %v7298_v51 = vld [vmem:[%s10028_s9 + $0xb00] ss:$28 sps:$4 sm:$0xff]  }
 0x498   :  { %5662 = vmatprep.subr.bf16.mxu0 %v7254_v0  ;;  %v7302_v0 = vld [vmem:[%s10028_s9 + $0x88] ss:$28 sps:$4 sm:$0xff]  }
 0x49a   :  { %5622 = vmatpush2.bf16.msra.mxu1 %v7249_v2  ;;  %v7305_v2 = vld [vmem:[%s10028_s9 + $0xacc] ss:$28 sps:$4 sm:$0xff]  }
 0x49b   :  { %5663 = vmatpush2.bf16.msra.mxu0 %v7252_v3  ;;  %5623 = vmatprep.subr.bf16.mxu1 %v7257_v4  ;;  %v7306_v3 = vld [vmem:[%s10028_s9 + $0x210] ss:$28 sps:$4 sm:$0xff]   ;;  %v7303_v4 = vld [vmem:[%s10028_s9 + $0xac8] ss:$28 sps:$4 sm:$0xff]  }
 0x49c   :  { %5664 = vmatprep.subr.bf16.mxu0 %v7260_v6  ;;  %v7307_v6 = vld [vmem:[%s10028_s9 + $0x50] ss:$28 sps:$4 sm:$0xff]  }
 0x49e   :  { %5624 = vmatpush2.bf16.msra.mxu1 %v7255_v8  ;;  %v7310_v8 = vld [vmem:[%s10028_s9 + $0xa94] ss:$28 sps:$4 sm:$0xff]  }
 0x49f   :  { %5665 = vmatpush2.bf16.msra.mxu0 %v7258_v9  ;;  %5625 = vmatprep.subr.bf16.mxu1 %v7263_v10  ;;  %v7311_v9 = vld [vmem:[%s10028_s9 + $0x1d8] ss:$28 sps:$4 sm:$0xff]   ;;  %v7308_v10 = vld [vmem:[%s10028_s9 + $0xa90] ss:$28 sps:$4 sm:$0xff]  }
 0x4a0   :  { %5666 = vmatprep.subr.bf16.mxu0 %v7266_v11  ;;  %v7312_v11 = vld [vmem:[%s10028_s9 + $0x18] ss:$28 sps:$4 sm:$0xff]  }
 0x4a2   :  { %5626 = vmatpush2.bf16.msra.mxu1 %v7261_v12  ;;  %v7315_v12 = vld [vmem:[%s10028_s9 + $0xddc] ss:$28 sps:$4 sm:$0xff]  }
 0x4a3   :  { %5667 = vmatpush2.bf16.msra.mxu0 %v7264_v14  ;;  %5627 = vmatprep.subr.bf16.mxu1 %v7269_v15  ;;  %v7316_v14 = vld [vmem:[%s10028_s9 + $0xa60] ss:$28 sps:$4 sm:$0xff]   ;;  %v7313_v15 = vld [vmem:[%s10028_s9 + $0xdd8] ss:$28 sps:$4 sm:$0xff]  }
 0x4a4   :  { %5668 = vmatprep.subr.bf16.mxu0 %v7272_v16  ;;  %v7317_v16 = vld [vmem:[%s10028_s9 + $0x8a0] ss:$28 sps:$4 sm:$0xff]  }
 0x4a6   :  { %5628 = vmatpush2.bf16.msra.mxu1 %v7267_v17  ;;  %v7320_v17 = vld [vmem:[%s10028_s9 + $0xda4] ss:$28 sps:$4 sm:$0xff]  }
 0x4a7   :  { %5669 = vmatpush2.bf16.msra.mxu0 %v7270_v18  ;;  %5679 = vmatprep.subr.bf16.mxu1 %v7275_v19  ;;  %v7321_v18 = vld [vmem:[%s10028_s9 + $0xa28] ss:$28 sps:$4 sm:$0xff]   ;;  %v7318_v19 = vld [vmem:[%s10028_s9 + $0xda0] ss:$28 sps:$4 sm:$0xff]  }
 0x4a8   :  { %6624 = vmatprep.subr.bf16.mxu0 %v7276_v20  ;;  %v7322_v20 = vld [vmem:[%s10028_s9 + $0x868] ss:$28 sps:$4 sm:$0xff]  }
 0x4a9   :  { %v9698_v34 = vpop.f32.mrf.mxu0  ;;  %5630 = vmatmul.mubr.bf16.vlgmr.msra.gmra.mxu1 %v8788_v31  ;;  %v5385_v37 = vpop.f32.mrf.mxu1 }
 0x4aa   :  { %5671 = vmatmul.mubr.bf16.vlgmr.msra.gmra.mxu0 %v8973_v57  ;;  %v5386_v32 = vadd.f32 %v5385_v37, %v5345_v25  ;;  %5680 = vmatpush1.bf16.msra.mxu1 %v7273_v21  ;;  %v7325_v21 = vld [vmem:[%s10028_s9 + $0xd6c] ss:$28 sps:$4 sm:$0xff]   ;;  %v7330_v25 = vld [vmem:[%s10028_s9 + $0xd34] ss:$28 sps:$4 sm:$0xff]  }
 0x4ab   :  { %5711 = vmatprep.mubr.bf16.mxu1 %v9077_v55  ;;  %6625 = vmatpush3.bf16.msra.mxu0 %v7277_v23  ;;  %v9711_v36 = vpop.f32.mrf.mxu0  ;;  %v5387_v39 = vpop.f32.mrf.mxu1  ;;  %v7323_v23 = vld [vmem:[%s10028_s9 + $0xd68] ss:$28 sps:$4 sm:$0xff]   ;;  %v7328_v37 = vld [vmem:[%s10028_s9 + $0xd30] ss:$28 sps:$4 sm:$0xff]  }
 0x4ac   :  { %5880 = vst [vmem:[#allocation2] sm:$0xff] %v5386_v32  ;;  %5752 = vmatprep.mubr.bf16.mxu0 %v8592_v5  ;;  %v5388_v1 = vadd.f32 %v5387_v39, %v5347_v30  ;;  %5681 = vmatprep.subr.bf16.mxu1 %v7280_v26  ;;  %v7287_v5 = vld [vmem:[%s10028_s9 + $0x130] ss:$28 sps:$4 sm:$0xff]   ;;  %v7331_v26 = vld [vmem:[%s10028_s9 + $0x9b8] ss:$28 sps:$4 sm:$0xff]  }
 0x4ad   :  { %v5430_v43 = vpop.f32.mrf.mxu0  ;;  %6626 = vmatprep.subr.bf16.mxu0 %v7281_v29  ;;  %v5389_v44 = vpop.f32.mrf.mxu1  ;;  %v7332_v29 = vld [vmem:[%s10028_s9 + $0x7f8] ss:$28 sps:$4 sm:$0xff]   ;;  %v7336_v32 = vld [vmem:[%s10028_s9 + $0x980] ss:$28 sps:$4 sm:$0xff]  }
 0x4ae   :  { %5881 = vst [vmem:[#allocation2 + $0x8] sm:$0xff] %v5388_v1  ;;  %5682 = vmatpush1.bf16.msra.mxu1 %v7278_v58  ;;  %v7335_v30 = vld [vmem:[%s10028_s9 + $0xcfc] ss:$28 sps:$4 sm:$0xff]   ;;  %v7345_v43 = vld [vmem:[%s10028_s9 + $0xc8c] ss:$28 sps:$4 sm:$0xff]  }
 0x4af   :  { %6627 = vmatpush3.bf16.msra.mxu0 %v7282_v40  ;;  %v5431_v47 = vpop.f32.mrf.mxu0  ;;  %v5390_v48 = vpop.f32.mrf.mxu1  ;;  %5683 = vmatprep.subr.bf16.mxu1 %v7285_v42  ;;  %v7333_v58 = vld [vmem:[%s10028_s9 + $0xcf8] ss:$28 sps:$4 sm:$0xff]   ;;  %v7337_v39 = vld [vmem:[%s10028_s9 + $0x7c0] ss:$28 sps:$4 sm:$0xff]   ;;  %v7341_v42 = vld [vmem:[%s10028_s9 + $0x948] ss:$28 sps:$4 sm:$0xff]  }
 0x4b0   :  { %6628 = vmatprep.subr.bf16.mxu0 %v7286_v41  ;;  %v7340_v40 = vld [vmem:[%s10028_s9 + $0xcc4] ss:$28 sps:$4 sm:$0xff]   ;;  %v7346_v44 = vld [vmem:[%s10028_s9 + $0x910] ss:$28 sps:$4 sm:$0xff]  }
 0x4b1   :  { %v7338_v1 = vld [vmem:[%s10028_s9 + $0xcc0] ss:$28 sps:$4 sm:$0xff]   ;;  %v7342_v41 = vld [vmem:[%s10028_s9 + $0x788] ss:$28 sps:$4 sm:$0xff]   ;;  %v7347_v47 = vld [vmem:[%s10028_s9 + $0x750] ss:$28 sps:$4 sm:$0xff]  }
 0x4b2   :  { %5684 = vmatpush1.bf16.msra.mxu1 %v7283_v46  ;;  %v7343_v46 = vld [vmem:[%s10028_s9 + $0xc88] ss:$28 sps:$4 sm:$0xff]   ;;  %v7350_v48 = vld [vmem:[%s10028_s9 + $0xc54] ss:$28 sps:$4 sm:$0xff]  }
 0x4b3   :  { %6629 = vmatpush3.bf16.msra.mxu0 %v7287_v5  ;;  %5685 = vmatprep.subr.bf16.mxu1 %v7290_v49  ;;  %v7351_v5 = vld [vmem:[%s10028_s9 + $0x8d8] ss:$28 sps:$4 sm:$0xff]   ;;  %v7348_v49 = vld [vmem:[%s10028_s9 + $0xc50] ss:$28 sps:$4 sm:$0xff]  }
 0x4b4   :  { %6630 = vmatprep.subr.bf16.mxu0 %v7291_v59  ;;  %v7352_v59 = vld [vmem:[%s10028_s9 + $0x718] ss:$28 sps:$4 sm:$0xff]  }
 0x4b6   :  { %5686 = vmatpush1.bf16.msra.mxu1 %v7288_v45  ;;  %v7353_v45 = vld [vmem:[%s10028_s9 + $0x6e0] ss:$28 sps:$4 sm:$0xff]  }
 0x4b7   :  { %6631 = vmatpush3.bf16.msra.mxu0 %v7292_v52  ;;  %5687 = vmatprep.subr.bf16.mxu1 %v7295_v60  ;;  %v7354_v52 = vld [vmem:[%s10028_s9 + $0x520] ss:$28 sps:$4 sm:$0xff]   ;;  %v7355_v60 = vld [vmem:[%s10028_s9 + $0x6a8] ss:$28 sps:$4 sm:$0xff]  }
 0x4b8   :  { %6632 = vmatprep.subr.bf16.mxu0 %v7296_v53 }
 0x4ba   :  { %5688 = vmatpush1.bf16.msra.mxu1 %v7293_v61 }
 0x4bb   :  { %6633 = vmatpush3.bf16.msra.mxu0 %v7297_v54  ;;  %5689 = vmatprep.subr.bf16.mxu1 %v7300_v62  ;;  %v7356_v54 = vld [vmem:[%s10028_s9 + $0x4e8] ss:$28 sps:$4 sm:$0xff]  }
 0x4bc   :  { %6634 = vmatprep.subr.bf16.mxu0 %v7301_v56 }
 0x4be   :  { %5690 = vmatpush1.bf16.msra.mxu1 %v7298_v51  ;;  %v7357_v51 = vld [vmem:[%s10028_s9 + $0x670] ss:$28 sps:$4 sm:$0xff]  }
 0x4bf   :  { %6635 = vmatpush3.bf16.msra.mxu0 %v7302_v0  ;;  %5691 = vmatprep.subr.bf16.mxu1 %v7305_v2 }
 0x4c0   :  { %6636 = vmatprep.subr.bf16.mxu0 %v7306_v3 }
 0x4c2   :  { %5692 = vmatpush1.bf16.msra.mxu1 %v7303_v4 }
 0x4c3   :  { %6637 = vmatpush3.bf16.msra.mxu0 %v7307_v6  ;;  %5693 = vmatprep.subr.bf16.mxu1 %v7310_v8  ;;  %v7360_v6 = vld [vmem:[%s10028_s9 + $0x478] ss:$28 sps:$4 sm:$0xff]   ;;  %v7361_v8 = vld [vmem:[%s10028_s9 + $0x600] ss:$28 sps:$4 sm:$0xff]  }
 0x4c4   :  { %6638 = vmatprep.subr.bf16.mxu0 %v7311_v9  ;;  %v7362_v9 = vld [vmem:[%s10028_s9 + $0x440] ss:$28 sps:$4 sm:$0xff]  }
 0x4c6   :  { %5694 = vmatpush1.bf16.msra.mxu1 %v7308_v10  ;;  %v7363_v10 = vld [vmem:[%s10028_s9 + $0x5c8] ss:$28 sps:$4 sm:$0xff]  }
 0x4c7   :  { %6639 = vmatpush3.bf16.msra.mxu0 %v7312_v11  ;;  %5695 = vmatprep.subr.bf16.mxu1 %v7315_v12  ;;  %v7364_v11 = vld [vmem:[%s10028_s9 + $0x408] ss:$28 sps:$4 sm:$0xff]   ;;  %v7365_v12 = vld [vmem:[%s10028_s9 + $0x590] ss:$28 sps:$4 sm:$0xff]  }
 0x4c8   :  { %6668 = vmatprep.subr.bf16.mxu0 %v7316_v14  ;;  %v7366_v14 = vld [vmem:[%s10028_s9 + $0x3d0] ss:$28 sps:$4 sm:$0xff]  }
 0x4ca   :  { %5753 = vmatmul.mubr.bf16.vlgmr.msra.gmra.mxu0 %v8760_v7  ;;  %5696 = vmatpush2.bf16.msra.mxu1 %v7313_v15  ;;  %v7326_v7 = vld [vmem:[%s10028_s9 + $0x9f0] ss:$28 sps:$4 sm:$0xff]   ;;  %v7367_v15 = vld [vmem:[%s10028_s9 + $0x558] ss:$28 sps:$4 sm:$0xff]  }
 0x4cb   :  { %6669 = vmatpush3.bf16.msra.mxu0 %v7317_v16  ;;  %5832 = vmatprep.mubr.bf16.mxu0 %v8968_v50  ;;  %v7327_v50 = vld [vmem:[%s10028_s9 + $0x830] ss:$28 sps:$4 sm:$0xff]   ;;  %v7368_v16 = vld [vmem:[%s10028_s9 + $0x398] ss:$28 sps:$4 sm:$0xff]  }
 0x4cc   :  { %5697 = vmatprep.subr.bf16.mxu1 %v7320_v17  ;;  %6670 = vmatprep.subr.bf16.mxu0 %v7321_v18  ;;  %v7369_v17 = vld [vmem:[%s10028_s9 + $0xde0] ss:$28 sps:$4 sm:$0xff]  }
 0x4cd   :  { %v7370_v18 = vld [vmem:[%s10028_s9 + $0xc20] ss:$28 sps:$4 sm:$0xff]  }
 0x4ce   :  { %5698 = vmatpush2.bf16.msra.mxu1 %v7318_v19  ;;  %v7371_v19 = vld [vmem:[%s10028_s9 + $0xda8] ss:$28 sps:$4 sm:$0xff]  }
 0x4cf   :  { %6671 = vmatpush3.bf16.msra.mxu0 %v7322_v20  ;;  %5699 = vmatprep.subr.bf16.mxu1 %v7325_v21  ;;  %v7372_v20 = vld [vmem:[%s10028_s9 + $0xbe8] ss:$28 sps:$4 sm:$0xff]   ;;  %v7373_v21 = vld [vmem:[%s10028_s9 + $0xd70] ss:$28 sps:$4 sm:$0xff]  }
 0x4d0   :  { %6672 = vmatprep.subr.bf16.mxu0 %v7326_v7  ;;  %v7374_v7 = vld [vmem:[%s10028_s9 + $0xbb0] ss:$28 sps:$4 sm:$0xff]  }
 0x4d2   :  { %5700 = vmatpush2.bf16.msra.mxu1 %v7323_v23  ;;  %v7377_v23 = vld [vmem:[%s10028_s9 + $0xd00] ss:$28 sps:$4 sm:$0xff]  }
 0x4d3   :  { %6673 = vmatpush3.bf16.msra.mxu0 %v7327_v50  ;;  %5701 = vmatprep.subr.bf16.mxu1 %v7330_v25  ;;  %v7378_v50 = vld [vmem:[%s10028_s9 + $0xb40] ss:$28 sps:$4 sm:$0xff]   ;;  %v7379_v25 = vld [vmem:[%s10028_s9 + $0xcc8] ss:$28 sps:$4 sm:$0xff]  }
 0x4d4   :  { %6674 = vmatprep.subr.bf16.mxu0 %v7331_v26  ;;  %v7380_v26 = vld [vmem:[%s10028_s9 + $0xb08] ss:$28 sps:$4 sm:$0xff]  }
 0x4d6   :  { %5702 = vmatpush2.bf16.msra.mxu1 %v7328_v37  ;;  %v7381_v37 = vld [vmem:[%s10028_s9 + $0xc90] ss:$28 sps:$4 sm:$0xff]  }
 0x4d7   :  { %6675 = vmatpush3.bf16.msra.mxu0 %v7332_v29  ;;  %5703 = vmatprep.subr.bf16.mxu1 %v7335_v30  ;;  %v2900_v29 = vrot.slane %v9269_v13, %v7936_v35  ;;  %v7382_v30 = vld [vmem:[%s10028_s9 + $0xad0] ss:$28 sps:$4 sm:$0xff]   ;;  %v7384_v35 = vld [vmem:[%s10028_s9 + $0xa98] ss:$28 sps:$4 sm:$0xff]  }
 0x4d8   :  { %6676 = vmatprep.subr.bf16.mxu0 %v7336_v32  ;;  %v7383_v32 = vld [vmem:[%s10028_s9 + $0xc58] ss:$28 sps:$4 sm:$0xff]  }
 0x4da   :  { %5704 = vmatpush2.bf16.msra.mxu1 %v7333_v58  ;;  %v2904_v58 = vrot.slane %v9269_v13, %v7945_v38 }
 0x4db   :  { %6677 = vmatpush3.bf16.msra.mxu0 %v7337_v39  ;;  %5705 = vmatprep.subr.bf16.mxu1 %v7340_v40  ;;  %v5427_v39 = vadd.f32 %v9698_v34, %v2900_v29 }
 0x4dc   :  { %6678 = vmatprep.subr.bf16.mxu0 %v7341_v42  ;;  %v5429_v40 = vadd.f32 %v9711_v36, %v2904_v58 }
 0x4de   :  { %5706 = vmatpush2.bf16.msra.mxu1 %v7338_v1 }
 0x4df   :  { %6679 = vmatpush3.bf16.msra.mxu0 %v7342_v41  ;;  %5707 = vmatprep.subr.bf16.mxu1 %v7345_v43 }
 0x4e0   :  { %6680 = vmatprep.subr.bf16.mxu0 %v7346_v44 }
 0x4e2   :  { %5708 = vmatpush2.bf16.msra.mxu1 %v7343_v46 }
 0x4e3   :  { %6681 = vmatpush3.bf16.msra.mxu0 %v7347_v47  ;;  %5709 = vmatprep.subr.bf16.mxu1 %v7350_v48 }
 0x4e4   :  { %6682 = vmatprep.subr.bf16.mxu0 %v7351_v5 }
 0x4e6   :  { %5710 = vmatpush2.bf16.msra.mxu1 %v7348_v49 }
 0x4e7   :  { %6683 = vmatpush3.bf16.msra.mxu0 %v7352_v59  ;;  %6646 = vmatprep.subr.bf16.mxu1 %v7353_v45 }
 0x4e9   :  { %v9896_v53 = vpop.f32.mrf.mxu1  ;;  %v9898_v61 = vpop.f32.mrf.mxu0  ;;  %5712 = vmatmul.mubr.bf16.vlgmr.msra.gmra.mxu1 %v9085_v63 }
 0x4ea   :  { %5833 = vmatmul.mubr.bf16.vlgmr.msra.gmra.mxu0 %v8973_v57  ;;  %6647 = vmatpush3.bf16.msra.mxu1 %v7354_v52  ;;  %v7358_v57 = vld [vmem:[%s10028_s9 + $0x4b0] ss:$28 sps:$4 sm:$0xff]   ;;  %v5468_v42 = vadd.f32 %v9896_v53, %v5427_v39 }
 0x4eb   :  { %5792 = vmatprep.mubr.bf16.mxu1 %v8780_v28  ;;  %v9906_v62 = vpop.f32.mrf.mxu1  ;;  %v9908_v56 = vpop.f32.mrf.mxu0  ;;  %6648 = vmatprep.subr.bf16.mxu1 %v7355_v60  ;;  %v7359_v28 = vld [vmem:[%s10028_s9 + $0x638] ss:$28 sps:$4 sm:$0xff]  }
 0x4ec   :  { %v5470_v1 = vadd.f32 %v9906_v62, %v5429_v40  ;;  %v5509_v41 = vadd.f32 %v9898_v61, %v5468_v42 }
 0x4ed   :  { %v5471_v0 = vpop.f32.mrf.mxu1  ;;  %v5512_v2 = vpop.f32.mrf.mxu0 }
 0x4ee   :  { %6649 = vmatpush3.bf16.msra.mxu1 %v7356_v54  ;;  %v5511_v38 = vadd.f32 %v9908_v56, %v5470_v1 }
 0x4ef   :  { %v5472_v3 = vpop.f32.mrf.mxu1  ;;  %v5513_v4 = vpop.f32.mrf.mxu0  ;;  %6650 = vmatprep.subr.bf16.mxu1 %v7357_v51 }
 0x4f2   :  { %6651 = vmatpush3.bf16.msra.mxu1 %v7358_v57  ;;  %v7385_v57 = vld [vmem:[%s10029_s10] sm:$0x7f]  ;;  %s7410_s10 = smov [#allocation2]  }
 0x4f3   :  { %6652 = vmatprep.subr.bf16.mxu1 %v7359_v28  ;;  %v2908_v3 = vrot.slane %v7385_v57, %v729_v22  ;;  %v2912_v4 = vrot.slane %v7385_v57, %v733_v27  ;;  %s5894_s21 = sshll.u32 %s7410_s10, 4  ;;  %s5895_s21 = int_to_ptr.vmem [resolvable:$true] %s5894_s21 }
 0x4f4   :  { %s7386_s22 = scalar_lea.vmem %s5895_s21, 896  ;;  %p7391_p1 = scmp.lt.s32.totalorder %s5895_s21, %s5895_s21 }
 0x4f5   :  { %p7387_p0 = scmp.ne.s32.totalorder %s5895_s21, %s7386_s22  ;;  %p7392_p2 = scmp.lt.s32.totalorder %s7386_s22, %s7386_s22 }
 0x4f6   :  { %6653 = vmatpush3.bf16.msra.mxu1 %v7360_v6 }
 0x4f7   :  { %6654 = vmatprep.subr.bf16.mxu1 %v7361_v8  ;;  %p7393_p3 = por %p7392_p2, %p7391_p1 }
 0x4f9   :  { %p7394_p4 = pnand %p7393_p3, %p7387_p0 }
 0x4fa   :  { %6655 = vmatpush3.bf16.msra.mxu1 %v7362_v9 }
 0x4fb   :  { %6656 = vmatprep.subr.bf16.mxu1 %v7363_v10 }
 0x4fe   :  { %6657 = vmatpush3.bf16.msra.mxu1 %v7364_v11 }
 0x4ff   :  { %6658 = vmatprep.subr.bf16.mxu1 %v7365_v12 }
 0x502   :  { %6659 = vmatpush3.bf16.msra.mxu1 %v7366_v14 }
 0x503   :  { %6660 = vmatprep.subr.bf16.mxu1 %v7367_v15 }
 0x506   :  { %6661 = vmatpush3.bf16.msra.mxu1 %v7368_v16 }
 0x507   :  { %6690 = vmatprep.subr.bf16.mxu1 %v7369_v17 }
 0x509   :  { %5793 = vmatmul.mubr.bf16.vlgmr.msra.gmra.mxu1 %v8788_v31  ;;  %v7375_v31 = vld [vmem:[%s10028_s9 + $0xd38] ss:$28 sps:$4 sm:$0xff]  }
 0x50a   :  { %6691 = vmatpush3.bf16.msra.mxu1 %v7370_v18  ;;  %5872 = vmatprep.mubr.bf16.mxu1 %v9077_v55  ;;  %v7376_v55 = vld [vmem:[%s10028_s9 + $0xb78] ss:$28 sps:$4 sm:$0xff]  }
 0x50b   :  { %6692 = vmatprep.subr.bf16.mxu1 %v7371_v19 }
 0x50e   :  { %6693 = vmatpush3.bf16.msra.mxu1 %v7372_v20 }
 0x50f   :  { %6694 = vmatprep.subr.bf16.mxu1 %v7373_v21 }
 0x512   :  { %6695 = vmatpush3.bf16.msra.mxu1 %v7374_v7 }
 0x513   :  { %6696 = vmatprep.subr.bf16.mxu1 %v7375_v31 }
 0x516   :  { %6697 = vmatpush3.bf16.msra.mxu1 %v7376_v55 }
 0x517   :  { %6698 = vmatprep.subr.bf16.mxu1 %v7377_v23  ;;  %v2916_v23 = vrot.slane %v7385_v57, %v737_v24 }
 0x51a   :  { %6699 = vmatpush3.bf16.msra.mxu1 %v7378_v50 }
 0x51b   :  { %6700 = vmatprep.subr.bf16.mxu1 %v7379_v25 }
 0x51e   :  { %6701 = vmatpush3.bf16.msra.mxu1 %v7380_v26 }
 0x51f   :  { %6702 = vmatprep.subr.bf16.mxu1 %v7381_v37 }
 0x522   :  { %6703 = vmatpush3.bf16.msra.mxu1 %v7382_v30 }
 0x523   :  { %6704 = vmatprep.subr.bf16.mxu1 %v7383_v32 }
 0x526   :  { %6705 = vmatpush3.bf16.msra.mxu1 %v7384_v35 }
 0x529   :  { %v5549_v43 = vpop.f32.mrf.mxu1  ;;  %5873 = vmatmul.mubr.bf16.vlgmr.msra.gmra.mxu1 %v9085_v63 }
 0x52a   :  { %v5550_v13 = vadd.f32 %v5549_v43, %v5509_v41  ;;  %v5590_v34 = vpop.f32.mrf.mxu0 }
 0x52b   :  { %v5551_v44 = vpop.f32.mrf.mxu1  ;;  %v5591_v28 = vadd.f32 %v5590_v34, %v2908_v3 }
 0x52c   :  { %5882 = vst [vmem:[#allocation2 + $0x10] sm:$0xff] %v5550_v13  ;;  %v5552_v46 = vadd.f32 %v5551_v44, %v5511_v38  ;;  %v5592_v47 = vpop.f32.mrf.mxu0 }
 0x52d   :  { %v5553_v48 = vpop.f32.mrf.mxu1  ;;  %v5593_v6 = vadd.f32 %v5592_v47, %v2912_v4 }
 0x52e   :  { %5883 = vst [vmem:[#allocation2 + $0x18] sm:$0xff] %v5552_v46  ;;  %v5594_v36 = vpop.f32.mrf.mxu0 }
 0x52f   :  { %v5554_v5 = vpop.f32.mrf.mxu1 }
 0x530   :  { %v5595_v49 = vpop.f32.mrf.mxu0 }
 0x569   :  { %v5631_v59 = vpop.f32.mrf.mxu1 }
 0x56a   :  { %v5672_v45 = vpop.f32.mrf.mxu0  ;;  %v5632_v8 = vadd.f32 %v5631_v59, %v5591_v28 }
 0x56b   :  { %v5633_v52 = vpop.f32.mrf.mxu1 }
 0x56c   :  { %v5674_v60 = vpop.f32.mrf.mxu0  ;;  %v5634_v9 = vadd.f32 %v5633_v52, %v5593_v6  ;;  %v5673_v10 = vadd.f32 %v5672_v45, %v5632_v8 }
 0x56d   :  { %v5635_v53 = vpop.f32.mrf.mxu1 }
 0x56e   :  { %v5676_v61 = vpop.f32.mrf.mxu0  ;;  %v5675_v12 = vadd.f32 %v5674_v60, %v5634_v9 }
 0x56f   :  { %v5636_v63 = vpop.f32.mrf.mxu1 }
 0x570   :  { %v5677_v54 = vpop.f32.mrf.mxu0 }
 0x58a   :  { %v6640_v62 = vpop.f32.mrf.mxu0 }
 0x58c   :  { %v6641_v56 = vpop.f32.mrf.mxu0 }
 0x58d   :  { %v6642_v51 = vadd.f32 %v6641_v56, %v6640_v62 }
 0x58e   :  { %v6643_v0 = vpop.f32.mrf.mxu0 }
 0x58f   :  { %v5755_v25 = vadd.f32 %v6642_v51, %v2916_v23 }
 0x590   :  { %v6644_v2 = vpop.f32.mrf.mxu0 }
 0x5a9   :  { %v5713_v11 = vpop.f32.mrf.mxu1 }
 0x5aa   :  { %v5714_v14 = vadd.f32 %v5713_v11, %v5673_v10  ;;  %v6684_v15 = vpop.f32.mrf.mxu0 }
 0x5ab   :  { %v5715_v16 = vpop.f32.mrf.mxu1 }
 0x5ac   :  { %5884 = vst [vmem:[#allocation2 + $0x20] sm:$0xff] %v5714_v14  ;;  %v5716_v17 = vadd.f32 %v5715_v16, %v5675_v12  ;;  %v6685_v18 = vpop.f32.mrf.mxu0 }
 0x5ad   :  { %v5717_v19 = vpop.f32.mrf.mxu1  ;;  %v6686_v29 = vadd.f32 %v6685_v18, %v6684_v15 }
 0x5ae   :  { %5885 = vst [vmem:[#allocation2 + $0x28] sm:$0xff] %v5716_v17  ;;  %v6687_v20 = vpop.f32.mrf.mxu0 }
 0x5af   :  { %v5718_v22 = vpop.f32.mrf.mxu1 }
 0x5b0   :  { %v6688_v21 = vpop.f32.mrf.mxu0 }
 0x5c9   :  { %v6662_v7 = vpop.f32.mrf.mxu1 }
 0x5cb   :  { %v6663_v27 = vpop.f32.mrf.mxu1 }
 0x5cc   :  { %v6664_v50 = vadd.f32 %v6663_v27, %v6662_v7 }
 0x5cd   :  { %v6665_v31 = vpop.f32.mrf.mxu1 }
 0x5ce   :  { %v5795_v26 = vadd.f32 %v6664_v50, %v5755_v25 }
 0x5cf   :  { %v6666_v55 = vpop.f32.mrf.mxu1 }
 0x5d0   :  { %v5835_v32 = vadd.f32 %v6686_v29, %v5795_v26 }
 0x5e9   :  { %v6706_v37 = vpop.f32.mrf.mxu1 }
 0x5eb   :  { %v6707_v30 = vpop.f32.mrf.mxu1 }
 0x5ec   :  { %v6708_v58 = vadd.f32 %v6707_v30, %v6706_v37 }
 0x5ed   :  { %v6709_v39 = vpop.f32.mrf.mxu1 }
 0x5ee   :  { %v5875_v35 = vadd.f32 %v6708_v58, %v5835_v32 }
 0x5ef   :  { %v6710_v40 = vpop.f32.mrf.mxu1 }
 0x5f0   :  { %5887 = vst.msk [vmem:[#allocation2 + $0x30] sm:$0xff] %vm5886_vm3, %v5875_v35 }
 0x5f1   :  { %7397 = shalt.err (!%p7394_p4)
}
 0x5f2   :  { %5897 = dma.vmem_to_hbm [thread:$0]  %s5895_s21, 896, %s10030_s11, [#allocation3]  }
 0x5f3   :  { %7406 = dma.done.wait [#allocation3], 896  }
 0x5f4   :  { %7407 = vsyncadd [#allocation3], 4294966400 }
 0x5f5   :  { %5901 = vsyncpa [#allocation3], 1 }

</bundles_post_ra>
